<compile_context>
chip_gen: v7x
topology: tpu7x:2x2x1
jax: 0.10.0
libtpu: 0.0.40
codegen_flags: <defaults>
</compile_context>

<pallas_src>
import math
import functools

import jax
import jax.numpy as jnp
from jax import lax
from jax.experimental import pallas as pl
from jax.experimental.pallas import tpu as pltpu

HIGHEST = lax.Precision.HIGHEST


def _round_up(x, m):
    return ((x + m - 1) // m) * m


def make_kernel(CP, hd_pad, n_head, TQ):
    """CP = n_head * hd_pad = padded per-head-block channel count."""

    def kernel(x_ref, wqkv_ref, cqkv_ref, wo_ref, bo_ref, m_ref, o_ref,
               k_scr, v_scr):
        qi = pl.program_id(1)

        # ---- once per batch image: project full-spatial K and V into VMEM ----
        @pl.when(qi == 0)
        def _():
            xb = x_ref[...]                                           # (C, S) f32
            kv = lax.dot_general(wqkv_ref[CP:3 * CP, :], xb,
                                 (((1,), (0,)), ((), ())),
                                 preferred_element_type=jnp.float32,
                                 precision=HIGHEST)                   # (2CP, S)
            kv = kv + cqkv_ref[CP:3 * CP, :]
            k_scr[...] = kv[:CP]
            v_scr[...] = kv[CP:]

        # ---- per query tile: Q projection (BN affine + 1/sqrt(hd) pre-folded) ----
        col = pl.multiple_of(qi * TQ, TQ)
        x_tile = x_ref[:, pl.ds(col, TQ)]                             # (C, TQ) f32
        q_all = lax.dot_general(wqkv_ref[0:CP, :], x_tile,
                                (((1,), (0,)), ((), ())),
                                preferred_element_type=jnp.float32,
                                precision=HIGHEST)
        q_all = q_all + cqkv_ref[0:CP, :]                             # (CP, TQ)

        mseg = m_ref[...]                                             # (S, H) f32 0/1

        head_outs = []
        for n in range(n_head):                 # static, tiny -> unrolled
            off = n * hd_pad                    # static, 8-aligned
            qn = q_all[off:off + hd_pad, :]                           # (hd_pad, TQ)
            kn = k_scr[off:off + hd_pad, :]                           # (hd_pad, S)
            vn = v_scr[off:off + hd_pad, :]                           # (hd_pad, S)

            # scores[t, k] = sum_c q[c, t] * k[c, k]   (scale folded into Wq)
            scores = lax.dot_general(qn, kn, (((0,), (0,)), ((), ())),
                                     preferred_element_type=jnp.float32,
                                     precision=HIGHEST)               # (TQ, S)

            # softmax over key columns x within each key row y (segments of W
            # consecutive key columns), done with f32 mask matmuls on the MXU.
            # Stabilised with the per-query global max (identical in exact
            # arithmetic); the per-segment sum is floored so a segment whose
            # scores all underflow yields 0 instead of 0/0 = NaN.
            mrow = jnp.max(scores, axis=-1, keepdims=True)            # (TQ, 1)
            e = jnp.exp(scores - mrow)                                # (TQ, S)
            seg = lax.dot_general(e, mseg, (((1,), (0,)), ((), ())),
                                  preferred_element_type=jnp.float32,
                                  precision=HIGHEST)                  # (TQ, H)
            inv = 1.0 / jnp.maximum(seg, 1e-30)                       # (TQ, H)
            inv_full = lax.dot_general(inv, mseg, (((1,), (1,)), ((), ())),
                                       preferred_element_type=jnp.float32,
                                       precision=HIGHEST)             # (TQ, S)
            p = e * inv_full                                          # (TQ, S)

            # head_out[c, t] = sum_k p[t, k] * v[c, k]
            head_out = lax.dot_general(vn, p, (((1,), (1,)), ((), ())),
                                       preferred_element_type=jnp.float32,
                                       precision=HIGHEST)             # (hd_pad, TQ)
            head_outs.append(head_out)

        attn_all = head_outs[0] if n_head == 1 else jnp.concatenate(head_outs, axis=0)

        # output 1x1 conv (+ bias) and residual add
        y = lax.dot_general(wo_ref[...], attn_all, (((1,), (0,)), ((), ())),
                            preferred_element_type=jnp.float32,
                            precision=HIGHEST) + bo_ref[...]
        o_ref[...] = (y + x_tile).astype(o_ref.dtype)

    return kernel


@functools.partial(jax.jit, static_argnums=(2,))
def lightweight_self_attention(x, params, n_head):
    """x: (B, C, H, W) float32 (NCHW, like PyTorch). Train-mode BN forward."""
    B, C, H, W = x.shape
    S = H * W
    head_dim = C // n_head
    eps = 1e-5

    # ---- BatchNorm2d train-mode batch statistics (cheap cross-batch reduction
    # done in glue JAX), folded with the depthwise 1x1 conv into dw = a*x + b ----
    mean = jnp.mean(x, axis=(0, 2, 3))
    var = jnp.var(x, axis=(0, 2, 3))                       # biased, like PyTorch BN
    inv_std = params["bn_gamma"] / jnp.sqrt(var + eps)
    a_vec = inv_std * params["dw_weight"]                                   # (C,)
    b_vec = (params["bn_beta"] - mean * inv_std) * params["dw_weight"]      # (C,)

    # ---- reorder pw_weight into [all-Q; all-K; all-V] with per-head row blocks
    # padded to 8-aligned offsets (clean f32 sublane slices); fold 1/sqrt(hd)
    # into the Q rows and the BN/depthwise affine into the projection:
    #   qkv = (Wp ⊙ a) @ x + Wp @ b
    hd_pad = _round_up(head_dim, 8)
    CP = n_head * hd_pad
    scale = 1.0 / math.sqrt(head_dim)
    wp = params["pw_weight"].reshape(n_head, 3, head_dim, C)

    def pad_heads(w):                       # (n_head, head_dim, C) -> (CP, C)
        return jnp.pad(w, ((0, 0), (0, hd_pad - head_dim), (0, 0))).reshape(CP, C)

    wqkv = jnp.concatenate(
        [pad_heads(wp[:, 0] * scale), pad_heads(wp[:, 1]), pad_heads(wp[:, 2])],
        axis=0).astype(jnp.float32)                                     # (3CP, C)
    cqkv = (wqkv @ b_vec).reshape(3 * CP, 1).astype(jnp.float32)
    wqkv = (wqkv * a_vec[None, :]).astype(jnp.float32)

    wo = params["out_weight"].reshape(C, n_head, head_dim)
    wo_p = jnp.pad(wo, ((0, 0), (0, 0), (0, hd_pad - head_dim))).reshape(C, CP)
    wo_p = wo_p.astype(jnp.float32)
    bo = params["out_bias"].reshape(C, 1).astype(jnp.float32)

    # segment-membership mask: key column k belongs to key row k // W
    mseg = (jnp.arange(S)[:, None] // W == jnp.arange(H)[None, :]).astype(jnp.float32)

    # ---- query tiling: bound per-step intermediates to (TQ, S) ----
    TQ = S
    for cand in (512, 256, 128):
        if S > cand and S % cand == 0:
            TQ = cand
            break
    NQ = S // TQ

    x_flat = x.reshape(B, C, S)

    # explicit VMEM budget, scaled to the chosen tiles (never below default,
    # capped at v7x physical VMEM)
    vmem_bytes = (
        8 * TQ * S * 4                        # live (TQ,S) f32 temporaries + slack
        + 2 * (C * S + C * TQ) * 4            # double-buffered x / out blocks
        + 2 * CP * S * 4                      # K/V f32 scratch
        + 2 * (4 * CP * C + S * H + 2 * CP + C) * 4   # weights + mask
        + (4 << 20)                           # headroom
    )
    vmem_bytes = int(min(max(vmem_bytes, 32 * 1024 * 1024), 64 * 1024 * 1024))

    kernel = make_kernel(CP, hd_pad, n_head, TQ)

    out = pl.pallas_call(
        kernel,
        out_shape=jax.ShapeDtypeStruct((B, C, S), x.dtype),
        grid_spec=pltpu.PrefetchScalarGridSpec(
            num_scalar_prefetch=0,
            grid=(B, NQ),
            in_specs=[
                pl.BlockSpec((None, C, S), lambda b, q: (b, 0, 0)),   # x, resident per batch
                pl.BlockSpec((3 * CP, C), lambda b, q: (0, 0)),       # qkv weight (f32)
                pl.BlockSpec((3 * CP, 1), lambda b, q: (0, 0)),       # qkv shift  (f32)
                pl.BlockSpec((C, CP), lambda b, q: (0, 0)),           # out weight (f32)
                pl.BlockSpec((C, 1), lambda b, q: (0, 0)),            # out bias
                pl.BlockSpec((S, H), lambda b, q: (0, 0)),            # segment mask (f32)
            ],
            out_specs=pl.BlockSpec((None, C, TQ), lambda b, q: (b, 0, q)),
            scratch_shapes=[
                pltpu.VMEM((CP, S), jnp.float32),    # K (full image, per batch)
                pltpu.VMEM((CP, S), jnp.float32),    # V
            ],
        ),
        compiler_params=pltpu.CompilerParams(
            # batch iterations are independent -> megacore-shardable on v7x;
            # the query-tile axis reuses the per-batch K/V scratch (written at
            # q == 0) so it must stay sequential ("arbitrary").
            dimension_semantics=("parallel", "arbitrary"),
            vmem_limit_bytes=vmem_bytes,
        ),
        input_output_aliases={0: 0},          # same shape/dtype: write in place of x
    )(x_flat, wqkv, cqkv, wo_p, bo, mseg)

    return out.reshape(B, C, H, W)


def reference(x, params, n_head):
    """Pure-JAX f32 reference matching the PyTorch forward (train-mode BN)."""
    B, C, H, W = x.shape
    head_dim = C // n_head
    eps = 1e-5
    mean = jnp.mean(x, axis=(0, 2, 3), keepdims=True)
    var = jnp.var(x, axis=(0, 2, 3), keepdims=True)
    norm = (x - mean) / jnp.sqrt(var + eps)
    norm = norm * params["bn_gamma"].reshape(1, C, 1, 1) + params["bn_beta"].reshape(1, C, 1, 1)
    dw = norm * params["dw_weight"].reshape(1, C, 1, 1)
    pw = jnp.einsum('oc,bchw->bohw', params["pw_weight"], dw, precision=HIGHEST)
    pw = pw.reshape(B, n_head, head_dim * 3, H, W)
    q, k, v = jnp.split(pw, 3, axis=2)
    attn = jnp.einsum('bnchw,bncyx->bnhwyx', q, k, precision=HIGHEST) / math.sqrt(head_dim)
    attn = jax.nn.softmax(attn, axis=-1)
    out = jnp.einsum('bnhwyx,bncyx->bnchw', attn, v, precision=HIGHEST).reshape(B, C, H, W)
    out = (jnp.einsum('oc,bchw->bohw', params["out_weight"], out, precision=HIGHEST)
           + params["out_bias"].reshape(1, C, 1, 1))
    return out + x


if __name__ == "__main__":
    import numpy as np

    def run_case(key, B, C, H, W, n_head, tol):
        ks = jax.random.split(key, 7)
        x = jax.random.normal(ks[0], (B, C, H, W), jnp.float32)
        params = {
            "bn_gamma":  1.0 + 0.1 * jax.random.normal(ks[1], (C,), jnp.float32),
            "bn_beta":   0.1 * jax.random.normal(ks[2], (C,), jnp.float32),
            "dw_weight": 0.5 * jax.random.normal(ks[3], (C,), jnp.float32),        # Conv2d(C,C,1,groups=C)
            "pw_weight": jax.random.normal(ks[4], (3 * C, C), jnp.float32) / math.sqrt(C),  # Conv2d(C,3C,1)
            "out_weight": jax.random.normal(ks[5], (C, C), jnp.float32) / math.sqrt(C),     # Conv2d(C,C,1)
            "out_bias":  0.1 * jax.random.normal(ks[6], (C,), jnp.float32),
        }
        out = jax.block_until_ready(lightweight_self_attention(x, params, n_head))
        ref = reference(x, params, n_head)
        np.testing.assert_allclose(np.asarray(out), np.asarray(ref), rtol=tol, atol=tol)

    key = jax.random.PRNGKey(0)
    k1, k2 = jax.random.split(key)
    # primary small case
    run_case(k1, B=2, C=4, H=16, W=16, n_head=2, tol=1e-2)
    # larger spatial case exercising the multi-query-tile path (S=1024 -> 2 tiles)
    run_case(k2, B=1, C=8, H=32, W=32, n_head=2, tol=1e-2)

    print("KERNEL_OK")
</pallas_src>

<mosaic_0001>
module attributes {stable_mosaic.version = 11 : i64} {
  func.func @kernel(%arg0: i32, %arg1: i32, %arg2: memref<1x4x256xf32, #tpu.memory_space<vmem>>, %arg3: memref<48x4xf32, #tpu.memory_space<vmem>>, %arg4: memref<48x1xf32, #tpu.memory_space<vmem>>, %arg5: memref<4x16xf32, #tpu.memory_space<vmem>>, %arg6: memref<4x1xf32, #tpu.memory_space<vmem>>, %arg7: memref<256x16xf32, #tpu.memory_space<vmem>>, %arg8: memref<1x4x128xf32, #tpu.memory_space<vmem>>, %arg9: memref<16x256xf32, #tpu.memory_space<vmem>>, %arg10: memref<16x256xf32, #tpu.memory_space<vmem>>) attributes {dimension_semantics = [#tpu.dimension_semantics<parallel>, #tpu.dimension_semantics<arbitrary>], iteration_bounds = array<i64: 2, 2>, scalar_prefetch = 0 : i64, scratch_operands = 2 : i64, tpu.core_type = #tpu.core_type<tc>, window_params = [{transform_indices = @transform_0, window_bounds = array<i64: 1, 4, 256>}, {pipeline_mode = #tpu.pipeline_mode<synchronous>, transform_indices = @transform_1, window_bounds = array<i64: 48, 4>}, {pipeline_mode = #tpu.pipeline_mode<synchronous>, transform_indices = @transform_2, window_bounds = array<i64: 48, 1>}, {pipeline_mode = #tpu.pipeline_mode<synchronous>, transform_indices = @transform_3, window_bounds = array<i64: 4, 16>}, {pipeline_mode = #tpu.pipeline_mode<synchronous>, transform_indices = @transform_4, window_bounds = array<i64: 4, 1>}, {pipeline_mode = #tpu.pipeline_mode<synchronous>, transform_indices = @transform_5, window_bounds = array<i64: 256, 16>}, {transform_indices = @transform_6, window_bounds = array<i64: 1, 4, 128>}]} {
    %c0_i32 = arith.constant 0 : i32
    %0 = arith.cmpi eq, %arg1, %c0_i32 : i32
    %1 = arith.extui %0 : i1 to i32
    %c0_i32_0 = arith.constant 0 : i32
    %2 = arith.cmpi ne, %1, %c0_i32_0 : i32
    scf.if %2 {
      %c0_37 = arith.constant 0 : index
      %c0_38 = arith.constant 0 : index
      %c0_39 = arith.constant 0 : index
      %58 = vector.load %arg2[%c0_37, %c0_38, %c0_39] : memref<1x4x256xf32, #tpu.memory_space<vmem>>, vector<1x4x256xf32>
      %59 = vector.shape_cast %58 : vector<1x4x256xf32> to vector<4x256xf32>
      %c16 = arith.constant 16 : index
      %c0_40 = arith.constant 0 : index
      %60 = vector.load %arg3[%c16, %c0_40] : memref<48x4xf32, #tpu.memory_space<vmem>>, vector<32x4xf32>
      %cst_41 = arith.constant dense<0.000000e+00> : vector<32x256xf32>
      %61 = tpu.matmul %60, %59, %cst_41 {dimension_numbers = #tpu.dot_dimension_numbers<[1], [0], [0], [1], [0, 0, 1, 1], [], []>, precision = #tpu.contract_precision<fp32>} : vector<32x4xf32>, vector<4x256xf32>, vector<32x256xf32> -> vector<32x256xf32>
      %c16_42 = arith.constant 16 : index
      %c0_43 = arith.constant 0 : index
      %62 = vector.load %arg4[%c16_42, %c0_43] : memref<48x1xf32, #tpu.memory_space<vmem>>, vector<32x1xf32>
      %63 = vector.broadcast %62 : vector<32x1xf32> to vector<32x256xf32>
      %64 = arith.addf %61, %63 : vector<32x256xf32>
      %65 = vector.extract_strided_slice %64 {offsets = [0, 0], sizes = [16, 256], strides = [1, 1]} : vector<32x256xf32> to vector<16x256xf32>
      %c0_44 = arith.constant 0 : index
      %c0_45 = arith.constant 0 : index
      %66 = vector.load %arg9[%c0_44, %c0_45] : memref<16x256xf32, #tpu.memory_space<vmem>>, vector<16x256xf32>
      tpu.vector_store %arg9[%c0_44, %c0_45], %65 {strides = array<i32>} : memref<16x256xf32, #tpu.memory_space<vmem>>, vector<16x256xf32>,
      %67 = vector.extract_strided_slice %64 {offsets = [16, 0], sizes = [16, 256], strides = [1, 1]} : vector<32x256xf32> to vector<16x256xf32>
      %c0_46 = arith.constant 0 : index
      %c0_47 = arith.constant 0 : index
      %68 = vector.load %arg10[%c0_46, %c0_47] : memref<16x256xf32, #tpu.memory_space<vmem>>, vector<16x256xf32>
      tpu.vector_store %arg10[%c0_46, %c0_47], %67 {strides = array<i32>} : memref<16x256xf32, #tpu.memory_space<vmem>>, vector<16x256xf32>,
    } else {
    }
    %c128_i32 = arith.constant 128 : i32
    %3 = arith.muli %arg1, %c128_i32 : i32
    %4 = tpu.assume_multiple %3, 128 : i32
    %c0 = arith.constant 0 : index
    %c0_1 = arith.constant 0 : index
    %5 = arith.index_cast %4 : i32 to index
    %6 = vector.load %arg2[%c0, %c0_1, %5] : memref<1x4x256xf32, #tpu.memory_space<vmem>>, vector<1x4x128xf32>
    %7 = vector.shape_cast %6 : vector<1x4x128xf32> to vector<4x128xf32>
    %c0_2 = arith.constant 0 : index
    %c0_3 = arith.constant 0 : index
    %8 = vector.load %arg3[%c0_2, %c0_3] : memref<48x4xf32, #tpu.memory_space<vmem>>, vector<16x4xf32>
    %cst = arith.constant dense<0.000000e+00> : vector<16x128xf32>
    %9 = tpu.matmul %8, %7, %cst {dimension_numbers = #tpu.dot_dimension_numbers<[1], [0], [0], [1], [0, 0, 1, 1], [], []>, precision = #tpu.contract_precision<fp32>} : vector<16x4xf32>, vector<4x128xf32>, vector<16x128xf32> -> vector<16x128xf32>
    %c0_4 = arith.constant 0 : index
    %c0_5 = arith.constant 0 : index
    %10 = vector.load %arg4[%c0_4, %c0_5] : memref<48x1xf32, #tpu.memory_space<vmem>>, vector<16x1xf32>
    %11 = vector.broadcast %10 : vector<16x1xf32> to vector<16x128xf32>
    %12 = arith.addf %9, %11 : vector<16x128xf32>
    %c0_6 = arith.constant 0 : index
    %c0_7 = arith.constant 0 : index
    %13 = vector.load %arg7[%c0_6, %c0_7] : memref<256x16xf32, #tpu.memory_space<vmem>>, vector<256x16xf32>
    %14 = vector.extract_strided_slice %12 {offsets = [0, 0], sizes = [8, 128], strides = [1, 1]} : vector<16x128xf32> to vector<8x128xf32>
    %c0_8 = arith.constant 0 : index
    %c0_9 = arith.constant 0 : index
    %15 = vector.load %arg9[%c0_8, %c0_9] : memref<16x256xf32, #tpu.memory_space<vmem>>, vector<8x256xf32>
    %c0_10 = arith.constant 0 : index
    %c0_11 = arith.constant 0 : index
    %16 = vector.load %arg10[%c0_10, %c0_11] : memref<16x256xf32, #tpu.memory_space<vmem>>, vector<8x256xf32>
    %cst_12 = arith.constant dense<0.000000e+00> : vector<128x256xf32>
    %17 = tpu.matmul %14, %15, %cst_12 {dimension_numbers = #tpu.dot_dimension_numbers<[0], [0], [1], [1], [0, 1, 1, 1], [], []>, precision = #tpu.contract_precision<fp32>} : vector<8x128xf32>, vector<8x256xf32>, vector<128x256xf32> -> vector<128x256xf32>
    %cst_13 = arith.constant dense<0xFF800000> : vector<128xf32>
    %18 = vector.multi_reduction <maximumf>, %17, %cst_13 [1] : vector<128x256xf32> to vector<128xf32>
    %19 = vector.shape_cast %18 : vector<128xf32> to vector<128x1xf32>
    %20 = vector.broadcast %19 : vector<128x1xf32> to vector<128x256xf32>
    %21 = arith.subf %17, %20 : vector<128x256xf32>
    %22 = math.exp %21 : vector<128x256xf32>
    %cst_14 = arith.constant dense<0.000000e+00> : vector<128x16xf32>
    %23 = tpu.matmul %22, %13, %cst_14 {dimension_numbers = #tpu.dot_dimension_numbers<[1], [0], [0], [1], [0, 0, 1, 1], [], []>, precision = #tpu.contract_precision<fp32>} : vector<128x256xf32>, vector<256x16xf32>, vector<128x16xf32> -> vector<128x16xf32>
    %cst_15 = arith.constant 1.000000e-30 : f32
    %24 = vector.broadcast %cst_15 : f32 to vector<128x16xf32>
    %25 = arith.maximumf %23, %24 : vector<128x16xf32>
    %cst_16 = arith.constant 1.000000e+00 : f32
    %26 = vector.broadcast %cst_16 : f32 to vector<128x16xf32>
    %27 = arith.divf %26, %25 : vector<128x16xf32>
    %cst_17 = arith.constant dense<0.000000e+00> : vector<128x256xf32>
    %28 = tpu.matmul %27, %13, %cst_17 {dimension_numbers = #tpu.dot_dimension_numbers<[1], [1], [0], [0], [0, 0, 1, 0], [], []>, precision = #tpu.contract_precision<fp32>} : vector<128x16xf32>, vector<256x16xf32>, vector<128x256xf32> -> vector<128x256xf32>
    %29 = arith.mulf %22, %28 : vector<128x256xf32>
    %cst_18 = arith.constant dense<0.000000e+00> : vector<8x128xf32>
    %30 = tpu.matmul %16, %29, %cst_18 {dimension_numbers = #tpu.dot_dimension_numbers<[1], [1], [0], [0], [0, 0, 1, 0], [], []>, precision = #tpu.contract_precision<fp32>} : vector<8x256xf32>, vector<128x256xf32>, vector<8x128xf32> -> vector<8x128xf32>
    %31 = vector.extract_strided_slice %12 {offsets = [8, 0], sizes = [8, 128], strides = [1, 1]} : vector<16x128xf32> to vector<8x128xf32>
    %c8 = arith.constant 8 : index
    %c0_19 = arith.constant 0 : index
    %32 = vector.load %arg9[%c8, %c0_19] : memref<16x256xf32, #tpu.memory_space<vmem>>, vector<8x256xf32>
    %c8_20 = arith.constant 8 : index
    %c0_21 = arith.constant 0 : index
    %33 = vector.load %arg10[%c8_20, %c0_21] : memref<16x256xf32, #tpu.memory_space<vmem>>, vector<8x256xf32>
    %cst_22 = arith.constant dense<0.000000e+00> : vector<128x256xf32>
    %34 = tpu.matmul %31, %32, %cst_22 {dimension_numbers = #tpu.dot_dimension_numbers<[0], [0], [1], [1], [0, 1, 1, 1], [], []>, precision = #tpu.contract_precision<fp32>} : vector<8x128xf32>, vector<8x256xf32>, vector<128x256xf32> -> vector<128x256xf32>
    %cst_23 = arith.constant dense<0xFF800000> : vector<128xf32>
    %35 = vector.multi_reduction <maximumf>, %34, %cst_23 [1] : vector<128x256xf32> to vector<128xf32>
    %36 = vector.shape_cast %35 : vector<128xf32> to vector<128x1xf32>
    %37 = vector.broadcast %36 : vector<128x1xf32> to vector<128x256xf32>
    %38 = arith.subf %34, %37 : vector<128x256xf32>
    %39 = math.exp %38 : vector<128x256xf32>
    %cst_24 = arith.constant dense<0.000000e+00> : vector<128x16xf32>
    %40 = tpu.matmul %39, %13, %cst_24 {dimension_numbers = #tpu.dot_dimension_numbers<[1], [0], [0], [1], [0, 0, 1, 1], [], []>, precision = #tpu.contract_precision<fp32>} : vector<128x256xf32>, vector<256x16xf32>, vector<128x16xf32> -> vector<128x16xf32>
    %cst_25 = arith.constant 1.000000e-30 : f32
    %41 = vector.broadcast %cst_25 : f32 to vector<128x16xf32>
    %42 = arith.maximumf %40, %41 : vector<128x16xf32>
    %cst_26 = arith.constant 1.000000e+00 : f32
    %43 = vector.broadcast %cst_26 : f32 to vector<128x16xf32>
    %44 = arith.divf %43, %42 : vector<128x16xf32>
    %cst_27 = arith.constant dense<0.000000e+00> : vector<128x256xf32>
    %45 = tpu.matmul %44, %13, %cst_27 {dimension_numbers = #tpu.dot_dimension_numbers<[1], [1], [0], [0], [0, 0, 1, 0], [], []>, precision = #tpu.contract_precision<fp32>} : vector<128x16xf32>, vector<256x16xf32>, vector<128x256xf32> -> vector<128x256xf32>
    %46 = arith.mulf %39, %45 : vector<128x256xf32>
    %cst_28 = arith.constant dense<0.000000e+00> : vector<8x128xf32>
    %47 = tpu.matmul %33, %46, %cst_28 {dimension_numbers = #tpu.dot_dimension_numbers<[1], [1], [0], [0], [0, 0, 1, 0], [], []>, precision = #tpu.contract_precision<fp32>} : vector<8x256xf32>, vector<128x256xf32>, vector<8x128xf32> -> vector<8x128xf32>
    %48 = tpu.concatenate %30, %47 in 0 : vector<8x128xf32>, vector<8x128xf32> -> vector<16x128xf32>
    %c0_29 = arith.constant 0 : index
    %c0_30 = arith.constant 0 : index
    %49 = vector.load %arg5[%c0_29, %c0_30] : memref<4x16xf32, #tpu.memory_space<vmem>>, vector<4x16xf32>
    %cst_31 = arith.constant dense<0.000000e+00> : vector<4x128xf32>
    %50 = tpu.matmul %49, %48, %cst_31 {dimension_numbers = #tpu.dot_dimension_numbers<[1], [0], [0], [1], [0, 0, 1, 1], [], []>, precision = #tpu.contract_precision<fp32>} : vector<4x16xf32>, vector<16x128xf32>, vector<4x128xf32> -> vector<4x128xf32>
    %c0_32 = arith.constant 0 : index
    %c0_33 = arith.constant 0 : index
    %51 = vector.load %arg6[%c0_32, %c0_33] : memref<4x1xf32, #tpu.memory_space<vmem>>, vector<4x1xf32>
    %52 = vector.broadcast %51 : vector<4x1xf32> to vector<4x128xf32>
    %53 = arith.addf %50, %52 : vector<4x128xf32>
    %54 = arith.addf %53, %7 : vector<4x128xf32>
    %c0_34 = arith.constant 0 : index
    %c0_35 = arith.constant 0 : index
    %c0_36 = arith.constant 0 : index
    %55 = vector.load %arg8[%c0_34, %c0_35, %c0_36] : memref<1x4x128xf32, #tpu.memory_space<vmem>>, vector<1x4x128xf32>
    %56 = vector.shape_cast %55 : vector<1x4x128xf32> to vector<4x128xf32>
    %57 = vector.shape_cast %54 : vector<4x128xf32> to vector<1x4x128xf32>
    tpu.vector_store %arg8[%c0_34, %c0_35, %c0_36], %57 {strides = array<i32>} : memref<1x4x128xf32, #tpu.memory_space<vmem>>, vector<1x4x128xf32>,
    return
  }
  func.func @transform_0(%arg0: i32, %arg1: i32) -> (i32, i32, i32) {
    %c0_i32 = arith.constant 0 : i32
    %c0_i32_0 = arith.constant 0 : i32
    %c0_i32_1 = arith.constant 0 : i32
    return %arg0, %c0_i32, %c0_i32_0 : i32, i32, i32
  }
  func.func @transform_1(%arg0: i32, %arg1: i32) -> (i32, i32) {
    %c0_i32 = arith.constant 0 : i32
    %c0_i32_0 = arith.constant 0 : i32
    %c0_i32_1 = arith.constant 0 : i32
    return %c0_i32, %c0_i32_0 : i32, i32
  }
  func.func @transform_2(%arg0: i32, %arg1: i32) -> (i32, i32) {
    %c0_i32 = arith.constant 0 : i32
    %c0_i32_0 = arith.constant 0 : i32
    %c0_i32_1 = arith.constant 0 : i32
    return %c0_i32, %c0_i32_0 : i32, i32
  }
  func.func @transform_3(%arg0: i32, %arg1: i32) -> (i32, i32) {
    %c0_i32 = arith.constant 0 : i32
    %c0_i32_0 = arith.constant 0 : i32
    %c0_i32_1 = arith.constant 0 : i32
    return %c0_i32, %c0_i32_0 : i32, i32
  }
  func.func @transform_4(%arg0: i32, %arg1: i32) -> (i32, i32) {
    %c0_i32 = arith.constant 0 : i32
    %c0_i32_0 = arith.constant 0 : i32
    %c0_i32_1 = arith.constant 0 : i32
    return %c0_i32, %c0_i32_0 : i32, i32
  }
  func.func @transform_5(%arg0: i32, %arg1: i32) -> (i32, i32) {
    %c0_i32 = arith.constant 0 : i32
    %c0_i32_0 = arith.constant 0 : i32
    %c0_i32_1 = arith.constant 0 : i32
    return %c0_i32, %c0_i32_0 : i32, i32
  }
  func.func @transform_6(%arg0: i32, %arg1: i32) -> (i32, i32, i32) {
    %c0_i32 = arith.constant 0 : i32
    %c0_i32_0 = arith.constant 0 : i32
    return %arg0, %c0_i32, %arg1 : i32, i32, i32
  }
}

</mosaic_0001>

<bundles_post_ra>
// kernel: lightweight_self_attention.1
= control target key start
LH: loop header
LB: loop body
LE: loop exit
PB: predicated region body
PF: predicated region fallthrough
CT: control target
= control target key end

     0   :  { %s17666_s21 = smov 0   ;;  %s17668_s22 = smov 0   ;;  %s24090_s0 = inlined_call_operand.vmem [shape: f32[2,4,256], index: 0, kind: input, shape index: {}, may-alias: {0,6}]   ;;  %s24091_s1 = inlined_call_operand.vmem [shape: f32[48,4], index: 1, kind: input, shape index: {}]   ;;  %s24092_s2 = inlined_call_operand.vmem [shape: f32[48,1], index: 2, kind: input, shape index: {}]   ;;  %s24093_s3 = inlined_call_operand.vmem [shape: f32[4,16], index: 3, kind: input, shape index: {}]   ;;  %s24094_s4 = inlined_call_operand.vmem [shape: f32[4,1], index: 4, kind: input, shape index: {}]   ;;  %s24095_s5 = inlined_call_operand.vmem [shape: f32[256,16], index: 5, kind: input, shape index: {}]   ;;  %s24096_s6 = inlined_call_operand.vmem [shape: f32[2,4,256], index: 6, kind: output, shape index: {}, may-alias: {0,6}]  }
   0x1   :  { %s17670_s23 = smov 0   ;;  %s17672_s24 = smov 0  }
   0x2   :  { %s17674_s25 = smov 0  }
   0x3 LB: > { %s25_s26 = sadd.s32 1, %s17615_s23  ;;  %s28_s27 = sadd.s32 1, %s17619_s24  ;;  %s17623_s25 = sphi %s17674_s25, %s16_s25   ;;  %s17619_s24 = sphi %s17672_s24, %s26066_s24   ;;  %s17615_s23 = sphi %s17670_s23, %s26065_s23   ;;  %s17611_s22 = sphi %s17668_s22, %s26064_s22   ;;  %s17607_s21 = sphi %s17666_s21, %s26063_s21  }
   0x4   : > { %p26_p0 = scmp.ge.s32.totalorder %s25_s26, 2  ;;  %p13572_p1 = scmp.ge.s32.totalorder %s17623_s25, 1 }
   0x5   : > { %p226_p2 = scmp.lt.s32.totalorder %s17623_s25, 5 }
   0x6   : > { %s26068_s26 = smov (%p26_p0, %s25_s26), 0  ;;  %s26070_s27 = smov (!%p26_p0, %s28_s27), %s17619_s24 }
   0x7   : > { %p227_p3 = pnand %p13572_p1, %p226_p2  ;;  %p30_p4 = scmp.ge.s32.totalorder %s26070_s27, 2 }
   0x9   : > { %s26072_s27 = smov (%p30_p4, %s26070_s27), 0  ;;  %230 = sbr.rel (%p227_p3) target bundleno = 5542 (0x15a6), region = 44 }
  0x10   : > { %p259_p5 = scmp.lt.s32.totalorder %s17611_s22, 1  ;;  %p266_p6 = scmp.lt.s32.totalorder %s17607_s21, 1 }
  0x11   : > { %p13577_p7 = scmp.ne.s32.totalorder %s17607_s21, 0 }
  0x12   : > { %s26074_s22 = smov (!%p259_p5, %s17611_s22), 1  ;;  %vm320_vm0 = vcmask (!%p13577_p7), 1043456   ;;  %v277_v1 = vld [vmem:[%s24091_s1 + $0x10] sm:$0xff] (!%p13577_p7)  ;;  %vm307_vm1 = vcmask (!%p13577_p7), 31744   ;;  %v278_v2 = vld [vmem:[%s24091_s1 + $0x18] sm:$0xff] (!%p13577_p7)  ;;  %v17625_v5 = vmov (!%p13577_p7), 0.0  }
  0x13   : > { %s267_s28 = scalar_select %p266_p6, %s17607_s21, 1 }
  0x14   : > { %s13582_s29 = sshll.u32 %s26074_s22, 3  ;;  %s13575_s30 = sshll.u32 %s26074_s22, 1  ;;  %706 = vmatprep.mubr.f32.mxu0 (!%p13577_p7), %v17625_v5  ;;  %v309_v6 = vsel (!%p13577_p7), %vm307_vm1, %v277_v1, 0  ;;  %391 = vmatprep.mubr.f32.mxu1 (!%p13577_p7), %v17625_v5  ;;  %v312_v7 = vsel (!%p13577_p7), %vm307_vm1, %v278_v2, 0  ;;  %v279_v8 = vld [vmem:[%s24091_s1 + $0x20] sm:$0xff] (!%p13577_p7)  ;;  %v280_v9 = vld [vmem:[%s24091_s1 + $0x28] sm:$0xff] (!%p13577_p7) }
  0x15   : > { %s17703_s9 = scalar_lea.vmem %s24090_s0, %s13582_s29  ;;  %s269_s10 = sadd.s32 %s13575_s30, %s267_s28  ;;  %v17731_v11 = vand.u32 (!%p13577_p7), 4294901760, %v309_v6  ;;  %v17733_v12 = vand.u32 (!%p13577_p7), 4294901760, %v312_v7  ;;  %v315_v13 = vsel (!%p13577_p7), %vm307_vm1, %v279_v8, 0  ;;  %v281_v14 = vld [vmem:[%s24092_s2 + $0x10] sm:$0xff] (!%p13577_p7)  ;;  %v283_v15 = vld [vmem:[%s24092_s2 + $0x20] sm:$0xff] (!%p13577_p7)  ;;  %v318_v18 = vsel (!%p13577_p7), %vm307_vm1, %v280_v9, 0 }
  0x16   : > { %s13576_s11 = sshll.u32 %s269_s10, 2  ;;  %275 = sbr.rel (%p13577_p7) target bundleno = 294 (0x126), region = 48  ;;  %v276_v0 = vld [vmem:[%s17703_s9] sm:$0xff] (!%p13577_p7)  ;;  %v17743_v17 = vand.u32 (!%p13577_p7), 4294901760, %v315_v13  ;;  %v17626_v23 = vmov (!%p13577_p7), 0   ;;  %v17758_v25 = vand.u32 (!%p13577_p7), 4294901760, %v318_v18 }
  0x17   : > { %s17708_s14 = scalar_lea.vmem %s24096_s6, %s13576_s11  ;;  %v306_v3 = vcombine.high (!%p13577_p7), %v276_v0, %v276_v0  ;;  %v321_v4 = vsel (!%p13577_p7), %vm320_vm0, %v276_v0, 0  ;;  %v17750_v21 = vsub.f32 (!%p13577_p7), %v309_v6, %v17731_v11  ;;  %v17753_v22 = vsub.f32 (!%p13577_p7), %v312_v7, %v17733_v12  ;;  %17355 = vset.pattern.permute.xlu0 (!%p13577_p7), %v17626_v23  ;;  %17356 = vset.pattern.permute.xlu1 (!%p13577_p7), %v17626_v23  ;;  %v282_v30 = vld [vmem:[%s24092_s2 + $0x18] sm:$0xff] (!%p13577_p7)  ;;  %v284_v33 = vld [vmem:[%s24092_s2 + $0x28] sm:$0xff] (!%p13577_p7) }
  0x18   : > { %v17729_v10 = vand.u32 (!%p13577_p7), 4294901760, %v321_v4  ;;  %v17756_v24 = vsub.f32 (!%p13577_p7), %v315_v13, %v17743_v17  ;;  %287 = vperm.xlu0 (!%p13577_p7), %17355, %v281_v14   ;;  %297 = vperm.xlu1 (!%p13577_p7), %17356, %v283_v15   ;;  %v17770_v32 = vsub.f32 (!%p13577_p7), %v318_v18, %v17758_v25 }
  0x19   : > { %v323_v16 = vsel (!%p13577_p7), %vm320_vm0, %v306_v3, 0  ;;  %v394_v26 = vand.u32 (!%p13577_p7), 4294901760, %v17750_v21  ;;  %v405_v27 = vand.u32 (!%p13577_p7), 4294901760, %v17753_v22 }
  0x1a   : > { %v325_v19 = vand.u32 (!%p13577_p7), 4294901760, %v323_v16  ;;  %v17747_v20 = vsub.f32 (!%p13577_p7), %v321_v4, %v17729_v10  ;;  %v416_v31 = vand.u32 (!%p13577_p7), 4294901760, %v17756_v24  ;;  %v427_v44 = vand.u32 (!%p13577_p7), 4294901760, %v17770_v32 }
  0x1b   : > { %v395_v34 = vsub.f32 (!%p13577_p7), %v17750_v21, %v394_v26  ;;  %v406_v37 = vsub.f32 (!%p13577_p7), %v17753_v22, %v405_v27 }
  0x1c   : > { %641 = vmatprep.subr.mxu0 (!%p13577_p7), %v325_v19  ;;  %326 = vmatprep.subr.mxu1 (!%p13577_p7), %v325_v19  ;;  %v437_v28 = vsub.f32 (!%p13577_p7), %v323_v16, %v325_v19  ;;  %v444_v29 = vand.u32 (!%p13577_p7), 4294901760, %v17747_v20  ;;  %v417_v43 = vsub.f32 (!%p13577_p7), %v17756_v24, %v416_v31  ;;  %v428_v46 = vsub.f32 (!%p13577_p7), %v17770_v32, %v427_v44 }
  0x1d   : > { %643 = vmatpush1.msra.mxu0 %v17729_v10  ;;  %328 = vmatpush1.msra.mxu1 %v17729_v10  ;;  %v396_v38 = vand.u32 4294901760, %v395_v34  ;;  %v407_v42 = vand.u32 4294901760, %v406_v37 }
  0x1e   : > { %710 = vmatmul.mubr.f32.vlgmr.msra.gmra.mrb[0].mxu0 %v394_v26  ;;  %v438_v35 = vand.u32 4294901760, %v437_v28  ;;  %v445_v36 = vsub.f32 %v17747_v20, %v444_v29  ;;  %292 = vperm.xlu0 %17355, %v282_v30   ;;  %v418_v45 = vand.u32 4294901760, %v417_v43  ;;  %v429_v47 = vand.u32 4294901760, %v428_v46 }
  0x1f   : > { %715 = vmatprep.mubr.f32.mxu0 %v17625_v5  ;;  %302 = vperm.xlu1 %17356, %v284_v33  }
  0x20   : > { %v439_v39 = vsub.f32 %v437_v28, %v438_v35  ;;  %746 = vmatprep.subr.mxu0 %v438_v35  ;;  %v446_v40 = vand.u32 4294901760, %v445_v36  ;;  %397 = vmatmul.mubr.f32.vlgmr.msra.gmra.mrb[0].mxu1 %v396_v38 }
  0x21   : > { %750 = vmatpush1.msra.mxu0 %v444_v29  ;;  %402 = vmatprep.mubr.f32.mxu1 %v17625_v5 }
  0x22   : > { %719 = vmatmul.mubr.f32.gmra.mrb[2].mxu0 %v405_v27  ;;  %v440_v41 = vand.u32 4294901760, %v439_v39  ;;  %843 = vmatprep.subr.mxu0 %v325_v19 }
  0x23   : > { %724 = vmatprep.mubr.f32.mxu0 %v17625_v5 }
  0x24   : > { %441 = vmatprep.subr.mxu1 %v440_v41  ;;  %408 = vmatmul.mubr.f32.gmra.mrb[2].mxu1 %v407_v42 }
  0x25   : > { %447 = vmatpush1.msra.mxu1 %v446_v40  ;;  %413 = vmatprep.mubr.f32.mxu1 %v17625_v5 }
  0x26   : > { %728 = vmatmul.mubr.f32.gmra.mrb[4].mxu0 %v416_v31  ;;  %541 = vmatprep.subr.mxu1 %v437_v28 }
  0x27   : > { %733 = vmatprep.mubr.f32.mxu0 %v17625_v5 }
  0x28   : > { %419 = vmatmul.mubr.f32.gmra.mrb[4].mxu1 %v418_v45 }
  0x29   : > { %424 = vmatprep.mubr.f32.mxu1 %v17625_v5 }
  0x2a   : > { %737 = vmatmul.mubr.f32.gmra.mrb[6].mxu0 %v427_v44 }
  0x2b   : > { %813 = vmatprep.mubr.f32.mxu0 %v17625_v5 }
  0x2c   : > { %430 = vmatmul.mubr.f32.gmra.mrb[6].mxu1 %v429_v47 }
  0x2d   : > { %510 = vmatprep.mubr.f32.mxu1 %v17625_v5 }
  0x2e   : > { %815 = vmatmul.mubr.f32.vlgmr.msra.gmra.mrb[0].mxu0 %v17731_v11 }
  0x2f   : > { %820 = vmatprep.mubr.f32.mxu0 %v17625_v5  ;;  %845 = vmatpush1.msra.mxu0 %v17729_v10 }
  0x30   : > { %512 = vmatmul.mubr.f32.vlgmr.msra.gmra.mrb[0].mxu1 %v17731_v11 }
  0x31   : > { %517 = vmatprep.mubr.f32.mxu1 %v17625_v5  ;;  %544 = vmatpush1.msra.mxu1 %v17747_v20 }
  0x32   : > { %822 = vmatmul.mubr.f32.gmra.mrb[2].mxu0 %v17733_v12 }
  0x33   : > { %827 = vmatprep.mubr.f32.mxu0 %v17625_v5 }
  0x34   : > { %519 = vmatmul.mubr.f32.gmra.mrb[2].mxu1 %v17733_v12 }
  0x35   : > { %524 = vmatprep.mubr.f32.mxu1 %v17625_v5 }
  0x36   : > { %829 = vmatmul.mubr.f32.gmra.mrb[4].mxu0 %v17743_v17 }
  0x37   : > { %834 = vmatprep.mubr.f32.mxu0 %v17625_v5 }
  0x38   : > { %526 = vmatmul.mubr.f32.gmra.mrb[4].mxu1 %v17743_v17 }
  0x39   : > { %531 = vmatprep.mubr.f32.mxu1 %v17625_v5 }
  0x3a   : > { %836 = vmatmul.mubr.f32.gmra.mrb[6].mxu0 %v17758_v25 }
  0x3b   : > { %908 = vmatprep.mubr.f32.mxu0 %v17625_v5 }
  0x3c   : > { %533 = vmatmul.mubr.f32.gmra.mrb[6].mxu1 %v17758_v25 }
  0x3d   : > { %607 = vmatprep.mubr.f32.mxu1 %v17625_v5 }
  0x3e   : > { %910 = vmatmul.mubr.f32.vlgmr.msra.gmra.mrb[0].mxu0 %v17731_v11 }
  0x3f   : > { %915 = vmatprep.mubr.f32.mxu0 %v17625_v5 }
  0x40   : > { %610 = vmatmul.mubr.f32.vlgmr.msra.gmra.mrb[0].mxu1 %v17750_v21 }
  0x41   : > { %615 = vmatprep.mubr.f32.mxu1 %v17625_v5 }
  0x42   : > { %917 = vmatmul.mubr.f32.gmra.mrb[2].mxu0 %v17733_v12 }
  0x43   : > { %922 = vmatprep.mubr.f32.mxu0 %v17625_v5 }
  0x44   : > { %618 = vmatmul.mubr.f32.gmra.mrb[2].mxu1 %v17753_v22 }
  0x45   : > { %623 = vmatprep.mubr.f32.mxu1 %v17625_v5 }
  0x46   : > { %924 = vmatmul.mubr.f32.gmra.mrb[4].mxu0 %v17743_v17 }
  0x47   : > { %929 = vmatprep.mubr.f32.mxu0 %v17625_v5 }
  0x48   : > { %626 = vmatmul.mubr.f32.gmra.mrb[4].mxu1 %v17756_v24 }
  0x49   : > { %631 = vmatprep.mubr.f32.mxu1 %v17625_v5 }
  0x4a   : > { %931 = vmatmul.mubr.f32.gmra.mrb[6].mxu0 %v17758_v25 }
  0x4c   : > { %634 = vmatmul.mubr.f32.gmra.mrb[6].mxu1 %v17770_v32 }
  0x97   : > { %v288_v49 = vpop.permute.xlu0 %287  ;;  %v298_v2 = vpop.permute.xlu1 %297 }
  0x9d   : > { %v293_v57 = vpop.permute.xlu0 %292 }
  0x9e   : > { %v303_v13 = vpop.permute.xlu1 %302 }
 0x111   : > { %v911_v48 = vpop.f32.mrb[0].mxu0 }
 0x112   : > { %v913_v50 = vpop.f32.mrb[1].mxu0 }
 0x113   : > { %v611_v51 = vpop.f32.mrb[0].mxu1 }
 0x114   : > { %v16589_v53 = vadd.f32 %v611_v51, %v288_v49  ;;  %v613_v54 = vpop.f32.mrb[1].mxu1 }
 0x115   : > { %v918_v52 = vpop.f32.mrb[2].mxu0  ;;  %v16591_v56 = vadd.f32 %v613_v54, %v288_v49 }
 0x116   : > { %v920_v55 = vpop.f32.mrb[3].mxu0  ;;  %v16590_v58 = vadd.f32 %v16589_v53, %v911_v48 }
 0x117   : > { %v16592_v59 = vadd.f32 %v16591_v56, %v913_v50  ;;  %v619_v60 = vpop.f32.mrb[2].mxu1 }
 0x118   : > { %937 = vst [vmem:[#allocation2] sm:$0xff] %v16590_v58  ;;  %v16593_v62 = vadd.f32 %v619_v60, %v293_v57  ;;  %v621_v63 = vpop.f32.mrb[3].mxu1 }
 0x119   : > { %v925_v61 = vpop.f32.mrb[4].mxu0  ;;  %938 = vst [vmem:[#allocation2 + $0x8] sm:$0xff] %v16592_v59  ;;  %v16595_v1 = vadd.f32 %v621_v63, %v293_v57 }
 0x11a   : > { %v927_v0 = vpop.f32.mrb[5].mxu0  ;;  %v16594_v3 = vadd.f32 %v16593_v62, %v918_v52 }
 0x11b   : > { %v16596_v4 = vadd.f32 %v16595_v1, %v920_v55  ;;  %v627_v5 = vpop.f32.mrb[4].mxu1 }
 0x11c   : > { %939 = vst [vmem:[#allocation2 + $0x10] sm:$0xff] %v16594_v3  ;;  %v16597_v7 = vadd.f32 %v627_v5, %v298_v2  ;;  %v629_v8 = vpop.f32.mrb[5].mxu1 }
 0x11d   : > { %v932_v6 = vpop.f32.mrb[6].mxu0  ;;  %940 = vst [vmem:[#allocation2 + $0x18] sm:$0xff] %v16596_v4  ;;  %v16599_v10 = vadd.f32 %v629_v8, %v298_v2 }
 0x11e   : > { %v934_v9 = vpop.f32.mrb[7].mxu0  ;;  %v16598_v11 = vadd.f32 %v16597_v7, %v925_v61 }
 0x11f   : > { %v16600_v12 = vadd.f32 %v16599_v10, %v927_v0  ;;  %v635_v14 = vpop.f32.mrb[6].mxu1 }
 0x120   : > { %941 = vst [vmem:[#allocation3] sm:$0xff] %v16598_v11  ;;  %v16601_v15 = vadd.f32 %v635_v14, %v303_v13  ;;  %v637_v16 = vpop.f32.mrb[7].mxu1 }
 0x121   : > { %942 = vst [vmem:[#allocation3 + $0x8] sm:$0xff] %v16600_v12  ;;  %v16603_v17 = vadd.f32 %v637_v16, %v303_v13 }
 0x122   : > { %v16602_v18 = vadd.f32 %v16601_v15, %v932_v6 }
 0x123   : > { %v16604_v19 = vadd.f32 %v16603_v17, %v934_v9 }
 0x124   : > { %943 = vst [vmem:[#allocation3 + $0x10] sm:$0xff] %v16602_v18 }
 0x125   : > { %944 = vst [vmem:[#allocation3 + $0x18] sm:$0xff] %v16604_v19 }
 0x126 PF: > { %s13578_s15 = sshll.u32 %s17607_s21, 7  ;;  %v951_v20 = vld [vmem:[%s24091_s1] sm:$0xff]  ;;  %v952_v21 = vld [vmem:[%s24091_s1 + $0x8] sm:$0xff]  ;;  %vm965_vm2 = vcmask 31744   ;;  %v17627_v24 = vmov 0   ;;  %vm972_vm3 = vcmask 1043456  }
 0x127   : > { %s946_s20 = sshra.s32 %s13578_s15, 7  ;;  %v967_v22 = vsel %vm965_vm2, %v951_v20, 0  ;;  %v970_v23 = vsel %vm965_vm2, %v952_v21, 0  ;;  %17358 = vset.pattern.permute.xlu0 %v17627_v24  ;;  %v953_v25 = vld [vmem:[%s24092_s2] sm:$0xff]  ;;  %17359 = vset.pattern.permute.xlu1 %v17627_v24  ;;  %v1498_v50 = vld [vmem:[#allocation2 + $0x8] sm:$0xff]  ;;  %v24097_v54 = vmov 0.0  }
 0x128   : > { %s13579_s21 = sshll.u32 %s946_s20, 2  ;;  %v1042_v26 = vand.u32 4294901760, %v967_v22  ;;  %v1052_v27 = vand.u32 4294901760, %v970_v23  ;;  %957 = vperm.xlu0 %17358, %v953_v25   ;;  %v17839_v51 = vand.u32 4294901760, %v1498_v50  ;;  %v1497_v52 = vld [vmem:[#allocation2] sm:$0xff]  ;;  %vm1533_vm4 = vcmask 64512  }
 0x129   : > { %s17832_s29 = scalar_lea.vmem %s17703_s9, %s13579_s21  ;;  %v17841_v53 = vand.u32 4294901760, %v1497_v52  ;;  %vm4676_vm5 = vcmask 130048   ;;  %vm17630_vm6 = vmmov 0  }
 0x12a   : > { %v950_v28 = vld [vmem:[%s17832_s29] sm:$0xf]  ;;  %v1043_v29 = vsub.f32 %v967_v22, %v1042_v26  ;;  %v1053_v30 = vsub.f32 %v970_v23, %v1052_v27  ;;  %v17847_v55 = vsub.f32 %v1498_v50, %v17839_v51 }
 0x12b   : > { %v974_v31 = vsel %vm972_vm3, %v950_v28, 0  ;;  %v17854_v59 = vsub.f32 %v1497_v52, %v17841_v53 }
 0x12c   : > { %v977_v32 = vand.u32 4294901760, %v974_v31  ;;  %v1044_v33 = vand.u32 4294901760, %v1043_v29  ;;  %v1054_v34 = vand.u32 4294901760, %v1053_v30  ;;  %v1827_v56 = vand.u32 4294901760, %v17847_v55 }
 0x12d   : > { %v1833_v62 = vand.u32 4294901760, %v17854_v59 }
 0x12e   : > { %15362 = vmatprep.subr.mxu0 %v977_v32  ;;  %15364 = vmatprep.mubr.f32.mxu0 %v1044_v33  ;;  %v1045_v35 = vsub.f32 %v1043_v29, %v1044_v33  ;;  %v1055_v36 = vsub.f32 %v1053_v30, %v1054_v34  ;;  %v1064_v37 = vsub.f32 %v974_v31, %v977_v32 }
 0x12f   : > { %15363 = vmatpush3.msra.mxu0 %v977_v32  ;;  %15347 = vmatprep.subr.mxu1 %v977_v32  ;;  %v1828_v57 = vsub.f32 %v17847_v55, %v1827_v56  ;;  %v1834_v3 = vsub.f32 %v17854_v59, %v1833_v62 }
 0x130   : > { %15365 = vmatmul.mubr.f32.vlgmr.msra.gmra.mrb[0].mxu0 %v1054_v34  ;;  %15348 = vmatpush3.msra.mxu1 %v977_v32  ;;  %v1046_v38 = vand.u32 4294901760, %v1045_v35  ;;  %v1056_v39 = vand.u32 4294901760, %v1055_v36  ;;  %v1065_v40 = vand.u32 4294901760, %v1064_v37 }
 0x131   : > { %15369 = vmatprep.mubr.f32.mxu0 %v1042_v26  ;;  %v1829_v58 = vand.u32 4294901760, %v1828_v57  ;;  %v1835_v10 = vand.u32 4294901760, %v1834_v3 }
 0x132   : > { %15349 = vmatprep.mubr.f32.mxu1 %v1046_v38  ;;  %v1066_v41 = vsub.f32 %v1064_v37, %v1065_v40  ;;  %15367 = vmatprep.subr.mxu0 %v1065_v40 }
 0x133   : > { %15350 = vmatmul.mubr.f32.vlgmr.msra.gmra.mrb[0].mxu1 %v1056_v39  ;;  %15368 = vmatpush3.msra.mxu0 %v1065_v40 }
 0x134   : > { %v1067_v42 = vand.u32 4294901760, %v1066_v41  ;;  %15354 = vmatprep.mubr.f32.mxu1 %v1042_v26  ;;  %15372 = vmatprep.subr.mxu0 %v977_v32 }
 0x136   : > { %15352 = vmatprep.subr.mxu1 %v1067_v42 }
 0x137   : > { %15353 = vmatpush3.msra.mxu1 %v1067_v42 }
 0x138   : > { %15370 = vmatmul.mubr.f32.vlgmr.msra.gmra.mrb[0].mxu0 %v1052_v27  ;;  %15357 = vmatprep.subr.mxu1 %v1064_v37 }
 0x139   : > { %15373 = vmatpush3.msra.mxu0 %v977_v32  ;;  %15374 = vmatprep.mubr.f32.mxu0 %v1042_v26 }
 0x13b   : > { %15355 = vmatmul.mubr.f32.vlgmr.msra.gmra.mrb[0].mxu1 %v1052_v27 }
 0x13c   : > { %15358 = vmatpush3.msra.mxu1 %v1064_v37  ;;  %15359 = vmatprep.mubr.f32.mxu1 %v1043_v29 }
 0x13d   : > { %1583 = vmatprep.subr.mxu1 %v17839_v51 }
 0x140   : > { %15375 = vmatmul.mubr.f32.vlgmr.msra.gmra.mrb[0].mxu0 %v1052_v27 }
 0x143   : > { %15360 = vmatmul.mubr.f32.vlgmr.msra.gmra.mrb[0].mxu1 %v1053_v30 }
 0x144   : > { %1585 = vmatpush1.msra.mxu1 %v17841_v53  ;;  %1648 = vmatprep.mubr.f32.mxu1 %v24097_v54 }
 0x145   : > { %1830 = vmatprep.subr.mxu1 %v1829_v58 }
 0x1a7   : > { %v958_v45 = vpop.permute.xlu0 %957 }
 0x213   : > { %v17835_v43 = vpop.f32.mrb[0].mxu0 }
 0x214   : > { %24833 = vst [vmem:[#allocation4_spill] sm:$0xff] %v17835_v43  ;;  %v1455_v44 = vpop.f32.mrb[1].mxu0 }
 0x216   : > { %v17837_v46 = vpop.f32.mrb[0].mxu1 }
 0x217   : > { %24834 = vst [vmem:[#allocation5_spill] sm:$0xff] %v17837_v46  ;;  %v1214_v47 = vpop.f32.mrb[1].mxu1 }
 0x218   : > { %v16639_v48 = vadd.f32 %v1214_v47, %v958_v45 }
 0x21a   : > { %v16640_v49 = vadd.f32 %v16639_v48, %v1455_v44 }
 0x21c   : > { %1501 = vxpose.xlu0.b32.start.end [1/1] (short) %v16640_v49, 128 }
 0x29c   : > { %v1517_v60 = vpop.trf.xlu0 }
 0x29d   : > { %v1535_v61 = vsel %vm1533_vm4, %v1517_v60, 0 }
 0x29e   : > { %v17858_v63 = vand.u32 4294901760, %v1535_v61 }
 0x2a0   : > { %v17861_v0 = vsub.f32 %v1535_v61, %v17858_v63  ;;  %v1518_v1 = vpop.trf.xlu0 }
 0x2a1   : > { %v1538_v2 = vsel %vm1533_vm4, %v1518_v1, 0 }
 0x2a2   : > { %v1651_v4 = vand.u32 4294901760, %v17861_v0  ;;  %v17868_v5 = vand.u32 4294901760, %v1538_v2 }
 0x2a4   : > { %v1652_v6 = vsub.f32 %v17861_v0, %v1651_v4  ;;  %v17874_v7 = vsub.f32 %v1538_v2, %v17868_v5  ;;  %v1519_v8 = vpop.trf.xlu0 }
 0x2a5   : > { %v1541_v9 = vsel %vm1533_vm4, %v1519_v8, 0 }
 0x2a6   : > { %v1653_v11 = vand.u32 4294901760, %v1652_v6  ;;  %v1662_v12 = vand.u32 4294901760, %v17874_v7  ;;  %v17878_v13 = vand.u32 4294901760, %v1541_v9 }
 0x2a8   : > { %v17881_v14 = vsub.f32 %v1541_v9, %v17878_v13  ;;  %1654 = vmatmul.mubr.f32.vlgmr.msra.gmra.mrb[2].mxu1 %v1653_v11  ;;  %v1520_v15 = vpop.trf.xlu0  ;;  %v1663_v16 = vsub.f32 %v17874_v7, %v1662_v12 }
 0x2a9   : > { %v1544_v17 = vsel %vm1533_vm4, %v1520_v15, 0  ;;  %1659 = vmatprep.mubr.f32.mxu1 %v24097_v54  ;;  %1836 = vmatpush1.msra.mxu1 %v1835_v10 }
 0x2aa   : > { %v1673_v18 = vand.u32 4294901760, %v17881_v14  ;;  %v17889_v19 = vand.u32 4294901760, %v1544_v17  ;;  %v1664_v20 = vand.u32 4294901760, %v1663_v16  ;;  %2014 = vmatprep.subr.mxu1 %v17847_v55  ;;  %v18234_v55 = vld [vmem:[%s24095_s5] sm:$0xff] }
 0x2ac   : > { %v17893_v21 = vsub.f32 %v1544_v17, %v17889_v19  ;;  %1665 = vmatmul.mubr.f32.gmra.mrb[4].mxu1 %v1664_v20  ;;  %v1521_v22 = vpop.trf.xlu0  ;;  %v1674_v23 = vsub.f32 %v17881_v14, %v1673_v18 }
 0x2ad   : > { %v1547_v24 = vsel %vm1533_vm4, %v1521_v22, 0  ;;  %1670 = vmatprep.mubr.f32.mxu1 %v24097_v54 }
 0x2ae   : > { %v1684_v25 = vand.u32 4294901760, %v17893_v21  ;;  %v17901_v26 = vand.u32 4294901760, %v1547_v24  ;;  %v1675_v27 = vand.u32 4294901760, %v1674_v23 }
 0x2b0   : > { %v17904_v28 = vsub.f32 %v1547_v24, %v17901_v26  ;;  %1676 = vmatmul.mubr.f32.gmra.mrb[6].mxu1 %v1675_v27  ;;  %v1522_v29 = vpop.trf.xlu0  ;;  %v1685_v30 = vsub.f32 %v17893_v21, %v1684_v25 }
 0x2b1   : > { %v1550_v31 = vsel %vm1533_vm4, %v1522_v29, 0  ;;  %1681 = vmatprep.mubr.f32.mxu1 %v24097_v54 }
 0x2b2   : > { %v1695_v32 = vand.u32 4294901760, %v17904_v28  ;;  %v17912_v33 = vand.u32 4294901760, %v1550_v31  ;;  %v1686_v34 = vand.u32 4294901760, %v1685_v30 }
 0x2b4   : > { %v17915_v35 = vsub.f32 %v1550_v31, %v17912_v33  ;;  %1687 = vmatmul.mubr.f32.gmra.mrb[8].mxu1 %v1686_v34  ;;  %v1523_v36 = vpop.trf.xlu0  ;;  %v1696_v37 = vsub.f32 %v17904_v28, %v1695_v32 }
 0x2b5   : > { %v1553_v38 = vsel %vm1533_vm4, %v1523_v36, 0  ;;  %1692 = vmatprep.mubr.f32.mxu1 %v24097_v54 }
 0x2b6   : > { %v1706_v39 = vand.u32 4294901760, %v17915_v35  ;;  %v17923_v40 = vand.u32 4294901760, %v1553_v38  ;;  %v1697_v41 = vand.u32 4294901760, %v1696_v37 }
 0x2b8   : > { %v17926_v42 = vsub.f32 %v1553_v38, %v17923_v40  ;;  %1698 = vmatmul.mubr.f32.gmra.mrb[10].mxu1 %v1697_v41  ;;  %v1524_v44 = vpop.trf.xlu0  ;;  %v1707_v45 = vsub.f32 %v17915_v35, %v1706_v39 }
 0x2b9   : > { %v1556_v47 = vsel %vm1533_vm4, %v1524_v44, 0  ;;  %1703 = vmatprep.mubr.f32.mxu1 %v24097_v54 }
 0x2ba   : > { %v1717_v48 = vand.u32 4294901760, %v17926_v42  ;;  %v17934_v49 = vand.u32 4294901760, %v1556_v47  ;;  %v1708_v50 = vand.u32 4294901760, %v1707_v45 }
 0x2bc   : > { %v17937_v52 = vsub.f32 %v1556_v47, %v17934_v49  ;;  %1709 = vmatmul.mubr.f32.gmra.mrb[12].mxu1 %v1708_v50  ;;  %v1525_v57 = vpop.trf.xlu0  ;;  %v1718_v58 = vsub.f32 %v17926_v42, %v1717_v48 }
 0x2bd   : > { %v1559_v60 = vsel %vm1533_vm4, %v1525_v57, 0  ;;  %1714 = vmatprep.mubr.f32.mxu1 %v24097_v54 }
 0x2be   : > { %v1728_v61 = vand.u32 4294901760, %v17937_v52  ;;  %v17945_v1 = vand.u32 4294901760, %v1559_v60  ;;  %v1719_v2 = vand.u32 4294901760, %v1718_v58 }
 0x2c0   : > { %v17948_v3 = vsub.f32 %v1559_v60, %v17945_v1  ;;  %1720 = vmatmul.mubr.f32.gmra.mrb[14].mxu1 %v1719_v2  ;;  %v1526_v6 = vpop.trf.xlu0  ;;  %v1729_v8 = vsub.f32 %v17937_v52, %v1728_v61 }
 0x2c1   : > { %v1562_v9 = vsel %vm1533_vm4, %v1526_v6, 0  ;;  %1725 = vmatprep.mubr.f32.mxu1 %v24097_v54 }
 0x2c2   : > { %v1739_v10 = vand.u32 4294901760, %v17948_v3  ;;  %v17956_v11 = vand.u32 4294901760, %v1562_v9  ;;  %v1730_v15 = vand.u32 4294901760, %v1729_v8 }
 0x2c4   : > { %v17959_v16 = vsub.f32 %v1562_v9, %v17956_v11  ;;  %1731 = vmatmul.mubr.f32.gmra.mrb[16].mxu1 %v1730_v15  ;;  %v1527_v17 = vpop.trf.xlu0  ;;  %v1740_v20 = vsub.f32 %v17948_v3, %v1739_v10 }
 0x2c5   : > { %v1565_v22 = vsel %vm1533_vm4, %v1527_v17, 0  ;;  %1736 = vmatprep.mubr.f32.mxu1 %v24097_v54 }
 0x2c6   : > { %v1750_v23 = vand.u32 4294901760, %v17959_v16  ;;  %v17967_v24 = vand.u32 4294901760, %v1565_v22  ;;  %v1741_v27 = vand.u32 4294901760, %v1740_v20 }
 0x2c8   : > { %v17970_v29 = vsub.f32 %v1565_v22, %v17967_v24  ;;  %1742 = vmatmul.mubr.f32.gmra.mrb[18].mxu1 %v1741_v27  ;;  %v1528_v30 = vpop.trf.xlu0  ;;  %v1751_v31 = vsub.f32 %v17959_v16, %v1750_v23 }
 0x2c9   : > { %v1568_v34 = vsel %vm1533_vm4, %v1528_v30, 0  ;;  %1747 = vmatprep.mubr.f32.mxu1 %v24097_v54 }
 0x2ca   : > { %v1761_v36 = vand.u32 4294901760, %v17970_v29  ;;  %v17978_v37 = vand.u32 4294901760, %v1568_v34  ;;  %v1752_v38 = vand.u32 4294901760, %v1751_v31 }
 0x2cc   : > { %v17981_v41 = vsub.f32 %v1568_v34, %v17978_v37  ;;  %1753 = vmatmul.mubr.f32.gmra.mrb[20].mxu1 %v1752_v38  ;;  %v1529_v44 = vpop.trf.xlu0  ;;  %v1762_v45 = vsub.f32 %v17970_v29, %v1761_v36 }
 0x2cd   : > { %v1571_v47 = vsel %vm1533_vm4, %v1529_v44, 0  ;;  %1758 = vmatprep.mubr.f32.mxu1 %v24097_v54 }
 0x2ce   : > { %v1772_v50 = vand.u32 4294901760, %v17981_v41  ;;  %v17989_v57 = vand.u32 4294901760, %v1571_v47  ;;  %v1763_v58 = vand.u32 4294901760, %v1762_v45 }
 0x2d0   : > { %v17992_v60 = vsub.f32 %v1571_v47, %v17989_v57  ;;  %1764 = vmatmul.mubr.f32.gmra.mrb[22].mxu1 %v1763_v58  ;;  %v1530_v2 = vpop.trf.xlu0  ;;  %v1773_v6 = vsub.f32 %v17981_v41, %v1772_v50 }
 0x2d1   : > { %v1574_v8 = vsel %vm1533_vm4, %v1530_v2, 0  ;;  %1769 = vmatprep.mubr.f32.mxu1 %v24097_v54 }
 0x2d2   : > { %v1783_v9 = vand.u32 4294901760, %v17992_v60  ;;  %v18000_v15 = vand.u32 4294901760, %v1574_v8  ;;  %v1774_v17 = vand.u32 4294901760, %v1773_v6 }
 0x2d4   : > { %v18003_v20 = vsub.f32 %v1574_v8, %v18000_v15  ;;  %1775 = vmatmul.mubr.f32.gmra.mrb[24].mxu1 %v1774_v17  ;;  %v1531_v22 = vpop.trf.xlu0  ;;  %v1784_v27 = vsub.f32 %v17992_v60, %v1783_v9 }
 0x2d5   : > { %v1577_v30 = vsel %vm1533_vm4, %v1531_v22, 0  ;;  %1780 = vmatprep.mubr.f32.mxu1 %v24097_v54 }
 0x2d6   : > { %v1794_v31 = vand.u32 4294901760, %v18003_v20  ;;  %v18011_v34 = vand.u32 4294901760, %v1577_v30  ;;  %v1785_v38 = vand.u32 4294901760, %v1784_v27 }
 0x2d8   : > { %v18014_v44 = vsub.f32 %v1577_v30, %v18011_v34  ;;  %1786 = vmatmul.mubr.f32.gmra.mrb[26].mxu1 %v1785_v38  ;;  %v1532_v45 = vpop.trf.xlu0  ;;  %v1795_v47 = vsub.f32 %v18003_v20, %v1794_v31 }
 0x2d9   : > { %v1580_v58 = vsel %vm1533_vm4, %v1532_v45, 0  ;;  %1791 = vmatprep.mubr.f32.mxu1 %v24097_v54 }
 0x2da   : > { %v1805_v2 = vand.u32 4294901760, %v18014_v44  ;;  %v18022_v6 = vand.u32 4294901760, %v1580_v58  ;;  %v1796_v8 = vand.u32 4294901760, %v1795_v47 }
 0x2dc   : > { %v18025_v17 = vsub.f32 %v1580_v58, %v18022_v6  ;;  %1797 = vmatmul.mubr.f32.gmra.mrb[28].mxu1 %v1796_v8  ;;  %v1806_v22 = vsub.f32 %v18014_v44, %v1805_v2  ;;  %v18383_v58 = vld [vmem:[%s24095_s5 + $0x30] sm:$0xff] }
 0x2dd   : > { %1802 = vmatprep.mubr.f32.mxu1 %v24097_v54  ;;  %v24110_v8 = vand.u32 4294901760, %v18383_v58 }
 0x2de   : > { %v1816_v27 = vand.u32 4294901760, %v18025_v17  ;;  %v1807_v30 = vand.u32 4294901760, %v1806_v22 }
 0x2e0   : > { %1808 = vmatmul.mubr.f32.gmra.mrb[30].mxu1 %v1807_v30  ;;  %v1817_v38 = vsub.f32 %v18025_v17, %v1816_v27 }
 0x2e1   : > { %1813 = vmatprep.mubr.f32.mxu1 %v24097_v54 }
 0x2e2   : > { %v1818_v45 = vand.u32 4294901760, %v1817_v38  ;;  %v18412_v38 = vld [vmem:[%s24095_s5 + $0xc0] sm:$0xff] }
 0x2e4   : > { %1819 = vmatmul.mubr.f32.gmra.mrb[32].mxu1 %v1818_v45  ;;  %v18417_v45 = vld [vmem:[%s24095_s5 + $0xc8] sm:$0xff] }
 0x2e5   : > { %1899 = vmatprep.mubr.f32.mxu1 %v24097_v54 }
 0x2e8   : > { %1901 = vmatmul.mubr.f32.vlgmr.msra.gmra.mrb[2].mxu1 %v17858_v63 }
 0x2e9   : > { %1906 = vmatprep.mubr.f32.mxu1 %v24097_v54  ;;  %2017 = vmatpush1.msra.mxu1 %v17854_v59 }
 0x2ea   : > { %2210 = vmatprep.subr.mxu1 %v17839_v51 }
 0x2ec   : > { %1908 = vmatmul.mubr.f32.gmra.mrb[4].mxu1 %v17868_v5 }
 0x2ed   : > { %1913 = vmatprep.mubr.f32.mxu1 %v24097_v54 }
 0x2f0   : > { %1915 = vmatmul.mubr.f32.gmra.mrb[6].mxu1 %v17878_v13 }
 0x2f1   : > { %1920 = vmatprep.mubr.f32.mxu1 %v24097_v54 }
 0x2f4   : > { %1922 = vmatmul.mubr.f32.gmra.mrb[8].mxu1 %v17889_v19 }
 0x2f5   : > { %1927 = vmatprep.mubr.f32.mxu1 %v24097_v54 }
 0x2f8   : > { %1929 = vmatmul.mubr.f32.gmra.mrb[10].mxu1 %v17901_v26 }
 0x2f9   : > { %1934 = vmatprep.mubr.f32.mxu1 %v24097_v54 }
 0x2fc   : > { %1936 = vmatmul.mubr.f32.gmra.mrb[12].mxu1 %v17912_v33 }
 0x2fd   : > { %1941 = vmatprep.mubr.f32.mxu1 %v24097_v54 }
 0x300   : > { %1943 = vmatmul.mubr.f32.gmra.mrb[14].mxu1 %v17923_v40 }
 0x301   : > { %1948 = vmatprep.mubr.f32.mxu1 %v24097_v54 }
 0x304   : > { %1950 = vmatmul.mubr.f32.gmra.mrb[16].mxu1 %v17934_v49 }
 0x305   : > { %1955 = vmatprep.mubr.f32.mxu1 %v24097_v54 }
 0x308   : > { %1957 = vmatmul.mubr.f32.gmra.mrb[18].mxu1 %v17945_v1 }
 0x309   : > { %1962 = vmatprep.mubr.f32.mxu1 %v24097_v54 }
 0x30c   : > { %1964 = vmatmul.mubr.f32.gmra.mrb[20].mxu1 %v17956_v11 }
 0x30d   : > { %1969 = vmatprep.mubr.f32.mxu1 %v24097_v54 }
 0x310   : > { %1971 = vmatmul.mubr.f32.gmra.mrb[22].mxu1 %v17967_v24 }
 0x311   : > { %1976 = vmatprep.mubr.f32.mxu1 %v24097_v54 }
 0x314   : > { %1978 = vmatmul.mubr.f32.gmra.mrb[24].mxu1 %v17978_v37 }
 0x315   : > { %1983 = vmatprep.mubr.f32.mxu1 %v24097_v54 }
 0x318   : > { %1985 = vmatmul.mubr.f32.gmra.mrb[26].mxu1 %v17989_v57 }
 0x319   : > { %1990 = vmatprep.mubr.f32.mxu1 %v24097_v54 }
 0x31c   : > { %1992 = vmatmul.mubr.f32.gmra.mrb[28].mxu1 %v18000_v15 }
 0x31d   : > { %1997 = vmatprep.mubr.f32.mxu1 %v24097_v54 }
 0x320   : > { %1999 = vmatmul.mubr.f32.gmra.mrb[30].mxu1 %v18011_v34 }
 0x321   : > { %2004 = vmatprep.mubr.f32.mxu1 %v24097_v54 }
 0x324   : > { %2006 = vmatmul.mubr.f32.gmra.mrb[32].mxu1 %v18022_v6 }
 0x325   : > { %2080 = vmatprep.mubr.f32.mxu1 %v24097_v54 }
 0x328   : > { %2083 = vmatmul.mubr.f32.vlgmr.msra.gmra.mrb[2].mxu1 %v17861_v0  ;;  %v18247_v0 = vld [vmem:[%s24095_s5 + $0x90] sm:$0xff] }
 0x329   : > { %2088 = vmatprep.mubr.f32.mxu1 %v24097_v54  ;;  %2212 = vmatpush1.msra.mxu1 %v17841_v53 }
 0x32a   : > { %2423 = vmatprep.subr.mxu1 %v1827_v56 }
 0x32c   : > { %2091 = vmatmul.mubr.f32.gmra.mrb[4].mxu1 %v17874_v7  ;;  %v24102_v7 = vand.u32 4294901760, %v18247_v0 }
 0x32d   : > { %2096 = vmatprep.mubr.f32.mxu1 %v24097_v54 }
 0x330   : > { %2099 = vmatmul.mubr.f32.gmra.mrb[6].mxu1 %v17881_v14  ;;  %v18265_v14 = vld [vmem:[%s24095_s5 + $0x18] sm:$0xff] }
 0x331   : > { %2104 = vmatprep.mubr.f32.mxu1 %v24097_v54 }
 0x334   : > { %2107 = vmatmul.mubr.f32.gmra.mrb[8].mxu1 %v17893_v21  ;;  %v24099_v21 = vand.u32 4294901760, %v18265_v14 }
 0x335   : > { %2112 = vmatprep.mubr.f32.mxu1 %v24097_v54 }
 0x338   : > { %2115 = vmatmul.mubr.f32.gmra.mrb[10].mxu1 %v17904_v28 }
 0x339   : > { %2120 = vmatprep.mubr.f32.mxu1 %v24097_v54 }
 0x33c   : > { %2123 = vmatmul.mubr.f32.gmra.mrb[12].mxu1 %v17915_v35 }
 0x33d   : > { %2128 = vmatprep.mubr.f32.mxu1 %v24097_v54 }
 0x340   : > { %2131 = vmatmul.mubr.f32.gmra.mrb[14].mxu1 %v17926_v42 }
 0x341   : > { %2136 = vmatprep.mubr.f32.mxu1 %v24097_v54 }
 0x344   : > { %2139 = vmatmul.mubr.f32.gmra.mrb[16].mxu1 %v17937_v52 }
 0x345   : > { %2144 = vmatprep.mubr.f32.mxu1 %v24097_v54 }
 0x348   : > { %2147 = vmatmul.mubr.f32.gmra.mrb[18].mxu1 %v17948_v3 }
 0x349   : > { %2152 = vmatprep.mubr.f32.mxu1 %v24097_v54 }
 0x34c   : > { %2155 = vmatmul.mubr.f32.gmra.mrb[20].mxu1 %v17959_v16  ;;  %v18331_v16 = vld [vmem:[%s24095_s5 + $0xa8] sm:$0xff] }
 0x34d   : > { %2160 = vmatprep.mubr.f32.mxu1 %v24097_v54 }
 0x350   : > { %2163 = vmatmul.mubr.f32.gmra.mrb[22].mxu1 %v17970_v29  ;;  %v24115_v29 = vand.u32 4294901760, %v18331_v16 }
 0x351   : > { %2168 = vmatprep.mubr.f32.mxu1 %v24097_v54 }
 0x354   : > { %2171 = vmatmul.mubr.f32.gmra.mrb[24].mxu1 %v17981_v41 }
 0x355   : > { %2176 = vmatprep.mubr.f32.mxu1 %v24097_v54 }
 0x358   : > { %2179 = vmatmul.mubr.f32.gmra.mrb[26].mxu1 %v17992_v60 }
 0x359   : > { %2184 = vmatprep.mubr.f32.mxu1 %v24097_v54 }
 0x35c   : > { %2187 = vmatmul.mubr.f32.gmra.mrb[28].mxu1 %v18003_v20  ;;  %v18368_v20 = vld [vmem:[%s24095_s5 + $0xb0] sm:$0xff] }
 0x35d   : > { %2192 = vmatprep.mubr.f32.mxu1 %v24097_v54 }
 0x360   : > { %2195 = vmatmul.mubr.f32.gmra.mrb[30].mxu1 %v18014_v44  ;;  %v24112_v44 = vand.u32 4294901760, %v18368_v20 }
 0x361   : > { %2200 = vmatprep.mubr.f32.mxu1 %v24097_v54 }
 0x364   : > { %2203 = vmatmul.mubr.f32.gmra.mrb[32].mxu1 %v18025_v17 }
 0x365   : > { %2275 = vmatprep.mubr.f32.mxu1 %v24097_v54 }
 0x368   : > { %2279 = vmatmul.mubr.f32.vlgmr.msra.gmra.mrb[2].mxu1 %v1651_v4  ;;  %v18252_v4 = vld [vmem:[%s24095_s5 + $0x98] sm:$0xff] }
 0x369   : > { %2284 = vmatprep.mubr.f32.mxu1 %v24097_v54  ;;  %2427 = vmatpush1.msra.mxu1 %v1833_v62  ;;  %v18241_v62 = vld [vmem:[%s24095_s5 + $0x8] sm:$0xff] }
 0x36a   : > { %2604 = vmatprep.subr.mxu1 %v17839_v51  ;;  %v18224_v51 = vld [vmem:[%s24095_s5 + $0x80] sm:$0xff] }
 0x36b   : > { %v24122_v56 = vand.u32 4294901760, %v18224_v51  ;;  %v24865_v43 = vand.u32 4294901760, %v18224_v51 }
 0x36c   : > { %2288 = vmatmul.mubr.f32.gmra.mrb[4].mxu1 %v1662_v12  ;;  %v24101_v12 = vand.u32 4294901760, %v18252_v4 }
 0x36d   : > { %2293 = vmatprep.mubr.f32.mxu1 %v24097_v54 }
 0x370   : > { %2297 = vmatmul.mubr.f32.gmra.mrb[6].mxu1 %v1673_v18 }
 0x371   : > { %2302 = vmatprep.mubr.f32.mxu1 %v24097_v54 }
 0x374   : > { %2306 = vmatmul.mubr.f32.gmra.mrb[8].mxu1 %v1684_v25 }
 0x375   : > { %2311 = vmatprep.mubr.f32.mxu1 %v24097_v54 }
 0x378   : > { %2315 = vmatmul.mubr.f32.gmra.mrb[10].mxu1 %v1695_v32 }
 0x379   : > { %2320 = vmatprep.mubr.f32.mxu1 %v24097_v54 }
 0x37c   : > { %2324 = vmatmul.mubr.f32.gmra.mrb[12].mxu1 %v1706_v39 }
 0x37d   : > { %2329 = vmatprep.mubr.f32.mxu1 %v24097_v54 }
 0x380   : > { %2333 = vmatmul.mubr.f32.gmra.mrb[14].mxu1 %v1717_v48 }
 0x381   : > { %2338 = vmatprep.mubr.f32.mxu1 %v24097_v54 }
 0x384   : > { %2342 = vmatmul.mubr.f32.gmra.mrb[16].mxu1 %v1728_v61 }
 0x385   : > { %2347 = vmatprep.mubr.f32.mxu1 %v24097_v54 }
 0x388   : > { %2351 = vmatmul.mubr.f32.gmra.mrb[18].mxu1 %v1739_v10 }
 0x389   : > { %2356 = vmatprep.mubr.f32.mxu1 %v24097_v54 }
 0x38c   : > { %2360 = vmatmul.mubr.f32.gmra.mrb[20].mxu1 %v1750_v23 }
 0x38d   : > { %2365 = vmatprep.mubr.f32.mxu1 %v24097_v54 }
 0x390   : > { %2369 = vmatmul.mubr.f32.gmra.mrb[22].mxu1 %v1761_v36  ;;  %v18340_v36 = vld [vmem:[%s24095_s5 + $0x20] sm:$0xff] }
 0x391   : > { %2374 = vmatprep.mubr.f32.mxu1 %v24097_v54 }
 0x394   : > { %2378 = vmatmul.mubr.f32.gmra.mrb[24].mxu1 %v1772_v50  ;;  %v24114_v50 = vand.u32 4294901760, %v18340_v36 }
 0x395   : > { %2383 = vmatprep.mubr.f32.mxu1 %v24097_v54 }
 0x398   : > { %2387 = vmatmul.mubr.f32.gmra.mrb[26].mxu1 %v1783_v9 }
 0x399   : > { %2392 = vmatprep.mubr.f32.mxu1 %v24097_v54 }
 0x39c   : > { %2396 = vmatmul.mubr.f32.gmra.mrb[28].mxu1 %v1794_v31  ;;  %v18373_v31 = vld [vmem:[%s24095_s5 + $0xb8] sm:$0xff] }
 0x39d   : > { %2401 = vmatprep.mubr.f32.mxu1 %v24097_v54  ;;  %v24111_v47 = vand.u32 4294901760, %v18373_v31 }
 0x39f   : > { %v18399_v22 = vpack.c.bf16 %v24111_v47, %v24112_v44 }
 0x3a0   : > { %2405 = vmatmul.mubr.f32.gmra.mrb[30].mxu1 %v1805_v2  ;;  %v18388_v2 = vld [vmem:[%s24095_s5 + $0x38] sm:$0xff] }
 0x3a1   : > { %2410 = vmatprep.mubr.f32.mxu1 %v24097_v54  ;;  %v24109_v17 = vand.u32 4294901760, %v18388_v2  ;;  %24841 = vst [vmem:[#allocation12_spill] sm:$0xff] %v18399_v22 }
 0x3a3   : > { %v18407_v30 = vpack.c.bf16 %v24109_v17, %v24110_v8 }
 0x3a4   : > { %2414 = vmatmul.mubr.f32.gmra.mrb[32].mxu1 %v1816_v27 }
 0x3a5   : > { %2490 = vmatprep.mubr.f32.mxu1 %v24097_v54  ;;  %24842 = vst [vmem:[#allocation13_spill] sm:$0xff] %v18407_v30 }
 0x3a8   : > { %2492 = vmatmul.mubr.f32.vlgmr.msra.gmra.mrb[2].mxu1 %v17858_v63 }
 0x3a9   : > { %2497 = vmatprep.mubr.f32.mxu1 %v24097_v54  ;;  %2606 = vmatpush1.msra.mxu1 %v17841_v53  ;;  %v18229_v53 = vld [vmem:[%s24095_s5 + $0x88] sm:$0xff] }
 0x3aa   : > { %v24121_v59 = vand.u32 4294901760, %v18229_v53 }
 0x3ac   : > { %2499 = vmatmul.mubr.f32.gmra.mrb[4].mxu1 %v17868_v5  ;;  %v18271_v18 = vpack.c.bf16 %v24121_v59, %v24122_v56 }
 0x3ad   : > { %2504 = vmatprep.mubr.f32.mxu1 %v24097_v54 }
 0x3ae   : > { %24835 = vst [vmem:[#allocation6_spill] sm:$0xff] %v18271_v18  ;;  %15420 = vmatprep.subr.bf16.mxu0 %v18271_v18 }
 0x3b0   : > { %2506 = vmatmul.mubr.f32.gmra.mrb[6].mxu1 %v17878_v13 }
 0x3b1   : > { %2511 = vmatprep.mubr.f32.mxu1 %v24097_v54 }
 0x3b4   : > { %2513 = vmatmul.mubr.f32.gmra.mrb[8].mxu1 %v17889_v19 }
 0x3b5   : > { %2518 = vmatprep.mubr.f32.mxu1 %v24097_v54 }
 0x3b8   : > { %2520 = vmatmul.mubr.f32.gmra.mrb[10].mxu1 %v17901_v26 }
 0x3b9   : > { %2525 = vmatprep.mubr.f32.mxu1 %v24097_v54 }
 0x3bc   : > { %2527 = vmatmul.mubr.f32.gmra.mrb[12].mxu1 %v17912_v33 }
 0x3bd   : > { %2532 = vmatprep.mubr.f32.mxu1 %v24097_v54 }
 0x3c0   : > { %2534 = vmatmul.mubr.f32.gmra.mrb[14].mxu1 %v17923_v40 }
 0x3c1   : > { %2539 = vmatprep.mubr.f32.mxu1 %v24097_v54 }
 0x3c4   : > { %2541 = vmatmul.mubr.f32.gmra.mrb[16].mxu1 %v17934_v49 }
 0x3c5   : > { %2546 = vmatprep.mubr.f32.mxu1 %v24097_v54 }
 0x3c8   : > { %2548 = vmatmul.mubr.f32.gmra.mrb[18].mxu1 %v17945_v1 }
 0x3c9   : > { %2553 = vmatprep.mubr.f32.mxu1 %v24097_v54 }
 0x3cc   : > { %2555 = vmatmul.mubr.f32.gmra.mrb[20].mxu1 %v17956_v11 }
 0x3cd   : > { %2560 = vmatprep.mubr.f32.mxu1 %v24097_v54 }
 0x3d0   : > { %2562 = vmatmul.mubr.f32.gmra.mrb[22].mxu1 %v17967_v24 }
 0x3d1   : > { %2567 = vmatprep.mubr.f32.mxu1 %v24097_v54 }
 0x3d4   : > { %2569 = vmatmul.mubr.f32.gmra.mrb[24].mxu1 %v17978_v37 }
 0x3d5   : > { %2574 = vmatprep.mubr.f32.mxu1 %v24097_v54 }
 0x3d8   : > { %2576 = vmatmul.mubr.f32.gmra.mrb[26].mxu1 %v17989_v57 }
 0x3d9   : > { %2581 = vmatprep.mubr.f32.mxu1 %v24097_v54 }
 0x3dc   : > { %2583 = vmatmul.mubr.f32.gmra.mrb[28].mxu1 %v18000_v15 }
 0x3dd   : > { %2588 = vmatprep.mubr.f32.mxu1 %v24097_v54 }
 0x3e0   : > { %2590 = vmatmul.mubr.f32.gmra.mrb[30].mxu1 %v18011_v34 }
 0x3e1   : > { %2595 = vmatprep.mubr.f32.mxu1 %v24097_v54 }
 0x3e4   : > { %2597 = vmatmul.mubr.f32.gmra.mrb[32].mxu1 %v18022_v6 }
 0x3e5   : > { %2669 = vmatprep.mubr.f32.mxu1 %v24097_v54 }
 0x3e8   : > { %2671 = vmatmul.mubr.f32.vlgmr.msra.gmra.mrb[2].mxu1 %v17858_v63  ;;  %v24104_v63 = vand.u32 4294901760, %v18234_v55 }
 0x3e9   : > { %2676 = vmatprep.mubr.f32.mxu1 %v24097_v54 }
 0x3ec   : > { %2678 = vmatmul.mubr.f32.gmra.mrb[4].mxu1 %v17868_v5  ;;  %v24103_v5 = vand.u32 4294901760, %v18241_v62 }
 0x3ed   : > { %2683 = vmatprep.mubr.f32.mxu1 %v24097_v54 }
 0x3ee   : > { %v18279_v25 = vpack.c.bf16 %v24103_v5, %v24104_v63  ;;  %v18456_v5 = vld [vmem:[%s24095_s5 + $0xd0] sm:$0xff]  ;;  %v18461_v63 = vld [vmem:[%s24095_s5 + $0xd8] sm:$0xff] }
 0x3f0   : > { %2685 = vmatmul.mubr.f32.gmra.mrb[6].mxu1 %v17878_v13  ;;  %v18260_v13 = vld [vmem:[%s24095_s5 + $0x10] sm:$0xff]  ;;  %24836 = vst [vmem:[#allocation7_spill] sm:$0xff] %v18279_v25  ;;  %15422 = vmatpush3.bf16.msra.mxu0 %v18279_v25 }
 0x3f1   : > { %2690 = vmatprep.mubr.f32.mxu1 %v24097_v54 }
 0x3f4   : > { %2692 = vmatmul.mubr.f32.gmra.mrb[8].mxu1 %v17889_v19  ;;  %v24100_v19 = vand.u32 4294901760, %v18260_v13 }
 0x3f5   : > { %2697 = vmatprep.mubr.f32.mxu1 %v24097_v54 }
 0x3f6   : > { %v18293_v28 = vpack.c.bf16 %v24099_v21, %v24100_v19 }
 0x3f8   : > { %2699 = vmatmul.mubr.f32.gmra.mrb[10].mxu1 %v17901_v26  ;;  %v18285_v26 = vpack.c.bf16 %v24101_v12, %v24102_v7  ;;  %24838 = vst [vmem:[#allocation9_spill] sm:$0xff] %v18293_v28 }
 0x3f9   : > { %2704 = vmatprep.mubr.f32.mxu1 %v24097_v54 }
 0x3fa   : > { %24837 = vst [vmem:[#allocation8_spill] sm:$0xff] %v18285_v26  ;;  %15424 = vmatprep.subr.bf16.mxu0 %v18285_v26 }
 0x3fb   : > { %15426 = vmatpush3.bf16.msra.mxu0 %v18293_v28 }
 0x3fc   : > { %2706 = vmatmul.mubr.f32.gmra.mrb[12].mxu1 %v17912_v33 }
 0x3fd   : > { %2711 = vmatprep.mubr.f32.mxu1 %v24097_v54 }
 0x400   : > { %2713 = vmatmul.mubr.f32.gmra.mrb[14].mxu1 %v17923_v40 }
 0x401   : > { %2718 = vmatprep.mubr.f32.mxu1 %v24097_v54 }
 0x404   : > { %2720 = vmatmul.mubr.f32.gmra.mrb[16].mxu1 %v17934_v49 }
 0x405   : > { %2725 = vmatprep.mubr.f32.mxu1 %v24097_v54 }
 0x408   : > { %2727 = vmatmul.mubr.f32.gmra.mrb[18].mxu1 %v17945_v1 }
 0x409   : > { %2732 = vmatprep.mubr.f32.mxu1 %v24097_v54 }
 0x40c   : > { %2734 = vmatmul.mubr.f32.gmra.mrb[20].mxu1 %v17956_v11  ;;  %v18326_v11 = vld [vmem:[%s24095_s5 + $0xa0] sm:$0xff] }
 0x40d   : > { %2739 = vmatprep.mubr.f32.mxu1 %v24097_v54 }
 0x410   : > { %2741 = vmatmul.mubr.f32.gmra.mrb[22].mxu1 %v17967_v24  ;;  %v24116_v24 = vand.u32 4294901760, %v18326_v11 }
 0x411   : > { %2746 = vmatprep.mubr.f32.mxu1 %v24097_v54 }
 0x412   : > { %v18355_v60 = vpack.c.bf16 %v24115_v29, %v24116_v24  ;;  %v18500_v29 = vld [vmem:[%s24095_s5 + $0xe0] sm:$0xff]  ;;  %v18505_v24 = vld [vmem:[%s24095_s5 + $0xe8] sm:$0xff] }
 0x414   : > { %2748 = vmatmul.mubr.f32.gmra.mrb[24].mxu1 %v17978_v37  ;;  %v18345_v37 = vld [vmem:[%s24095_s5 + $0x28] sm:$0xff]  ;;  %24839 = vst [vmem:[#allocation10_spill] sm:$0xff] %v18355_v60  ;;  %15428 = vmatprep.subr.bf16.mxu0 %v18355_v60 }
 0x415   : > { %2753 = vmatprep.mubr.f32.mxu1 %v24097_v54 }
 0x418   : > { %2755 = vmatmul.mubr.f32.gmra.mrb[26].mxu1 %v17989_v57  ;;  %v24113_v57 = vand.u32 4294901760, %v18345_v37 }
 0x419   : > { %2760 = vmatprep.mubr.f32.mxu1 %v24097_v54 }
 0x41c   : > { %2762 = vmatmul.mubr.f32.gmra.mrb[28].mxu1 %v18000_v15  ;;  %v18363_v15 = vpack.c.bf16 %v24113_v57, %v24114_v50 }
 0x41d   : > { %2767 = vmatprep.mubr.f32.mxu1 %v24097_v54 }
 0x41e   : > { %24840 = vst [vmem:[#allocation11_spill] sm:$0xff] %v18363_v15  ;;  %15430 = vmatpush3.bf16.msra.mxu0 %v18363_v15 }
 0x41f   : > { %15432 = vmatprep.subr.bf16.mxu0 %v18399_v22  ;;  %v18549_v22 = vld [vmem:[%s24095_s5 + $0xf8] sm:$0xff] }
 0x420   : > { %2769 = vmatmul.mubr.f32.gmra.mrb[30].mxu1 %v18011_v34  ;;  %v24856_v60 = vand.u32 4294901760, %v18549_v22 }
 0x421   : > { %2774 = vmatprep.mubr.f32.mxu1 %v24097_v54 }
 0x422   : > { %15434 = vmatpush3.bf16.msra.mxu0 %v18407_v30 }
 0x424   : > { %2776 = vmatmul.mubr.f32.gmra.mrb[32].mxu1 %v18022_v6 }
 0x4bb   : > { %v18297_v32 = vpop.f32.mrb[2].mxu1 }
 0x4bc   : > { %v18299_v33 = vpop.f32.mrb[3].mxu1 }
 0x4bd   : > { %v2782_v35 = vmax.f32 %v18297_v32, %v18299_v33 }
 0x4bf   : > { %2783 = vmax.xlane.f32.xlu1 %v2782_v35  ;;  %v18303_v39 = vpop.f32.mrb[4].mxu1 }
 0x4c0   : > { %v18305_v40 = vpop.f32.mrb[5].mxu1 }
 0x4c1   : > { %v2785_v42 = vmax.f32 %v18303_v39, %v18305_v40 }
 0x4c3   : > { %2786 = vmax.xlane.f32.xlu1 %v2785_v42  ;;  %v18309_v48 = vpop.f32.mrb[6].mxu1  ;;  %v24106_v42 = vand.u32 4294901760, %v18412_v38 }
 0x4c4   : > { %v18311_v49 = vpop.f32.mrb[7].mxu1 }
 0x4c5   : > { %v2788_v52 = vmax.f32 %v18309_v48, %v18311_v49 }
 0x4c7   : > { %2789 = vmax.xlane.f32.xlu1 %v2788_v52  ;;  %v18315_v61 = vpop.f32.mrb[8].mxu1  ;;  %v24105_v52 = vand.u32 4294901760, %v18417_v45 }
 0x4c8   : > { %v18317_v1 = vpop.f32.mrb[9].mxu1 }
 0x4c9   : > { %v2791_v3 = vmax.f32 %v18315_v61, %v18317_v1  ;;  %v18443_v19 = vpack.c.bf16 %v24105_v52, %v24106_v42  ;;  %v24117_v42 = vand.u32 4294901760, %v18461_v63 }
 0x4cb   : > { %2792 = vmax.xlane.f32.xlu1 %v2791_v3  ;;  %v18321_v10 = vpop.f32.mrb[10].mxu1  ;;  %v18427_v3 = vld [vmem:[%s24095_s5 + $0x40] sm:$0xff]  ;;  %24843 = vst [vmem:[#allocation14_spill] sm:$0xff] %v18443_v19  ;;  %15436 = vmatprep.subr.bf16.mxu0 %v18443_v19 }
 0x4cc   : > { %v18333_v23 = vpop.f32.mrb[11].mxu1  ;;  %v24108_v54 = vand.u32 4294901760, %v18427_v3 }
 0x4cd   : > { %v2794_v41 = vmax.f32 %v18321_v10, %v18333_v23 }
 0x4cf   : > { %2795 = vmax.xlane.f32.xlu1 %v2794_v41  ;;  %v18357_v9 = vpop.f32.mrb[12].mxu1  ;;  %v18432_v41 = vld [vmem:[%s24095_s5 + $0x48] sm:$0xff] }
 0x4d0   : > { %v18375_v34 = vpop.f32.mrb[13].mxu1  ;;  %v24107_v21 = vand.u32 4294901760, %v18432_v41 }
 0x4d1   : > { %v2797_v6 = vmax.f32 %v18357_v9, %v18375_v34 }
 0x4d2   : > { %v18451_v7 = vpack.c.bf16 %v24107_v21, %v24108_v54  ;;  %v18471_v21 = vld [vmem:[%s24095_s5 + $0x50] sm:$0xff]  ;;  %v18476_v54 = vld [vmem:[%s24095_s5 + $0x58] sm:$0xff] }
 0x4d3   : > { %2798 = vmax.xlane.f32.xlu1 %v2797_v6  ;;  %v18401_v27 = vpop.f32.mrb[14].mxu1  ;;  %v24120_v8 = vand.u32 4294901760, %v18471_v21  ;;  %v24119_v47 = vand.u32 4294901760, %v18476_v54 }
 0x4d4   : > { %v18419_v35 = vpop.f32.mrb[15].mxu1  ;;  %24844 = vst [vmem:[#allocation15_spill] sm:$0xff] %v18451_v7  ;;  %15438 = vmatpush3.bf16.msra.mxu0 %v18451_v7 }
 0x4d5   : > { %v2800_v6 = vmax.f32 %v18401_v27, %v18419_v35  ;;  %v18495_v50 = vpack.c.bf16 %v24119_v47, %v24120_v8  ;;  %v18515_v47 = vld [vmem:[%s24095_s5 + $0x60] sm:$0xff]  ;;  %v18520_v8 = vld [vmem:[%s24095_s5 + $0x68] sm:$0xff] }
 0x4d6   : > { %v24136_v56 = vand.u32 4294901760, %v18515_v47 }
 0x4d7   : > { %2801 = vmax.xlane.f32.xlu1 %v2800_v6  ;;  %v18445_v12 = vpop.f32.mrb[16].mxu1  ;;  %v24118_v6 = vand.u32 4294901760, %v18456_v5  ;;  %24847 = vst [vmem:[#allocation18_spill] sm:$0xff] %v18495_v50 }
 0x4d8   : > { %v18463_v52 = vpop.f32.mrb[17].mxu1 }
 0x4d9   : > { %v2803_v17 = vmax.f32 %v18445_v12, %v18463_v52  ;;  %v18487_v44 = vpack.c.bf16 %v24117_v42, %v24118_v6  ;;  %v24849_v6 = vand.u32 4294901760, %v18500_v29 }
 0x4db   : > { %24845 = vst [vmem:[#allocation16_spill] sm:$0xff] %v18487_v44  ;;  %2804 = vmax.xlane.f32.xlu1 %v2803_v17  ;;  %v18489_v57 = vpop.f32.mrb[18].mxu1  ;;  %15440 = vmatprep.subr.bf16.mxu0 %v18487_v44  ;;  %v24135_v17 = vand.u32 4294901760, %v18520_v8  ;;  %v24850_v44 = vand.u32 4294901760, %v18505_v24 }
 0x4dc   : > { %24846 = vst [vmem:[#allocation17_spill] sm:$0xff] %v18489_v57  ;;  %v18507_v42 = vpop.f32.mrb[19].mxu1  ;;  %15442 = vmatpush3.bf16.msra.mxu0 %v18495_v50  ;;  %v18544_v50 = vld [vmem:[%s24095_s5 + $0xf0] sm:$0xff] }
 0x4dd   : > { %24848 = vst [vmem:[#allocation19_spill] sm:$0xff] %v18507_v42  ;;  %v2806_v59 = vmax.f32 %v18489_v57, %v18507_v42  ;;  %v18531_v7 = vpack.c.bf16 %v24850_v44, %v24849_v6  ;;  %v18539_v30 = vpack.c.bf16 %v24135_v17, %v24136_v56  ;;  %v18559_v17 = vld [vmem:[%s24095_s5 + $0x70] sm:$0xff]  ;;  %v18564_v56 = vld [vmem:[%s24095_s5 + $0x78] sm:$0xff]  ;;  %v24855_v6 = vand.u32 4294901760, %v18544_v50 }
 0x4df   : > { %24851 = vst [vmem:[#allocation20_spill] sm:$0xff] %v18531_v7  ;;  %2807 = vmax.xlane.f32.xlu1 %v2806_v59  ;;  %v18533_v19 = vpop.f32.mrb[20].mxu1  ;;  %24853 = vst [vmem:[#allocation22_spill] sm:$0xff] %v18539_v30  ;;  %15444 = vmatprep.subr.bf16.mxu0 %v18531_v7  ;;  %v24154_v7 = vand.u32 4294901760, %v18559_v17  ;;  %v24153_v59 = vand.u32 4294901760, %v18564_v56  ;;  %v18575_v28 = vpack.c.bf16 %v24856_v60, %v24855_v6 }
 0x4e0   : > { %24852 = vst [vmem:[#allocation21_spill] sm:$0xff] %v18533_v19  ;;  %v18551_v44 = vpop.f32.mrb[21].mxu1  ;;  %15446 = vmatpush3.bf16.msra.mxu0 %v18539_v30 }
 0x4e1   : > { %24854 = vst [vmem:[#allocation23_spill] sm:$0xff] %v18551_v44  ;;  %v2809_v15 = vmax.f32 %v18533_v19, %v18551_v44  ;;  %24857 = vst [vmem:[#allocation24_spill] sm:$0xff] %v18575_v28  ;;  %v18583_v25 = vpack.c.bf16 %v24153_v59, %v24154_v7  ;;  %15448 = vmatprep.subr.bf16.mxu0 %v18575_v28 }
 0x4e3   : > { %2810 = vmax.xlane.f32.xlu0 %v2809_v15  ;;  %v18577_v26 = vpop.f32.mrb[22].mxu1  ;;  %24859 = vst [vmem:[#allocation26_spill] sm:$0xff] %v18583_v25 }
 0x4e4   : > { %24858 = vst [vmem:[#allocation25_spill] sm:$0xff] %v18577_v26  ;;  %v18585_v30 = vpop.f32.mrb[23].mxu1  ;;  %15450 = vmatpush3.bf16.msra.mxu0 %v18583_v25  ;;  %v18606_v25 = vsub.f32 %v18224_v51, %v24865_v43 }
 0x4e5   : > { %24860 = vst [vmem:[#allocation27_spill] sm:$0xff] %v18585_v30  ;;  %v2812_v18 = vmax.f32 %v18577_v26, %v18585_v30 }
 0x4e6   : > { %24866 = vst [vmem:[#allocation32_spill] sm:$0xff] %v18606_v25 }
 0x4e7   : > { %2813 = vmax.xlane.f32.xlu1 %v2812_v18  ;;  %v18591_v60 = vpop.f32.mrb[24].mxu1  ;;  %v24867_v18 = vand.u32 4294901760, %v18229_v53 }
 0x4e8   : > { %24861 = vst [vmem:[#allocation28_spill] sm:$0xff] %v18591_v60  ;;  %v18593_v15 = vpop.f32.mrb[25].mxu1 }
 0x4e9   : > { %24862 = vst [vmem:[#allocation29_spill] sm:$0xff] %v18593_v15  ;;  %v2815_v6 = vmax.f32 %v18591_v60, %v18593_v15  ;;  %v18611_v46 = vsub.f32 %v18229_v53, %v24867_v18  ;;  %v24167_v60 = vand.u32 4294901760, %v18606_v25 }
 0x4eb   : > { %2816 = vmax.xlane.f32.xlu1 %v2815_v6  ;;  %v18597_v59 = vpop.f32.mrb[26].mxu1  ;;  %24868 = vst [vmem:[#allocation33_spill] sm:$0xff] %v18611_v46  ;;  %v24168_v30 = vand.u32 4294901760, %v18611_v46  ;;  %v3379_v43 = vsub.f32 %v18606_v25, %v24167_v60 }
 0x4ec   : > { %24863 = vst [vmem:[#allocation30_spill] sm:$0xff] %v18597_v59  ;;  %v18599_v7 = vpop.f32.mrb[27].mxu1 }
 0x4ed   : > { %24864 = vst [vmem:[#allocation31_spill] sm:$0xff] %v18599_v7  ;;  %v2818_v28 = vmax.f32 %v18597_v59, %v18599_v7  ;;  %v3386_v51 = vsub.f32 %v18611_v46, %v24168_v30  ;;  %v3380_v18 = vand.u32 4294901760, %v3379_v43  ;;  %v24876_v30 = vand.u32 4294901760, %v18326_v11 }
 0x4ef   : > { %2819 = vmax.xlane.f32.xlu1 %v2818_v28  ;;  %v18613_v15 = vpop.f32.mrb[28].mxu1  ;;  %v3387_v59 = vand.u32 4294901760, %v3386_v51  ;;  %v18645_v43 = vsub.f32 %v18326_v11, %v24876_v30  ;;  %v24878_v51 = vand.u32 4294901760, %v18331_v16 }
 0x4f0   : > { %24869 = vst [vmem:[#allocation34_spill] sm:$0xff] %v18613_v15  ;;  %v18615_v6 = vpop.f32.mrb[29].mxu1 }
 0x4f1   : > { %24870 = vst [vmem:[#allocation35_spill] sm:$0xff] %v18615_v6  ;;  %v2821_v7 = vmax.f32 %v18613_v15, %v18615_v6  ;;  %v18633_v44 = vpack.c.bf16 %v3387_v59, %v3380_v18  ;;  %24877 = vst [vmem:[#allocation41_spill] sm:$0xff] %v18645_v43  ;;  %v18650_v59 = vsub.f32 %v18331_v16, %v24878_v51 }
 0x4f3   : > { %2822 = vmax.xlane.f32.xlu1 %v2821_v7  ;;  %v18627_v53 = vpop.f32.mrb[30].mxu1  ;;  %24873 = vst [vmem:[#allocation38_spill] sm:$0xff] %v18633_v44  ;;  %15452 = vmatprep.subr.bf16.mxu0 %v18633_v44  ;;  %24879 = vst [vmem:[#allocation42_spill] sm:$0xff] %v18650_v59  ;;  %v24882_v44 = vand.u32 4294901760, %v18345_v37  ;;  %v24177_v11 = vand.u32 4294901760, %v18650_v59 }
 0x4f4   : > { %24871 = vst [vmem:[#allocation36_spill] sm:$0xff] %v18627_v53  ;;  %v18629_v28 = vpop.f32.mrb[31].mxu1 }
 0x4f5   : > { %24872 = vst [vmem:[#allocation37_spill] sm:$0xff] %v18629_v28  ;;  %v2824_v26 = vmax.f32 %v18627_v53, %v18629_v28 }
 0x4f7   : > { %2825 = vmax.xlane.f32.xlu1 %v2824_v26  ;;  %v18635_v6 = vpop.f32.mrb[32].mxu1  ;;  %v24880_v26 = vand.u32 4294901760, %v18340_v36 }
 0x4f8   : > { %24874 = vst [vmem:[#allocation39_spill] sm:$0xff] %v18635_v6  ;;  %v18637_v60 = vpop.f32.mrb[33].mxu1 }
 0x4f9   : > { %24875 = vst [vmem:[#allocation40_spill] sm:$0xff] %v18637_v60  ;;  %v2827_v7 = vmax.f32 %v18635_v6, %v18637_v60  ;;  %v18655_v18 = vsub.f32 %v18340_v36, %v24880_v26  ;;  %v18660_v60 = vsub.f32 %v18345_v37, %v24882_v44  ;;  %v3414_v36 = vsub.f32 %v18650_v59, %v24177_v11 }
 0x4fa   : > { %v24887_v11 = vand.u32 4294901760, %v18373_v31 }
 0x4fb   : > { %2828 = vmax.xlane.f32.xlu1 %v2827_v7  ;;  %24881 = vst [vmem:[#allocation43_spill] sm:$0xff] %v18655_v18  ;;  %24883 = vst [vmem:[#allocation44_spill] sm:$0xff] %v18660_v60  ;;  %v24175_v7 = vand.u32 4294901760, %v18645_v43  ;;  %v24179_v30 = vand.u32 4294901760, %v18655_v18  ;;  %v24180_v6 = vand.u32 4294901760, %v18660_v60  ;;  %v3415_v26 = vand.u32 4294901760, %v3414_v36 }
 0x4fc   : > { %v18688_v42 = vsub.f32 %v18373_v31, %v24887_v11  ;;  %v24892_v36 = vand.u32 4294901760, %v18388_v2  ;;  %v954_v31 = vld [vmem:[%s24092_s2 + $0x8] sm:$0xff] }
 0x4fd   : > { %v3407_v16 = vsub.f32 %v18645_v43, %v24175_v7  ;;  %v3295_v37 = vsub.f32 %v18655_v18, %v24179_v30  ;;  %v3302_v44 = vsub.f32 %v18660_v60, %v24180_v6  ;;  %v24885_v7 = vand.u32 4294901760, %v18368_v20 }
 0x4fe   : > { %24888 = vst [vmem:[#allocation47_spill] sm:$0xff] %v18688_v42  ;;  %v24890_v6 = vand.u32 4294901760, %v18383_v58 }
 0x4ff   : > { %v3408_v51 = vand.u32 4294901760, %v3407_v16  ;;  %v3296_v28 = vand.u32 4294901760, %v3295_v37  ;;  %v3303_v53 = vand.u32 4294901760, %v3302_v44  ;;  %v18683_v19 = vsub.f32 %v18368_v20, %v24885_v7 }
 0x500   : > { %v18695_v16 = vsub.f32 %v18383_v58, %v24890_v6  ;;  %v18700_v37 = vsub.f32 %v18388_v2, %v24892_v36  ;;  %v24184_v7 = vand.u32 4294901760, %v18688_v42 }
 0x501   : > { %v18678_v15 = vpack.c.bf16 %v3415_v26, %v3408_v51  ;;  %24886 = vst [vmem:[#allocation46_spill] sm:$0xff] %v18683_v19  ;;  %v18690_v30 = vpack.c.bf16 %v3303_v53, %v3296_v28  ;;  %v24182_v20 = vand.u32 4294901760, %v18683_v19 }
 0x502   : > { %24891 = vst [vmem:[#allocation49_spill] sm:$0xff] %v18695_v16  ;;  %24893 = vst [vmem:[#allocation50_spill] sm:$0xff] %v18700_v37  ;;  %v24185_v53 = vand.u32 4294901760, %v18695_v16  ;;  %v24188_v28 = vand.u32 4294901760, %v18700_v37  ;;  %v3428_v2 = vsub.f32 %v18688_v42, %v24184_v7  ;;  %v24897_v7 = vand.u32 4294901760, %v18417_v45 }
 0x503   : > { %24884 = vst [vmem:[#allocation45_spill] sm:$0xff] %v18678_v15  ;;  %24889 = vst [vmem:[#allocation48_spill] sm:$0xff] %v18690_v30  ;;  %v3421_v58 = vsub.f32 %v18683_v19, %v24182_v20  ;;  %v24895_v20 = vand.u32 4294901760, %v18412_v38 }
 0x504   : > { %v3309_v6 = vsub.f32 %v18695_v16, %v24185_v53  ;;  %v3316_v11 = vsub.f32 %v18700_v37, %v24188_v28  ;;  %v3429_v51 = vand.u32 4294901760, %v3428_v2  ;;  %v18731_v53 = vsub.f32 %v18417_v45, %v24897_v7 }
 0x505   : > { %v3422_v44 = vand.u32 4294901760, %v3421_v58  ;;  %v18726_v15 = vsub.f32 %v18412_v38, %v24895_v20  ;;  %v24902_v2 = vand.u32 4294901760, %v18432_v41  ;;  %v24906_v28 = vand.u32 4294901760, %v18461_v63 }
 0x506   : > { %v3310_v26 = vand.u32 4294901760, %v3309_v6  ;;  %v3317_v36 = vand.u32 4294901760, %v3316_v11  ;;  %24898 = vst [vmem:[#allocation53_spill] sm:$0xff] %v18731_v53  ;;  %v24189_v20 = vand.u32 4294901760, %v18731_v53 }
 0x507   : > { %v18721_v30 = vpack.c.bf16 %v3429_v51, %v3422_v44  ;;  %24896 = vst [vmem:[#allocation52_spill] sm:$0xff] %v18726_v15  ;;  %v18743_v6 = vsub.f32 %v18432_v41, %v24902_v2  ;;  %v24187_v38 = vand.u32 4294901760, %v18726_v15  ;;  %v24904_v2 = vand.u32 4294901760, %v18456_v5 }
 0x508   : > { %v18733_v57 = vpack.c.bf16 %v3317_v36, %v3310_v26 }
 0x509   : > { %24894 = vst [vmem:[#allocation51_spill] sm:$0xff] %v18721_v30  ;;  %24903 = vst [vmem:[#allocation56_spill] sm:$0xff] %v18743_v6  ;;  %v24192_v45 = vand.u32 4294901760, %v18743_v6  ;;  %v3435_v7 = vsub.f32 %v18726_v15, %v24187_v38  ;;  %v18764_v38 = vsub.f32 %v18456_v5, %v24904_v2 }
 0x50a   : > { %24899 = vst [vmem:[#allocation54_spill] sm:$0xff] %v18733_v57 }
 0x50b   : > { %v3330_v44 = vsub.f32 %v18743_v6, %v24192_v45  ;;  %v3436_v51 = vand.u32 4294901760, %v3435_v7  ;;  %24905 = vst [vmem:[#allocation57_spill] sm:$0xff] %v18764_v38  ;;  %v24911_v7 = vand.u32 4294901760, %v18476_v54  ;;  %v24194_v5 = vand.u32 4294901760, %v18764_v38 }
 0x50c   : > { %962 = vperm.xlu1 %17359, %v954_v31   ;;  %v24900_v31 = vand.u32 4294901760, %v18427_v3 }
 0x50e   : > { %v18738_v58 = vsub.f32 %v18427_v3, %v24900_v31  ;;  %v3442_v3 = vsub.f32 %v18731_v53, %v24189_v20  ;;  %v3331_v31 = vand.u32 4294901760, %v3330_v44  ;;  %v18769_v20 = vsub.f32 %v18461_v63, %v24906_v28 }
 0x510   : > { %24901 = vst [vmem:[#allocation55_spill] sm:$0xff] %v18738_v58  ;;  %v24191_v11 = vand.u32 4294901760, %v18738_v58  ;;  %v3443_v26 = vand.u32 4294901760, %v3442_v3  ;;  %24907 = vst [vmem:[#allocation58_spill] sm:$0xff] %v18769_v20  ;;  %v18781_v3 = vsub.f32 %v18476_v54, %v24911_v7  ;;  %v24195_v44 = vand.u32 4294901760, %v18769_v20 }
 0x512   : > { %v3323_v41 = vsub.f32 %v18738_v58, %v24191_v11  ;;  %v18771_v57 = vpack.c.bf16 %v3443_v26, %v3436_v51  ;;  %v24909_v11 = vand.u32 4294901760, %v18471_v21  ;;  %24912 = vst [vmem:[#allocation61_spill] sm:$0xff] %v18781_v3  ;;  %v24198_v28 = vand.u32 4294901760, %v18781_v3 }
 0x514   : > { %v3324_v36 = vand.u32 4294901760, %v3323_v41  ;;  %24908 = vst [vmem:[#allocation59_spill] sm:$0xff] %v18771_v57  ;;  %v18776_v45 = vsub.f32 %v18471_v21, %v24909_v11  ;;  %v3449_v21 = vsub.f32 %v18764_v38, %v24194_v5  ;;  %v3456_v11 = vsub.f32 %v18769_v20, %v24195_v44 }
 0x515   : > { %v3344_v51 = vsub.f32 %v18781_v3, %v24198_v28  ;;  %v18807_v5 = vpack.c.bf16 %v18611_v46, %v18606_v25  ;;  %v24917_v44 = vand.u32 4294901760, %v18234_v55  ;;  %v24919_v57 = vand.u32 4294901760, %v18241_v62  ;;  %v24987_v46 = vld [vmem:[#allocation19_spill] sm:$0xff] }
 0x516   : > { %24910 = vst [vmem:[#allocation60_spill] sm:$0xff] %v18776_v45  ;;  %v18783_v41 = vpack.c.bf16 %v3331_v31, %v3324_v36  ;;  %v24196_v63 = vand.u32 4294901760, %v18776_v45  ;;  %v3450_v26 = vand.u32 4294901760, %v3449_v21  ;;  %v3457_v36 = vand.u32 4294901760, %v3456_v11 }
 0x517   : > { %v3345_v2 = vand.u32 4294901760, %v3344_v51  ;;  %24916 = vst [vmem:[#allocation65_spill] sm:$0xff] %v18807_v5  ;;  %v18817_v21 = vsub.f32 %v18241_v62, %v24919_v57  ;;  %v24927_v62 = vand.u32 4294901760, %v18260_v13  ;;  %v18890_v28 = vpack.c.bf16 %v18731_v53, %v18726_v15 }
 0x518   : > { %24913 = vst [vmem:[#allocation62_spill] sm:$0xff] %v18783_v41  ;;  %v3337_v54 = vsub.f32 %v18776_v45, %v24196_v63  ;;  %v18801_v7 = vpack.c.bf16 %v3457_v36, %v3450_v26  ;;  %v18812_v63 = vsub.f32 %v18234_v55, %v24917_v44  ;;  %v24924_v26 = vand.u32 4294901760, %v18252_v4 }
 0x519   : > { %24920 = vst [vmem:[#allocation67_spill] sm:$0xff] %v18817_v21  ;;  %v18840_v57 = vsub.f32 %v18260_v13, %v24927_v62  ;;  %v24929_v44 = vand.u32 4294901760, %v18265_v14  ;;  %24938 = vst [vmem:[#allocation79_spill] sm:$0xff] %v18890_v28 }
 0x51a   : > { %v3338_v31 = vand.u32 4294901760, %v3337_v54  ;;  %24914 = vst [vmem:[#allocation63_spill] sm:$0xff] %v18801_v7  ;;  %24918 = vst [vmem:[#allocation66_spill] sm:$0xff] %v18812_v63  ;;  %v18821_v11 = vpack.c.bf16 %v18817_v21, %v18812_v63  ;;  %v24922_v54 = vand.u32 4294901760, %v18247_v0  ;;  %v18831_v36 = vsub.f32 %v18252_v4, %v24924_v26 }
 0x51b   : > { %24928 = vst [vmem:[#allocation72_spill] sm:$0xff] %v18840_v57  ;;  %v18853_v4 = vpack.c.bf16 %v18650_v59, %v18645_v43  ;;  %v24205_v13 = vand.u32 4294901760, %v18812_v63  ;;  %v24936_v43 = vand.u32 4294901760, %v18500_v29 }
 0x51c   : > { %v18803_v41 = vpack.c.bf16 %v3345_v2, %v3338_v31  ;;  %24921 = vst [vmem:[#allocation68_spill] sm:$0xff] %v18821_v11  ;;  %v18826_v51 = vsub.f32 %v18247_v0, %v24922_v54  ;;  %24925 = vst [vmem:[#allocation70_spill] sm:$0xff] %v18831_v36  ;;  %v18845_v31 = vsub.f32 %v18265_v14, %v24929_v44  ;;  %v24206_v54 = vand.u32 4294901760, %v18817_v21 }
 0x51d   : > { %24932 = vst [vmem:[#allocation75_spill] sm:$0xff] %v18853_v4  ;;  %v18857_v2 = vpack.c.bf16 %v18660_v60, %v18655_v18  ;;  %v18863_v14 = vpack.c.bf16 %v18688_v42, %v18683_v19  ;;  %v3267_v26 = vsub.f32 %v18812_v63, %v24205_v13  ;;  %v18873_v44 = vpack.c.bf16 %v18700_v37, %v18695_v16 }
 0x51e   : > { %24915 = vst [vmem:[#allocation64_spill] sm:$0xff] %v18803_v41  ;;  %24923 = vst [vmem:[#allocation69_spill] sm:$0xff] %v18826_v51  ;;  %v18835_v55 = vpack.c.bf16 %v18831_v36, %v18826_v51  ;;  %v18849_v0 = vpack.c.bf16 %v18845_v31, %v18840_v57  ;;  %v3274_v62 = vsub.f32 %v18817_v21, %v24206_v54  ;;  %v24937_v54 = vand.u32 4294901760, %v18505_v24 }
 0x51f   : > { %24930 = vst [vmem:[#allocation73_spill] sm:$0xff] %v18845_v31  ;;  %24933 = vst [vmem:[#allocation76_spill] sm:$0xff] %v18857_v2  ;;  %v3268_v60 = vand.u32 4294901760, %v3267_v26  ;;  %v18881_v13 = vsub.f32 %v18500_v29, %v24936_v43  ;;  %v24939_v59 = vand.u32 4294901760, %v18826_v51  ;;  %v24940_v43 = vand.u32 4294901760, %v18515_v47 }
 0x520   : > { %24926 = vst [vmem:[#allocation71_spill] sm:$0xff] %v18835_v55  ;;  %24931 = vst [vmem:[#allocation74_spill] sm:$0xff] %v18849_v0  ;;  %v3275_v18 = vand.u32 4294901760, %v3274_v62  ;;  %v18886_v21 = vsub.f32 %v18505_v24, %v24937_v54  ;;  %v24941_v24 = vand.u32 4294901760, %v18520_v8  ;;  %v18913_v19 = vpack.c.bf16 %v18743_v6, %v18738_v58 }
 0x521   : > { %24934 = vst [vmem:[#allocation77_spill] sm:$0xff] %v18863_v14  ;;  %24935 = vst [vmem:[#allocation78_spill] sm:$0xff] %v18873_v44  ;;  %v3393_v29 = vsub.f32 %v18826_v51, %v24939_v59  ;;  %v18901_v37 = vsub.f32 %v18515_v47, %v24940_v43  ;;  %v24945_v47 = vand.u32 4294901760, %v18840_v57 }
 0x522   : > { %v18906_v54 = vsub.f32 %v18520_v8, %v24941_v24  ;;  %24943 = vst [vmem:[#allocation80_spill] sm:$0xff] %v18913_v19  ;;  %v18915_v15 = vpack.c.bf16 %v3275_v18, %v3268_v60 }
 0x523   : > { %v3281_v43 = vsub.f32 %v18840_v57, %v24945_v47  ;;  %v3394_v60 = vand.u32 4294901760, %v3393_v29  ;;  %v24217_v18 = vand.u32 4294901760, %v18901_v37 }
 0x524   : > { %24944 = vst [vmem:[#allocation81_spill] sm:$0xff] %v18915_v15  ;;  %v24216_v58 = vand.u32 4294901760, %v18906_v54 }
 0x54c   : > { %v2784_v42 = vpop.xlane.xlu1 %2783 }
 0x54d   : > { %v2830_v26 = vsub.f32 %v18297_v32, %v2784_v42  ;;  %v2831_v62 = vsub.f32 %v18299_v33, %v2784_v42  ;;  %v24942_v33 = vand.u32 4294901760, %v18831_v36 }
 0x54f   : > { %v2862_v53 = vmul.f32 1.442695, %v2830_v26  ;;  %v2864_v32 = vmul.f32 1.442695, %v2831_v62  ;;  %v3400_v42 = vsub.f32 %v18831_v36, %v24942_v33  ;;  %v24946_v33 = vand.u32 4294901760, %v18845_v31 }
 0x550   : > { %v2787_v59 = vpop.xlane.xlu1 %2786  ;;  %v24947_v26 = vand.u32 4294901760, %v18544_v50 }
 0x551   : > { %17360 = vpow2.f32 %v2862_v53  ;;  %v2832_v62 = vsub.f32 %v18303_v39, %v2787_v59  ;;  %v2833_v24 = vsub.f32 %v18305_v40, %v2787_v59  ;;  %v3288_v6 = vsub.f32 %v18845_v31, %v24946_v33 }
 0x552   : > { %17362 = vpow2.f32 %v2864_v32  ;;  %v3401_v8 = vand.u32 4294901760, %v3400_v42  ;;  %v18932_v53 = vsub.f32 %v18544_v50, %v24947_v26  ;;  %v24948_v40 = vand.u32 4294901760, %v18881_v13 }
 0x553   : > { %v2866_v47 = vmul.f32 1.442695, %v2832_v62  ;;  %v2868_v16 = vmul.f32 1.442695, %v2833_v24  ;;  %v24949_v32 = vand.u32 4294901760, %v18886_v21  ;;  %v24950_v33 = vand.u32 4294901760, %v18549_v22 }
 0x554   : > { %v2790_v39 = vpop.xlane.xlu1 %2789  ;;  %v3463_v59 = vsub.f32 %v18881_v13, %v24948_v40  ;;  %v18947_v42 = vpack.c.bf16 %v18769_v20, %v18764_v38  ;;  %v3282_v24 = vand.u32 4294901760, %v3281_v43  ;;  %v3289_v40 = vand.u32 4294901760, %v3288_v6 }
 0x555   : > { %v3470_v29 = vsub.f32 %v18886_v21, %v24949_v32  ;;  %v18943_v62 = vsub.f32 %v18549_v22, %v24950_v33  ;;  %17364 = vpow2.f32 %v2866_v47  ;;  %v2834_v50 = vsub.f32 %v18309_v48, %v2790_v39 }
 0x556   : > { %24951 = vst [vmem:[#allocation82_spill] sm:$0xff] %v18947_v42  ;;  %v2835_v26 = vsub.f32 %v18311_v49, %v2790_v39  ;;  %17366 = vpow2.f32 %v2868_v16  ;;  %v3351_v32 = vsub.f32 %v18901_v37, %v24217_v18  ;;  %v3358_v22 = vsub.f32 %v18906_v54, %v24216_v58 }
 0x557   : > { %v2870_v33 = vmul.f32 1.442695, %v2834_v50  ;;  %v18960_v48 = vpack.c.bf16 %v18781_v3, %v18776_v45  ;;  %v3464_v43 = vand.u32 4294901760, %v3463_v59  ;;  %v3471_v16 = vand.u32 4294901760, %v3470_v29 }
 0x558   : > { %v2872_v31 = vmul.f32 1.442695, %v2835_v26  ;;  %v2793_v49 = vpop.xlane.xlu1 %2792  ;;  %v24953_v47 = vand.u32 4294901760, %v18559_v17  ;;  %v18970_v58 = vpack.c.bf16 %v3401_v8, %v3394_v60  ;;  %v3352_v18 = vand.u32 4294901760, %v3351_v32 }
 0x559   : > { %24952 = vst [vmem:[#allocation83_spill] sm:$0xff] %v18960_v48  ;;  %17368 = vpow2.f32 %v2870_v33  ;;  %v2836_v50 = vsub.f32 %v18315_v61, %v2793_v49  ;;  %v2837_v26 = vsub.f32 %v18317_v1, %v2793_v49  ;;  %v3359_v20 = vand.u32 4294901760, %v3358_v22 }
 0x55a   : > { %v18966_v39 = vsub.f32 %v18559_v17, %v24953_v47  ;;  %24954 = vst [vmem:[#allocation84_spill] sm:$0xff] %v18970_v58  ;;  %17370 = vpow2.f32 %v2872_v31  ;;  %v24955_v59 = vand.u32 4294901760, %v18564_v56  ;;  %v18979_v47 = vpack.c.bf16 %v3289_v40, %v3282_v24 }
 0x55b   : > { %v18977_v6 = vpop.eup %17360  ;;  %v2874_v3 = vmul.f32 1.442695, %v2836_v50  ;;  %v2876_v17 = vmul.f32 1.442695, %v2837_v26  ;;  %v24958_v61 = vand.u32 4294901760, %v18932_v53  ;;  %v18991_v32 = vpack.c.bf16 %v3471_v16, %v3464_v43 }
 0x55c   : > { %v18975_v29 = vsub.f32 %v18564_v56, %v24955_v59  ;;  %24956 = vst [vmem:[#allocation85_spill] sm:$0xff] %v18977_v6  ;;  %24957 = vst [vmem:[#allocation86_spill] sm:$0xff] %v18979_v47  ;;  %v18986_v8 = vpop.eup %17362  ;;  %v2796_v31 = vpop.xlane.xlu1 %2795  ;;  %v18989_v60 = vand.u32 4294901760, %v18977_v6  ;;  %v24961_v56 = vand.u32 4294901760, %v18943_v62  ;;  %v24220_v24 = vand.u32 4294901760, %v18966_v39 }
 0x55d   : > { %v18984_v1 = vsub.f32 %v18932_v53, %v24958_v61  ;;  %24959 = vst [vmem:[#allocation87_spill] sm:$0xff] %v18986_v8  ;;  %24960 = vst [vmem:[#allocation88_spill] sm:$0xff] %v18991_v32  ;;  %17372 = vpow2.f32 %v2874_v3  ;;  %v2838_v40 = vsub.f32 %v18321_v10, %v2796_v31  ;;  %v2839_v33 = vsub.f32 %v18333_v23, %v2796_v31 }
 0x55e   : > { %v18996_v22 = vsub.f32 %v18943_v62, %v24961_v56  ;;  %v19002_v49 = vand.u32 4294901760, %v18986_v8  ;;  %17374 = vpow2.f32 %v2876_v17  ;;  %v19006_v43 = vsub.f32 %v18977_v6, %v18989_v60 }
 0x55f   : > { %v19008_v16 = vpack.c.bf16 %v3359_v20, %v3352_v18  ;;  %v19011_v26 = vpop.eup %17364  ;;  %v2878_v59 = vmul.f32 1.442695, %v2838_v40  ;;  %v2880_v3 = vmul.f32 1.442695, %v2839_v33  ;;  %v19028_v56 = vsub.f32 %v18966_v39, %v24220_v24 }
 0x560   : > { %24962 = vst [vmem:[#allocation89_spill] sm:$0xff] %v19006_v43  ;;  %24964 = vst [vmem:[#allocation91_spill] sm:$0xff] %v19011_v26  ;;  %v19015_v10 = vsub.f32 %v18986_v8, %v19002_v49  ;;  %v19018_v61 = vpop.eup %17366  ;;  %v2799_v17 = vpop.xlane.xlu1 %2798  ;;  %v24221_v31 = vand.u32 4294901760, %v19006_v43  ;;  %v19022_v20 = vand.u32 4294901760, %v19011_v26 }
 0x561   : > { %24963 = vst [vmem:[#allocation90_spill] sm:$0xff] %v19008_v16  ;;  %24966 = vst [vmem:[#allocation93_spill] sm:$0xff] %v19018_v61  ;;  %17376 = vpow2.f32 %v2878_v59  ;;  %v2840_v40 = vsub.f32 %v18357_v9, %v2799_v17  ;;  %v2841_v33 = vsub.f32 %v18375_v34, %v2799_v17  ;;  %v19037_v8 = vand.u32 4294901760, %v19018_v61 }
 0x562   : > { %24965 = vst [vmem:[#allocation92_spill] sm:$0xff] %v19015_v10  ;;  %v24225_v23 = vand.u32 4294901760, %v19015_v10  ;;  %17378 = vpow2.f32 %v2880_v3  ;;  %v3031_v50 = vsub.f32 %v19006_v43, %v24221_v31  ;;  %v19041_v18 = vsub.f32 %v19011_v26, %v19022_v20 }
 0x563   : > { %v19043_v24 = vpop.eup %17368  ;;  %v2882_v59 = vmul.f32 1.442695, %v2840_v40  ;;  %v2884_v9 = vmul.f32 1.442695, %v2841_v33  ;;  %v24969_v3 = vand.u32 4294901760, %v18975_v29  ;;  %v19057_v26 = vsub.f32 %v19018_v61, %v19037_v8 }
 0x564   : > { %24967 = vst [vmem:[#allocation94_spill] sm:$0xff] %v19041_v18  ;;  %24968 = vst [vmem:[#allocation95_spill] sm:$0xff] %v19043_v24  ;;  %v3025_v34 = vsub.f32 %v19015_v10, %v24225_v23  ;;  %v19053_v31 = vpop.eup %17370  ;;  %v2802_v6 = vpop.xlane.xlu1 %2801  ;;  %v3032_v45 = vand.u32 4294901760, %v3031_v50  ;;  %v24232_v40 = vand.u32 4294901760, %v19041_v18  ;;  %v19061_v33 = vand.u32 4294901760, %v19043_v24 }
 0x565   : > { %v19051_v17 = vsub.f32 %v18975_v29, %v24969_v3  ;;  %24970 = vst [vmem:[#allocation96_spill] sm:$0xff] %v19053_v31  ;;  %24971 = vst [vmem:[#allocation97_spill] sm:$0xff] %v19057_v26  ;;  %17380 = vpow2.f32 %v2882_v59  ;;  %v2842_v23 = vsub.f32 %v18401_v27, %v2802_v6  ;;  %v2843_v38 = vsub.f32 %v18419_v35, %v2802_v6 }
 0x566   : > { %v3026_v3 = vand.u32 4294901760, %v3025_v34  ;;  %17382 = vpow2.f32 %v2884_v9  ;;  %v24233_v57 = vand.u32 4294901760, %v19057_v26  ;;  %v3046_v50 = vsub.f32 %v19041_v18, %v24232_v40 }
 0x567   : > { %v19070_v61 = vand.u32 4294901760, %v19053_v31  ;;  %v19072_v36 = vpop.eup %17372  ;;  %v2886_v51 = vmul.f32 1.442695, %v2842_v23  ;;  %v2888_v63 = vmul.f32 1.442695, %v2843_v38  ;;  %v19076_v27 = vsub.f32 %v19043_v24, %v19061_v33 }
 0x568   : > { %24972 = vst [vmem:[#allocation98_spill] sm:$0xff] %v19072_v36  ;;  %3027 = vmatprep.mubr.f32.mxu0 %v3026_v3  ;;  %v19079_v6 = vpop.eup %17374  ;;  %v2805_v59 = vpop.xlane.xlu1 %2804  ;;  %v3040_v9 = vsub.f32 %v19057_v26, %v24233_v57  ;;  %v3047_v34 = vand.u32 4294901760, %v3046_v50  ;;  %v19089_v38 = vand.u32 4294901760, %v19072_v36 }
 0x569   : > { %24973 = vst [vmem:[#allocation99_spill] sm:$0xff] %v19076_v27  ;;  %24974 = vst [vmem:[#allocation100_spill] sm:$0xff] %v19079_v6  ;;  %3033 = vmatmul.mubr.f32.vlgmr.msra.gmra.mrb[2].mxu0 %v3032_v45  ;;  %v19086_v23 = vsub.f32 %v19053_v31, %v19070_v61  ;;  %17384 = vpow2.f32 %v2886_v51  ;;  %v2844_v3 = vsub.f32 %v18445_v12, %v2805_v59  ;;  %v24236_v45 = vand.u32 4294901760, %v19076_v27 }
 0x56a   : > { %24976 = vst [vmem:[#allocation102_spill] sm:$0xff] %v19089_v38  ;;  %v2845_v40 = vsub.f32 %v18463_v52, %v2805_v59  ;;  %15454 = vmatpush3.bf16.msra.mxu0 %v18915_v15  ;;  %17386 = vpow2.f32 %v2888_v63  ;;  %v3041_v35 = vand.u32 4294901760, %v3040_v9  ;;  %v19097_v57 = vand.u32 4294901760, %v19079_v6 }
 0x56b   : > { %24975 = vst [vmem:[#allocation101_spill] sm:$0xff] %v19086_v23  ;;  %v24242_v50 = vand.u32 4294901760, %v19086_v23  ;;  %15456 = vmatprep.subr.bf16.mxu0 %v18970_v58  ;;  %v19100_v31 = vpop.eup %17376  ;;  %v2890_v51 = vmul.f32 1.442695, %v2844_v3  ;;  %v3061_v12 = vsub.f32 %v19076_v27, %v24236_v45  ;;  %v19107_v52 = vsub.f32 %v19072_v36, %v19089_v38 }
 0x56c   : > { %24977 = vst [vmem:[#allocation103_spill] sm:$0xff] %v19097_v57  ;;  %24978 = vst [vmem:[#allocation104_spill] sm:$0xff] %v19100_v31  ;;  %v2892_v24 = vmul.f32 1.442695, %v2845_v40  ;;  %v19109_v63 = vpop.eup %17378  ;;  %3042 = vmatprep.mubr.f32.mxu0 %v3041_v35  ;;  %v2808_v59 = vpop.xlane.xlu1 %2807  ;;  %v19116_v3 = vsub.f32 %v19079_v6, %v19097_v57  ;;  %v19119_v40 = vand.u32 4294901760, %v19100_v31  ;;  %v24983_v45 = vand.u32 4294901760, %v18984_v1 }
 0x56d   : > { %24979 = vst [vmem:[#allocation105_spill] sm:$0xff] %v19107_v52  ;;  %24980 = vst [vmem:[#allocation106_spill] sm:$0xff] %v19109_v63  ;;  %v3055_v9 = vsub.f32 %v19086_v23, %v24242_v50  ;;  %v24984_v58 = vand.u32 4294901760, %v18996_v22  ;;  %17388 = vpow2.f32 %v2890_v51  ;;  %3048 = vmatmul.mubr.f32.gmra.mrb[4].mxu0 %v3047_v34  ;;  %v24986_v35 = vld [vmem:[#allocation17_spill] sm:$0xff]  ;;  %v2847_v25 = vsub.f32 %v24987_v46, %v2808_v59 }
 0x56e   : > { %24981 = vst [vmem:[#allocation107_spill] sm:$0xff] %v19116_v3  ;;  %24982 = vst [vmem:[#allocation108_spill] sm:$0xff] %v19119_v40  ;;  %v2846_v36 = vsub.f32 %v24986_v35, %v2808_v59  ;;  %v3062_v50 = vand.u32 4294901760, %v3061_v12  ;;  %17390 = vpow2.f32 %v2892_v24  ;;  %v24249_v6 = vand.u32 4294901760, %v19116_v3  ;;  %15458 = vmatpush3.bf16.msra.mxu0 %v18979_v47  ;;  %v24991_v46 = vld [vmem:[#allocation45_spill] sm:$0xff] }
 0x56f   : > { %v19125_v15 = vpack.c.bf16 %v24984_v58, %v24983_v45  ;;  %v3056_v27 = vand.u32 4294901760, %v3055_v9  ;;  %v24251_v23 = vand.u32 4294901760, %v19107_v52  ;;  %v19132_v1 = vpop.eup %17380  ;;  %v2896_v58 = vmul.f32 1.442695, %v2847_v25  ;;  %15460 = vmatprep.subr.bf16.mxu0 %v24991_v46  ;;  %v24994_v9 = vld [vmem:[#allocation21_spill] sm:$0xff]  ;;  %v24995_v46 = vld [vmem:[#allocation23_spill] sm:$0xff] }
 0x570   : > { %24988 = vst [vmem:[#allocation17_spill] sm:$0xff] %v19132_v1  ;;  %v2894_v22 = vmul.f32 1.442695, %v2846_v36  ;;  %v19135_v45 = vand.u32 4294901760, %v19109_v63  ;;  %v19139_v34 = vsub.f32 %v19100_v31, %v19119_v40  ;;  %v19142_v24 = vpop.eup %17382  ;;  %v2811_v51 = vpop.xlane.xlu0 %2810  ;;  %v3070_v12 = vsub.f32 %v19116_v3, %v24249_v6 }
 0x571   : > { %24985 = vst [vmem:[#allocation109_spill] sm:$0xff] %v19125_v15  ;;  %24992 = vst [vmem:[#allocation111_spill] sm:$0xff] %v19142_v24  ;;  %3057 = vmatprep.mubr.f32.mxu0 %v3056_v27  ;;  %v3076_v25 = vsub.f32 %v19107_v52, %v24251_v23  ;;  %v19151_v36 = vand.u32 4294901760, %v19132_v1  ;;  %v3373_v59 = vand.u32 4294901760, %v19051_v17  ;;  %v2848_v35 = vsub.f32 %v24994_v9, %v2811_v51  ;;  %v24997_v52 = vld [vmem:[#allocation48_spill] sm:$0xff] }
 0x572   : > { %24989 = vst [vmem:[#allocation19_spill] sm:$0xff] %v19135_v45  ;;  %24990 = vst [vmem:[#allocation110_spill] sm:$0xff] %v19139_v34  ;;  %17392 = vpow2.f32 %v2894_v22  ;;  %3063 = vmatmul.mubr.f32.gmra.mrb[6].mxu0 %v3062_v50  ;;  %v2849_v27 = vsub.f32 %v24995_v46, %v2811_v51  ;;  %v19158_v47 = vsub.f32 %v19109_v63, %v19135_v45  ;;  %v3071_v6 = vand.u32 4294901760, %v3070_v12  ;;  %v25005_v50 = vld [vmem:[#allocation25_spill] sm:$0xff] }
 0x573   : > { %24993 = vst [vmem:[#allocation112_spill] sm:$0xff] %v19151_v36  ;;  %17394 = vpow2.f32 %v2896_v58  ;;  %v3077_v31 = vand.u32 4294901760, %v3076_v25  ;;  %v24258_v23 = vand.u32 4294901760, %v19139_v34  ;;  %15462 = vmatpush3.bf16.msra.mxu0 %v24997_v52  ;;  %v19162_v3 = vpop.eup %17384  ;;  %v2898_v17 = vmul.f32 1.442695, %v2848_v35 }
 0x574   : > { %24996 = vst [vmem:[#allocation21_spill] sm:$0xff] %v19158_v47  ;;  %24998 = vst [vmem:[#allocation23_spill] sm:$0xff] %v19162_v3  ;;  %v2900_v22 = vmul.f32 1.442695, %v2849_v27  ;;  %v19166_v9 = vand.u32 4294901760, %v19142_v24  ;;  %15464 = vmatprep.subr.bf16.mxu0 %v18721_v30  ;;  %v19169_v46 = vpop.eup %17386  ;;  %3072 = vmatprep.mubr.f32.mxu0 %v3071_v6  ;;  %v2814_v58 = vpop.xlane.xlu1 %2813  ;;  %v19176_v12 = vsub.f32 %v19132_v1, %v19151_v36  ;;  %v19179_v25 = vand.u32 4294901760, %v19162_v3 }
 0x575   : > { %25000 = vst [vmem:[#allocation114_spill] sm:$0xff] %v19169_v46  ;;  %v3091_v51 = vsub.f32 %v19139_v34, %v24258_v23  ;;  %v25003_v35 = vand.u32 4294901760, %v19028_v56  ;;  %17396 = vpow2.f32 %v2898_v17  ;;  %v2850_v6 = vsub.f32 %v25005_v50, %v2814_v58  ;;  %v25006_v30 = vld [vmem:[#allocation27_spill] sm:$0xff] }
 0x576   : > { %24999 = vst [vmem:[#allocation113_spill] sm:$0xff] %v19166_v9  ;;  %25001 = vst [vmem:[#allocation115_spill] sm:$0xff] %v19176_v12  ;;  %3078 = vmatmul.mubr.f32.gmra.mrb[8].mxu0 %v3077_v31  ;;  %v2851_v52 = vsub.f32 %v25006_v30, %v2814_v58  ;;  %v25007_v63 = vand.u32 4294901760, %v19158_v47  ;;  %17398 = vpow2.f32 %v2900_v22  ;;  %v19192_v34 = vsub.f32 %v19142_v24, %v19166_v9  ;;  %v25012_v58 = vld [vmem:[#allocation59_spill] sm:$0xff] }
 0x577   : > { %25002 = vst [vmem:[#allocation116_spill] sm:$0xff] %v19179_v25  ;;  %v19183_v27 = vpack.c.bf16 %v3373_v59, %v25003_v35  ;;  %v3092_v1 = vand.u32 4294901760, %v3091_v51  ;;  %v24265_v56 = vand.u32 4294901760, %v19176_v12  ;;  %v25009_v59 = vld [vmem:[#allocation54_spill] sm:$0xff]  ;;  %v19196_v17 = vpop.eup %17388  ;;  %v2902_v31 = vmul.f32 1.442695, %v2850_v6 }
 0x578   : > { %v3085_v23 = vsub.f32 %v19158_v47, %v25007_v63  ;;  %25008 = vst [vmem:[#allocation25_spill] sm:$0xff] %v19192_v34  ;;  %15466 = vmatpush3.bf16.msra.mxu0 %v25009_v59  ;;  %25010 = vst [vmem:[#allocation27_spill] sm:$0xff] %v19196_v17  ;;  %v2904_v50 = vmul.f32 1.442695, %v2851_v52  ;;  %v19199_v30 = vand.u32 4294901760, %v19169_v46  ;;  %v19202_v63 = vpop.eup %17390  ;;  %v2817_v22 = vpop.xlane.xlu1 %2816  ;;  %v19210_v59 = vsub.f32 %v19162_v3, %v19179_v25  ;;  %v25016_v52 = vld [vmem:[#allocation28_spill] sm:$0xff] }
 0x579   : > { %25004 = vst [vmem:[#allocation117_spill] sm:$0xff] %v19183_v27  ;;  %15468 = vmatprep.subr.bf16.mxu0 %v25012_v58  ;;  %25013 = vst [vmem:[#allocation119_spill] sm:$0xff] %v19202_v63  ;;  %v3106_v24 = vsub.f32 %v19176_v12, %v24265_v56  ;;  %17400 = vpow2.f32 %v2902_v31  ;;  %v2852_v6 = vsub.f32 %v25016_v52, %v2817_v22  ;;  %v25017_v58 = vld [vmem:[#allocation29_spill] sm:$0xff]  ;;  %v25019_v56 = vand.u32 4294901760, %v19192_v34 }
 0x57a   : > { %v3086_v35 = vand.u32 4294901760, %v3085_v23  ;;  %25011 = vst [vmem:[#allocation118_spill] sm:$0xff] %v19199_v30  ;;  %25014 = vst [vmem:[#allocation120_spill] sm:$0xff] %v19210_v59  ;;  %v19213_v23 = vand.u32 4294901760, %v19196_v17  ;;  %v2853_v47 = vsub.f32 %v25017_v58, %v2817_v22  ;;  %v19219_v51 = vsub.f32 %v19169_v46, %v19199_v30  ;;  %v25022_v22 = vld [vmem:[#allocation62_spill] sm:$0xff] }
 0x57b   : > { %17402 = vpow2.f32 %v2904_v50  ;;  %v3100_v3 = vsub.f32 %v19192_v34, %v25019_v56  ;;  %v3107_v12 = vand.u32 4294901760, %v3106_v24  ;;  %v24278_v18 = vand.u32 4294901760, %v19210_v59 }
 0x57c   : > { %25015 = vst [vmem:[#allocation121_spill] sm:$0xff] %v19213_v23  ;;  %3087 = vmatprep.mubr.f32.mxu0 %v3086_v35  ;;  %25018 = vst [vmem:[#allocation28_spill] sm:$0xff] %v19219_v51  ;;  %v19225_v26 = vpop.eup %17392  ;;  %v2906_v31 = vmul.f32 1.442695, %v2852_v6  ;;  %v2908_v35 = vmul.f32 1.442695, %v2853_v47  ;;  %15470 = vmatpush3.bf16.msra.mxu0 %v25022_v22  ;;  %v2820_v46 = vpop.xlane.xlu1 %2819  ;;  %v19239_v56 = vsub.f32 %v19196_v17, %v19213_v23 }
 0x57d   : > { %3093 = vmatmul.mubr.f32.gmra.mrb[10].mxu0 %v3092_v1  ;;  %25020 = vst [vmem:[#allocation29_spill] sm:$0xff] %v19225_v26  ;;  %v19229_v58 = vand.u32 4294901760, %v19202_v63  ;;  %v19232_v50 = vpop.eup %17394  ;;  %v3101_v1 = vand.u32 4294901760, %v3100_v3  ;;  %v3121_v24 = vsub.f32 %v19210_v59, %v24278_v18  ;;  %v19242_v47 = vand.u32 4294901760, %v19225_v26  ;;  %15472 = vmatprep.subr.bf16.mxu0 %v18801_v7  ;;  %v25026_v6 = vld [vmem:[#allocation30_spill] sm:$0xff]  ;;  %v25027_v22 = vld [vmem:[#allocation31_spill] sm:$0xff] }
 0x57e   : > { %25023 = vst [vmem:[#allocation123_spill] sm:$0xff] %v19232_v50  ;;  %25024 = vst [vmem:[#allocation124_spill] sm:$0xff] %v19239_v56  ;;  %17404 = vpow2.f32 %v2906_v31  ;;  %v2854_v52 = vsub.f32 %v25026_v6, %v2820_v46  ;;  %v2855_v34 = vsub.f32 %v25027_v22, %v2820_v46  ;;  %v25028_v3 = vand.u32 4294901760, %v19219_v51 }
 0x57f   : > { %25021 = vst [vmem:[#allocation122_spill] sm:$0xff] %v19229_v58  ;;  %25025 = vst [vmem:[#allocation125_spill] sm:$0xff] %v19242_v47  ;;  %17406 = vpow2.f32 %v2908_v35  ;;  %3102 = vmatprep.mubr.f32.mxu0 %v3101_v1  ;;  %v3122_v18 = vand.u32 4294901760, %v3121_v24  ;;  %v19252_v17 = vsub.f32 %v19202_v63, %v19229_v58  ;;  %v24286_v59 = vand.u32 4294901760, %v19239_v56  ;;  %v19255_v10 = vpop.eup %17396 }
 0x580   : > { %v3115_v43 = vsub.f32 %v19219_v51, %v25028_v3  ;;  %25030 = vst [vmem:[#allocation31_spill] sm:$0xff] %v19255_v10  ;;  %v2910_v31 = vmul.f32 1.442695, %v2854_v52  ;;  %v2912_v6 = vmul.f32 1.442695, %v2855_v34  ;;  %v19258_v46 = vand.u32 4294901760, %v19232_v50  ;;  %v19260_v22 = vpop.eup %17398  ;;  %v2823_v35 = vpop.xlane.xlu1 %2822  ;;  %15474 = vmatpush3.bf16.msra.mxu0 %v18803_v41 }
 0x581   : > { %25029 = vst [vmem:[#allocation30_spill] sm:$0xff] %v19252_v17  ;;  %3108 = vmatmul.mubr.f32.gmra.mrb[12].mxu0 %v3107_v12  ;;  %25032 = vst [vmem:[#allocation127_spill] sm:$0xff] %v19260_v22  ;;  %v3136_v24 = vsub.f32 %v19239_v56, %v24286_v59  ;;  %v19268_v3 = vsub.f32 %v19225_v26, %v19242_v47  ;;  %v19271_v12 = vand.u32 4294901760, %v19255_v10  ;;  %v25036_v52 = vld [vmem:[#allocation35_spill] sm:$0xff]  ;;  %15476 = vmatprep.subr.bf16.mxu0 %v18991_v32 }
 0x582   : > { %v3116_v7 = vand.u32 4294901760, %v3115_v43  ;;  %25031 = vst [vmem:[#allocation126_spill] sm:$0xff] %v19258_v46  ;;  %17408 = vpow2.f32 %v2910_v31  ;;  %v25035_v43 = vld [vmem:[#allocation34_spill] sm:$0xff]  ;;  %v2857_v63 = vsub.f32 %v25036_v52, %v2823_v35  ;;  %v19278_v1 = vsub.f32 %v19232_v50, %v19258_v46 }
 0x583   : > { %25033 = vst [vmem:[#allocation128_spill] sm:$0xff] %v19268_v3  ;;  %25034 = vst [vmem:[#allocation129_spill] sm:$0xff] %v19271_v12  ;;  %v2856_v34 = vsub.f32 %v25035_v43, %v2823_v35  ;;  %17410 = vpow2.f32 %v2912_v6  ;;  %v25038_v59 = vand.u32 4294901760, %v19252_v17  ;;  %v3137_v56 = vand.u32 4294901760, %v3136_v24  ;;  %v19285_v31 = vpop.eup %17400  ;;  %v25045_v35 = vld [vmem:[#allocation37_spill] sm:$0xff] }
 0x584   : > { %3117 = vmatprep.mubr.f32.mxu0 %v3116_v7  ;;  %25037 = vst [vmem:[#allocation34_spill] sm:$0xff] %v19278_v1  ;;  %v24297_v41 = vand.u32 4294901760, %v19268_v3  ;;  %25039 = vst [vmem:[#allocation35_spill] sm:$0xff] %v19285_v31  ;;  %v2916_v43 = vmul.f32 1.442695, %v2857_v63  ;;  %v19289_v52 = vand.u32 4294901760, %v19260_v22  ;;  %v2826_v32 = vpop.xlane.xlu1 %2825  ;;  %v19298_v24 = vsub.f32 %v19255_v10, %v19271_v12  ;;  %15478 = vmatpush3.bf16.msra.mxu0 %v19008_v16 }
 0x585   : > { %v3130_v26 = vsub.f32 %v19252_v17, %v25038_v59  ;;  %3123 = vmatmul.mubr.f32.gmra.mrb[14].mxu0 %v3122_v18  ;;  %v2914_v7 = vmul.f32 1.442695, %v2856_v34  ;;  %v19291_v50 = vpop.eup %17402  ;;  %v19301_v18 = vand.u32 4294901760, %v19285_v31  ;;  %v25044_v63 = vld [vmem:[#allocation36_spill] sm:$0xff]  ;;  %v2859_v17 = vsub.f32 %v25045_v35, %v2826_v32  ;;  %15480 = vmatprep.subr.bf16.mxu0 %v19125_v15 }
 0x586   : > { %25040 = vst [vmem:[#allocation130_spill] sm:$0xff] %v19289_v52  ;;  %25041 = vst [vmem:[#allocation131_spill] sm:$0xff] %v19291_v50  ;;  %v3151_v59 = vsub.f32 %v19268_v3, %v24297_v41  ;;  %v2858_v34 = vsub.f32 %v25044_v63, %v2826_v32  ;;  %v19312_v10 = vsub.f32 %v19260_v22, %v19289_v52  ;;  %v24304_v16 = vand.u32 4294901760, %v19298_v24 }
 0x587   : > { %v3131_v6 = vand.u32 4294901760, %v3130_v26  ;;  %25042 = vst [vmem:[#allocation132_spill] sm:$0xff] %v19298_v24  ;;  %25043 = vst [vmem:[#allocation133_spill] sm:$0xff] %v19301_v18  ;;  %17412 = vpow2.f32 %v2914_v7  ;;  %v25046_v26 = vand.u32 4294901760, %v19278_v1  ;;  %v2920_v32 = vmul.f32 1.442695, %v2859_v17 }
 0x588   : > { %17414 = vpow2.f32 %v2916_v43  ;;  %v3152_v41 = vand.u32 4294901760, %v3151_v59  ;;  %25047 = vst [vmem:[#allocation36_spill] sm:$0xff] %v19312_v10  ;;  %v19315_v7 = vpop.eup %17404  ;;  %v2918_v63 = vmul.f32 1.442695, %v2858_v34  ;;  %v19318_v3 = vand.u32 4294901760, %v19291_v50  ;;  %v2829_v43 = vpop.xlane.xlu1 %2828  ;;  %15482 = vmatpush3.bf16.msra.mxu0 %v19183_v27  ;;  %v25053_v17 = vld [vmem:[#allocation39_spill] sm:$0xff] }
 0x589   : > { %v3145_v51 = vsub.f32 %v19278_v1, %v25046_v26  ;;  %3132 = vmatprep.mubr.f32.mxu0 %v3131_v6  ;;  %25048 = vst [vmem:[#allocation37_spill] sm:$0xff] %v19315_v7  ;;  %v19320_v26 = vpop.eup %17406  ;;  %v3166_v59 = vsub.f32 %v19298_v24, %v24304_v16  ;;  %v19328_v15 = vsub.f32 %v19285_v31, %v19301_v18  ;;  %v25054_v34 = vld [vmem:[#allocation40_spill] sm:$0xff]  ;;  %v25056_v16 = vand.u32 4294901760, %v19312_v10 }
 0x58a   : > { %3138 = vmatmul.mubr.f32.gmra.mrb[16].mxu0 %v3137_v56  ;;  %25049 = vst [vmem:[#allocation134_spill] sm:$0xff] %v19318_v3  ;;  %25050 = vst [vmem:[#allocation135_spill] sm:$0xff] %v19320_v26  ;;  %v19331_v56 = vand.u32 4294901760, %v19315_v7  ;;  %17416 = vpow2.f32 %v2918_v63  ;;  %v2861_v22 = vsub.f32 %v25054_v34, %v2829_v43  ;;  %v19338_v6 = vsub.f32 %v19291_v50, %v19318_v3 }
 0x58b   : > { %v3146_v35 = vand.u32 4294901760, %v3145_v51  ;;  %25051 = vst [vmem:[#allocation136_spill] sm:$0xff] %v19328_v15  ;;  %v2860_v51 = vsub.f32 %v25053_v17, %v2829_v43  ;;  %15484 = vmatprep.subr.bf16.mxu0 %v18807_v5  ;;  %17418 = vpow2.f32 %v2920_v32  ;;  %v3160_v31 = vsub.f32 %v19312_v10, %v25056_v16 }
 0x58c   : > { %25052 = vst [vmem:[#allocation137_spill] sm:$0xff] %v19331_v56  ;;  %25055 = vst [vmem:[#allocation39_spill] sm:$0xff] %v19338_v6  ;;  %v3167_v24 = vand.u32 4294901760, %v3166_v59  ;;  %v24313_v27 = vand.u32 4294901760, %v19328_v15  ;;  %v19345_v63 = vpop.eup %17408  ;;  %v2924_v17 = vmul.f32 1.442695, %v2861_v22  ;;  %v963_v5 = vpop.permute.xlu1 %962  ;;  %v19358_v59 = vsub.f32 %v19315_v7, %v19331_v56 }
 0x58d   : > { %3147 = vmatprep.mubr.f32.mxu0 %v3146_v35  ;;  %25057 = vst [vmem:[#allocation40_spill] sm:$0xff] %v19345_v63  ;;  %v2922_v35 = vmul.f32 1.442695, %v2860_v51  ;;  %v24319_v43 = vand.u32 4294901760, %v19338_v6  ;;  %v19349_v34 = vand.u32 4294901760, %v19320_v26  ;;  %v19351_v50 = vpop.eup %17410  ;;  %v3161_v32 = vand.u32 4294901760, %v3160_v31 }
 0x58e   : > { %3153 = vmatmul.mubr.f32.gmra.mrb[18].mxu0 %v3152_v41  ;;  %25059 = vst [vmem:[#allocation139_spill] sm:$0xff] %v19351_v50  ;;  %v3181_v16 = vsub.f32 %v19328_v15, %v24313_v27  ;;  %25060 = vst [vmem:[#allocation140_spill] sm:$0xff] %v19358_v59  ;;  %v19361_v41 = vand.u32 4294901760, %v19345_v63  ;;  %v25062_v22 = vld [vmem:[#allocation5_spill] sm:$0xff]  ;;  %v24321_v7 = vand.u32 4294901760, %v19358_v59  ;;  %v19373_v15 = vand.u32 4294901760, %v19351_v50 }
 0x58f   : > { %25058 = vst [vmem:[#allocation138_spill] sm:$0xff] %v19349_v34  ;;  %17420 = vpow2.f32 %v2922_v35  ;;  %v16637_v51 = vadd.f32 %v25062_v22, %v963_v5  ;;  %v3175_v10 = vsub.f32 %v19338_v6, %v24319_v43  ;;  %v19369_v31 = vsub.f32 %v19320_v26, %v19349_v34  ;;  %3162 = vmatprep.mubr.f32.mxu0 %v3161_v32  ;;  %v25066_v5 = vld [vmem:[#allocation4_spill] sm:$0xff] }
 0x590   : > { %25061 = vst [vmem:[#allocation141_spill] sm:$0xff] %v19361_v41  ;;  %17422 = vpow2.f32 %v2924_v17  ;;  %v3182_v27 = vand.u32 4294901760, %v3181_v16  ;;  %25064 = vst [vmem:[#allocation142_spill] sm:$0xff] %v19373_v15  ;;  %v19381_v26 = vsub.f32 %v19345_v63, %v19361_v41  ;;  %v3196_v32 = vsub.f32 %v19358_v59, %v24321_v7 }
 0x591   : > { %25063 = vst [vmem:[#allocation5_spill] sm:$0xff] %v19369_v31  ;;  %v19375_v1 = vpop.eup %17412  ;;  %v16638_v35 = vadd.f32 %v16637_v51, %v25066_v5  ;;  %v3176_v22 = vand.u32 4294901760, %v3175_v10  ;;  %v24324_v43 = vand.u32 4294901760, %v19369_v31  ;;  %v19390_v16 = vsub.f32 %v19351_v50, %v19373_v15 }
 0x592   : > { %25065 = vst [vmem:[#allocation143_spill] sm:$0xff] %v19375_v1  ;;  %3168 = vmatmul.mubr.f32.gmra.mrb[20].mxu0 %v3167_v24  ;;  %25067 = vst [vmem:[#allocation4_spill] sm:$0xff] %v19381_v26  ;;  %v19383_v17 = vpop.eup %17414  ;;  %v19393_v24 = vand.u32 4294901760, %v19375_v1  ;;  %v24332_v51 = vand.u32 4294901760, %v19381_v26 }
 0x593   : > { %25068 = vst [vmem:[#allocation144_spill] sm:$0xff] %v19383_v17  ;;  %25069 = vst [vmem:[#allocation145_spill] sm:$0xff] %v19390_v16  ;;  %3177 = vmatprep.mubr.f32.mxu0 %v3176_v22  ;;  %7309 = vxpose.xlu1.b32.start.end [1/1] (short) %v16638_v35, 128  ;;  %v3190_v10 = vsub.f32 %v19369_v31, %v24324_v43  ;;  %v19400_v5 = vand.u32 4294901760, %v19383_v17  ;;  %v24336_v7 = vand.u32 4294901760, %v19390_v16  ;;  %v3197_v35 = vand.u32 4294901760, %v3196_v32 }
 0x594   : > { %25070 = vst [vmem:[#allocation146_spill] sm:$0xff] %v19393_v24  ;;  %v19405_v50 = vsub.f32 %v19375_v1, %v19393_v24  ;;  %v19407_v63 = vpop.eup %17416  ;;  %v3211_v43 = vsub.f32 %v19381_v26, %v24332_v51 }
 0x595   : > { %25071 = vst [vmem:[#allocation147_spill] sm:$0xff] %v19400_v5  ;;  %25073 = vst [vmem:[#allocation149_spill] sm:$0xff] %v19407_v63  ;;  %v3191_v22 = vand.u32 4294901760, %v3190_v10  ;;  %v19414_v59 = vsub.f32 %v19383_v17, %v19400_v5  ;;  %v19416_v31 = vpop.eup %17418  ;;  %v3205_v1 = vsub.f32 %v19390_v16, %v24336_v7 }
 0x596   : > { %25072 = vst [vmem:[#allocation148_spill] sm:$0xff] %v19405_v50  ;;  %3183 = vmatmul.mubr.f32.gmra.mrb[22].mxu0 %v3182_v27  ;;  %25075 = vst [vmem:[#allocation151_spill] sm:$0xff] %v19416_v31  ;;  %v19423_v27 = vand.u32 4294901760, %v19407_v63  ;;  %v19427_v10 = vand.u32 4294901760, %v19416_v31  ;;  %v3212_v7 = vand.u32 4294901760, %v3211_v43 }
 0x597   : > { %25074 = vst [vmem:[#allocation150_spill] sm:$0xff] %v19414_v59  ;;  %3192 = vmatprep.mubr.f32.mxu0 %v3191_v22  ;;  %v24344_v32 = vand.u32 4294901760, %v19414_v59  ;;  %v3206_v51 = vand.u32 4294901760, %v3205_v1  ;;  %v25079_v22 = vand.u32 4294901760, %v19405_v50 }
 0x598   : > { %25076 = vst [vmem:[#allocation152_spill] sm:$0xff] %v19423_v27  ;;  %25077 = vst [vmem:[#allocation153_spill] sm:$0xff] %v19427_v10  ;;  %v19431_v17 = vsub.f32 %v19407_v63, %v19423_v27  ;;  %v19443_v24 = vsub.f32 %v19416_v31, %v19427_v10 }
 0x599   : > { %v19433_v26 = vpop.eup %17420  ;;  %v3220_v6 = vsub.f32 %v19414_v59, %v24344_v32  ;;  %v3226_v16 = vsub.f32 %v19405_v50, %v25079_v22 }
 0x59a   : > { %25078 = vst [vmem:[#allocation154_spill] sm:$0xff] %v19433_v26  ;;  %3198 = vmatmul.mubr.f32.gmra.mrb[24].mxu0 %v3197_v35  ;;  %v19445_v1 = vpop.eup %17422  ;;  %v24353_v63 = vand.u32 4294901760, %v19431_v17  ;;  %v19449_v35 = vand.u32 4294901760, %v19433_v26  ;;  %v24354_v27 = vand.u32 4294901760, %v19443_v24 }
 0x59b   : > { %25080 = vst [vmem:[#allocation155_spill] sm:$0xff] %v19445_v1  ;;  %3207 = vmatprep.mubr.f32.mxu0 %v3206_v51  ;;  %v3221_v43 = vand.u32 4294901760, %v3220_v6  ;;  %v19453_v32 = vand.u32 4294901760, %v19445_v1  ;;  %v3227_v31 = vand.u32 4294901760, %v3226_v16 }
 0x59c   : > { %25081 = vst [vmem:[#allocation156_spill] sm:$0xff] %v19449_v35  ;;  %v19457_v22 = vsub.f32 %v19433_v26, %v19449_v35  ;;  %v3235_v51 = vsub.f32 %v19443_v24, %v24354_v27  ;;  %v3241_v50 = vsub.f32 %v19431_v17, %v24353_v63 }
 0x59d   : > { %25082 = vst [vmem:[#allocation157_spill] sm:$0xff] %v19453_v32  ;;  %v19467_v6 = vsub.f32 %v19445_v1, %v19453_v32 }
 0x59e   : > { %3213 = vmatmul.mubr.f32.gmra.mrb[26].mxu0 %v3212_v7  ;;  %v24356_v59 = vand.u32 4294901760, %v19457_v22  ;;  %v3236_v10 = vand.u32 4294901760, %v3235_v51  ;;  %v3242_v7 = vand.u32 4294901760, %v3241_v50  ;;  %v19500_v50 = vpack.c.bf16 %v18886_v21, %v18881_v13 }
 0x59f   : > { %3222 = vmatprep.mubr.f32.mxu0 %v3221_v43  ;;  %v24357_v26 = vand.u32 4294901760, %v19467_v6  ;;  %v25089_v43 = vld [vmem:[#allocation153_spill] sm:$0xff]  ;;  %v25090_v51 = vld [vmem:[#allocation152_spill] sm:$0xff] }
 0x5a0   : > { %v3256_v63 = vsub.f32 %v19457_v22, %v24356_v59  ;;  %25083 = vst [vmem:[#allocation158_spill] sm:$0xff] %v19500_v50  ;;  %v25093_v59 = vld [vmem:[#allocation97_spill] sm:$0xff] }
 0x5a1   : > { %v3250_v16 = vsub.f32 %v19467_v6, %v24357_v26  ;;  %v25094_v26 = vld [vmem:[#allocation7_spill] sm:$0xff] }
 0x5a2   : > { %3228 = vmatmul.mubr.f32.gmra.mrb[28].mxu0 %v3227_v31  ;;  %v3257_v1 = vand.u32 4294901760, %v3256_v63  ;;  %v19507_v63 = vpack.c.bf16 %v18906_v54, %v18901_v37  ;;  %v19512_v31 = vpack.c.bf16 %v18943_v62, %v18932_v53 }
 0x5a3   : > { %3237 = vmatprep.mubr.f32.mxu0 %v3236_v10  ;;  %v3251_v27 = vand.u32 4294901760, %v3250_v16  ;;  %v25087_v10 = vld [vmem:[#allocation6_spill] sm:$0xff]  ;;  %v25092_v16 = vld [vmem:[#allocation89_spill] sm:$0xff] }
 0x5a4   : > { %25084 = vst [vmem:[#allocation159_spill] sm:$0xff] %v19507_v63  ;;  %25085 = vst [vmem:[#allocation160_spill] sm:$0xff] %v19512_v31 }
 0x5a6   : > { %3243 = vmatmul.mubr.f32.gmra.mrb[30].mxu0 %v3242_v7  ;;  %v25091_v7 = vld [vmem:[#allocation92_spill] sm:$0xff] }
 0x5a7   : > { %3252 = vmatprep.mubr.f32.mxu0 %v3251_v27  ;;  %v19519_v27 = vpack.c.bf16 %v18975_v29, %v18966_v39 }
 0x5a9   : > { %25086 = vst [vmem:[#allocation161_spill] sm:$0xff] %v19519_v27 }
 0x5aa   : > { %3258 = vmatmul.mubr.f32.gmra.mrb[32].mxu0 %v3257_v1  ;;  %v25088_v1 = vld [vmem:[#allocation146_spill] sm:$0xff] }
 0x5ab   : > { %3488 = vmatprep.mubr.f32.mxu0 %v19002_v49 }
 0x5ae   : > { %3490 = vmatmul.mubr.f32.vlgmr.msra.gmra.mrb[34].mxu0 %v18989_v60 }
 0x5af   : > { %3495 = vmatprep.mubr.f32.mxu0 %v19037_v8  ;;  %15486 = vmatpush3.bf16.msra.mxu0 %v18821_v11  ;;  %v25109_v11 = vld [vmem:[#allocation25_spill] sm:$0xff] }
 0x5b0   : > { %15488 = vmatprep.subr.bf16.mxu0 %v18835_v55  ;;  %v25108_v55 = vld [vmem:[#allocation110_spill] sm:$0xff] }
 0x5b2   : > { %3497 = vmatmul.mubr.f32.gmra.mrb[36].mxu0 %v19022_v20 }
 0x5b3   : > { %3502 = vmatprep.mubr.f32.mxu0 %v19070_v61  ;;  %15490 = vmatpush3.bf16.msra.mxu0 %v18849_v0  ;;  %v25107_v0 = vld [vmem:[#allocation14_spill] sm:$0xff] }
 0x5b4   : > { %15492 = vmatprep.subr.bf16.mxu0 %v18853_v4  ;;  %v25106_v4 = vld [vmem:[#allocation13_spill] sm:$0xff] }
 0x5b6   : > { %3504 = vmatmul.mubr.f32.gmra.mrb[38].mxu0 %v19061_v33 }
 0x5b7   : > { %3509 = vmatprep.mubr.f32.mxu0 %v19097_v57  ;;  %15494 = vmatpush3.bf16.msra.mxu0 %v18857_v2  ;;  %v25105_v2 = vld [vmem:[#allocation21_spill] sm:$0xff]  ;;  %v25151_v57 = vand.u32 4294901760, %v25093_v59 }
 0x5b8   : > { %15496 = vmatprep.subr.bf16.mxu0 %v18863_v14  ;;  %v25104_v14 = vld [vmem:[#allocation105_spill] sm:$0xff] }
 0x5ba   : > { %3511 = vmatmul.mubr.f32.gmra.mrb[40].mxu0 %v19089_v38 }
 0x5bb   : > { %3516 = vmatprep.mubr.f32.mxu0 %v19135_v45  ;;  %15498 = vmatpush3.bf16.msra.mxu0 %v18873_v44  ;;  %v25103_v44 = vld [vmem:[#allocation12_spill] sm:$0xff]  ;;  %v25147_v45 = vld [vmem:[#allocation70_spill] sm:$0xff] }
 0x5bc   : > { %15500 = vmatprep.subr.bf16.mxu0 %v18890_v28  ;;  %v25102_v28 = vld [vmem:[#allocation11_spill] sm:$0xff]  ;;  %v25148_v38 = vand.u32 4294901760, %v25147_v45 }
 0x5be   : > { %3518 = vmatmul.mubr.f32.gmra.mrb[42].mxu0 %v19119_v40 }
 0x5bf   : > { %3523 = vmatprep.mubr.f32.mxu0 %v19166_v9  ;;  %15502 = vmatpush3.bf16.msra.mxu0 %v18913_v19  ;;  %v25101_v19 = vld [vmem:[#allocation107_spill] sm:$0xff] }
 0x5c0   : > { %15504 = vmatprep.subr.bf16.mxu0 %v18947_v42  ;;  %v25100_v42 = vld [vmem:[#allocation99_spill] sm:$0xff] }
 0x5c2   : > { %3525 = vmatmul.mubr.f32.gmra.mrb[44].mxu0 %v19151_v36  ;;  %v25140_v36 = vld [vmem:[#allocation66_spill] sm:$0xff] }
 0x5c3   : > { %3530 = vmatprep.mubr.f32.mxu0 %v19199_v30  ;;  %15506 = vmatpush3.bf16.msra.mxu0 %v18960_v48  ;;  %v25099_v48 = vld [vmem:[#allocation10_spill] sm:$0xff]  ;;  %v25139_v30 = vand.u32 4294901760, %v25091_v7 }
 0x5c4   : > { %15508 = vmatprep.subr.bf16.mxu0 %v19500_v50  ;;  %v25098_v50 = vld [vmem:[#allocation9_spill] sm:$0xff] }
 0x5c6   : > { %3532 = vmatmul.mubr.f32.gmra.mrb[46].mxu0 %v19179_v25  ;;  %v25128_v25 = vld [vmem:[#allocation128_spill] sm:$0xff] }
 0x5c7   : > { %3537 = vmatprep.mubr.f32.mxu0 %v19229_v58  ;;  %15510 = vmatpush3.bf16.msra.mxu0 %v19507_v63  ;;  %v25097_v63 = vld [vmem:[#allocation101_spill] sm:$0xff]  ;;  %v25127_v58 = vld [vmem:[#allocation26_spill] sm:$0xff] }
 0x5c8   : > { %15512 = vmatprep.subr.bf16.mxu0 %v19512_v31  ;;  %v25096_v31 = vld [vmem:[#allocation94_spill] sm:$0xff] }
 0x5ca   : > { %3539 = vmatmul.mubr.f32.gmra.mrb[48].mxu0 %v19213_v23  ;;  %v25126_v23 = vld [vmem:[#allocation34_spill] sm:$0xff] }
 0x5cb   : > { %3544 = vmatprep.mubr.f32.mxu0 %v19258_v46  ;;  %15514 = vmatpush3.bf16.msra.mxu0 %v19519_v27  ;;  %v25095_v27 = vld [vmem:[#allocation8_spill] sm:$0xff] }
 0x5cc   : > { %15516 = vmatprep.subr.bf16.mxu0 %v25087_v10  ;;  %v25125_v46 = vld [vmem:[#allocation124_spill] sm:$0xff] }
 0x5ce   : > { %3546 = vmatmul.mubr.f32.gmra.mrb[50].mxu0 %v19242_v47 }
 0x5cf   : > { %3551 = vmatprep.mubr.f32.mxu0 %v19289_v52 }
 0x5d2   : > { %3553 = vmatmul.mubr.f32.gmra.mrb[52].mxu0 %v19271_v12  ;;  %v25122_v12 = vld [vmem:[#allocation33_spill] sm:$0xff] }
 0x5d3   : > { %3558 = vmatprep.mubr.f32.mxu0 %v19318_v3  ;;  %v25123_v52 = vand.u32 4294901760, %v25122_v12  ;;  %v25134_v12 = vld [vmem:[#allocation140_spill] sm:$0xff] }
 0x5d6   : > { %3560 = vmatmul.mubr.f32.gmra.mrb[54].mxu0 %v19301_v18  ;;  %v25120_v18 = vld [vmem:[#allocation32_spill] sm:$0xff] }
 0x5d7   : > { %3565 = vmatprep.mubr.f32.mxu0 %v19349_v34  ;;  %v25119_v34 = vld [vmem:[#allocation24_spill] sm:$0xff]  ;;  %v25121_v3 = vand.u32 4294901760, %v25120_v18 }
 0x5d8   : > { %v25132_v18 = vld [vmem:[#allocation136_spill] sm:$0xff] }
 0x5d9   : > { %v19574_v47 = vpack.c.bf16 %v25123_v52, %v25121_v3  ;;  %v25133_v3 = vld [vmem:[#allocation5_spill] sm:$0xff] }
 0x5da   : > { %3567 = vmatmul.mubr.f32.gmra.mrb[56].mxu0 %v19331_v56  ;;  %v25118_v56 = vld [vmem:[#allocation22_spill] sm:$0xff]  ;;  %v25135_v52 = vld [vmem:[#allocation145_spill] sm:$0xff] }
 0x5db   : > { %3572 = vmatprep.mubr.f32.mxu0 %v19373_v15  ;;  %v25117_v15 = vld [vmem:[#allocation30_spill] sm:$0xff]  ;;  %25124 = vst [vmem:[#allocation92_spill] sm:$0xff] %v19574_v47 }
 0x5de   : > { %3574 = vmatmul.mubr.f32.gmra.mrb[58].mxu0 %v19361_v41  ;;  %v25116_v41 = vld [vmem:[#allocation120_spill] sm:$0xff] }
 0x5df   : > { %3579 = vmatprep.mubr.f32.mxu0 %v19400_v5  ;;  %v25115_v5 = vld [vmem:[#allocation20_spill] sm:$0xff] }
 0x5e2   : > { %3581 = vmatmul.mubr.f32.gmra.mrb[60].mxu0 %v25088_v1  ;;  %v25114_v1 = vld [vmem:[#allocation18_spill] sm:$0xff] }
 0x5e3   : > { %3586 = vmatprep.mubr.f32.mxu0 %v25089_v43  ;;  %v25113_v43 = vld [vmem:[#allocation28_spill] sm:$0xff] }
 0x5e6   : > { %3588 = vmatmul.mubr.f32.gmra.mrb[62].mxu0 %v25090_v51  ;;  %v25112_v51 = vld [vmem:[#allocation115_spill] sm:$0xff] }
 0x5e7   : > { %3593 = vmatprep.mubr.f32.mxu0 %v19453_v32  ;;  %v25111_v32 = vld [vmem:[#allocation16_spill] sm:$0xff] }
 0x5ea   : > { %3595 = vmatmul.mubr.f32.gmra.mrb[64].mxu0 %v19449_v35  ;;  %v25110_v35 = vld [vmem:[#allocation15_spill] sm:$0xff] }
 0x5eb   : > { %3730 = vmatprep.mubr.f32.mxu0 %v25091_v7  ;;  %v25154_v7 = vld [vmem:[#allocation73_spill] sm:$0xff] }
 0x5ee   : > { %3733 = vmatmul.mubr.f32.vlgmr.msra.gmra.mrb[66].mxu0 %v25092_v16 }
 0x5ef   : > { %3739 = vmatprep.mubr.f32.mxu0 %v25093_v59  ;;  %15518 = vmatpush3.bf16.msra.mxu0 %v25094_v26  ;;  %v25164_v59 = vld [vmem:[#allocation43_spill] sm:$0xff] }
 0x5f0   : > { %15520 = vmatprep.subr.bf16.mxu0 %v25095_v27 }
 0x5f2   : > { %3742 = vmatmul.mubr.f32.gmra.mrb[68].mxu0 %v25096_v31 }
 0x5f3   : > { %3748 = vmatprep.mubr.f32.mxu0 %v25097_v63  ;;  %15522 = vmatpush3.bf16.msra.mxu0 %v25098_v50 }
 0x5f4   : > { %15524 = vmatprep.subr.bf16.mxu0 %v25099_v48 }
 0x5f6   : > { %3751 = vmatmul.mubr.f32.gmra.mrb[70].mxu0 %v25100_v42 }
 0x5f7   : > { %3757 = vmatprep.mubr.f32.mxu0 %v25101_v19  ;;  %15526 = vmatpush3.bf16.msra.mxu0 %v25102_v28  ;;  %v25150_v28 = vand.u32 4294901760, %v25092_v16  ;;  %v25165_v16 = vand.u32 4294901760, %v25164_v59  ;;  %v25178_v59 = vld [vmem:[#allocation50_spill] sm:$0xff] }
 0x5f8   : > { %15528 = vmatprep.subr.bf16.mxu0 %v25103_v44 }
 0x5fa   : > { %3760 = vmatmul.mubr.f32.gmra.mrb[72].mxu0 %v25104_v14 }
 0x5fb   : > { %3766 = vmatprep.mubr.f32.mxu0 %v25105_v2  ;;  %15530 = vmatpush3.bf16.msra.mxu0 %v25106_v4 }
 0x5fc   : > { %15532 = vmatprep.subr.bf16.mxu0 %v25107_v0  ;;  %v25145_v0 = vld [vmem:[#allocation69_spill] sm:$0xff] }
 0x5fd   : > { %v25146_v4 = vand.u32 4294901760, %v25145_v0  ;;  %v25157_v0 = vld [vmem:[#allocation41_spill] sm:$0xff] }
 0x5fe   : > { %3769 = vmatmul.mubr.f32.gmra.mrb[74].mxu0 %v25108_v55  ;;  %v25158_v45 = vand.u32 4294901760, %v25157_v0 }
 0x5ff   : > { %3775 = vmatprep.mubr.f32.mxu0 %v25109_v11  ;;  %15534 = vmatpush3.bf16.msra.mxu0 %v25110_v35  ;;  %v25142_v35 = vld [vmem:[#allocation67_spill] sm:$0xff]  ;;  %v19607_v44 = vpack.c.bf16 %v25148_v38, %v25146_v4  ;;  %v25159_v4 = vld [vmem:[#allocation42_spill] sm:$0xff] }
 0x600   : > { %15536 = vmatprep.subr.bf16.mxu0 %v25111_v32  ;;  %v25141_v32 = vand.u32 4294901760, %v25140_v36  ;;  %v25143_v9 = vand.u32 4294901760, %v25142_v35  ;;  %v25155_v35 = vand.u32 4294901760, %v25154_v7  ;;  %v25160_v38 = vand.u32 4294901760, %v25159_v4 }
 0x601   : > { %25149 = vst [vmem:[#allocation97_spill] sm:$0xff] %v19607_v44 }
 0x602   : > { %3778 = vmatmul.mubr.f32.gmra.mrb[76].mxu0 %v25112_v51  ;;  %v19601_v40 = vpack.c.bf16 %v25143_v9, %v25141_v32  ;;  %v19625_v32 = vpack.c.bf16 %v25160_v38, %v25158_v45  ;;  %v25171_v45 = vld [vmem:[#allocation47_spill] sm:$0xff] }
 0x603   : > { %3784 = vmatprep.mubr.f32.mxu0 %v25113_v43  ;;  %15538 = vmatpush3.bf16.msra.mxu0 %v25114_v1  ;;  %v25136_v1 = vld [vmem:[#allocation4_spill] sm:$0xff]  ;;  %v25172_v4 = vand.u32 4294901760, %v25171_v45 }
 0x604   : > { %15540 = vmatprep.subr.bf16.mxu0 %v25115_v5  ;;  %v25129_v5 = vld [vmem:[#allocation36_spill] sm:$0xff]  ;;  %25144 = vst [vmem:[#allocation89_spill] sm:$0xff] %v19601_v40  ;;  %25161 = vst [vmem:[#allocation101_spill] sm:$0xff] %v19625_v32 }
 0x606   : > { %3787 = vmatmul.mubr.f32.gmra.mrb[78].mxu0 %v25116_v41 }
 0x607   : > { %3793 = vmatprep.mubr.f32.mxu0 %v25117_v15  ;;  %15542 = vmatpush3.bf16.msra.mxu0 %v25118_v56  ;;  %v25130_v56 = vld [vmem:[#allocation132_spill] sm:$0xff] }
 0x608   : > { %15544 = vmatprep.subr.bf16.mxu0 %v25119_v34  ;;  %v25131_v34 = vld [vmem:[#allocation39_spill] sm:$0xff] }
 0x60a   : > { %3796 = vmatmul.mubr.f32.gmra.mrb[80].mxu0 %v25125_v46 }
 0x60b   : > { %3802 = vmatprep.mubr.f32.mxu0 %v25126_v23  ;;  %15546 = vmatpush3.bf16.msra.mxu0 %v25127_v58  ;;  %v25137_v58 = vld [vmem:[#allocation150_spill] sm:$0xff] }
 0x60c   : > { %15548 = vmatprep.subr.bf16.mxu0 %v19574_v47  ;;  %v25138_v47 = vld [vmem:[#allocation148_spill] sm:$0xff] }
 0x60e   : > { %3805 = vmatmul.mubr.f32.gmra.mrb[82].mxu0 %v25128_v25 }
 0x60f   : > { %3811 = vmatprep.mubr.f32.mxu0 %v25129_v5 }
 0x612   : > { %3814 = vmatmul.mubr.f32.gmra.mrb[84].mxu0 %v25130_v56 }
 0x613   : > { %3820 = vmatprep.mubr.f32.mxu0 %v25131_v34 }
 0x616   : > { %3823 = vmatmul.mubr.f32.gmra.mrb[86].mxu0 %v25132_v18 }
 0x617   : > { %3829 = vmatprep.mubr.f32.mxu0 %v25133_v3 }
 0x61a   : > { %3832 = vmatmul.mubr.f32.gmra.mrb[88].mxu0 %v25134_v12 }
 0x61b   : > { %3838 = vmatprep.mubr.f32.mxu0 %v25135_v52 }
 0x61e   : > { %3841 = vmatmul.mubr.f32.gmra.mrb[90].mxu0 %v25136_v1 }
 0x61f   : > { %3847 = vmatprep.mubr.f32.mxu0 %v25137_v58 }
 0x622   : > { %3850 = vmatmul.mubr.f32.gmra.mrb[92].mxu0 %v25138_v47 }
 0x623   : > { %3856 = vmatprep.mubr.f32.mxu0 %v19443_v24 }
 0x626   : > { %3859 = vmatmul.mubr.f32.gmra.mrb[94].mxu0 %v19431_v17 }
 0x627   : > { %3865 = vmatprep.mubr.f32.mxu0 %v19467_v6 }
 0x62a   : > { %3868 = vmatmul.mubr.f32.gmra.mrb[96].mxu0 %v19457_v22 }
 0x62b   : > { %3972 = vmatprep.mubr.f32.mxu0 %v25139_v30  ;;  %v25152_v30 = vld [vmem:[#allocation72_spill] sm:$0xff] }
 0x62c   : > { %v25153_v36 = vand.u32 4294901760, %v25152_v30  ;;  %v25166_v30 = vld [vmem:[#allocation44_spill] sm:$0xff] }
 0x62e   : > { %3976 = vmatmul.mubr.f32.vlgmr.msra.gmra.mrb[98].mxu0 %v25150_v28  ;;  %v19618_v9 = vpack.c.bf16 %v25155_v35, %v25153_v36  ;;  %v25162_v28 = vand.u32 4294901760, %v25096_v31  ;;  %v25167_v36 = vand.u32 4294901760, %v25166_v30  ;;  %v25169_v35 = vld [vmem:[#allocation46_spill] sm:$0xff]  ;;  %v25174_v31 = vand.u32 4294901760, %v25100_v42 }
 0x62f   : > { %3983 = vmatprep.mubr.f32.mxu0 %v25151_v57  ;;  %15550 = vmatpush3.bf16.msra.mxu0 %v19601_v40  ;;  %v25163_v57 = vand.u32 4294901760, %v25097_v63  ;;  %v25170_v0 = vand.u32 4294901760, %v25169_v35  ;;  %v25175_v63 = vand.u32 4294901760, %v25101_v19  ;;  %v25186_v42 = vand.u32 4294901760, %v25104_v14  ;;  %v25264_v40 = vld [vmem:[#allocation133_spill] sm:$0xff] }
 0x630   : > { %25156 = vst [vmem:[#allocation94_spill] sm:$0xff] %v19618_v9  ;;  %15552 = vmatprep.subr.bf16.mxu0 %v19607_v44  ;;  %v19636_v7 = vpack.c.bf16 %v25167_v36, %v25165_v16  ;;  %v25179_v16 = vand.u32 4294901760, %v25178_v59  ;;  %v25181_v36 = vld [vmem:[#allocation52_spill] sm:$0xff]  ;;  %v25187_v19 = vand.u32 4294901760, %v25105_v2  ;;  %v25198_v14 = vand.u32 4294901760, %v25108_v55 }
 0x631   : > { %v19643_v38 = vpack.c.bf16 %v25172_v4, %v25170_v0  ;;  %v25182_v35 = vand.u32 4294901760, %v25181_v36  ;;  %v25183_v0 = vld [vmem:[#allocation53_spill] sm:$0xff]  ;;  %v25206_v55 = vand.u32 4294901760, %v18886_v21 }
 0x632   : > { %3987 = vmatmul.mubr.f32.gmra.mrb[100].mxu0 %v25162_v28  ;;  %25168 = vst [vmem:[#allocation99_spill] sm:$0xff] %v19636_v7  ;;  %v25176_v28 = vld [vmem:[#allocation49_spill] sm:$0xff]  ;;  %v25184_v45 = vand.u32 4294901760, %v25183_v0 }
 0x633   : > { %3994 = vmatprep.mubr.f32.mxu0 %v25163_v57  ;;  %15554 = vmatpush3.bf16.msra.mxu0 %v19618_v9  ;;  %25173 = vst [vmem:[#allocation107_spill] sm:$0xff] %v19643_v38  ;;  %v25177_v57 = vand.u32 4294901760, %v25176_v28  ;;  %v25190_v28 = vld [vmem:[#allocation56_spill] sm:$0xff]  ;;  %v25263_v9 = vld [vmem:[#allocation134_spill] sm:$0xff] }
 0x634   : > { %15556 = vmatprep.subr.bf16.mxu0 %v19625_v32  ;;  %v19661_v4 = vpack.c.bf16 %v25184_v45, %v25182_v35  ;;  %v25195_v35 = vld [vmem:[#allocation58_spill] sm:$0xff] }
 0x635   : > { %v19654_v30 = vpack.c.bf16 %v25179_v16, %v25177_v57  ;;  %v25191_v57 = vand.u32 4294901760, %v25190_v28  ;;  %v25193_v16 = vld [vmem:[#allocation57_spill] sm:$0xff]  ;;  %v25196_v0 = vand.u32 4294901760, %v25195_v35 }
 0x636   : > { %3998 = vmatmul.mubr.f32.gmra.mrb[102].mxu0 %v25174_v31  ;;  %25185 = vst [vmem:[#allocation21_spill] sm:$0xff] %v19661_v4  ;;  %v25188_v31 = vld [vmem:[#allocation55_spill] sm:$0xff]  ;;  %v25194_v36 = vand.u32 4294901760, %v25193_v16  ;;  %v25202_v28 = vld [vmem:[#allocation61_spill] sm:$0xff]  ;;  %v25205_v16 = vand.u32 4294901760, %v18881_v13 }
 0x637   : > { %4005 = vmatprep.mubr.f32.mxu0 %v25175_v63  ;;  %15558 = vmatpush3.bf16.msra.mxu0 %v19636_v7  ;;  %25180 = vst [vmem:[#allocation105_spill] sm:$0xff] %v19654_v30  ;;  %v25189_v63 = vand.u32 4294901760, %v25188_v31  ;;  %v25200_v31 = vld [vmem:[#allocation60_spill] sm:$0xff]  ;;  %v25261_v7 = vld [vmem:[#allocation130_spill] sm:$0xff] }
 0x638   : > { %15560 = vmatprep.subr.bf16.mxu0 %v19643_v38  ;;  %v19679_v45 = vpack.c.bf16 %v25196_v0, %v25194_v36  ;;  %v19697_v36 = vpack.c.bf16 %v25206_v55, %v25205_v16  ;;  %v25209_v0 = vand.u32 4294901760, %v25113_v43 }
 0x639   : > { %v19672_v59 = vpack.c.bf16 %v25191_v57, %v25189_v63  ;;  %v25201_v63 = vand.u32 4294901760, %v25200_v31  ;;  %v25203_v57 = vand.u32 4294901760, %v25202_v28  ;;  %v25211_v31 = vand.u32 4294901760, %v18906_v54 }
 0x63a   : > { %4009 = vmatmul.mubr.f32.gmra.mrb[104].mxu0 %v25186_v42  ;;  %25197 = vst [vmem:[#allocation25_spill] sm:$0xff] %v19679_v45  ;;  %v25199_v42 = vand.u32 4294901760, %v25109_v11  ;;  %25207 = vst [vmem:[#allocation28_spill] sm:$0xff] %v19697_v36  ;;  %v25208_v11 = vand.u32 4294901760, %v25112_v51  ;;  %v25214_v51 = vand.u32 4294901760, %v18943_v62  ;;  %v25218_v28 = vand.u32 4294901760, %v18966_v39 }
 0x63b   : > { %4016 = vmatprep.mubr.f32.mxu0 %v25187_v19  ;;  %15562 = vmatpush3.bf16.msra.mxu0 %v19654_v30  ;;  %25192 = vst [vmem:[#allocation110_spill] sm:$0xff] %v19672_v59  ;;  %v25260_v30 = vld [vmem:[#allocation125_spill] sm:$0xff] }
 0x63c   : > { %15564 = vmatprep.subr.bf16.mxu0 %v19661_v4  ;;  %v13633_v2 = vpop.f32.mrb[2].mxu0  ;;  %v19690_v4 = vpack.c.bf16 %v25203_v57, %v25201_v63  ;;  %v25216_v63 = vand.u32 4294901760, %v25116_v41  ;;  %v25219_v57 = vand.u32 4294901760, %v18975_v29  ;;  %v25221_v41 = vand.u32 4294901760, %v25125_v46 }
 0x63d   : > { %v13634_v19 = vpop.f32.mrb[3].mxu0  ;;  %v25223_v29 = vand.u32 4294901760, %v25128_v25 }
 0x63e   : > { %4020 = vmatmul.mubr.f32.gmra.mrb[106].mxu0 %v25198_v14  ;;  %25204 = vst [vmem:[#allocation115_spill] sm:$0xff] %v19690_v4  ;;  %v19699_v35 = vadd.f32 %v13634_v19, %v13633_v2  ;;  %v25213_v2 = vand.u32 4294901760, %v18932_v53  ;;  %v19730_v53 = vpack.c.bf16 %v25219_v57, %v25218_v28 }
 0x63f   : > { %4027 = vmatprep.mubr.f32.mxu0 %v25199_v42  ;;  %15566 = vmatpush3.bf16.msra.mxu0 %v19672_v59  ;;  %v25210_v42 = vand.u32 4294901760, %v18901_v37  ;;  %v25217_v37 = vand.u32 4294901760, %v25117_v15  ;;  %v25222_v15 = vand.u32 4294901760, %v25126_v23  ;;  %v25225_v23 = vand.u32 4294901760, %v25130_v56 }
 0x640   : > { %15568 = vmatprep.subr.bf16.mxu0 %v19679_v45  ;;  %v13636_v14 = vpop.f32.mrb[4].mxu0  ;;  %v19717_v19 = vpack.c.bf16 %v25214_v51, %v25213_v2  ;;  %25220 = vst [vmem:[#allocation32_spill] sm:$0xff] %v19730_v53  ;;  %v25227_v51 = vand.u32 4294901760, %v25132_v18  ;;  %v25231_v18 = vand.u32 4294901760, %v25136_v1  ;;  %v25235_v1 = vand.u32 4294901760, %v19431_v17  ;;  %v25259_v45 = vld [vmem:[#allocation26_spill] sm:$0xff] }
 0x641   : > { %v19710_v13 = vpack.c.bf16 %v25211_v31, %v25210_v42  ;;  %v13637_v21 = vpop.f32.mrb[5].mxu0  ;;  %v25226_v31 = vand.u32 4294901760, %v25131_v34  ;;  %v25230_v34 = vand.u32 4294901760, %v25135_v52  ;;  %v25234_v52 = vand.u32 4294901760, %v19443_v24 }
 0x642   : > { %4031 = vmatmul.mubr.f32.gmra.mrb[108].mxu0 %v25208_v11  ;;  %25215 = vst [vmem:[#allocation30_spill] sm:$0xff] %v19717_v19  ;;  %v19719_v43 = vadd.f32 %v13637_v21, %v13636_v14 }
 0x643   : > { %4038 = vmatprep.mubr.f32.mxu0 %v25209_v0  ;;  %15570 = vmatpush3.bf16.msra.mxu0 %v19690_v4  ;;  %25212 = vst [vmem:[#allocation120_spill] sm:$0xff] %v19710_v13  ;;  %v25224_v0 = vand.u32 4294901760, %v25129_v5  ;;  %v25228_v5 = vand.u32 4294901760, %v25133_v3  ;;  %v25232_v3 = vand.u32 4294901760, %v25137_v58  ;;  %v25236_v58 = vand.u32 4294901760, %v19467_v6  ;;  %v25257_v4 = vld [vmem:[#allocation121_spill] sm:$0xff] }
 0x644   : > { %15572 = vmatprep.subr.bf16.mxu0 %v19697_v36 }
 0x645   : > { %v13639_v54 = vpop.f32.mrb[6].mxu0 }
 0x646   : > { %4042 = vmatmul.mubr.f32.gmra.mrb[110].mxu0 %v25216_v63  ;;  %v13640_v62 = vpop.f32.mrb[7].mxu0 }
 0x647   : > { %4049 = vmatprep.mubr.f32.mxu0 %v25217_v37  ;;  %15574 = vmatpush3.bf16.msra.mxu0 %v19710_v13  ;;  %v19733_v16 = vadd.f32 %v13640_v62, %v13639_v54  ;;  %v25229_v54 = vand.u32 4294901760, %v25134_v12  ;;  %v25233_v12 = vand.u32 4294901760, %v25138_v47  ;;  %v25237_v47 = vand.u32 4294901760, %v19457_v22  ;;  %v25256_v13 = vld [vmem:[#allocation24_spill] sm:$0xff] }
 0x648   : > { %15576 = vmatprep.subr.bf16.mxu0 %v19717_v19  ;;  %v25255_v19 = vld [vmem:[#allocation22_spill] sm:$0xff] }
 0x649   : > { %v13642_v55 = vpop.f32.mrb[8].mxu0 }
 0x64a   : > { %4053 = vmatmul.mubr.f32.gmra.mrb[112].mxu0 %v25221_v41  ;;  %v13643_v11 = vpop.f32.mrb[9].mxu0 }
 0x64b   : > { %4060 = vmatprep.mubr.f32.mxu0 %v25222_v15  ;;  %15578 = vmatpush3.bf16.msra.mxu0 %v19730_v53  ;;  %v19741_v39 = vadd.f32 %v13643_v11, %v13642_v55  ;;  %v25254_v53 = vld [vmem:[#allocation122_spill] sm:$0xff] }
 0x64c   : > { %15580 = vmatprep.subr.bf16.mxu0 %v25087_v10 }
 0x64e   : > { %4064 = vmatmul.mubr.f32.gmra.mrb[114].mxu0 %v25223_v29 }
 0x64f   : > { %4071 = vmatprep.mubr.f32.mxu0 %v25224_v0 }
 0x650   : > { %v13645_v14 = vpop.f32.mrb[10].mxu0 }
 0x651   : > { %v13646_v46 = vpop.f32.mrb[11].mxu0 }
 0x652   : > { %v19747_v42 = vadd.f32 %v13646_v46, %v13645_v14  ;;  %4075 = vmatmul.mubr.f32.gmra.mrb[116].mxu0 %v25225_v23 }
 0x653   : > { %4082 = vmatprep.mubr.f32.mxu0 %v25226_v31 }
 0x654   : > { %v13648_v21 = vpop.f32.mrb[12].mxu0 }
 0x655   : > { %v13649_v2 = vpop.f32.mrb[13].mxu0 }
 0x656   : > { %4086 = vmatmul.mubr.f32.gmra.mrb[118].mxu0 %v25227_v51  ;;  %v19755_v25 = vadd.f32 %v13649_v2, %v13648_v21 }
 0x657   : > { %4093 = vmatprep.mubr.f32.mxu0 %v25228_v5 }
 0x658   : > { %v13651_v63 = vpop.f32.mrb[14].mxu0 }
 0x659   : > { %v13652_v37 = vpop.f32.mrb[15].mxu0 }
 0x65a   : > { %4097 = vmatmul.mubr.f32.gmra.mrb[120].mxu0 %v25229_v54  ;;  %v19761_v56 = vadd.f32 %v13652_v37, %v13651_v63  ;;  %v25238_v63 = vld [vmem:[#allocation103_spill] sm:$0xff]  ;;  %v25240_v54 = vld [vmem:[#allocation12_spill] sm:$0xff] }
 0x65b   : > { %4104 = vmatprep.mubr.f32.mxu0 %v25230_v34  ;;  %v25239_v37 = vld [vmem:[#allocation11_spill] sm:$0xff] }
 0x65d   : > { %v13654_v28 = vpop.f32.mrb[16].mxu0 }
 0x65e   : > { %v13655_v57 = vpop.f32.mrb[17].mxu0  ;;  %4108 = vmatmul.mubr.f32.gmra.mrb[122].mxu0 %v25231_v18 }
 0x65f   : > { %v19767_v62 = vadd.f32 %v13655_v57, %v13654_v28  ;;  %4115 = vmatprep.mubr.f32.mxu0 %v25232_v3  ;;  %v25241_v57 = vld [vmem:[#allocation102_spill] sm:$0xff]  ;;  %v25242_v3 = vld [vmem:[#allocation19_spill] sm:$0xff] }
 0x661   : > { %v13657_v41 = vpop.f32.mrb[18].mxu0 }
 0x662   : > { %v13658_v15 = vpop.f32.mrb[19].mxu0  ;;  %4119 = vmatmul.mubr.f32.gmra.mrb[124].mxu0 %v25233_v12 }
 0x663   : > { %v19773_v55 = vadd.f32 %v13658_v15, %v13657_v41  ;;  %4126 = vmatprep.mubr.f32.mxu0 %v25234_v52  ;;  %v25243_v41 = vld [vmem:[#allocation13_spill] sm:$0xff]  ;;  %v25244_v15 = vld [vmem:[#allocation14_spill] sm:$0xff] }
 0x665   : > { %v13660_v11 = vpop.f32.mrb[20].mxu0 }
 0x666   : > { %v13661_v29 = vpop.f32.mrb[21].mxu0  ;;  %4130 = vmatmul.mubr.f32.gmra.mrb[126].mxu0 %v25235_v1  ;;  %v25246_v1 = vld [vmem:[#allocation113_spill] sm:$0xff] }
 0x667   : > { %v19779_v0 = vadd.f32 %v13661_v29, %v13660_v11  ;;  %4137 = vmatprep.mubr.f32.mxu0 %v25236_v58  ;;  %v25245_v11 = vld [vmem:[#allocation108_spill] sm:$0xff]  ;;  %v25247_v58 = vld [vmem:[#allocation15_spill] sm:$0xff] }
 0x669   : > { %v13663_v14 = vpop.f32.mrb[22].mxu0 }
 0x66a   : > { %v13664_v46 = vpop.f32.mrb[23].mxu0  ;;  %4141 = vmatmul.mubr.f32.gmra.mrb[128].mxu0 %v25237_v47 }
 0x66b   : > { %v19785_v23 = vadd.f32 %v13664_v46, %v13663_v14  ;;  %4307 = vmatprep.mubr.f32.mxu0 %v19002_v49  ;;  %v25248_v14 = vld [vmem:[#allocation16_spill] sm:$0xff] }
 0x66d   : > { %v13666_v24 = vpop.f32.mrb[24].mxu0 }
 0x66e   : > { %v13667_v31 = vpop.f32.mrb[25].mxu0  ;;  %4309 = vmatmul.mubr.f32.vlgmr.msra.gmra.mrb[130].mxu0 %v18989_v60 }
 0x66f   : > { %v19789_v17 = vadd.f32 %v13667_v31, %v13666_v24  ;;  %4314 = vmatprep.mubr.f32.mxu0 %v19037_v8  ;;  %15582 = vmatpush3.bf16.msra.mxu0 %v25094_v26  ;;  %v25249_v24 = vld [vmem:[#allocation112_spill] sm:$0xff] }
 0x670   : > { %15584 = vmatprep.subr.bf16.mxu0 %v25095_v27 }
 0x671   : > { %v13669_v6 = vpop.f32.mrb[26].mxu0 }
 0x672   : > { %v13670_v21 = vpop.f32.mrb[27].mxu0  ;;  %4316 = vmatmul.mubr.f32.gmra.mrb[132].mxu0 %v19022_v20 }
 0x673   : > { %v19795_v22 = vadd.f32 %v13670_v21, %v13669_v6  ;;  %4321 = vmatprep.mubr.f32.mxu0 %v19070_v61  ;;  %15586 = vmatpush3.bf16.msra.mxu0 %v25098_v50  ;;  %v25250_v6 = vld [vmem:[#allocation118_spill] sm:$0xff] }
 0x674   : > { %15588 = vmatprep.subr.bf16.mxu0 %v25099_v48  ;;  %v25251_v21 = vld [vmem:[#allocation18_spill] sm:$0xff] }
 0x675   : > { %v13672_v2 = vpop.f32.mrb[28].mxu0 }
 0x676   : > { %v13673_v51 = vpop.f32.mrb[29].mxu0  ;;  %4323 = vmatmul.mubr.f32.gmra.mrb[134].mxu0 %v19061_v33 }
 0x677   : > { %v19801_v5 = vadd.f32 %v13673_v51, %v13672_v2  ;;  %4328 = vmatprep.mubr.f32.mxu0 %v25238_v63  ;;  %15590 = vmatpush3.bf16.msra.mxu0 %v25239_v37  ;;  %v25252_v2 = vld [vmem:[#allocation20_spill] sm:$0xff] }
 0x678   : > { %15592 = vmatprep.subr.bf16.mxu0 %v25240_v54  ;;  %v25274_v54 = vld [vmem:[#allocation156_spill] sm:$0xff] }
 0x679   : > { %v13675_v34 = vpop.f32.mrb[30].mxu0 }
 0x67a   : > { %v13676_v28 = vpop.f32.mrb[31].mxu0  ;;  %4330 = vmatmul.mubr.f32.gmra.mrb[136].mxu0 %v25241_v57 }
 0x67b   : > { %v19807_v18 = vadd.f32 %v13676_v28, %v13675_v34  ;;  %4335 = vmatprep.mubr.f32.mxu0 %v25242_v3  ;;  %15594 = vmatpush3.bf16.msra.mxu0 %v25243_v41 }
 0x67c   : > { %15596 = vmatprep.subr.bf16.mxu0 %v25244_v15  ;;  %v25272_v15 = vld [vmem:[#allocation152_spill] sm:$0xff] }
 0x67d   : > { %v13678_v12 = vpop.f32.mrb[32].mxu0 }
 0x67e   : > { %v13679_v52 = vpop.f32.mrb[33].mxu0  ;;  %4337 = vmatmul.mubr.f32.gmra.mrb[138].mxu0 %v25245_v11 }
 0x67f   : > { %v19813_v29 = vadd.f32 %v13679_v52, %v13678_v12  ;;  %4342 = vmatprep.mubr.f32.mxu0 %v25246_v1  ;;  %15598 = vmatpush3.bf16.msra.mxu0 %v25247_v58  ;;  %v25253_v12 = vld [vmem:[#allocation116_spill] sm:$0xff] }
 0x680   : > { %15600 = vmatprep.subr.bf16.mxu0 %v25248_v14  ;;  %v25270_v14 = vld [vmem:[#allocation146_spill] sm:$0xff] }
 0x681   : > { %v13713_v46 = vpop.f32.mrb[34].mxu0 }
 0x682   : > { %v13714_v47 = vpop.f32.mrb[35].mxu0  ;;  %4344 = vmatmul.mubr.f32.gmra.mrb[140].mxu0 %v25249_v24 }
 0x683   : > { %v13715_v31 = vadd.f32 %v13714_v47, %v13713_v46  ;;  %4349 = vmatprep.mubr.f32.mxu0 %v25250_v6  ;;  %15602 = vmatpush3.bf16.msra.mxu0 %v25251_v21 }
 0x684   : > { %15604 = vmatprep.subr.bf16.mxu0 %v25252_v2  ;;  %v25268_v2 = vld [vmem:[#allocation141_spill] sm:$0xff] }
 0x685   : > { %v19823_v51 = vadd.f32 %v13715_v31, %v19699_v35  ;;  %v13716_v34 = vpop.f32.mrb[36].mxu0  ;;  %v25258_v31 = vld [vmem:[#allocation126_spill] sm:$0xff] }
 0x686   : > { %v13717_v28 = vpop.f32.mrb[37].mxu0  ;;  %4351 = vmatmul.mubr.f32.gmra.mrb[142].mxu0 %v25253_v12 }
 0x687   : > { %v13718_v52 = vadd.f32 %v13717_v28, %v13716_v34  ;;  %4356 = vmatprep.mubr.f32.mxu0 %v25254_v53  ;;  %15606 = vmatpush3.bf16.msra.mxu0 %v25255_v19 }
 0x688   : > { %15608 = vmatprep.subr.bf16.mxu0 %v25256_v13  ;;  %v25266_v13 = vld [vmem:[#allocation137_spill] sm:$0xff] }
 0x689   : > { %v19830_v46 = vadd.f32 %v13718_v52, %v19719_v43  ;;  %v13719_v47 = vpop.f32.mrb[38].mxu0 }
 0x68a   : > { %v13720_v36 = vpop.f32.mrb[39].mxu0  ;;  %4358 = vmatmul.mubr.f32.gmra.mrb[144].mxu0 %v25257_v4 }
 0x68b   : > { %v13721_v35 = vadd.f32 %v13720_v36, %v13719_v47  ;;  %4363 = vmatprep.mubr.f32.mxu0 %v25258_v31  ;;  %15610 = vmatpush3.bf16.msra.mxu0 %v25259_v45  ;;  %v25262_v36 = vld [vmem:[#allocation129_spill] sm:$0xff] }
 0x68d   : > { %v19836_v34 = vadd.f32 %v13721_v35, %v19733_v16  ;;  %v13722_v28 = vpop.f32.mrb[40].mxu0 }
 0x68e   : > { %v13723_v59 = vpop.f32.mrb[41].mxu0  ;;  %4365 = vmatmul.mubr.f32.gmra.mrb[146].mxu0 %v25260_v30 }
 0x68f   : > { %v13724_v38 = vadd.f32 %v13723_v59, %v13722_v28  ;;  %4370 = vmatprep.mubr.f32.mxu0 %v25261_v7  ;;  %v25265_v28 = vld [vmem:[#allocation138_spill] sm:$0xff] }
 0x691   : > { %v19841_v43 = vadd.f32 %v13724_v38, %v19741_v39  ;;  %v13725_v52 = vpop.f32.mrb[42].mxu0 }
 0x692   : > { %v13726_v32 = vpop.f32.mrb[43].mxu0  ;;  %4372 = vmatmul.mubr.f32.gmra.mrb[148].mxu0 %v25262_v36 }
 0x693   : > { %v13727_v47 = vadd.f32 %v13726_v32, %v13725_v52  ;;  %4377 = vmatprep.mubr.f32.mxu0 %v25263_v9  ;;  %v25267_v52 = vld [vmem:[#allocation142_spill] sm:$0xff] }
 0x695   : > { %v19846_v16 = vadd.f32 %v13727_v47, %v19747_v42  ;;  %v13728_v35 = vpop.f32.mrb[44].mxu0 }
 0x696   : > { %v13729_v44 = vpop.f32.mrb[45].mxu0  ;;  %4379 = vmatmul.mubr.f32.gmra.mrb[150].mxu0 %v25264_v40 }
 0x697   : > { %v13730_v59 = vadd.f32 %v13729_v44, %v13728_v35  ;;  %4384 = vmatprep.mubr.f32.mxu0 %v25265_v28  ;;  %v25269_v35 = vld [vmem:[#allocation147_spill] sm:$0xff] }
 0x699   : > { %v19851_v38 = vadd.f32 %v13730_v59, %v19755_v25  ;;  %v13731_v39 = vpop.f32.mrb[46].mxu0 }
 0x69a   : > { %v13732_v45 = vpop.f32.mrb[47].mxu0  ;;  %4386 = vmatmul.mubr.f32.gmra.mrb[152].mxu0 %v25266_v13 }
 0x69b   : > { %v13733_v32 = vadd.f32 %v13732_v45, %v13731_v39  ;;  %4391 = vmatprep.mubr.f32.mxu0 %v25267_v52  ;;  %v25271_v39 = vld [vmem:[#allocation153_spill] sm:$0xff] }
 0x69d   : > { %v19856_v42 = vadd.f32 %v13733_v32, %v19761_v56  ;;  %v13734_v47 = vpop.f32.mrb[48].mxu0 }
 0x69e   : > { %v13735_v19 = vpop.f32.mrb[49].mxu0  ;;  %4393 = vmatmul.mubr.f32.gmra.mrb[154].mxu0 %v25268_v2 }
 0x69f   : > { %v13736_v44 = vadd.f32 %v13735_v19, %v13734_v47  ;;  %4398 = vmatprep.mubr.f32.mxu0 %v25269_v35  ;;  %v25273_v47 = vld [vmem:[#allocation157_spill] sm:$0xff] }
 0x6a1   : > { %v19861_v25 = vadd.f32 %v13736_v44, %v19767_v62  ;;  %v13737_v59 = vpop.f32.mrb[50].mxu0 }
 0x6a2   : > { %v13738_v21 = vpop.f32.mrb[51].mxu0  ;;  %4400 = vmatmul.mubr.f32.gmra.mrb[156].mxu0 %v25270_v14 }
 0x6a3   : > { %v13739_v45 = vadd.f32 %v13738_v21, %v13737_v59  ;;  %4405 = vmatprep.mubr.f32.mxu0 %v25271_v39 }
 0x6a5   : > { %v19866_v56 = vadd.f32 %v13739_v45, %v19773_v55  ;;  %v13740_v32 = vpop.f32.mrb[52].mxu0 }
 0x6a6   : > { %v13741_v58 = vpop.f32.mrb[53].mxu0  ;;  %4407 = vmatmul.mubr.f32.gmra.mrb[158].mxu0 %v25272_v15 }
 0x6a7   : > { %v13742_v19 = vadd.f32 %v13741_v58, %v13740_v32  ;;  %4412 = vmatprep.mubr.f32.mxu0 %v25273_v47 }
 0x6a9   : > { %v19871_v62 = vadd.f32 %v13742_v19, %v19779_v0  ;;  %v13743_v44 = vpop.f32.mrb[54].mxu0 }
 0x6aa   : > { %v13744_v41 = vpop.f32.mrb[55].mxu0  ;;  %4414 = vmatmul.mubr.f32.gmra.mrb[160].mxu0 %v25274_v54 }
 0x6ab   : > { %v13745_v21 = vadd.f32 %v13744_v41, %v13743_v44  ;;  %4516 = vmatprep.mubr.f32.mxu0 %v19002_v49 }
 0x6ad   : > { %v19876_v55 = vadd.f32 %v13745_v21, %v19785_v23  ;;  %v13746_v59 = vpop.f32.mrb[56].mxu0 }
 0x6ae   : > { %v13747_v45 = vpop.f32.mrb[57].mxu0  ;;  %4518 = vmatmul.mubr.f32.vlgmr.msra.gmra.mrb[162].mxu0 %v18989_v60 }
 0x6af   : > { %v13748_v58 = vadd.f32 %v13747_v45, %v13746_v59  ;;  %4523 = vmatprep.mubr.f32.mxu0 %v19037_v8 }
 0x6b1   : > { %v19881_v0 = vadd.f32 %v13748_v58, %v19789_v17  ;;  %v13749_v32 = vpop.f32.mrb[58].mxu0 }
 0x6b2   : > { %v13750_v19 = vpop.f32.mrb[59].mxu0  ;;  %4525 = vmatmul.mubr.f32.gmra.mrb[164].mxu0 %v19022_v20 }
 0x6b3   : > { %v13751_v41 = vadd.f32 %v13750_v19, %v13749_v32  ;;  %4530 = vmatprep.mubr.f32.mxu0 %v19070_v61 }
 0x6b5   : > { %v19886_v49 = vadd.f32 %v13751_v41, %v19795_v22  ;;  %v13752_v23 = vpop.f32.mrb[60].mxu0 }
 0x6b6   : > { %v13753_v44 = vpop.f32.mrb[61].mxu0  ;;  %4532 = vmatmul.mubr.f32.gmra.mrb[166].mxu0 %v19061_v33 }
 0x6b7   : > { %v13754_v60 = vadd.f32 %v13753_v44, %v13752_v23  ;;  %4537 = vmatprep.mubr.f32.mxu0 %v25238_v63 }
 0x6b9   : > { %v19891_v8 = vadd.f32 %v13754_v60, %v19801_v5  ;;  %v13755_v17 = vpop.f32.mrb[62].mxu0 }
 0x6ba   : > { %v13756_v21 = vpop.f32.mrb[63].mxu0  ;;  %4539 = vmatmul.mubr.f32.gmra.mrb[168].mxu0 %v25241_v57 }
 0x6bb   : > { %v13757_v20 = vadd.f32 %v13756_v21, %v13755_v17  ;;  %4544 = vmatprep.mubr.f32.mxu0 %v25242_v3  ;;  %v17555_v17 = vld [vmem:[%s24095_s5 + $0x8] sm:$0xff] }
 0x6bc   : > { %v19959_v21 = vsel %vm4676_vm5, %v17555_v17, 0 }
 0x6bd   : > { %v19896_v61 = vadd.f32 %v13757_v20, %v19807_v18  ;;  %v13758_v22 = vpop.f32.mrb[64].mxu0 }
 0x6be   : > { %v13759_v59 = vpop.f32.mrb[65].mxu0  ;;  %4546 = vmatmul.mubr.f32.gmra.mrb[170].mxu0 %v25245_v11 }
 0x6bf   : > { %v13760_v33 = vadd.f32 %v13759_v59, %v13758_v22  ;;  %4551 = vmatprep.mubr.f32.mxu0 %v25246_v1 }
 0x6c1   : > { %v19901_v5 = vadd.f32 %v13760_v33, %v19813_v29  ;;  %v13793_v63 = vpop.f32.mrb[66].mxu0  ;;  %v24447_v33 = vand.u32 4294901760, %v19959_v21 }
 0x6c2   : > { %v13794_v45 = vpop.f32.mrb[67].mxu0  ;;  %4553 = vmatmul.mubr.f32.gmra.mrb[172].mxu0 %v25249_v24 }
 0x6c3   : > { %v13795_v57 = vadd.f32 %v13794_v45, %v13793_v63  ;;  %4558 = vmatprep.mubr.f32.mxu0 %v25250_v6 }
 0x6c5   : > { %v19906_v18 = vadd.f32 %v13795_v57, %v19823_v51  ;;  %v13796_v3 = vpop.f32.mrb[68].mxu0 }
 0x6c6   : > { %v13797_v58 = vpop.f32.mrb[69].mxu0  ;;  %4560 = vmatmul.mubr.f32.gmra.mrb[174].mxu0 %v25253_v12 }
 0x6c7   : > { %v13798_v11 = vadd.f32 %v13797_v58, %v13796_v3  ;;  %4565 = vmatprep.mubr.f32.mxu0 %v25254_v53 }
 0x6c9   : > { %v19911_v29 = vadd.f32 %v13798_v11, %v19830_v46  ;;  %v13799_v1 = vpop.f32.mrb[70].mxu0 }
 0x6ca   : > { %v13800_v32 = vpop.f32.mrb[71].mxu0  ;;  %4567 = vmatmul.mubr.f32.gmra.mrb[176].mxu0 %v25257_v4 }
 0x6cb   : > { %v13801_v24 = vadd.f32 %v13800_v32, %v13799_v1  ;;  %4572 = vmatprep.mubr.f32.mxu0 %v25258_v31 }
 0x6cd   : > { %v19916_v6 = vadd.f32 %v13801_v24, %v19836_v34  ;;  %v13802_v51 = vpop.f32.mrb[72].mxu0 }
 0x6ce   : > { %v13803_v19 = vpop.f32.mrb[73].mxu0  ;;  %4574 = vmatmul.mubr.f32.gmra.mrb[178].mxu0 %v25260_v30 }
 0x6cf   : > { %v13804_v12 = vadd.f32 %v13803_v19, %v13802_v51  ;;  %4579 = vmatprep.mubr.f32.mxu0 %v25261_v7  ;;  %v17559_v19 = vld [vmem:[%s24095_s5 + $0x18] sm:$0xff] }
 0x6d1   : > { %v19921_v53 = vadd.f32 %v13804_v12, %v19841_v43  ;;  %v13805_v46 = vpop.f32.mrb[74].mxu0  ;;  %v20011_v12 = vsel %vm4676_vm5, %v17559_v19, 0 }
 0x6d2   : > { %v13806_v41 = vpop.f32.mrb[75].mxu0  ;;  %4581 = vmatmul.mubr.f32.gmra.mrb[180].mxu0 %v25262_v36 }
 0x6d3   : > { %v13807_v4 = vadd.f32 %v13806_v41, %v13805_v46  ;;  %4586 = vmatprep.mubr.f32.mxu0 %v25263_v9  ;;  %v17552_v9 = vld [vmem:[%s24095_s5 + $0x80] sm:$0xff] }
 0x6d5   : > { %v19926_v31 = vadd.f32 %v13807_v4, %v19846_v16  ;;  %v13808_v34 = vpop.f32.mrb[76].mxu0  ;;  %v17553_v16 = vld [vmem:[%s24095_s5 + $0x88] sm:$0xff] }
 0x6d6   : > { %v13809_v23 = vpop.f32.mrb[77].mxu0  ;;  %4588 = vmatmul.mubr.f32.gmra.mrb[182].mxu0 %v25264_v40  ;;  %v19939_v40 = vsel %vm4676_vm5, %v17552_v9, 0 }
 0x6d7   : > { %v13810_v30 = vadd.f32 %v13809_v23, %v13808_v34  ;;  %4593 = vmatprep.mubr.f32.mxu0 %v25265_v28  ;;  %v19945_v28 = vsel %vm4676_vm5, %v17553_v16, 0  ;;  %v24439_v34 = vand.u32 4294901760, %v20011_v12 }
 0x6d9   : > { %v19931_v7 = vadd.f32 %v13810_v30, %v19851_v38  ;;  %v13811_v43 = vpop.f32.mrb[78].mxu0  ;;  %v24449_v38 = vand.u32 4294901760, %v19945_v28 }
 0x6da   : > { %v13812_v44 = vpop.f32.mrb[79].mxu0  ;;  %4595 = vmatmul.mubr.f32.gmra.mrb[184].mxu0 %v25266_v13  ;;  %v24454_v13 = vand.u32 4294901760, %v19939_v40 }
 0x6db   : > { %v13813_v36 = vadd.f32 %v13812_v44, %v13811_v43  ;;  %4600 = vmatprep.mubr.f32.mxu0 %v25267_v52  ;;  %v17554_v52 = vld [vmem:[%s24095_s5] sm:$0xff] }
 0x6dc   : > { %v19953_v60 = vsel %vm4676_vm5, %v17554_v52, 0  ;;  %v19971_v45 = vpack.c.bf16 %v24449_v38, %v24454_v13  ;;  %v17561_v52 = vld [vmem:[%s24095_s5 + $0xa8] sm:$0xff] }
 0x6dd   : > { %v19962_v20 = vadd.f32 %v13813_v36, %v19856_v42  ;;  %v13814_v22 = vpop.f32.mrb[80].mxu0  ;;  %v24448_v59 = vand.u32 4294901760, %v19953_v60 }
 0x6de   : > { %v13815_v63 = vpop.f32.mrb[81].mxu0  ;;  %4602 = vmatmul.mubr.f32.gmra.mrb[186].mxu0 %v25268_v2  ;;  %25275 = vst [vmem:[#allocation33_spill] sm:$0xff] %v19971_v45  ;;  %15612 = vmatprep.subr.bf16.mxu1 %v19971_v45 }
 0x6df   : > { %v13816_v57 = vadd.f32 %v13815_v63, %v13814_v22  ;;  %4607 = vmatprep.mubr.f32.mxu0 %v25269_v35  ;;  %v19978_v42 = vpack.c.bf16 %v24447_v33, %v24448_v59  ;;  %v17556_v35 = vld [vmem:[%s24095_s5 + $0x90] sm:$0xff] }
 0x6e0   : > { %v19991_v1 = vsel %vm4676_vm5, %v17556_v35, 0 }
 0x6e1   : > { %25276 = vst [vmem:[#allocation124_spill] sm:$0xff] %v19978_v42  ;;  %v19982_v3 = vadd.f32 %v13816_v57, %v19861_v25  ;;  %v13817_v2 = vpop.f32.mrb[82].mxu0  ;;  %15614 = vmatpush3.bf16.xpose.msra.mxu1 %v19978_v42  ;;  %v17557_v25 = vld [vmem:[%s24095_s5 + $0x98] sm:$0xff]  ;;  %v24446_v24 = vand.u32 4294901760, %v19991_v1  ;;  %v17563_v57 = vld [vmem:[%s24095_s5 + $0x28] sm:$0xff]  ;;  %v25305_v42 = vand.u32 4294901760, %v19991_v1 }
 0x6e2   : > { %v13818_v58 = vpop.f32.mrb[83].mxu0  ;;  %4609 = vmatmul.mubr.f32.gmra.mrb[188].mxu0 %v25270_v14  ;;  %v19997_v32 = vsel %vm4676_vm5, %v17557_v25, 0 }
 0x6e3   : > { %v13819_v11 = vadd.f32 %v13818_v58, %v13817_v2  ;;  %4614 = vmatprep.mubr.f32.mxu0 %v25271_v39  ;;  %v24445_v14 = vand.u32 4294901760, %v19997_v32  ;;  %v17558_v39 = vld [vmem:[%s24095_s5 + $0x10] sm:$0xff]  ;;  %v20062_v2 = vsel %vm4676_vm5, %v17563_v57, 0  ;;  %v20362_v45 = vsub.f32 %v19991_v1, %v25305_v42 }
 0x6e4   : > { %v20005_v51 = vsel %vm4676_vm5, %v17558_v39, 0  ;;  %v24435_v25 = vand.u32 4294901760, %v20062_v2 }
 0x6e5   : > { %v20014_v46 = vadd.f32 %v13819_v11, %v19866_v56  ;;  %v13820_v41 = vpop.f32.mrb[84].mxu0  ;;  %v24444_v4 = vand.u32 4294901760, %v20005_v51  ;;  %v20023_v30 = vpack.c.bf16 %v24445_v14, %v24446_v24 }
 0x6e6   : > { %v13821_v23 = vpop.f32.mrb[85].mxu0  ;;  %4616 = vmatmul.mubr.f32.gmra.mrb[190].mxu0 %v25272_v15 }
 0x6e7   : > { %25277 = vst [vmem:[#allocation34_spill] sm:$0xff] %v20023_v30  ;;  %v13822_v43 = vadd.f32 %v13821_v23, %v13820_v41  ;;  %4621 = vmatprep.mubr.f32.mxu0 %v25273_v47  ;;  %v20030_v56 = vpack.c.bf16 %v24439_v34, %v24444_v4  ;;  %15616 = vmatprep.subr.bf16.mxu1 %v20023_v30  ;;  %v17560_v47 = vld [vmem:[%s24095_s5 + $0xa0] sm:$0xff] }
 0x6e8   : > { %v20042_v16 = vsel %vm4676_vm5, %v17560_v47, 0 }
 0x6e9   : > { %25278 = vst [vmem:[#allocation128_spill] sm:$0xff] %v20030_v56  ;;  %v20034_v44 = vadd.f32 %v13822_v43, %v19871_v62  ;;  %v13823_v15 = vpop.f32.mrb[86].mxu0  ;;  %15618 = vmatpush3.bf16.xpose.msra.mxu1 %v20030_v56  ;;  %v20048_v62 = vsel %vm4676_vm5, %v17561_v52, 0  ;;  %v24438_v17 = vand.u32 4294901760, %v20042_v16  ;;  %v17565_v52 = vld [vmem:[%s24095_s5 + $0xb8] sm:$0xff] }
 0x6ea   : > { %v13824_v36 = vpop.f32.mrb[87].mxu0  ;;  %4623 = vmatmul.mubr.f32.gmra.mrb[192].mxu0 %v25274_v54  ;;  %v24437_v22 = vand.u32 4294901760, %v20048_v62  ;;  %v17562_v54 = vld [vmem:[%s24095_s5 + $0x20] sm:$0xff] }
 0x6eb   : > { %v13825_v9 = vadd.f32 %v13824_v36, %v13823_v15  ;;  %v20056_v63 = vsel %vm4676_vm5, %v17562_v54, 0  ;;  %v20096_v54 = vsel %vm4676_vm5, %v17565_v52, 0 }
 0x6ec   : > { %v24436_v35 = vand.u32 4294901760, %v20056_v63  ;;  %v20073_v19 = vpack.c.bf16 %v24437_v22, %v24438_v17  ;;  %v24442_v57 = vand.u32 4294901760, %v20096_v54 }
 0x6ed   : > { %v20065_v58 = vadd.f32 %v13825_v9, %v19876_v55  ;;  %v13826_v11 = vpop.f32.mrb[88].mxu0  ;;  %v17564_v9 = vld [vmem:[%s24095_s5 + $0xb0] sm:$0xff] }
 0x6ee   : > { %v13827_v39 = vpop.f32.mrb[89].mxu0  ;;  %25279 = vst [vmem:[#allocation36_spill] sm:$0xff] %v20073_v19  ;;  %v20079_v23 = vpack.c.bf16 %v24435_v25, %v24436_v35  ;;  %15620 = vmatprep.subr.bf16.mxu1 %v20073_v19  ;;  %v20090_v47 = vsel %vm4676_vm5, %v17564_v9, 0 }
 0x6ef   : > { %v13828_v41 = vadd.f32 %v13827_v39, %v13826_v11  ;;  %v17566_v11 = vld [vmem:[%s24095_s5 + $0x30] sm:$0xff] }
 0x6f0   : > { %25280 = vst [vmem:[#allocation132_spill] sm:$0xff] %v20079_v23  ;;  %v20104_v39 = vsel %vm4676_vm5, %v17566_v11, 0 }
 0x6f1   : > { %v20083_v55 = vadd.f32 %v13828_v41, %v19881_v0  ;;  %v13829_v43 = vpop.f32.mrb[90].mxu0  ;;  %15622 = vmatpush3.bf16.xpose.msra.mxu1 %v20079_v23  ;;  %v24443_v0 = vand.u32 4294901760, %v20090_v47  ;;  %v17567_v41 = vld [vmem:[%s24095_s5 + $0x38] sm:$0xff]  ;;  %v24441_v52 = vand.u32 4294901760, %v20104_v39  ;;  %v25296_v23 = vand.u32 4294901760, %v19939_v40 }
 0x6f2   : > { %v13830_v15 = vpop.f32.mrb[91].mxu0 }
 0x6f3   : > { %v13831_v36 = vadd.f32 %v13830_v15, %v13829_v43  ;;  %v20110_v43 = vsel %vm4676_vm5, %v17567_v41, 0  ;;  %v20121_v11 = vpack.c.bf16 %v24442_v57, %v24443_v0 }
 0x6f4   : > { %v24440_v25 = vand.u32 4294901760, %v20110_v43 }
 0x6f5   : > { %v20113_v15 = vadd.f32 %v13831_v36, %v19886_v49  ;;  %v13832_v9 = vpop.f32.mrb[92].mxu0  ;;  %25281 = vst [vmem:[#allocation39_spill] sm:$0xff] %v20121_v11  ;;  %15624 = vmatprep.subr.bf16.mxu1 %v20121_v11 }
 0x6f6   : > { %v13833_v35 = vpop.f32.mrb[93].mxu0  ;;  %v20127_v41 = vpack.c.bf16 %v24440_v25, %v24441_v52  ;;  %v17569_v25 = vld [vmem:[%s24095_s5 + $0xc8] sm:$0xff] }
 0x6f7   : > { %v13834_v22 = vadd.f32 %v13833_v35, %v13832_v9  ;;  %v17568_v35 = vld [vmem:[%s24095_s5 + $0xc0] sm:$0xff]  ;;  %v20144_v52 = vsel %vm4676_vm5, %v17569_v25, 0 }
 0x6f8   : > { %25282 = vst [vmem:[#allocation136_spill] sm:$0xff] %v20127_v41  ;;  %v20138_v9 = vsel %vm4676_vm5, %v17568_v35, 0  ;;  %v17571_v35 = vld [vmem:[%s24095_s5 + $0x48] sm:$0xff] }
 0x6f9   : > { %v20131_v49 = vadd.f32 %v13834_v22, %v19891_v8  ;;  %v13835_v36 = vpop.f32.mrb[94].mxu0  ;;  %15626 = vmatpush3.bf16.xpose.msra.mxu1 %v20127_v41  ;;  %v24453_v8 = vand.u32 4294901760, %v20138_v9  ;;  %v24452_v22 = vand.u32 4294901760, %v20144_v52  ;;  %v20158_v57 = vsel %vm4676_vm5, %v17571_v35, 0 }
 0x6fa   : > { %v13836_v17 = vpop.f32.mrb[95].mxu0  ;;  %v24450_v14 = vand.u32 4294901760, %v20158_v57 }
 0x6fb   : > { %v13837_v34 = vadd.f32 %v13836_v17, %v13835_v36  ;;  %v17570_v17 = vld [vmem:[%s24095_s5 + $0x40] sm:$0xff] }
 0x6fc   : > { %v20152_v36 = vsel %vm4676_vm5, %v17570_v17, 0  ;;  %v20169_v17 = vpack.c.bf16 %v24452_v22, %v24453_v8 }
 0x6fd   : > { %v20161_v25 = vadd.f32 %v13837_v34, %v19896_v61  ;;  %v13838_v0 = vpop.f32.mrb[96].mxu0  ;;  %v24451_v4 = vand.u32 4294901760, %v20152_v36 }
 0x6fe   : > { %v13839_v24 = vpop.f32.mrb[97].mxu0  ;;  %25283 = vst [vmem:[#allocation5_spill] sm:$0xff] %v20169_v17  ;;  %15628 = vmatprep.subr.bf16.mxu1 %v20169_v17 }
 0x6ff   : > { %v13840_v33 = vadd.f32 %v13839_v24, %v13838_v0  ;;  %v20175_v35 = vpack.c.bf16 %v24450_v14, %v24451_v4  ;;  %v17572_v24 = vld [vmem:[%s24095_s5 + $0xd0] sm:$0xff]  ;;  %v17573_v14 = vld [vmem:[%s24095_s5 + $0xd8] sm:$0xff] }
 0x700   : > { %v20186_v0 = vsel %vm4676_vm5, %v17572_v24, 0  ;;  %v20192_v4 = vsel %vm4676_vm5, %v17573_v14, 0  ;;  %v17575_v24 = vld [vmem:[%s24095_s5 + $0x58] sm:$0xff] }
 0x701   : > { %25284 = vst [vmem:[#allocation140_spill] sm:$0xff] %v20175_v35  ;;  %v20179_v61 = vadd.f32 %v13840_v33, %v19901_v5  ;;  %v13873_v34 = vpop.f32.mrb[98].mxu0  ;;  %15630 = vmatpush3.bf16.xpose.msra.mxu1 %v20175_v35  ;;  %v20206_v22 = vsel %vm4676_vm5, %v17575_v24, 0  ;;  %v25285_v37 = vand.u32 4294901760, %v20186_v0 }
 0x702   : > { %v13874_v59 = vpop.f32.mrb[99].mxu0  ;;  %v24459_v33 = vand.u32 4294901760, %v20206_v22 }
 0x703   : > { %v13875_v38 = vadd.f32 %v13874_v59, %v13873_v34  ;;  %v17574_v59 = vld [vmem:[%s24095_s5 + $0x50] sm:$0xff] }
 0x704   : > { %v20200_v34 = vsel %vm4676_vm5, %v17574_v59, 0  ;;  %v25286_v59 = vand.u32 4294901760, %v20192_v4 }
 0x705   : > { %v20209_v14 = vadd.f32 %v13875_v38, %v19906_v18  ;;  %v13876_v8 = vpop.f32.mrb[100].mxu0  ;;  %v24460_v13 = vand.u32 4294901760, %v20200_v34 }
 0x706   : > { %v13877_v5 = vpop.f32.mrb[101].mxu0  ;;  %v20217_v48 = vpack.c.bf16 %v25286_v59, %v25285_v37  ;;  %v17576_v37 = vld [vmem:[%s24095_s5 + $0xe0] sm:$0xff] }
 0x707   : > { %v13878_v50 = vadd.f32 %v13877_v5, %v13876_v8  ;;  %v20223_v24 = vpack.c.bf16 %v24459_v33, %v24460_v13  ;;  %v20234_v8 = vsel %vm4676_vm5, %v17576_v37, 0  ;;  %v17577_v5 = vld [vmem:[%s24095_s5 + $0xe8] sm:$0xff] }
 0x708   : > { %25287 = vst [vmem:[#allocation145_spill] sm:$0xff] %v20217_v48  ;;  %15632 = vmatprep.subr.bf16.mxu1 %v20217_v48  ;;  %v20240_v59 = vsel %vm4676_vm5, %v17577_v5, 0  ;;  %v17579_v37 = vld [vmem:[%s24095_s5 + $0x68] sm:$0xff] }
 0x709   : > { %25288 = vst [vmem:[#allocation4_spill] sm:$0xff] %v20223_v24  ;;  %v20227_v18 = vadd.f32 %v13878_v50, %v19911_v29  ;;  %v13879_v38 = vpop.f32.mrb[102].mxu0  ;;  %15634 = vmatpush3.bf16.xpose.msra.mxu1 %v20223_v24  ;;  %v20254_v33 = vsel %vm4676_vm5, %v17579_v37, 0  ;;  %v25289_v24 = vand.u32 4294901760, %v20234_v8 }
 0x70a   : > { %v13880_v27 = vpop.f32.mrb[103].mxu0  ;;  %v24472_v50 = vand.u32 4294901760, %v20254_v33 }
 0x70b   : > { %v13881_v26 = vadd.f32 %v13880_v27, %v13879_v38  ;;  %v17578_v27 = vld [vmem:[%s24095_s5 + $0x60] sm:$0xff] }
 0x70c   : > { %v20248_v38 = vsel %vm4676_vm5, %v17578_v27, 0  ;;  %v25290_v27 = vand.u32 4294901760, %v20240_v59 }
 0x70d   : > { %v20257_v5 = vadd.f32 %v13881_v26, %v19916_v6  ;;  %v13882_v13 = vpop.f32.mrb[104].mxu0  ;;  %v24473_v29 = vand.u32 4294901760, %v20248_v38 }
 0x70e   : > { %v13883_v10 = vpop.f32.mrb[105].mxu0  ;;  %v20265_v48 = vpack.c.bf16 %v25290_v27, %v25289_v24  ;;  %v17581_v24 = vld [vmem:[%s24095_s5 + $0xf8] sm:$0xff] }
 0x70f   : > { %v13884_v35 = vadd.f32 %v13883_v10, %v13882_v13  ;;  %v20271_v37 = vpack.c.bf16 %v24472_v50, %v24473_v29  ;;  %v17580_v10 = vld [vmem:[%s24095_s5 + $0xf0] sm:$0xff]  ;;  %v20288_v27 = vsel %vm4676_vm5, %v17581_v24, 0 }
 0x710   : > { %25291 = vst [vmem:[#allocation150_spill] sm:$0xff] %v20265_v48  ;;  %15636 = vmatprep.subr.bf16.mxu1 %v20265_v48  ;;  %v20282_v13 = vsel %vm4676_vm5, %v17580_v10, 0  ;;  %v17583_v10 = vld [vmem:[%s24095_s5 + $0x78] sm:$0xff] }
 0x711   : > { %25292 = vst [vmem:[#allocation148_spill] sm:$0xff] %v20271_v37  ;;  %v20275_v26 = vadd.f32 %v13884_v35, %v19921_v53  ;;  %v13885_v6 = vpop.f32.mrb[106].mxu0  ;;  %15638 = vmatpush3.bf16.xpose.msra.mxu1 %v20271_v37  ;;  %v20302_v50 = vsel %vm4676_vm5, %v17583_v10, 0  ;;  %v25293_v48 = vand.u32 4294901760, %v20282_v13  ;;  %v20318_v10 = vsub.f32 %v19939_v40, %v25296_v23 }
 0x712   : > { %v13886_v17 = vpop.f32.mrb[107].mxu0  ;;  %v25300_v19 = vand.u32 4294901760, %v20302_v50  ;;  %v25303_v40 = vand.u32 4294901760, %v19959_v21 }
 0x713   : > { %v13887_v41 = vadd.f32 %v13886_v17, %v13885_v6  ;;  %v17582_v17 = vld [vmem:[%s24095_s5 + $0x70] sm:$0xff] }
 0x714   : > { %v20296_v6 = vsel %vm4676_vm5, %v17582_v17, 0  ;;  %v25294_v17 = vand.u32 4294901760, %v20288_v27  ;;  %v20339_v23 = vsub.f32 %v19959_v21, %v25303_v40 }
 0x715   : > { %v20305_v24 = vadd.f32 %v13887_v41, %v19926_v31  ;;  %v13888_v29 = vpop.f32.mrb[108].mxu0  ;;  %v25297_v31 = vand.u32 4294901760, %v19945_v28  ;;  %v25299_v53 = vand.u32 4294901760, %v20296_v6 }
 0x716   : > { %v13889_v37 = vpop.f32.mrb[109].mxu0  ;;  %v20313_v11 = vpack.c.bf16 %v25294_v17, %v25293_v48  ;;  %v25302_v48 = vand.u32 4294901760, %v19953_v60 }
 0x717   : > { %v20323_v41 = vsub.f32 %v19945_v28, %v25297_v31  ;;  %v13890_v35 = vadd.f32 %v13889_v37, %v13888_v29  ;;  %v20329_v56 = vpack.c.bf16 %v25300_v19, %v25299_v53  ;;  %v24496_v28 = vand.u32 4294901760, %v20318_v10 }
 0x718   : > { %25295 = vst [vmem:[#allocation66_spill] sm:$0xff] %v20313_v11  ;;  %v20334_v17 = vsub.f32 %v19953_v60, %v25302_v48  ;;  %15640 = vmatprep.subr.bf16.mxu1 %v20313_v11 }
 0x719   : > { %25298 = vst [vmem:[#allocation67_spill] sm:$0xff] %v20323_v41  ;;  %25301 = vst [vmem:[#allocation69_spill] sm:$0xff] %v20329_v56  ;;  %v24497_v29 = vand.u32 4294901760, %v20323_v41  ;;  %v20345_v37 = vadd.f32 %v13890_v35, %v19931_v7  ;;  %v13891_v19 = vpop.f32.mrb[110].mxu0  ;;  %15642 = vmatpush3.bf16.xpose.msra.mxu1 %v20329_v56  ;;  %v5210_v60 = vsub.f32 %v20318_v10, %v24496_v28  ;;  %v25306_v28 = vand.u32 4294901760, %v19997_v32 }
 0x71a   : > { %v13892_v53 = vpop.f32.mrb[111].mxu0 }
 0x71b   : > { %v5217_v21 = vsub.f32 %v20323_v41, %v24497_v29  ;;  %v13893_v31 = vadd.f32 %v13892_v53, %v13891_v19  ;;  %v5211_v48 = vand.u32 4294901760, %v5210_v60  ;;  %v20367_v29 = vsub.f32 %v19997_v32, %v25306_v28 }
 0x71c   : > { %v25310_v53 = vand.u32 4294901760, %v20011_v12 }
 0x71d   : > { %v5218_v40 = vand.u32 4294901760, %v5217_v21  ;;  %v20355_v11 = vadd.f32 %v13893_v31, %v19962_v20  ;;  %v13894_v7 = vpop.f32.mrb[112].mxu0  ;;  %25307 = vst [vmem:[#allocation72_spill] sm:$0xff] %v20367_v29  ;;  %v25308_v20 = vand.u32 4294901760, %v20005_v51 }
 0x71e   : > { %v13895_v35 = vpop.f32.mrb[113].mxu0  ;;  %v20378_v60 = vsub.f32 %v20011_v12, %v25310_v53  ;;  %v25314_v12 = vand.u32 4294901760, %v20048_v62 }
 0x71f   : > { %v20357_v30 = vpack.c.bf16 %v5218_v40, %v5211_v48  ;;  %v13896_v56 = vadd.f32 %v13895_v35, %v13894_v7  ;;  %v20373_v19 = vsub.f32 %v20005_v51, %v25308_v20  ;;  %v25312_v51 = vand.u32 4294901760, %v20042_v16 }
 0x720   : > { %25311 = vst [vmem:[#allocation41_spill] sm:$0xff] %v20378_v60  ;;  %v20394_v35 = vsub.f32 %v20048_v62, %v25314_v12 }
 0x721   : > { %25304 = vst [vmem:[#allocation70_spill] sm:$0xff] %v20357_v30  ;;  %15644 = vmatprep.subr.bf16.mxu1 %v20357_v30  ;;  %25309 = vst [vmem:[#allocation73_spill] sm:$0xff] %v20373_v19  ;;  %v20381_v42 = vadd.f32 %v13896_v56, %v19982_v3  ;;  %v13897_v1 = vpop.f32.mrb[114].mxu0  ;;  %v20389_v7 = vsub.f32 %v20042_v16, %v25312_v51  ;;  %v25315_v3 = vand.u32 4294901760, %v20056_v63 }
 0x722   : > { %v13898_v21 = vpop.f32.mrb[115].mxu0 }
 0x723   : > { %v13899_v31 = vadd.f32 %v13898_v21, %v13897_v1  ;;  %25313 = vst [vmem:[#allocation42_spill] sm:$0xff] %v20389_v7  ;;  %v20399_v56 = vsub.f32 %v20056_v63, %v25315_v3  ;;  %v25317_v63 = vand.u32 4294901760, %v20090_v47 }
 0x725   : > { %v20384_v32 = vadd.f32 %v13899_v31, %v20014_v46  ;;  %v13900_v28 = vpop.f32.mrb[116].mxu0  ;;  %v25316_v46 = vand.u32 4294901760, %v20062_v2  ;;  %v20415_v51 = vsub.f32 %v20090_v47, %v25317_v63 }
 0x726   : > { %v13901_v48 = vpop.f32.mrb[117].mxu0 }
 0x727   : > { %v13902_v40 = vadd.f32 %v13901_v48, %v13900_v28  ;;  %v20404_v20 = vsub.f32 %v20062_v2, %v25316_v46  ;;  %v25318_v2 = vand.u32 4294901760, %v20096_v54 }
 0x729   : > { %v20407_v53 = vadd.f32 %v13902_v40, %v20034_v44  ;;  %v13903_v16 = vpop.f32.mrb[118].mxu0  ;;  %v20420_v12 = vsub.f32 %v20096_v54, %v25318_v2  ;;  %v25319_v44 = vand.u32 4294901760, %v20104_v39 }
 0x72a   : > { %v13904_v1 = vpop.f32.mrb[119].mxu0 }
 0x72b   : > { %v13905_v21 = vadd.f32 %v13904_v1, %v13903_v16  ;;  %v20425_v40 = vsub.f32 %v20104_v39, %v25319_v44  ;;  %v25321_v39 = vand.u32 4294901760, %v20138_v9 }
 0x72d   : > { %v20410_v31 = vadd.f32 %v13905_v21, %v20065_v58  ;;  %v13906_v62 = vpop.f32.mrb[120].mxu0  ;;  %v25320_v58 = vand.u32 4294901760, %v20110_v43  ;;  %v20441_v63 = vsub.f32 %v20138_v9, %v25321_v39 }
 0x72e   : > { %v13907_v28 = vpop.f32.mrb[121].mxu0 }
 0x72f   : > { %v13908_v48 = vadd.f32 %v13907_v28, %v13906_v62  ;;  %v20430_v3 = vsub.f32 %v20110_v43, %v25320_v58  ;;  %v25322_v43 = vand.u32 4294901760, %v20144_v52 }
 0x731   : > { %v20433_v46 = vadd.f32 %v13908_v48, %v20083_v55  ;;  %v13909_v47 = vpop.f32.mrb[122].mxu0  ;;  %v20446_v2 = vsub.f32 %v20144_v52, %v25322_v43  ;;  %v25323_v55 = vand.u32 4294901760, %v20152_v36 }
 0x732   : > { %v13910_v16 = vpop.f32.mrb[123].mxu0 }
 0x733   : > { %v13911_v1 = vadd.f32 %v13910_v16, %v13909_v47  ;;  %v20451_v48 = vsub.f32 %v20152_v36, %v25323_v55  ;;  %v25325_v36 = vand.u32 4294901760, %v20186_v0 }
 0x735   : > { %v20436_v21 = vadd.f32 %v13911_v1, %v20113_v15  ;;  %v13912_v54 = vpop.f32.mrb[124].mxu0  ;;  %v25324_v15 = vand.u32 4294901760, %v20158_v57  ;;  %v20467_v39 = vsub.f32 %v20186_v0, %v25325_v36 }
 0x736   : > { %v13913_v62 = vpop.f32.mrb[125].mxu0 }
 0x737   : > { %v13914_v28 = vadd.f32 %v13913_v62, %v13912_v54  ;;  %v20456_v44 = vsub.f32 %v20158_v57, %v25324_v15  ;;  %v25326_v57 = vand.u32 4294901760, %v20192_v4 }
 0x739   : > { %v20459_v58 = vadd.f32 %v13914_v28, %v20131_v49  ;;  %v13915_v9 = vpop.f32.mrb[126].mxu0  ;;  %v20472_v43 = vsub.f32 %v20192_v4, %v25326_v57  ;;  %v25327_v49 = vand.u32 4294901760, %v20200_v34 }
 0x73a   : > { %v13916_v47 = vpop.f32.mrb[127].mxu0 }
 0x73b   : > { %v13917_v16 = vadd.f32 %v13916_v47, %v13915_v9  ;;  %v20477_v28 = vsub.f32 %v20200_v34, %v25327_v49  ;;  %v25329_v34 = vand.u32 4294901760, %v20234_v8 }
 0x73d   : > { %v20462_v1 = vadd.f32 %v13917_v16, %v20161_v25  ;;  %v13918_v52 = vpop.f32.mrb[128].mxu0  ;;  %v25328_v25 = vand.u32 4294901760, %v20206_v22  ;;  %v20493_v36 = vsub.f32 %v20234_v8, %v25329_v34 }
 0x73e   : > { %v13919_v54 = vpop.f32.mrb[129].mxu0 }
 0x73f   : > { %v13920_v62 = vadd.f32 %v13919_v54, %v13918_v52  ;;  %v20482_v55 = vsub.f32 %v20206_v22, %v25328_v25  ;;  %v25330_v22 = vand.u32 4294901760, %v20240_v59 }
 0x741   : > { %v20485_v15 = vadd.f32 %v13920_v62, %v20179_v61  ;;  %v13953_v0 = vpop.f32.mrb[130].mxu0  ;;  %v20498_v57 = vsub.f32 %v20240_v59, %v25330_v22  ;;  %v25331_v61 = vand.u32 4294901760, %v20248_v38 }
 0x742   : > { %v13954_v9 = vpop.f32.mrb[131].mxu0 }
 0x743   : > { %v13955_v47 = vadd.f32 %v13954_v9, %v13953_v0  ;;  %v20503_v62 = vsub.f32 %v20248_v38, %v25331_v61  ;;  %v25333_v38 = vand.u32 4294901760, %v20282_v13 }
 0x745   : > { %v20488_v16 = vadd.f32 %v13955_v47, %v20209_v14  ;;  %v13956_v4 = vpop.f32.mrb[132].mxu0  ;;  %v25332_v14 = vand.u32 4294901760, %v20254_v33  ;;  %v20519_v34 = vsub.f32 %v20282_v13, %v25333_v38 }
 0x746   : > { %v13957_v52 = vpop.f32.mrb[133].mxu0 }
 0x747   : > { %v13958_v54 = vadd.f32 %v13957_v52, %v13956_v4  ;;  %v20508_v49 = vsub.f32 %v20254_v33, %v25332_v14  ;;  %v25334_v33 = vand.u32 4294901760, %v20288_v27 }
 0x749   : > { %v20511_v25 = vadd.f32 %v13958_v54, %v20227_v18  ;;  %v13959_v8 = vpop.f32.mrb[134].mxu0  ;;  %v20524_v22 = vsub.f32 %v20288_v27, %v25334_v33  ;;  %v25335_v18 = vand.u32 4294901760, %v20296_v6 }
 0x74a   : > { %v13960_v0 = vpop.f32.mrb[135].mxu0 }
 0x74b   : > { %v13961_v9 = vadd.f32 %v13960_v0, %v13959_v8  ;;  %v20529_v54 = vsub.f32 %v20296_v6, %v25335_v18 }
 0x74d   : > { %v20514_v47 = vadd.f32 %v13961_v9, %v20257_v5  ;;  %v13962_v59 = vpop.f32.mrb[136].mxu0  ;;  %v25336_v5 = vand.u32 4294901760, %v20302_v50 }
 0x74e   : > { %v13963_v4 = vpop.f32.mrb[137].mxu0 }
 0x74f   : > { %v13964_v52 = vadd.f32 %v13963_v4, %v13962_v59  ;;  %v20534_v61 = vsub.f32 %v20302_v50, %v25336_v5 }
 0x751   : > { %v20537_v14 = vadd.f32 %v13964_v52, %v20275_v26  ;;  %v13965_v13 = vpop.f32.mrb[138].mxu0 }
 0x752   : > { %v13966_v8 = vpop.f32.mrb[139].mxu0 }
 0x753   : > { %v13967_v0 = vadd.f32 %v13966_v8, %v13965_v13 }
 0x755   : > { %v20540_v9 = vadd.f32 %v13967_v0, %v20305_v24  ;;  %v13968_v27 = vpop.f32.mrb[140].mxu0 }
 0x756   : > { %v13969_v59 = vpop.f32.mrb[141].mxu0 }
 0x757   : > { %v13970_v4 = vadd.f32 %v13969_v59, %v13968_v27 }
 0x759   : > { %v20543_v6 = vadd.f32 %v13970_v4, %v20345_v37  ;;  %v13971_v38 = vpop.f32.mrb[142].mxu0 }
 0x75a   : > { %v13972_v33 = vpop.f32.mrb[143].mxu0 }
 0x75b   : > { %v13973_v18 = vadd.f32 %v13972_v33, %v13971_v38 }
 0x75d   : > { %v20546_v50 = vadd.f32 %v13973_v18, %v20355_v11  ;;  %v13974_v26 = vpop.f32.mrb[144].mxu0 }
 0x75e   : > { %v13975_v52 = vpop.f32.mrb[145].mxu0 }
 0x75f   : > { %v13976_v5 = vadd.f32 %v13975_v52, %v13974_v26 }
 0x761   : > { %v20549_v13 = vadd.f32 %v13976_v5, %v20381_v42  ;;  %v13977_v24 = vpop.f32.mrb[146].mxu0 }
 0x762   : > { %v13978_v8 = vpop.f32.mrb[147].mxu0 }
 0x763   : > { %v13979_v0 = vadd.f32 %v13978_v8, %v13977_v24 }
 0x765   : > { %v20552_v27 = vadd.f32 %v13979_v0, %v20384_v32  ;;  %v13980_v37 = vpop.f32.mrb[148].mxu0 }
 0x766   : > { %v13981_v59 = vpop.f32.mrb[149].mxu0 }
 0x767   : > { %v13982_v4 = vadd.f32 %v13981_v59, %v13980_v37 }
 0x769   : > { %v20555_v38 = vadd.f32 %v13982_v4, %v20407_v53  ;;  %v13983_v11 = vpop.f32.mrb[150].mxu0 }
 0x76a   : > { %v13984_v33 = vpop.f32.mrb[151].mxu0 }
 0x76b   : > { %v13985_v18 = vadd.f32 %v13984_v33, %v13983_v11 }
 0x76d   : > { %v20558_v26 = vadd.f32 %v13985_v18, %v20410_v31  ;;  %v13986_v42 = vpop.f32.mrb[152].mxu0 }
 0x76e   : > { %v13987_v52 = vpop.f32.mrb[153].mxu0 }
 0x76f   : > { %v13988_v5 = vadd.f32 %v13987_v52, %v13986_v42 }
 0x771   : > { %v20561_v24 = vadd.f32 %v13988_v5, %v20433_v46  ;;  %v13989_v32 = vpop.f32.mrb[154].mxu0 }
 0x772   : > { %v13990_v8 = vpop.f32.mrb[155].mxu0 }
 0x773   : > { %v13991_v0 = vadd.f32 %v13990_v8, %v13989_v32 }
 0x775   : > { %v20564_v37 = vadd.f32 %v13991_v0, %v20436_v21  ;;  %v13992_v53 = vpop.f32.mrb[156].mxu0 }
 0x776   : > { %v13993_v59 = vpop.f32.mrb[157].mxu0 }
 0x777   : > { %v13994_v4 = vadd.f32 %v13993_v59, %v13992_v53 }
 0x779   : > { %v20567_v11 = vadd.f32 %v13994_v4, %v20459_v58  ;;  %v13995_v31 = vpop.f32.mrb[158].mxu0 }
 0x77a   : > { %v13996_v33 = vpop.f32.mrb[159].mxu0 }
 0x77b   : > { %v13997_v18 = vadd.f32 %v13996_v33, %v13995_v31 }
 0x77d   : > { %v20570_v42 = vadd.f32 %v13997_v18, %v20462_v1  ;;  %v13998_v46 = vpop.f32.mrb[160].mxu0 }
 0x77e   : > { %v13999_v52 = vpop.f32.mrb[161].mxu0 }
 0x77f   : > { %v14000_v5 = vadd.f32 %v13999_v52, %v13998_v46 }
 0x781   : > { %v20573_v32 = vadd.f32 %v14000_v5, %v20485_v15  ;;  %v14033_v21 = vpop.f32.mrb[162].mxu0  ;;  %v24504_v5 = vand.u32 4294901760, %v20334_v17 }
 0x782   : > { %v14034_v8 = vpop.f32.mrb[163].mxu0 }
 0x783   : > { %v14035_v0 = vadd.f32 %v14034_v8, %v14033_v21 }
 0x785   : > { %v4520_v53 = vadd.f32 %v14035_v0, %v20488_v16  ;;  %v14036_v59 = vpop.f32.mrb[164].mxu0  ;;  %v24503_v16 = vand.u32 4294901760, %v20339_v23  ;;  %v24501_v0 = vand.u32 4294901760, %v20362_v45 }
 0x786   : > { %v14037_v58 = vpop.f32.mrb[165].mxu0 }
 0x787   : > { %v4628_v4 = vmax.f32 %v4520_v53, 1e-30  ;;  %v14038_v30 = vadd.f32 %v14037_v58, %v14036_v59  ;;  %v24502_v53 = vand.u32 4294901760, %v20367_v29  ;;  %v5098_v58 = vsub.f32 %v20334_v17, %v24504_v5 }
 0x789   : > { %17424 = vrcp.f32 %v4628_v4  ;;  %v4527_v31 = vadd.f32 %v14038_v30, %v20511_v25  ;;  %v14039_v1 = vpop.f32.mrb[166].mxu0  ;;  %v24505_v30 = vand.u32 4294901760, %v20373_v19  ;;  %v24508_v25 = vand.u32 4294901760, %v20378_v60 }
 0x78a   : > { %v14040_v33 = vpop.f32.mrb[167].mxu0  ;;  %v5105_v4 = vsub.f32 %v20339_v23, %v24503_v16 }
 0x78b   : > { %v4629_v18 = vmax.f32 %v4527_v31, 1e-30  ;;  %v14041_v41 = vadd.f32 %v14040_v33, %v14039_v1 }
 0x78d   : > { %17426 = vrcp.f32 %v4629_v18  ;;  %v4534_v15 = vadd.f32 %v14041_v41, %v20514_v47  ;;  %v14042_v46 = vpop.f32.mrb[168].mxu0  ;;  %v5224_v18 = vsub.f32 %v20362_v45, %v24501_v0 }
 0x78e   : > { %v14043_v52 = vpop.f32.mrb[169].mxu0 }
 0x78f   : > { %v4630_v21 = vmax.f32 %v4534_v15, 1e-30  ;;  %v14044_v8 = vadd.f32 %v14043_v52, %v14042_v46  ;;  %v5112_v46 = vsub.f32 %v20373_v19, %v24505_v30  ;;  %v5119_v52 = vsub.f32 %v20378_v60, %v24508_v25 }
 0x790   : > { %v5225_v25 = vand.u32 4294901760, %v5224_v18 }
 0x791   : > { %17428 = vrcp.f32 %v4630_v21  ;;  %v4541_v59 = vadd.f32 %v14044_v8, %v20537_v14  ;;  %v14045_v41 = vpop.f32.mrb[170].mxu0  ;;  %v5231_v14 = vsub.f32 %v20367_v29, %v24502_v53  ;;  %v5120_v60 = vand.u32 4294901760, %v5119_v52 }
 0x792   : > { %v14046_v47 = vpop.f32.mrb[171].mxu0 }
 0x793   : > { %v17425_v31 = vpop.eup %17424  ;;  %v4631_v1 = vmax.f32 %v4541_v59, 1e-30  ;;  %v14047_v33 = vadd.f32 %v14046_v47, %v14045_v41  ;;  %v5099_v47 = vand.u32 4294901760, %v5098_v58 }
 0x794   : > { %v4678_v15 = vsel %vm4676_vm5, %v17425_v31, 0  ;;  %v5106_v31 = vand.u32 4294901760, %v5105_v4 }
 0x795   : > { %17430 = vrcp.f32 %v4631_v1  ;;  %v4548_v21 = vadd.f32 %v14047_v33, %v20540_v9  ;;  %v14048_v8 = vpop.f32.mrb[172].mxu0  ;;  %v20605_v59 = vand.u32 4294901760, %v4678_v15  ;;  %v5232_v9 = vand.u32 4294901760, %v5231_v14 }
 0x796   : > { %v14049_v41 = vpop.f32.mrb[173].mxu0  ;;  %v5113_v33 = vand.u32 4294901760, %v5112_v46 }
 0x797   : > { %v17427_v16 = vpop.eup %17426  ;;  %v4632_v5 = vmax.f32 %v4548_v21, 1e-30  ;;  %v14050_v30 = vadd.f32 %v14049_v41, %v14048_v8  ;;  %v20610_v19 = vsub.f32 %v4678_v15, %v20605_v59  ;;  %v25339_v8 = vand.u32 4294901760, %v20389_v7 }
 0x798   : > { %v4681_v1 = vsel %vm4676_vm5, %v17427_v16, 0  ;;  %v25340_v16 = vand.u32 4294901760, %v20394_v35  ;;  %v20639_v29 = vpack.c.bf16 %v5232_v9, %v5225_v25 }
 0x799   : > { %25337 = vst [vmem:[#allocation43_spill] sm:$0xff] %v20610_v19  ;;  %17432 = vrcp.f32 %v4632_v5  ;;  %v4555_v58 = vadd.f32 %v14050_v30, %v20543_v6  ;;  %v14051_v4 = vpop.f32.mrb[174].mxu0  ;;  %v20615_v0 = vand.u32 4294901760, %v20610_v19  ;;  %v20617_v53 = vand.u32 4294901760, %v4681_v1 }
 0x79a   : > { %v14052_v21 = vpop.f32.mrb[175].mxu0  ;;  %v20622_v15 = vsub.f32 %v20389_v7, %v25339_v8  ;;  %v20627_v18 = vsub.f32 %v20394_v35, %v25340_v16  ;;  %v20636_v8 = vpack.c.bf16 %v5106_v31, %v5099_v47  ;;  %25343 = vst [vmem:[#allocation49_spill] sm:$0xff] %v20639_v29  ;;  %v20641_v16 = vpack.c.bf16 %v5120_v60, %v5113_v33 }
 0x79b   : > { %25338 = vst [vmem:[#allocation44_spill] sm:$0xff] %v20615_v0  ;;  %v17429_v30 = vpop.eup %17428  ;;  %v4633_v14 = vmax.f32 %v4555_v58, 1e-30  ;;  %v14053_v46 = vadd.f32 %v14052_v21, %v14051_v4  ;;  %v4921_v52 = vsub.f32 %v20610_v19, %v20615_v0  ;;  %v20634_v41 = vsub.f32 %v4681_v1, %v20617_v53 }
 0x79c   : > { %25342 = vst [vmem:[#allocation47_spill] sm:$0xff] %v20636_v8  ;;  %v4684_v7 = vsel %vm4676_vm5, %v17429_v30, 0  ;;  %25344 = vst [vmem:[#allocation50_spill] sm:$0xff] %v20641_v16  ;;  %v5239_v47 = vand.u32 4294901760, %v20622_v15  ;;  %v25346_v31 = vand.u32 4294901760, %v20399_v56  ;;  %v25347_v60 = vand.u32 4294901760, %v20404_v20 }
 0x79d   : > { %25341 = vst [vmem:[#allocation46_spill] sm:$0xff] %v20634_v41  ;;  %17434 = vrcp.f32 %v4633_v14  ;;  %v4562_v6 = vadd.f32 %v14053_v46, %v20546_v50  ;;  %v14054_v5 = vpop.f32.mrb[176].mxu0  ;;  %v4922_v58 = vand.u32 4294901760, %v4921_v52  ;;  %v20645_v4 = vand.u32 4294901760, %v20634_v41 }
 0x79e   : > { %v14055_v21 = vpop.f32.mrb[177].mxu0  ;;  %v20647_v0 = vand.u32 4294901760, %v4684_v7  ;;  %v5126_v25 = vsub.f32 %v20399_v56, %v25346_v31  ;;  %v5133_v1 = vsub.f32 %v20404_v20, %v25347_v60  ;;  %v5246_v14 = vand.u32 4294901760, %v20627_v18 }
 0x79f   : > { %25345 = vst [vmem:[#allocation52_spill] sm:$0xff] %v20645_v4  ;;  %v17431_v9 = vpop.eup %17430  ;;  %v4634_v50 = vmax.f32 %v4562_v6, 1e-30  ;;  %v14056_v33 = vadd.f32 %v14055_v21, %v14054_v5  ;;  %14113 = vmatprep.mubr.f32.mxu1 %v4922_v58  ;;  %v4932_v30 = vsub.f32 %v20634_v41, %v20645_v4  ;;  %v25352_v52 = vand.u32 4294901760, %v20420_v12 }
 0x7a0   : > { %14114 = vmatmul.mubr.f32.vlgmr.msra.gmra.mrb[34].mxu1 %v4922_v58  ;;  %v20660_v15 = vsub.f32 %v4684_v7, %v20647_v0  ;;  %v4687_v46 = vsel %vm4676_vm5, %v17431_v9, 0  ;;  %v5127_v7 = vand.u32 4294901760, %v5126_v25  ;;  %v5134_v9 = vand.u32 4294901760, %v5133_v1 }
 0x7a1   : > { %17436 = vrcp.f32 %v4634_v50  ;;  %v4569_v6 = vadd.f32 %v14056_v33, %v20549_v13  ;;  %v14057_v5 = vpop.f32.mrb[178].mxu0  ;;  %15646 = vmatpush3.bf16.xpose.msra.mxu1 %v20636_v8  ;;  %v4933_v21 = vand.u32 4294901760, %v4932_v30  ;;  %v20667_v60 = vand.u32 4294901760, %v4687_v46 }
 0x7a2   : > { %25348 = vst [vmem:[#allocation53_spill] sm:$0xff] %v20660_v15  ;;  %v14058_v18 = vpop.f32.mrb[179].mxu0  ;;  %v20670_v58 = vand.u32 4294901760, %v20660_v15  ;;  %15648 = vmatprep.subr.bf16.mxu1 %v20639_v29  ;;  %v25351_v25 = vand.u32 4294901760, %v20415_v51 }
 0x7a3   : > { %v17433_v31 = vpop.eup %17432  ;;  %v4635_v50 = vmax.f32 %v4569_v6, 1e-30  ;;  %v14059_v4 = vadd.f32 %v14058_v18, %v14057_v5  ;;  %14115 = vmatprep.mubr.f32.mxu1 %v4933_v21  ;;  %v20675_v13 = vsub.f32 %v4687_v46, %v20667_v60  ;;  %v5259_v6 = vsub.f32 %v20420_v12, %v25352_v52 }
 0x7a4   : > { %25349 = vst [vmem:[#allocation55_spill] sm:$0xff] %v20670_v58  ;;  %14116 = vmatmul.mubr.f32.gmra.mrb[36].mxu1 %v4933_v21  ;;  %v4943_v30 = vsub.f32 %v20660_v15, %v20670_v58  ;;  %v4690_v8 = vsel %vm4676_vm5, %v17433_v31, 0  ;;  %v5252_v1 = vsub.f32 %v20415_v51, %v25351_v25  ;;  %v20693_v31 = vpack.c.bf16 %v5246_v14, %v5239_v47 }
 0x7a5   : > { %25350 = vst [vmem:[#allocation56_spill] sm:$0xff] %v20675_v13  ;;  %17438 = vrcp.f32 %v4635_v50  ;;  %v4576_v46 = vadd.f32 %v14059_v4, %v20552_v27  ;;  %v14060_v5 = vpop.f32.mrb[180].mxu0  ;;  %v20689_v18 = vand.u32 4294901760, %v20675_v13  ;;  %v20691_v21 = vand.u32 4294901760, %v4690_v8 }
 0x7a6   : > { %v14061_v33 = vpop.f32.mrb[181].mxu0  ;;  %v4944_v29 = vand.u32 4294901760, %v4943_v30  ;;  %25354 = vst [vmem:[#allocation58_spill] sm:$0xff] %v20693_v31  ;;  %v20695_v58 = vpack.c.bf16 %v5134_v9, %v5127_v7  ;;  %v25356_v25 = vand.u32 4294901760, %v20425_v40  ;;  %v5253_v14 = vand.u32 4294901760, %v5252_v1 }
 0x7a7   : > { %25353 = vst [vmem:[#allocation57_spill] sm:$0xff] %v20689_v18  ;;  %v17435_v52 = vpop.eup %17434  ;;  %v4636_v50 = vmax.f32 %v4576_v46, 1e-30  ;;  %v14062_v27 = vadd.f32 %v14061_v33, %v14060_v5  ;;  %v4954_v4 = vsub.f32 %v20675_v13, %v20689_v18  ;;  %v20705_v41 = vsub.f32 %v4690_v8, %v20691_v21 }
 0x7a8   : > { %25355 = vst [vmem:[#allocation60_spill] sm:$0xff] %v20695_v58  ;;  %v20700_v15 = vsub.f32 %v20425_v40, %v25356_v25  ;;  %14117 = vmatprep.mubr.f32.mxu1 %v4944_v29  ;;  %v4693_v47 = vsel %vm4676_vm5, %v17435_v52, 0  ;;  %v5260_v7 = vand.u32 4294901760, %v5259_v6  ;;  %v25358_v9 = vand.u32 4294901760, %v20430_v3 }
 0x7a9   : > { %25357 = vst [vmem:[#allocation61_spill] sm:$0xff] %v20705_v41  ;;  %17440 = vrcp.f32 %v4636_v50  ;;  %v4583_v46 = vadd.f32 %v14062_v27, %v20555_v38  ;;  %14118 = vmatmul.mubr.f32.gmra.mrb[38].mxu1 %v4944_v29  ;;  %v14063_v33 = vpop.f32.mrb[182].mxu0  ;;  %v4955_v5 = vand.u32 4294901760, %v4954_v4  ;;  %v20715_v25 = vand.u32 4294901760, %v20705_v41 }
 0x7aa   : > { %v20711_v30 = vsub.f32 %v20430_v3, %v25358_v9  ;;  %15650 = vmatpush3.bf16.xpose.msra.mxu1 %v20641_v16  ;;  %v14064_v8 = vpop.f32.mrb[183].mxu0  ;;  %v20718_v52 = vand.u32 4294901760, %v4693_v47  ;;  %v5141_v1 = vand.u32 4294901760, %v20700_v15  ;;  %v25364_v9 = vand.u32 4294901760, %v20446_v2 }
 0x7ab   : > { %25359 = vst [vmem:[#allocation103_spill] sm:$0xff] %v20715_v25  ;;  %v17437_v50 = vpop.eup %17436  ;;  %v4637_v18 = vmax.f32 %v4583_v46, 1e-30  ;;  %v14065_v38 = vadd.f32 %v14064_v8, %v14063_v33  ;;  %14119 = vmatprep.mubr.f32.mxu1 %v4955_v5  ;;  %v4965_v29 = vsub.f32 %v20705_v41, %v20715_v25  ;;  %15652 = vmatprep.subr.bf16.mxu1 %v20693_v31  ;;  %v25365_v25 = vand.u32 4294901760, %v20451_v48 }
 0x7ac   : > { %v20728_v4 = vsub.f32 %v4693_v47, %v20718_v52  ;;  %v4696_v15 = vsel %vm4676_vm5, %v17437_v50, 0  ;;  %v5148_v6 = vand.u32 4294901760, %v20711_v30  ;;  %v20739_v47 = vpack.c.bf16 %v5260_v7, %v5253_v14 }
 0x7ad   : > { %17442 = vrcp.f32 %v4637_v18  ;;  %v4590_v46 = vadd.f32 %v14065_v38, %v20558_v26  ;;  %14120 = vmatmul.mubr.f32.gmra.mrb[40].mxu1 %v4955_v5  ;;  %v14066_v33 = vpop.f32.mrb[184].mxu0  ;;  %v4966_v8 = vand.u32 4294901760, %v4965_v29  ;;  %v20734_v16 = vand.u32 4294901760, %v4696_v15 }
 0x7ae   : > { %25360 = vst [vmem:[#allocation102_spill] sm:$0xff] %v20728_v4  ;;  %v14067_v31 = vpop.f32.mrb[185].mxu0  ;;  %v20737_v27 = vand.u32 4294901760, %v20728_v4  ;;  %25362 = vst [vmem:[#allocation108_spill] sm:$0xff] %v20739_v47  ;;  %v25363_v50 = vand.u32 4294901760, %v20441_v63  ;;  %v5273_v18 = vsub.f32 %v20446_v2, %v25364_v9  ;;  %v20753_v14 = vsub.f32 %v20451_v48, %v25365_v25 }
 0x7af   : > { %v17439_v26 = vpop.eup %17438  ;;  %v4638_v5 = vmax.f32 %v4590_v46, 1e-30  ;;  %v14068_v38 = vadd.f32 %v14067_v31, %v14066_v33  ;;  %14121 = vmatprep.mubr.f32.mxu1 %v4966_v8  ;;  %v20748_v29 = vsub.f32 %v4696_v15, %v20734_v16  ;;  %v25366_v41 = vand.u32 4294901760, %v20456_v44 }
 0x7b0   : > { %25361 = vst [vmem:[#allocation19_spill] sm:$0xff] %v20737_v27  ;;  %v5266_v30 = vsub.f32 %v20441_v63, %v25363_v50  ;;  %v4976_v7 = vsub.f32 %v20728_v4, %v20737_v27  ;;  %v4699_v50 = vsel %vm4676_vm5, %v17439_v26, 0  ;;  %v5274_v13 = vand.u32 4294901760, %v5273_v18 }
 0x7b1   : > { %v20761_v9 = vsub.f32 %v20456_v44, %v25366_v41  ;;  %17444 = vrcp.f32 %v4638_v5  ;;  %v4597_v15 = vadd.f32 %v14068_v38, %v20561_v24  ;;  %14122 = vmatmul.mubr.f32.gmra.mrb[42].mxu1 %v4966_v8  ;;  %v14069_v46 = vpop.f32.mrb[186].mxu0  ;;  %v20766_v25 = vand.u32 4294901760, %v20748_v29 }
 0x7b2   : > { %v20768_v33 = vand.u32 4294901760, %v4699_v50  ;;  %15654 = vmatpush3.bf16.xpose.msra.mxu1 %v20695_v58  ;;  %v14070_v26 = vpop.f32.mrb[187].mxu0  ;;  %v4977_v27 = vand.u32 4294901760, %v4976_v7  ;;  %v5267_v4 = vand.u32 4294901760, %v5266_v30  ;;  %v20778_v38 = vpack.c.bf16 %v5148_v6, %v5141_v1 }
 0x7b3   : > { %25367 = vst [vmem:[#allocation113_spill] sm:$0xff] %v20766_v25  ;;  %v17441_v19 = vpop.eup %17440  ;;  %v4639_v31 = vmax.f32 %v4597_v15, 1e-30  ;;  %v14071_v5 = vadd.f32 %v14070_v26, %v14069_v46  ;;  %v4987_v24 = vsub.f32 %v20748_v29, %v20766_v25  ;;  %15656 = vmatprep.subr.bf16.mxu1 %v20739_v47  ;;  %v5155_v30 = vand.u32 4294901760, %v20753_v14 }
 0x7b4   : > { %v20776_v8 = vsub.f32 %v4699_v50, %v20768_v33  ;;  %14123 = vmatprep.mubr.f32.mxu1 %v4977_v27  ;;  %25369 = vst [vmem:[#allocation118_spill] sm:$0xff] %v20778_v38  ;;  %v4702_v7 = vsel %vm4676_vm5, %v17441_v19, 0  ;;  %v25370_v18 = vand.u32 4294901760, %v20467_v39  ;;  %v20791_v6 = vpack.c.bf16 %v5274_v13, %v5267_v4 }
 0x7b5   : > { %17446 = vrcp.f32 %v4639_v31  ;;  %v4604_v46 = vadd.f32 %v14071_v5, %v20564_v37  ;;  %14124 = vmatmul.mubr.f32.gmra.mrb[44].mxu1 %v4977_v27  ;;  %v14072_v26 = vpop.f32.mrb[188].mxu0  ;;  %v4988_v41 = vand.u32 4294901760, %v4987_v24  ;;  %v20789_v1 = vand.u32 4294901760, %v4702_v7 }
 0x7b6   : > { %25368 = vst [vmem:[#allocation112_spill] sm:$0xff] %v20776_v8  ;;  %v5280_v15 = vsub.f32 %v20467_v39, %v25370_v18  ;;  %v20787_v50 = vand.u32 4294901760, %v20776_v8  ;;  %v14073_v47 = vpop.f32.mrb[189].mxu0  ;;  %25372 = vst [vmem:[#allocation122_spill] sm:$0xff] %v20791_v6  ;;  %v5162_v19 = vand.u32 4294901760, %v20761_v9  ;;  %v25373_v14 = vand.u32 4294901760, %v20472_v43 }
 0x7b7   : > { %v17443_v31 = vpop.eup %17442  ;;  %v4640_v58 = vmax.f32 %v4604_v46, 1e-30  ;;  %v14074_v37 = vadd.f32 %v14073_v47, %v14072_v26  ;;  %14125 = vmatprep.mubr.f32.mxu1 %v4988_v41  ;;  %v20801_v24 = vsub.f32 %v4702_v7, %v20789_v1 }
 0x7b8   : > { %25371 = vst [vmem:[#allocation116_spill] sm:$0xff] %v20787_v50  ;;  %v5287_v18 = vsub.f32 %v20472_v43, %v25373_v14  ;;  %v4998_v27 = vsub.f32 %v20776_v8, %v20787_v50  ;;  %v4705_v13 = vsel %vm4676_vm5, %v17443_v31, 0  ;;  %v5281_v4 = vand.u32 4294901760, %v5280_v15 }
 0x7b9   : > { %25374 = vst [vmem:[#allocation121_spill] sm:$0xff] %v20801_v24  ;;  %17448 = vrcp.f32 %v4640_v58  ;;  %v4611_v14 = vadd.f32 %v14074_v37, %v20567_v11  ;;  %14126 = vmatmul.mubr.f32.gmra.mrb[46].mxu1 %v4988_v41  ;;  %v14075_v46 = vpop.f32.mrb[190].mxu0  ;;  %v20806_v26 = vand.u32 4294901760, %v4705_v13  ;;  %v20810_v5 = vand.u32 4294901760, %v20801_v24 }
 0x7ba   : > { %v4999_v47 = vand.u32 4294901760, %v4998_v27  ;;  %15658 = vmatpush3.bf16.xpose.msra.mxu1 %v20778_v38  ;;  %v14076_v50 = vpop.f32.mrb[191].mxu0  ;;  %v5288_v7 = vand.u32 4294901760, %v5287_v18  ;;  %v20815_v11 = vpack.c.bf16 %v5162_v19, %v5155_v30  ;;  %v25378_v27 = vand.u32 4294901760, %v20477_v28 }
 0x7bb   : > { %25375 = vst [vmem:[#allocation126_spill] sm:$0xff] %v20806_v26  ;;  %25376 = vst [vmem:[#allocation125_spill] sm:$0xff] %v20810_v5  ;;  %v17445_v9 = vpop.eup %17444  ;;  %v4641_v58 = vmax.f32 %v4611_v14, 1e-30  ;;  %v14077_v25 = vadd.f32 %v14076_v50, %v14075_v46  ;;  %15660 = vmatprep.subr.bf16.mxu1 %v20791_v6  ;;  %v20818_v41 = vsub.f32 %v4705_v13, %v20806_v26  ;;  %v25379_v14 = vand.u32 4294901760, %v20482_v55 }
 0x7bc   : > { %14127 = vmatprep.mubr.f32.mxu1 %v4999_v47  ;;  %25377 = vst [vmem:[#allocation130_spill] sm:$0xff] %v20815_v11  ;;  %v5009_v37 = vsub.f32 %v20801_v24, %v20810_v5  ;;  %v4708_v18 = vsel %vm4676_vm5, %v17445_v9, 0  ;;  %v5168_v15 = vsub.f32 %v20477_v28, %v25378_v27  ;;  %v20835_v6 = vpack.c.bf16 %v5288_v7, %v5281_v4 }
 0x7bd   : > { %v5175_v50 = vsub.f32 %v20482_v55, %v25379_v14  ;;  %17450 = vrcp.f32 %v4641_v58  ;;  %v4618_v30 = vadd.f32 %v14077_v25, %v20570_v42  ;;  %14128 = vmatmul.mubr.f32.gmra.mrb[48].mxu1 %v4999_v47  ;;  %v14078_v19 = vpop.f32.mrb[192].mxu0  ;;  %v20831_v13 = vand.u32 4294901760, %v20818_v41 }
 0x7be   : > { %v20833_v46 = vand.u32 4294901760, %v4708_v18  ;;  %v14079_v31 = vpop.f32.mrb[193].mxu0  ;;  %v5010_v9 = vand.u32 4294901760, %v5009_v37  ;;  %25382 = vst [vmem:[#allocation133_spill] sm:$0xff] %v20835_v6  ;;  %v25383_v27 = vand.u32 4294901760, %v20493_v36  ;;  %v25384_v14 = vand.u32 4294901760, %v20498_v57 }
 0x7bf   : > { %25380 = vst [vmem:[#allocation129_spill] sm:$0xff] %v20831_v13  ;;  %v17447_v42 = vpop.eup %17446  ;;  %v4642_v25 = vmax.f32 %v4618_v30, 1e-30  ;;  %v14080_v47 = vadd.f32 %v14079_v31, %v14078_v19  ;;  %v5020_v5 = vsub.f32 %v20818_v41, %v20831_v13  ;;  %v5169_v4 = vand.u32 4294901760, %v5168_v15 }
 0x7c0   : > { %25381 = vst [vmem:[#allocation134_spill] sm:$0xff] %v20833_v46  ;;  %v5294_v38 = vsub.f32 %v20493_v36, %v25383_v27  ;;  %v5301_v58 = vsub.f32 %v20498_v57, %v25384_v14  ;;  %v20846_v24 = vsub.f32 %v4708_v18, %v20833_v46  ;;  %14129 = vmatprep.mubr.f32.mxu1 %v5010_v9  ;;  %v5176_v7 = vand.u32 4294901760, %v5175_v50 }
 0x7c1   : > { %v4711_v37 = vsel %vm4676_vm5, %v17447_v42, 0  ;;  %v24558_v27 = vand.u32 4294901760, %v20503_v62  ;;  %17452 = vrcp.f32 %v4642_v25  ;;  %v4625_v8 = vadd.f32 %v14080_v47, %v20573_v32  ;;  %14130 = vmatmul.mubr.f32.gmra.mrb[50].mxu1 %v5010_v9 }
 0x7c2   : > { %v5021_v14 = vand.u32 4294901760, %v5020_v5  ;;  %v20852_v31 = vand.u32 4294901760, %v20846_v24  ;;  %15662 = vmatpush3.bf16.xpose.msra.mxu1 %v20815_v11  ;;  %v20855_v30 = vand.u32 4294901760, %v4711_v37  ;;  %v5295_v18 = vand.u32 4294901760, %v5294_v38 }
 0x7c3   : > { %v5302_v19 = vand.u32 4294901760, %v5301_v58  ;;  %v17449_v50 = vpop.eup %17448  ;;  %v4643_v42 = vmax.f32 %v4625_v8, 1e-30  ;;  %15664 = vmatprep.subr.bf16.mxu1 %v20835_v6  ;;  %v5182_v8 = vsub.f32 %v20503_v62, %v24558_v27  ;;  %v20872_v15 = vpack.c.bf16 %v5176_v7, %v5169_v4 }
 0x7c4   : > { %25385 = vst [vmem:[#allocation138_spill] sm:$0xff] %v20852_v31  ;;  %25386 = vst [vmem:[#allocation137_spill] sm:$0xff] %v20855_v30  ;;  %14131 = vmatprep.mubr.f32.mxu1 %v5021_v14  ;;  %v5031_v25 = vsub.f32 %v20846_v24, %v20852_v31  ;;  %v20864_v9 = vsub.f32 %v4711_v37, %v20855_v30  ;;  %v4714_v38 = vsel %vm4676_vm5, %v17449_v50, 0  ;;  %v25391_v5 = vand.u32 4294901760, %v20508_v49 }
 0x7c5   : > { %17454 = vrcp.f32 %v4643_v42  ;;  %14132 = vmatmul.mubr.f32.gmra.mrb[52].mxu1 %v5021_v14  ;;  %v20867_v47 = vand.u32 4294901760, %v4714_v38  ;;  %25389 = vst [vmem:[#allocation147_spill] sm:$0xff] %v20872_v15  ;;  %v20883_v50 = vpack.c.bf16 %v5302_v19, %v5295_v18  ;;  %v25394_v42 = vand.u32 4294901760, %v20519_v34 }
 0x7c6   : > { %25387 = vst [vmem:[#allocation142_spill] sm:$0xff] %v20864_v9  ;;  %v5032_v58 = vand.u32 4294901760, %v5031_v25  ;;  %v20875_v32 = vand.u32 4294901760, %v20864_v9  ;;  %v5189_v37 = vsub.f32 %v20508_v49, %v25391_v5  ;;  %v25395_v4 = vand.u32 4294901760, %v20524_v22 }
 0x7c7   : > { %25388 = vst [vmem:[#allocation141_spill] sm:$0xff] %v20867_v47  ;;  %v17451_v6 = vpop.eup %17450  ;;  %v20881_v14 = vsub.f32 %v4714_v38, %v20867_v47  ;;  %25393 = vst [vmem:[#allocation152_spill] sm:$0xff] %v20883_v50  ;;  %v5308_v25 = vsub.f32 %v20519_v34, %v25394_v42  ;;  %v5183_v38 = vand.u32 4294901760, %v5182_v8 }
 0x7c8   : > { %25390 = vst [vmem:[#allocation146_spill] sm:$0xff] %v20875_v32  ;;  %14133 = vmatprep.mubr.f32.mxu1 %v5032_v58  ;;  %v5315_v7 = vsub.f32 %v20524_v22, %v25395_v4  ;;  %v5042_v27 = vsub.f32 %v20864_v9, %v20875_v32  ;;  %v4717_v5 = vsel %vm4676_vm5, %v17451_v6, 0  ;;  %v5190_v42 = vand.u32 4294901760, %v5189_v37 }
 0x7c9   : > { %25392 = vst [vmem:[#allocation153_spill] sm:$0xff] %v20881_v14  ;;  %14134 = vmatmul.mubr.f32.gmra.mrb[54].mxu1 %v5032_v58  ;;  %v20895_v11 = vand.u32 4294901760, %v20881_v14  ;;  %v20897_v18 = vand.u32 4294901760, %v4717_v5  ;;  %v5309_v58 = vand.u32 4294901760, %v5308_v25 }
 0x7ca   : > { %15666 = vmatpush3.bf16.xpose.msra.mxu1 %v20872_v15  ;;  %v5043_v19 = vand.u32 4294901760, %v5042_v27  ;;  %v5316_v8 = vand.u32 4294901760, %v5315_v7  ;;  %v20914_v31 = vpack.c.bf16 %v5190_v42, %v5183_v38 }
 0x7cb   : > { %25396 = vst [vmem:[#allocation157_spill] sm:$0xff] %v20895_v11  ;;  %25397 = vst [vmem:[#allocation156_spill] sm:$0xff] %v20897_v18  ;;  %v17453_v13 = vpop.eup %17452  ;;  %v5053_v32 = vsub.f32 %v20881_v14, %v20895_v11  ;;  %15668 = vmatprep.subr.bf16.mxu1 %v20883_v50  ;;  %v20906_v6 = vsub.f32 %v4717_v5, %v20897_v18  ;;  %v25400_v11 = vand.u32 4294901760, %v20529_v54  ;;  %v25401_v5 = vand.u32 4294901760, %v20534_v61 }
 0x7cc   : > { %14135 = vmatprep.mubr.f32.mxu1 %v5043_v19  ;;  %v4720_v15 = vsel %vm4676_vm5, %v17453_v13, 0  ;;  %25399 = vst [vmem:[#allocation163_spill] sm:$0xff] %v20914_v31 }
 0x7cd   : > { %14136 = vmatmul.mubr.f32.gmra.mrb[56].mxu1 %v5043_v19  ;;  %v5054_v27 = vand.u32 4294901760, %v5053_v32  ;;  %v20910_v37 = vand.u32 4294901760, %v20906_v6  ;;  %v20912_v4 = vand.u32 4294901760, %v4720_v15  ;;  %v5196_v50 = vsub.f32 %v20529_v54, %v25400_v11 }
 0x7ce   : > { %v5203_v25 = vsub.f32 %v20534_v61, %v25401_v5  ;;  %v20927_v19 = vpack.c.bf16 %v5316_v8, %v5309_v58 }
 0x7cf   : > { %25398 = vst [vmem:[#allocation162_spill] sm:$0xff] %v20912_v4  ;;  %v17455_v7 = vpop.eup %17454  ;;  %14137 = vmatprep.mubr.f32.mxu1 %v5054_v27  ;;  %v5064_v13 = vsub.f32 %v20906_v6, %v20910_v37  ;;  %v20925_v32 = vsub.f32 %v4720_v15, %v20912_v4  ;;  %v5197_v5 = vand.u32 4294901760, %v5196_v50 }
 0x7d0   : > { %25402 = vst [vmem:[#allocation164_spill] sm:$0xff] %v20927_v19  ;;  %v4723_v38 = vsel %vm4676_vm5, %v17455_v7, 0  ;;  %v5204_v9 = vand.u32 4294901760, %v5203_v25  ;;  %v25405_v25 = vld [vmem:[#allocation67_spill] sm:$0xff] }
 0x7d1   : > { %14138 = vmatmul.mubr.f32.gmra.mrb[58].mxu1 %v5054_v27  ;;  %v5065_v42 = vand.u32 4294901760, %v5064_v13  ;;  %v20931_v11 = vand.u32 4294901760, %v20925_v32  ;;  %v20933_v14 = vand.u32 4294901760, %v4723_v38  ;;  %v20951_v13 = vpack.c.bf16 %v25405_v25, %v20318_v10 }
 0x7d2   : > { %15670 = vmatpush3.bf16.xpose.msra.mxu1 %v20914_v31  ;;  %v20945_v7 = vpack.c.bf16 %v5204_v9, %v5197_v5  ;;  %v20958_v9 = vpack.c.bf16 %v20339_v23, %v20334_v17  ;;  %v25411_v5 = vld [vmem:[#allocation41_spill] sm:$0xff] }
 0x7d3   : > { %25403 = vst [vmem:[#allocation165_spill] sm:$0xff] %v20933_v14  ;;  %14139 = vmatprep.mubr.f32.mxu1 %v5065_v42  ;;  %v5075_v15 = vsub.f32 %v20925_v32, %v20931_v11  ;;  %15672 = vmatprep.subr.bf16.mxu1 %v20927_v19  ;;  %v20940_v58 = vsub.f32 %v4723_v38, %v20933_v14  ;;  %25406 = vst [vmem:[#allocation67_spill] sm:$0xff] %v20951_v13  ;;  %v25408_v38 = vld [vmem:[#allocation72_spill] sm:$0xff]  ;;  %v25431_v31 = vld [vmem:[#allocation53_spill] sm:$0xff] }
 0x7d4   : > { %25404 = vst [vmem:[#allocation166_spill] sm:$0xff] %v20945_v7  ;;  %25407 = vst [vmem:[#allocation167_spill] sm:$0xff] %v20958_v9 }
 0x7d5   : > { %14140 = vmatmul.mubr.f32.gmra.mrb[60].mxu1 %v5065_v42  ;;  %v5076_v8 = vand.u32 4294901760, %v5075_v15  ;;  %v20943_v27 = vand.u32 4294901760, %v20940_v58  ;;  %v20962_v42 = vpack.c.bf16 %v25408_v38, %v20362_v45 }
 0x7d7   : > { %14141 = vmatprep.mubr.f32.mxu1 %v5076_v8  ;;  %v5086_v50 = vsub.f32 %v20940_v58, %v20943_v27  ;;  %25409 = vst [vmem:[#allocation72_spill] sm:$0xff] %v20962_v42 }
 0x7d9   : > { %14142 = vmatmul.mubr.f32.gmra.mrb[62].mxu1 %v5076_v8  ;;  %v5087_v19 = vand.u32 4294901760, %v5086_v50  ;;  %v25413_v8 = vld [vmem:[#allocation42_spill] sm:$0xff] }
 0x7da   : > { %15674 = vmatpush3.bf16.xpose.msra.mxu1 %v20945_v7  ;;  %v20976_v50 = vpack.c.bf16 %v20394_v35, %v25413_v8  ;;  %v25430_v7 = vld [vmem:[#allocation34_spill] sm:$0xff] }
 0x7db   : > { %14143 = vmatprep.mubr.f32.mxu1 %v5087_v19  ;;  %15676 = vmatprep.subr.bf16.mxu1 %v20951_v13  ;;  %v25429_v13 = vld [vmem:[#allocation124_spill] sm:$0xff] }
 0x7dc   : > { %25414 = vst [vmem:[#allocation41_spill] sm:$0xff] %v20976_v50 }
 0x7dd   : > { %14144 = vmatmul.mubr.f32.gmra.mrb[64].mxu1 %v5087_v19  ;;  %v25410_v19 = vld [vmem:[#allocation73_spill] sm:$0xff] }
 0x7de   : > { %14177 = vmatprep.mubr.f32.mxu1 %v20605_v59  ;;  %v20972_v15 = vpack.c.bf16 %v25411_v5, %v25410_v19 }
 0x7e0   : > { %25412 = vst [vmem:[#allocation73_spill] sm:$0xff] %v20972_v15 }
 0x7e1   : > { %14178 = vmatmul.mubr.f32.vlgmr.msra.gmra.mrb[34].mxu1 %v20605_v59 }
 0x7e2   : > { %14179 = vmatprep.mubr.f32.mxu1 %v20617_v53  ;;  %15678 = vmatpush3.bf16.xpose.msra.mxu1 %v20958_v9  ;;  %v20990_v9 = vpack.c.bf16 %v20420_v12, %v20415_v51 }
 0x7e3   : > { %15680 = vmatprep.subr.bf16.mxu1 %v20962_v42  ;;  %v20986_v42 = vpack.c.bf16 %v20404_v20, %v20399_v56 }
 0x7e4   : > { %25416 = vst [vmem:[#allocation168_spill] sm:$0xff] %v20990_v9 }
 0x7e5   : > { %14180 = vmatmul.mubr.f32.gmra.mrb[36].mxu1 %v20617_v53  ;;  %25415 = vst [vmem:[#allocation42_spill] sm:$0xff] %v20986_v42 }
 0x7e6   : > { %14181 = vmatprep.mubr.f32.mxu1 %v20647_v0 }
 0x7e9   : > { %14182 = vmatmul.mubr.f32.gmra.mrb[38].mxu1 %v20647_v0 }
 0x7ea   : > { %14183 = vmatprep.mubr.f32.mxu1 %v20667_v60  ;;  %15682 = vmatpush3.bf16.xpose.msra.mxu1 %v20972_v15  ;;  %v21004_v15 = vpack.c.bf16 %v20446_v2, %v20441_v63 }
 0x7eb   : > { %15684 = vmatprep.subr.bf16.mxu1 %v20976_v50  ;;  %v21000_v50 = vpack.c.bf16 %v20430_v3, %v20425_v40 }
 0x7ec   : > { %25418 = vst [vmem:[#allocation170_spill] sm:$0xff] %v21004_v15 }
 0x7ed   : > { %14184 = vmatmul.mubr.f32.gmra.mrb[40].mxu1 %v20667_v60  ;;  %25417 = vst [vmem:[#allocation169_spill] sm:$0xff] %v21000_v50 }
 0x7ee   : > { %14185 = vmatprep.mubr.f32.mxu1 %v20691_v21 }
 0x7f1   : > { %14186 = vmatmul.mubr.f32.gmra.mrb[42].mxu1 %v20691_v21 }
 0x7f2   : > { %14187 = vmatprep.mubr.f32.mxu1 %v20718_v52  ;;  %15686 = vmatpush3.bf16.xpose.msra.mxu1 %v20986_v42  ;;  %v21018_v42 = vpack.c.bf16 %v20472_v43, %v20467_v39 }
 0x7f3   : > { %15688 = vmatprep.subr.bf16.mxu1 %v20990_v9  ;;  %v21014_v9 = vpack.c.bf16 %v20456_v44, %v20451_v48 }
 0x7f4   : > { %25420 = vst [vmem:[#allocation172_spill] sm:$0xff] %v21018_v42 }
 0x7f5   : > { %14188 = vmatmul.mubr.f32.gmra.mrb[44].mxu1 %v20718_v52  ;;  %25419 = vst [vmem:[#allocation171_spill] sm:$0xff] %v21014_v9 }
 0x7f6   : > { %14189 = vmatprep.mubr.f32.mxu1 %v20734_v16 }
 0x7f9   : > { %14190 = vmatmul.mubr.f32.gmra.mrb[46].mxu1 %v20734_v16 }
 0x7fa   : > { %14191 = vmatprep.mubr.f32.mxu1 %v20768_v33  ;;  %15690 = vmatpush3.bf16.xpose.msra.mxu1 %v21000_v50  ;;  %v21032_v50 = vpack.c.bf16 %v20498_v57, %v20493_v36 }
 0x7fb   : > { %15692 = vmatprep.subr.bf16.mxu1 %v21004_v15  ;;  %v21028_v15 = vpack.c.bf16 %v20482_v55, %v20477_v28 }
 0x7fc   : > { %25422 = vst [vmem:[#allocation174_spill] sm:$0xff] %v21032_v50 }
 0x7fd   : > { %14192 = vmatmul.mubr.f32.gmra.mrb[48].mxu1 %v20768_v33  ;;  %25421 = vst [vmem:[#allocation173_spill] sm:$0xff] %v21028_v15 }
 0x7fe   : > { %14193 = vmatprep.mubr.f32.mxu1 %v20789_v1 }
 0x801   : > { %14194 = vmatmul.mubr.f32.gmra.mrb[50].mxu1 %v20789_v1 }
 0x802   : > { %14195 = vmatprep.mubr.f32.mxu1 %v20806_v26  ;;  %15694 = vmatpush3.bf16.xpose.msra.mxu1 %v21014_v9  ;;  %v21046_v9 = vpack.c.bf16 %v20524_v22, %v20519_v34 }
 0x803   : > { %15696 = vmatprep.subr.bf16.mxu1 %v21018_v42  ;;  %v21042_v42 = vpack.c.bf16 %v20508_v49, %v20503_v62 }
 0x804   : > { %25424 = vst [vmem:[#allocation176_spill] sm:$0xff] %v21046_v9 }
 0x805   : > { %14196 = vmatmul.mubr.f32.gmra.mrb[52].mxu1 %v20806_v26  ;;  %25423 = vst [vmem:[#allocation175_spill] sm:$0xff] %v21042_v42  ;;  %v25446_v26 = vld [vmem:[#allocation4_spill] sm:$0xff] }
 0x806   : > { %14197 = vmatprep.mubr.f32.mxu1 %v20833_v46 }
 0x809   : > { %14198 = vmatmul.mubr.f32.gmra.mrb[54].mxu1 %v20833_v46  ;;  %v25443_v46 = vld [vmem:[#allocation140_spill] sm:$0xff] }
 0x80a   : > { %14199 = vmatprep.mubr.f32.mxu1 %v20855_v30  ;;  %15698 = vmatpush3.bf16.xpose.msra.mxu1 %v21028_v15  ;;  %v25426_v15 = vld [vmem:[#allocation33_spill] sm:$0xff] }
 0x80b   : > { %15700 = vmatprep.subr.bf16.mxu1 %v21032_v50  ;;  %v21056_v50 = vpack.c.bf16 %v20534_v61, %v20529_v54 }
 0x80d   : > { %14200 = vmatmul.mubr.f32.gmra.mrb[56].mxu1 %v20855_v30  ;;  %25425 = vst [vmem:[#allocation177_spill] sm:$0xff] %v21056_v50  ;;  %v25440_v30 = vld [vmem:[#allocation136_spill] sm:$0xff] }
 0x80e   : > { %14201 = vmatprep.mubr.f32.mxu1 %v20867_v47 }
 0x811   : > { %14202 = vmatmul.mubr.f32.gmra.mrb[58].mxu1 %v20867_v47  ;;  %v25437_v47 = vld [vmem:[#allocation132_spill] sm:$0xff] }
 0x812   : > { %14203 = vmatprep.mubr.f32.mxu1 %v20897_v18  ;;  %15702 = vmatpush3.bf16.xpose.msra.mxu1 %v21042_v42  ;;  %v25427_v42 = vld [vmem:[#allocation43_spill] sm:$0xff] }
 0x813   : > { %15704 = vmatprep.subr.bf16.mxu1 %v21046_v9  ;;  %v25428_v9 = vld [vmem:[#allocation46_spill] sm:$0xff] }
 0x815   : > { %14204 = vmatmul.mubr.f32.gmra.mrb[60].mxu1 %v20897_v18  ;;  %v25436_v18 = vld [vmem:[#allocation102_spill] sm:$0xff] }
 0x816   : > { %14205 = vmatprep.mubr.f32.mxu1 %v20912_v4 }
 0x819   : > { %14206 = vmatmul.mubr.f32.gmra.mrb[62].mxu1 %v20912_v4  ;;  %v25433_v4 = vld [vmem:[#allocation128_spill] sm:$0xff] }
 0x81a   : > { %14207 = vmatprep.mubr.f32.mxu1 %v20933_v14  ;;  %15706 = vmatpush3.bf16.xpose.msra.mxu1 %v21056_v50  ;;  %v25432_v50 = vld [vmem:[#allocation56_spill] sm:$0xff] }
 0x81b   : > { %15708 = vmatprep.subr.bf16.mxu1 %v25426_v15 }
 0x81d   : > { %14208 = vmatmul.mubr.f32.gmra.mrb[64].mxu1 %v20933_v14  ;;  %v25434_v14 = vld [vmem:[#allocation36_spill] sm:$0xff] }
 0x81e   : > { %14241 = vmatprep.mubr.f32.mxu1 %v25427_v42 }
 0x821   : > { %14242 = vmatmul.mubr.f32.vlgmr.msra.gmra.mrb[34].mxu1 %v25427_v42  ;;  %v25435_v42 = vld [vmem:[#allocation61_spill] sm:$0xff] }
 0x822   : > { %14243 = vmatprep.mubr.f32.mxu1 %v25428_v9  ;;  %15710 = vmatpush3.bf16.xpose.msra.mxu1 %v25429_v13 }
 0x823   : > { %15712 = vmatprep.subr.bf16.mxu1 %v25430_v7 }
 0x825   : > { %14244 = vmatmul.mubr.f32.gmra.mrb[36].mxu1 %v25428_v9  ;;  %v25438_v9 = vld [vmem:[#allocation39_spill] sm:$0xff] }
 0x826   : > { %14245 = vmatprep.mubr.f32.mxu1 %v25431_v31 }
 0x829   : > { %14246 = vmatmul.mubr.f32.gmra.mrb[38].mxu1 %v25431_v31  ;;  %v25439_v31 = vld [vmem:[#allocation112_spill] sm:$0xff] }
 0x82a   : > { %14247 = vmatprep.mubr.f32.mxu1 %v25432_v50  ;;  %15714 = vmatpush3.bf16.xpose.msra.mxu1 %v25433_v4 }
 0x82b   : > { %15716 = vmatprep.subr.bf16.mxu1 %v25434_v14 }
 0x82d   : > { %14248 = vmatmul.mubr.f32.gmra.mrb[40].mxu1 %v25432_v50  ;;  %v25441_v50 = vld [vmem:[#allocation5_spill] sm:$0xff] }
 0x82e   : > { %14249 = vmatprep.mubr.f32.mxu1 %v25435_v42 }
 0x831   : > { %14250 = vmatmul.mubr.f32.gmra.mrb[42].mxu1 %v25435_v42  ;;  %v25442_v42 = vld [vmem:[#allocation121_spill] sm:$0xff] }
 0x832   : > { %14251 = vmatprep.mubr.f32.mxu1 %v25436_v18  ;;  %15718 = vmatpush3.bf16.xpose.msra.mxu1 %v25437_v47 }
 0x833   : > { %15720 = vmatprep.subr.bf16.mxu1 %v25438_v9 }
 0x835   : > { %14252 = vmatmul.mubr.f32.gmra.mrb[44].mxu1 %v25436_v18  ;;  %v25444_v18 = vld [vmem:[#allocation145_spill] sm:$0xff] }
 0x836   : > { %14253 = vmatprep.mubr.f32.mxu1 %v20748_v29 }
 0x839   : > { %14254 = vmatmul.mubr.f32.gmra.mrb[46].mxu1 %v20748_v29  ;;  %v25445_v29 = vld [vmem:[#allocation142_spill] sm:$0xff] }
 0x83a   : > { %14255 = vmatprep.mubr.f32.mxu1 %v25439_v31  ;;  %15722 = vmatpush3.bf16.xpose.msra.mxu1 %v25440_v30 }
 0x83b   : > { %15724 = vmatprep.subr.bf16.mxu1 %v25441_v50 }
 0x83d   : > { %14256 = vmatmul.mubr.f32.gmra.mrb[48].mxu1 %v25439_v31  ;;  %v25447_v31 = vld [vmem:[#allocation150_spill] sm:$0xff] }
 0x83e   : > { %14257 = vmatprep.mubr.f32.mxu1 %v25442_v42 }
 0x841   : > { %14258 = vmatmul.mubr.f32.gmra.mrb[50].mxu1 %v25442_v42  ;;  %v25448_v42 = vld [vmem:[#allocation153_spill] sm:$0xff] }
 0x842   : > { %14259 = vmatprep.mubr.f32.mxu1 %v20818_v41  ;;  %15726 = vmatpush3.bf16.xpose.msra.mxu1 %v25443_v46 }
 0x843   : > { %15728 = vmatprep.subr.bf16.mxu1 %v25444_v18  ;;  %v25449_v18 = vld [vmem:[#allocation148_spill] sm:$0xff] }
 0x845   : > { %14260 = vmatmul.mubr.f32.gmra.mrb[52].mxu1 %v20818_v41  ;;  %v25450_v41 = vld [vmem:[#allocation66_spill] sm:$0xff] }
 0x846   : > { %14261 = vmatprep.mubr.f32.mxu1 %v20846_v24 }
 0x849   : > { %14262 = vmatmul.mubr.f32.gmra.mrb[54].mxu1 %v20846_v24  ;;  %v25451_v24 = vand.u32 4294901760, %v20318_v10  ;;  %v25457_v10 = vand.u32 4294901760, %v20339_v23  ;;  %v25464_v23 = vand.u32 4294901760, %v25410_v19  ;;  %v25471_v19 = vld [vmem:[#allocation103_spill] sm:$0xff] }
 0x84a   : > { %14263 = vmatprep.mubr.f32.mxu1 %v25445_v29  ;;  %15730 = vmatpush3.bf16.xpose.msra.mxu1 %v25446_v26 }
 0x84b   : > { %15732 = vmatprep.subr.bf16.mxu1 %v25447_v31  ;;  %v25452_v31 = vand.u32 4294901760, %v25405_v25  ;;  %v25459_v25 = vand.u32 4294901760, %v20362_v45  ;;  %v25465_v45 = vand.u32 4294901760, %v25411_v5  ;;  %v25472_v5 = vand.u32 4294901760, %v20399_v56  ;;  %v25479_v56 = vld [vmem:[#allocation113_spill] sm:$0xff] }
 0x84d   : > { %14264 = vmatmul.mubr.f32.gmra.mrb[56].mxu1 %v25445_v29  ;;  %v21110_v26 = vpack.c.bf16 %v25452_v31, %v25451_v24  ;;  %v25454_v29 = vld [vmem:[#allocation69_spill] sm:$0xff]  ;;  %v25462_v24 = vld [vmem:[#allocation52_spill] sm:$0xff] }
 0x84e   : > { %14265 = vmatprep.mubr.f32.mxu1 %v25448_v42 }
 0x84f   : > { %25453 = vst [vmem:[#allocation43_spill] sm:$0xff] %v21110_v26 }
 0x851   : > { %14266 = vmatmul.mubr.f32.gmra.mrb[58].mxu1 %v25448_v42  ;;  %v25455_v42 = vld [vmem:[#allocation44_spill] sm:$0xff] }
 0x852   : > { %14267 = vmatprep.mubr.f32.mxu1 %v20906_v6  ;;  %15734 = vmatpush3.bf16.xpose.msra.mxu1 %v25449_v18 }
 0x853   : > { %15736 = vmatprep.subr.bf16.mxu1 %v25450_v41 }
 0x855   : > { %14268 = vmatmul.mubr.f32.gmra.mrb[60].mxu1 %v20906_v6  ;;  %v25456_v6 = vand.u32 4294901760, %v20334_v17  ;;  %v25463_v17 = vld [vmem:[#allocation55_spill] sm:$0xff] }
 0x856   : > { %14269 = vmatprep.mubr.f32.mxu1 %v20925_v32 }
 0x857   : > { %v21122_v41 = vpack.c.bf16 %v25457_v10, %v25456_v6  ;;  %v25470_v10 = vld [vmem:[#allocation57_spill] sm:$0xff] }
 0x859   : > { %14270 = vmatmul.mubr.f32.gmra.mrb[62].mxu1 %v20925_v32  ;;  %25458 = vst [vmem:[#allocation46_spill] sm:$0xff] %v21122_v41  ;;  %v25460_v32 = vand.u32 4294901760, %v25408_v38  ;;  %v25467_v38 = vand.u32 4294901760, %v25413_v8  ;;  %v25473_v8 = vand.u32 4294901760, %v20404_v20  ;;  %v25480_v20 = vand.u32 4294901760, %v20425_v40  ;;  %v25487_v40 = vld [vmem:[#allocation125_spill] sm:$0xff] }
 0x85a   : > { %14271 = vmatprep.mubr.f32.mxu1 %v20940_v58  ;;  %15738 = vmatpush3.bf16.xpose.msra.mxu1 %v25454_v29 }
 0x85b   : > { %15740 = vmatprep.subr.bf16.mxu1 %v21110_v26  ;;  %v21128_v31 = vpack.c.bf16 %v25460_v32, %v25459_v25  ;;  %v21158_v25 = vpack.c.bf16 %v25473_v8, %v25472_v5  ;;  %v25476_v32 = vand.u32 4294901760, %v20420_v12  ;;  %v25483_v12 = vand.u32 4294901760, %v20441_v63  ;;  %v25494_v8 = vld [vmem:[#allocation129_spill] sm:$0xff] }
 0x85c   : > { %v25489_v63 = vand.u32 4294901760, %v20456_v44  ;;  %v25496_v44 = vand.u32 4294901760, %v20477_v28  ;;  %v25503_v28 = vld [vmem:[#allocation157_spill] sm:$0xff] }
 0x85d   : > { %14272 = vmatmul.mubr.f32.gmra.mrb[64].mxu1 %v20940_v58  ;;  %25461 = vst [vmem:[#allocation53_spill] sm:$0xff] %v21128_v31  ;;  %v21140_v58 = vpack.c.bf16 %v25465_v45, %v25464_v23  ;;  %25474 = vst [vmem:[#allocation102_spill] sm:$0xff] %v21158_v25  ;;  %v25484_v45 = vand.u32 4294901760, %v20446_v2  ;;  %v25491_v2 = vand.u32 4294901760, %v20467_v39  ;;  %v25497_v39 = vand.u32 4294901760, %v20482_v55 }
 0x85e   : > { %14305 = vmatprep.mubr.f32.mxu1 %v25455_v42  ;;  %v25504_v55 = vand.u32 4294901760, %v20503_v62  ;;  %v25510_v62 = vand.u32 4294901760, %v20529_v54  ;;  %v25514_v54 = vld [vmem:[#allocation145_spill] sm:$0xff] }
 0x85f   : > { %25466 = vst [vmem:[#allocation56_spill] sm:$0xff] %v21140_v58 }
 0x861   : > { %14306 = vmatmul.mubr.f32.vlgmr.msra.gmra.mrb[34].mxu1 %v25455_v42  ;;  %v25468_v42 = vand.u32 4294901760, %v20394_v35  ;;  %v25475_v35 = vand.u32 4294901760, %v20415_v51  ;;  %v25481_v51 = vand.u32 4294901760, %v20430_v3  ;;  %v25488_v3 = vand.u32 4294901760, %v20451_v48  ;;  %v25495_v48 = vld [vmem:[#allocation138_spill] sm:$0xff] }
 0x862   : > { %14307 = vmatprep.mubr.f32.mxu1 %v25462_v24  ;;  %15742 = vmatpush3.bf16.xpose.msra.mxu1 %v21122_v41  ;;  %v25551_v41 = vld [vmem:[#allocation100_spill] sm:$0xff] }
 0x863   : > { %15744 = vmatprep.subr.bf16.mxu1 %v21128_v31  ;;  %v21146_v6 = vpack.c.bf16 %v25468_v42, %v25467_v38  ;;  %v21176_v23 = vpack.c.bf16 %v25481_v51, %v25480_v20  ;;  %v21182_v38 = vpack.c.bf16 %v25484_v45, %v25483_v12  ;;  %v25486_v42 = vld [vmem:[#allocation116_spill] sm:$0xff]  ;;  %v25508_v51 = vand.u32 4294901760, %v20524_v22  ;;  %v25513_v22 = vld [vmem:[#allocation126_spill] sm:$0xff]  ;;  %v25519_v45 = vld [vmem:[#allocation141_spill] sm:$0xff] }
 0x865   : > { %14308 = vmatmul.mubr.f32.gmra.mrb[36].mxu1 %v25462_v24  ;;  %25469 = vst [vmem:[#allocation61_spill] sm:$0xff] %v21146_v6  ;;  %v21164_v24 = vpack.c.bf16 %v25476_v32, %v25475_v35  ;;  %25482 = vst [vmem:[#allocation121_spill] sm:$0xff] %v21176_v23  ;;  %v21212_v35 = vpack.c.bf16 %v25497_v39, %v25496_v44  ;;  %v25500_v32 = vand.u32 4294901760, %v20498_v57  ;;  %v25507_v57 = vand.u32 4294901760, %v20519_v34  ;;  %v25528_v44 = vld [vmem:[#allocation10_spill] sm:$0xff]  ;;  %v25529_v39 = vld [vmem:[#allocation11_spill] sm:$0xff] }
 0x866   : > { %14309 = vmatprep.mubr.f32.mxu1 %v25463_v17  ;;  %25485 = vst [vmem:[#allocation142_spill] sm:$0xff] %v21182_v38 }
 0x867   : > { %25477 = vst [vmem:[#allocation112_spill] sm:$0xff] %v21164_v24  ;;  %25498 = vst [vmem:[#allocation52_spill] sm:$0xff] %v21212_v35  ;;  %v21236_v12 = vpack.c.bf16 %v25508_v51, %v25507_v57 }
 0x869   : > { %14310 = vmatmul.mubr.f32.gmra.mrb[38].mxu1 %v25463_v17  ;;  %v25478_v17 = vld [vmem:[#allocation19_spill] sm:$0xff]  ;;  %25509 = vst [vmem:[#allocation103_spill] sm:$0xff] %v21236_v12 }
 0x86a   : > { %14311 = vmatprep.mubr.f32.mxu1 %v25470_v10  ;;  %15746 = vmatpush3.bf16.xpose.msra.mxu1 %v21140_v58 }
 0x86b   : > { %15748 = vmatprep.subr.bf16.mxu1 %v21146_v6 }
 0x86d   : > { %14312 = vmatmul.mubr.f32.gmra.mrb[40].mxu1 %v25470_v10  ;;  %v21194_v10 = vpack.c.bf16 %v25489_v63, %v25488_v3  ;;  %v25522_v3 = vld [vmem:[#allocation162_spill] sm:$0xff]  ;;  %v25523_v63 = vld [vmem:[#allocation165_spill] sm:$0xff] }
 0x86e   : > { %14313 = vmatprep.mubr.f32.mxu1 %v25471_v19 }
 0x86f   : > { %25490 = vst [vmem:[#allocation153_spill] sm:$0xff] %v21194_v10 }
 0x871   : > { %14314 = vmatmul.mubr.f32.gmra.mrb[42].mxu1 %v25471_v19  ;;  %v25492_v19 = vand.u32 4294901760, %v20472_v43  ;;  %v25499_v43 = vand.u32 4294901760, %v20493_v36  ;;  %v25505_v36 = vand.u32 4294901760, %v20508_v49  ;;  %v25511_v49 = vand.u32 4294901760, %v20534_v61  ;;  %v25515_v61 = vld [vmem:[#allocation134_spill] sm:$0xff] }
 0x872   : > { %14315 = vmatprep.mubr.f32.mxu1 %v25478_v17  ;;  %15750 = vmatpush3.bf16.xpose.msra.mxu1 %v21158_v25 }
 0x873   : > { %15752 = vmatprep.subr.bf16.mxu1 %v21164_v24  ;;  %v21200_v5 = vpack.c.bf16 %v25492_v19, %v25491_v2  ;;  %v21230_v20 = vpack.c.bf16 %v25505_v36, %v25504_v55  ;;  %v21248_v34 = vpack.c.bf16 %v25511_v49, %v25510_v62  ;;  %v25524_v2 = vld [vmem:[#allocation6_spill] sm:$0xff]  ;;  %v25525_v19 = vld [vmem:[#allocation7_spill] sm:$0xff]  ;;  %v25541_v49 = vld [vmem:[#allocation85_spill] sm:$0xff] }
 0x874   : > { %v25539_v55 = vld [vmem:[#allocation26_spill] sm:$0xff] }
 0x875   : > { %14316 = vmatmul.mubr.f32.gmra.mrb[44].mxu1 %v25478_v17  ;;  %25493 = vst [vmem:[#allocation44_spill] sm:$0xff] %v21200_v5  ;;  %v21218_v17 = vpack.c.bf16 %v25500_v32, %v25499_v43  ;;  %25506 = vst [vmem:[#allocation57_spill] sm:$0xff] %v21230_v20  ;;  %v25531_v43 = vld [vmem:[#allocation13_spill] sm:$0xff]  ;;  %v25533_v32 = vld [vmem:[#allocation15_spill] sm:$0xff] }
 0x876   : > { %14317 = vmatprep.mubr.f32.mxu1 %v25479_v56  ;;  %25512 = vst [vmem:[#allocation19_spill] sm:$0xff] %v21248_v34 }
 0x877   : > { %25501 = vst [vmem:[#allocation55_spill] sm:$0xff] %v21218_v17 }
 0x879   : > { %14318 = vmatmul.mubr.f32.gmra.mrb[46].mxu1 %v25479_v56  ;;  %v25502_v56 = vld [vmem:[#allocation146_spill] sm:$0xff] }
 0x87a   : > { %14319 = vmatprep.mubr.f32.mxu1 %v25486_v42  ;;  %15754 = vmatpush3.bf16.xpose.msra.mxu1 %v21176_v23 }
 0x87b   : > { %15756 = vmatprep.subr.bf16.mxu1 %v21182_v38 }
 0x87d   : > { %14320 = vmatmul.mubr.f32.gmra.mrb[48].mxu1 %v25486_v42  ;;  %v25520_v42 = vld [vmem:[#allocation156_spill] sm:$0xff] }
 0x87e   : > { %14321 = vmatprep.mubr.f32.mxu1 %v25487_v40 }
 0x881   : > { %14322 = vmatmul.mubr.f32.gmra.mrb[50].mxu1 %v25487_v40  ;;  %v25521_v40 = vld [vmem:[#allocation66_spill] sm:$0xff] }
 0x882   : > { %14323 = vmatprep.mubr.f32.mxu1 %v25494_v8  ;;  %15758 = vmatpush3.bf16.xpose.msra.mxu1 %v21194_v10 }
 0x883   : > { %15760 = vmatprep.subr.bf16.mxu1 %v21200_v5 }
 0x885   : > { %14324 = vmatmul.mubr.f32.gmra.mrb[52].mxu1 %v25494_v8  ;;  %v25526_v8 = vld [vmem:[#allocation8_spill] sm:$0xff] }
 0x886   : > { %14325 = vmatprep.mubr.f32.mxu1 %v25495_v48 }
 0x889   : > { %14326 = vmatmul.mubr.f32.gmra.mrb[54].mxu1 %v25495_v48  ;;  %v25527_v48 = vld [vmem:[#allocation9_spill] sm:$0xff] }
 0x88a   : > { %14327 = vmatprep.mubr.f32.mxu1 %v25502_v56  ;;  %15762 = vmatpush3.bf16.xpose.msra.mxu1 %v21212_v35 }
 0x88b   : > { %15764 = vmatprep.subr.bf16.mxu1 %v21218_v17 }
 0x88d   : > { %14328 = vmatmul.mubr.f32.gmra.mrb[56].mxu1 %v25502_v56  ;;  %v25535_v56 = vld [vmem:[#allocation18_spill] sm:$0xff] }
 0x88e   : > { %14329 = vmatprep.mubr.f32.mxu1 %v25503_v28 }
 0x891   : > { %14330 = vmatmul.mubr.f32.gmra.mrb[58].mxu1 %v25503_v28  ;;  %v25537_v28 = vld [vmem:[#allocation22_spill] sm:$0xff] }
 0x892   : > { %14331 = vmatprep.mubr.f32.mxu1 %v20910_v37  ;;  %15766 = vmatpush3.bf16.xpose.msra.mxu1 %v21230_v20 }
 0x893   : > { %15768 = vmatprep.subr.bf16.mxu1 %v21236_v12  ;;  %v25543_v12 = vld [vmem:[#allocation91_spill] sm:$0xff] }
 0x895   : > { %14332 = vmatmul.mubr.f32.gmra.mrb[60].mxu1 %v20910_v37  ;;  %v25516_v37 = vld [vmem:[#allocation137_spill] sm:$0xff] }
 0x896   : > { %14333 = vmatprep.mubr.f32.mxu1 %v20931_v11 }
 0x899   : > { %14334 = vmatmul.mubr.f32.gmra.mrb[62].mxu1 %v20931_v11  ;;  %v25517_v11 = vld [vmem:[#allocation4_spill] sm:$0xff] }
 0x89a   : > { %14335 = vmatprep.mubr.f32.mxu1 %v20943_v27  ;;  %15770 = vmatpush3.bf16.xpose.msra.mxu1 %v21248_v34 }
 0x89b   : > { %15772 = vmatprep.subr.bf16.mxu1 %v25426_v15 }
 0x89d   : > { %14336 = vmatmul.mubr.f32.gmra.mrb[64].mxu1 %v20943_v27  ;;  %v25518_v27 = vld [vmem:[#allocation150_spill] sm:$0xff] }
 0x89e   : > { %14369 = vmatprep.mubr.f32.mxu1 %v20605_v59 }
 0x8a1   : > { %14370 = vmatmul.mubr.f32.vlgmr.msra.gmra.mrb[34].mxu1 %v20605_v59 }
 0x8a2   : > { %14371 = vmatprep.mubr.f32.mxu1 %v20617_v53  ;;  %15774 = vmatpush3.bf16.xpose.msra.mxu1 %v25429_v13 }
 0x8a3   : > { %15776 = vmatprep.subr.bf16.mxu1 %v25430_v7 }
 0x8a5   : > { %14372 = vmatmul.mubr.f32.gmra.mrb[36].mxu1 %v20617_v53 }
 0x8a6   : > { %14373 = vmatprep.mubr.f32.mxu1 %v20647_v0 }
 0x8a9   : > { %14374 = vmatmul.mubr.f32.gmra.mrb[38].mxu1 %v20647_v0 }
 0x8aa   : > { %14375 = vmatprep.mubr.f32.mxu1 %v20667_v60  ;;  %15778 = vmatpush3.bf16.xpose.msra.mxu1 %v25433_v4 }
 0x8ab   : > { %15780 = vmatprep.subr.bf16.mxu1 %v25434_v14 }
 0x8ad   : > { %14376 = vmatmul.mubr.f32.gmra.mrb[40].mxu1 %v20667_v60 }
 0x8ae   : > { %14377 = vmatprep.mubr.f32.mxu1 %v20691_v21 }
 0x8b1   : > { %14378 = vmatmul.mubr.f32.gmra.mrb[42].mxu1 %v20691_v21 }
 0x8b2   : > { %14379 = vmatprep.mubr.f32.mxu1 %v20718_v52  ;;  %15782 = vmatpush3.bf16.xpose.msra.mxu1 %v25437_v47 }
 0x8b3   : > { %15784 = vmatprep.subr.bf16.mxu1 %v25438_v9 }
 0x8b5   : > { %14380 = vmatmul.mubr.f32.gmra.mrb[44].mxu1 %v20718_v52 }
 0x8b6   : > { %14381 = vmatprep.mubr.f32.mxu1 %v20734_v16 }
 0x8b9   : > { %14382 = vmatmul.mubr.f32.gmra.mrb[46].mxu1 %v20734_v16 }
 0x8ba   : > { %14383 = vmatprep.mubr.f32.mxu1 %v20768_v33  ;;  %15786 = vmatpush3.bf16.xpose.msra.mxu1 %v25440_v30 }
 0x8bb   : > { %15788 = vmatprep.subr.bf16.mxu1 %v25441_v50 }
 0x8bd   : > { %14384 = vmatmul.mubr.f32.gmra.mrb[48].mxu1 %v20768_v33 }
 0x8be   : > { %14385 = vmatprep.mubr.f32.mxu1 %v20789_v1 }
 0x8c1   : > { %14386 = vmatmul.mubr.f32.gmra.mrb[50].mxu1 %v20789_v1 }
 0x8c2   : > { %14387 = vmatprep.mubr.f32.mxu1 %v25513_v22  ;;  %15790 = vmatpush3.bf16.xpose.msra.mxu1 %v25443_v46 }
 0x8c3   : > { %15792 = vmatprep.subr.bf16.mxu1 %v25514_v54 }
 0x8c5   : > { %14388 = vmatmul.mubr.f32.gmra.mrb[52].mxu1 %v25513_v22 }
 0x8c6   : > { %14389 = vmatprep.mubr.f32.mxu1 %v25515_v61 }
 0x8c9   : > { %14390 = vmatmul.mubr.f32.gmra.mrb[54].mxu1 %v25515_v61 }
 0x8ca   : > { %14391 = vmatprep.mubr.f32.mxu1 %v25516_v37  ;;  %15794 = vmatpush3.bf16.xpose.msra.mxu1 %v25517_v11 }
 0x8cb   : > { %15796 = vmatprep.subr.bf16.mxu1 %v25518_v27 }
 0x8cd   : > { %14392 = vmatmul.mubr.f32.gmra.mrb[56].mxu1 %v25516_v37 }
 0x8ce   : > { %14393 = vmatprep.mubr.f32.mxu1 %v25519_v45 }
 0x8d1   : > { %14394 = vmatmul.mubr.f32.gmra.mrb[58].mxu1 %v25519_v45 }
 0x8d2   : > { %14395 = vmatprep.mubr.f32.mxu1 %v25520_v42  ;;  %15798 = vmatpush3.bf16.xpose.msra.mxu1 %v25449_v18 }
 0x8d3   : > { %15800 = vmatprep.subr.bf16.mxu1 %v25521_v40 }
 0x8d5   : > { %14396 = vmatmul.mubr.f32.gmra.mrb[60].mxu1 %v25520_v42 }
 0x8d6   : > { %14397 = vmatprep.mubr.f32.mxu1 %v25522_v3 }
 0x8d9   : > { %14398 = vmatmul.mubr.f32.gmra.mrb[62].mxu1 %v25522_v3 }
 0x8da   : > { %14399 = vmatprep.mubr.f32.mxu1 %v25523_v63  ;;  %15802 = vmatpush3.bf16.xpose.msra.mxu1 %v25454_v29 }
 0x8db   : > { %15996 = vmatprep.subr.bf16.mxu1 %v25524_v2 }
 0x8dd   : > { %14400 = vmatmul.mubr.f32.gmra.mrb[64].mxu1 %v25523_v63 }
 0x8de   : > { %14433 = vmatprep.mubr.f32.mxu1 %v20605_v59 }
 0x8e1   : > { %14434 = vmatmul.mubr.f32.vlgmr.msra.gmra.mrb[34].mxu1 %v20605_v59  ;;  %v25530_v59 = vld [vmem:[#allocation12_spill] sm:$0xff] }
 0x8e2   : > { %14435 = vmatprep.mubr.f32.mxu1 %v20617_v53  ;;  %15998 = vmatpush3.bf16.msra.mxu1 %v25525_v19 }
 0x8e3   : > { %16000 = vmatprep.subr.bf16.mxu1 %v25526_v8 }
 0x8e5   : > { %14436 = vmatmul.mubr.f32.gmra.mrb[36].mxu1 %v20617_v53  ;;  %v25532_v53 = vld [vmem:[#allocation14_spill] sm:$0xff] }
 0x8e6   : > { %14437 = vmatprep.mubr.f32.mxu1 %v20647_v0  ;;  %16002 = vmatpush3.bf16.msra.mxu1 %v25527_v48 }
 0x8e7   : > { %16004 = vmatprep.subr.bf16.mxu1 %v25528_v44 }
 0x8e9   : > { %14438 = vmatmul.mubr.f32.gmra.mrb[38].mxu1 %v20647_v0  ;;  %v25534_v0 = vld [vmem:[#allocation16_spill] sm:$0xff] }
 0x8ea   : > { %14439 = vmatprep.mubr.f32.mxu1 %v20667_v60  ;;  %16006 = vmatpush3.bf16.msra.mxu1 %v25529_v39 }
 0x8eb   : > { %16008 = vmatprep.subr.bf16.mxu1 %v25530_v59 }
 0x8ed   : > { %14440 = vmatmul.mubr.f32.gmra.mrb[40].mxu1 %v20667_v60  ;;  %v25536_v60 = vld [vmem:[#allocation20_spill] sm:$0xff] }
 0x8ee   : > { %14441 = vmatprep.mubr.f32.mxu1 %v20691_v21  ;;  %16010 = vmatpush3.bf16.msra.mxu1 %v25531_v43 }
 0x8ef   : > { %16012 = vmatprep.subr.bf16.mxu1 %v25532_v53 }
 0x8f1   : > { %14442 = vmatmul.mubr.f32.gmra.mrb[42].mxu1 %v20691_v21  ;;  %v25538_v21 = vld [vmem:[#allocation24_spill] sm:$0xff] }
 0x8f2   : > { %14443 = vmatprep.mubr.f32.mxu1 %v20718_v52  ;;  %16014 = vmatpush3.bf16.msra.mxu1 %v25533_v32 }
 0x8f3   : > { %16016 = vmatprep.subr.bf16.mxu1 %v25534_v0  ;;  %v25555_v0 = vld [vmem:[#allocation106_spill] sm:$0xff] }
 0x8f5   : > { %14444 = vmatmul.mubr.f32.gmra.mrb[44].mxu1 %v20718_v52  ;;  %v25540_v52 = vld [vmem:[#allocation38_spill] sm:$0xff] }
 0x8f6   : > { %14445 = vmatprep.mubr.f32.mxu1 %v20734_v16  ;;  %16018 = vmatpush3.bf16.msra.mxu1 %v25535_v56 }
 0x8f7   : > { %16020 = vmatprep.subr.bf16.mxu1 %v25536_v60 }
 0x8f9   : > { %14446 = vmatmul.mubr.f32.gmra.mrb[46].mxu1 %v20734_v16  ;;  %v1500_v16 = vld [vmem:[#allocation3 + $0x8] sm:$0xff] }
 0x8fa   : > { %14447 = vmatprep.mubr.f32.mxu1 %v20768_v33  ;;  %16022 = vmatpush3.bf16.msra.mxu1 %v25537_v28 }
 0x8fb   : > { %16024 = vmatprep.subr.bf16.mxu1 %v25538_v21 }
 0x8fd   : > { %14448 = vmatmul.mubr.f32.gmra.mrb[48].mxu1 %v20768_v33  ;;  %v21351_v33 = vand.u32 4294901760, %v1500_v16 }
 0x8fe   : > { %14449 = vmatprep.mubr.f32.mxu1 %v20789_v1  ;;  %16026 = vmatpush3.bf16.msra.mxu1 %v25539_v55 }
 0x8ff   : > { %16028 = vmatprep.subr.bf16.mxu1 %v25540_v52 }
 0x901   : > { %14450 = vmatmul.mubr.f32.gmra.mrb[50].mxu1 %v20789_v1  ;;  %v21354_v1 = vsub.f32 %v1500_v16, %v21351_v33 }
 0x902   : > { %14451 = vmatprep.mubr.f32.mxu1 %v25513_v22 }
 0x903   : > { %v24611_v36 = vand.u32 4294901760, %v21354_v1 }
 0x905   : > { %14452 = vmatmul.mubr.f32.gmra.mrb[52].mxu1 %v25513_v22  ;;  %v6542_v57 = vsub.f32 %v21354_v1, %v24611_v36 }
 0x906   : > { %14453 = vmatprep.mubr.f32.mxu1 %v25515_v61 }
 0x907   : > { %v6543_v51 = vand.u32 4294901760, %v6542_v57  ;;  %v25544_v57 = vld [vmem:[#allocation93_spill] sm:$0xff] }
 0x909   : > { %14454 = vmatmul.mubr.f32.gmra.mrb[54].mxu1 %v25515_v61  ;;  %6544 = vmatprep.mubr.f32.mxu0 %v6543_v51 }
 0x90a   : > { %14455 = vmatprep.mubr.f32.mxu1 %v25516_v37 }
 0x90d   : > { %14456 = vmatmul.mubr.f32.gmra.mrb[56].mxu1 %v25516_v37  ;;  %v1499_v37 = vld [vmem:[#allocation3] sm:$0xff] }
 0x90e   : > { %14457 = vmatprep.mubr.f32.mxu1 %v25519_v45  ;;  %v21362_v16 = vand.u32 4294901760, %v1499_v37 }
 0x910   : > { %v21373_v5 = vsub.f32 %v1499_v37, %v21362_v16 }
 0x911   : > { %14458 = vmatmul.mubr.f32.gmra.mrb[58].mxu1 %v25519_v45  ;;  %v25542_v45 = vld [vmem:[#allocation87_spill] sm:$0xff] }
 0x912   : > { %14459 = vmatprep.mubr.f32.mxu1 %v25520_v42 }
 0x915   : > { %14460 = vmatmul.mubr.f32.gmra.mrb[60].mxu1 %v25520_v42 }
 0x916   : > { %14461 = vmatprep.mubr.f32.mxu1 %v25522_v3 }
 0x919   : > { %14462 = vmatmul.mubr.f32.gmra.mrb[62].mxu1 %v25522_v3 }
 0x91a   : > { %14463 = vmatprep.mubr.f32.mxu1 %v25523_v63 }
 0x91d   : > { %14464 = vmatmul.mubr.f32.gmra.mrb[64].mxu1 %v25523_v63 }
 0x9b4   : > { %v6301_v62 = vpop.f32.mrb[34].mxu1 }
 0x9b5   : > { %v6411_v22 = vmul.f32 %v25541_v49, %v6301_v62  ;;  %v6303_v61 = vpop.f32.mrb[35].mxu1 }
 0x9b6   : > { %v6412_v42 = vmul.f32 %v25542_v45, %v6303_v61 }
 0x9b7   : > { %v6445_v3 = vand.u32 4294901760, %v6411_v22 }
 0x9b8   : > { %v6443_v63 = vand.u32 4294901760, %v6412_v42  ;;  %v6308_v52 = vpop.f32.mrb[36].mxu1 }
 0x9b9   : > { %v21364_v34 = vsub.f32 %v6411_v22, %v6445_v3  ;;  %v6413_v20 = vmul.f32 %v25543_v12, %v6308_v52  ;;  %v6310_v17 = vpop.f32.mrb[37].mxu1  ;;  %v25546_v12 = vld [vmem:[#allocation95_spill] sm:$0xff] }
 0x9ba   : > { %v21367_v36 = vsub.f32 %v6412_v42, %v6443_v63  ;;  %v6414_v51 = vmul.f32 %v25544_v57, %v6310_v17  ;;  %v25547_v57 = vld [vmem:[#allocation96_spill] sm:$0xff] }
 0x9bb   : > { %v6563_v62 = vand.u32 4294901760, %v21364_v34  ;;  %v6449_v49 = vand.u32 4294901760, %v6413_v20 }
 0x9bc   : > { %v6557_v35 = vand.u32 4294901760, %v21367_v36  ;;  %v6447_v61 = vand.u32 4294901760, %v6414_v51  ;;  %v6315_v45 = vpop.f32.mrb[38].mxu1 }
 0x9bd   : > { %v21375_v10 = vpack.c.bf16 %v6449_v49, %v6445_v3  ;;  %v21377_v22 = vsub.f32 %v6413_v20, %v6449_v49  ;;  %v6415_v52 = vmul.f32 %v25546_v12, %v6315_v45  ;;  %v6317_v42 = vpop.f32.mrb[39].mxu1  ;;  %v6564_v38 = vsub.f32 %v21364_v34, %v6563_v62 }
 0x9be   : > { %v21381_v17 = vsub.f32 %v6414_v51, %v6447_v61  ;;  %v6416_v23 = vmul.f32 %v25547_v57, %v6317_v42  ;;  %v21384_v24 = vpack.c.bf16 %v6447_v61, %v6443_v63  ;;  %v6558_v20 = vsub.f32 %v21367_v36, %v6557_v35  ;;  %v25549_v57 = vld [vmem:[#allocation98_spill] sm:$0xff] }
 0x9bf   : > { %25545 = vst [vmem:[#allocation113_spill] sm:$0xff] %v21375_v10  ;;  %v6575_v25 = vand.u32 4294901760, %v21377_v22  ;;  %v6453_v3 = vand.u32 4294901760, %v6415_v52  ;;  %v6565_v63 = vand.u32 4294901760, %v6564_v38 }
 0x9c0   : > { %25548 = vst [vmem:[#allocation116_spill] sm:$0xff] %v21384_v24  ;;  %v6569_v49 = vand.u32 4294901760, %v21381_v17  ;;  %v6451_v45 = vand.u32 4294901760, %v6416_v23  ;;  %v6322_v12 = vpop.f32.mrb[40].mxu1  ;;  %15804 = vmatprep.subr.bf16.mxu0 %v21384_v24  ;;  %v6559_v28 = vand.u32 4294901760, %v6558_v20 }
 0x9c1   : > { %v6576_v61 = vsub.f32 %v21377_v22, %v6575_v25  ;;  %v21396_v42 = vsub.f32 %v6415_v52, %v6453_v3  ;;  %v6417_v37 = vmul.f32 %v25549_v57, %v6322_v12  ;;  %v6324_v6 = vpop.f32.mrb[41].mxu1  ;;  %15806 = vmatpush1.bf16.xpose.msra.mxu0 %v21375_v10  ;;  %v21400_v58 = vpack.c.bf16 %v6575_v25, %v6563_v62 }
 0x9c2   : > { %v21402_v31 = vsub.f32 %v6416_v23, %v6451_v45  ;;  %v6418_v26 = vmul.f32 %v25551_v41, %v6324_v6  ;;  %v6570_v51 = vsub.f32 %v21381_v17, %v6569_v49  ;;  %v21406_v55 = vpack.c.bf16 %v6569_v49, %v6557_v35  ;;  %v25554_v6 = vld [vmem:[#allocation104_spill] sm:$0xff] }
 0x9c3   : > { %25550 = vst [vmem:[#allocation125_spill] sm:$0xff] %v21400_v58  ;;  %v6587_v21 = vand.u32 4294901760, %v21396_v42  ;;  %v6457_v52 = vand.u32 4294901760, %v6417_v37  ;;  %v6577_v60 = vand.u32 4294901760, %v6576_v61 }
 0x9c4   : > { %25552 = vst [vmem:[#allocation129_spill] sm:$0xff] %v21406_v55  ;;  %v6581_v12 = vand.u32 4294901760, %v21402_v31  ;;  %v6455_v57 = vand.u32 4294901760, %v6418_v26  ;;  %v6329_v56 = vpop.f32.mrb[42].mxu1  ;;  %v6571_v25 = vand.u32 4294901760, %v6570_v51 }
 0x9c5   : > { %v6588_v23 = vsub.f32 %v21396_v42, %v6587_v21  ;;  %v21411_v62 = vpack.c.bf16 %v6457_v52, %v6453_v3  ;;  %v21413_v41 = vsub.f32 %v6417_v37, %v6457_v52  ;;  %v6419_v35 = vmul.f32 %v25554_v6, %v6329_v56  ;;  %v6331_v49 = vpop.f32.mrb[43].mxu1  ;;  %v25558_v3 = vld [vmem:[#allocation111_spill] sm:$0xff] }
 0x9c6   : > { %v21416_v38 = vsub.f32 %v6418_v26, %v6455_v57  ;;  %v6420_v32 = vmul.f32 %v25555_v0, %v6331_v49  ;;  %v21419_v20 = vpack.c.bf16 %v6455_v57, %v6451_v45  ;;  %v21421_v61 = vpack.c.bf16 %v6571_v25, %v6559_v28  ;;  %v25557_v57 = vld [vmem:[#allocation17_spill] sm:$0xff] }
 0x9c7   : > { %25553 = vst [vmem:[#allocation138_spill] sm:$0xff] %v21411_v62  ;;  %v6589_v53 = vand.u32 4294901760, %v6588_v23  ;;  %v6599_v51 = vand.u32 4294901760, %v21413_v41  ;;  %v6461_v43 = vand.u32 4294901760, %v6419_v35  ;;  %v21428_v26 = vpack.c.bf16 %v6577_v60, %v6565_v63 }
 0x9c8   : > { %25556 = vst [vmem:[#allocation146_spill] sm:$0xff] %v21419_v20  ;;  %v6593_v37 = vand.u32 4294901760, %v21416_v38  ;;  %v6459_v52 = vand.u32 4294901760, %v6420_v32  ;;  %v6336_v56 = vpop.f32.mrb[44].mxu1  ;;  %15808 = vmatprep.subr.bf16.mxu0 %v21419_v20  ;;  %v6582_v0 = vsub.f32 %v21402_v31, %v6581_v12 }
 0x9c9   : > { %v6600_v28 = vsub.f32 %v21413_v41, %v6599_v51  ;;  %v21432_v45 = vsub.f32 %v6419_v35, %v6461_v43  ;;  %v6421_v25 = vmul.f32 %v25557_v57, %v6336_v56  ;;  %v6338_v23 = vpop.f32.mrb[45].mxu1  ;;  %15810 = vmatpush1.bf16.xpose.msra.mxu0 %v21411_v62  ;;  %v21446_v2 = vpack.c.bf16 %v6599_v51, %v6587_v21 }
 0x9ca   : > { %v21438_v49 = vsub.f32 %v6420_v32, %v6459_v52  ;;  %v6422_v59 = vmul.f32 %v25558_v3, %v6338_v23  ;;  %v6583_v60 = vand.u32 4294901760, %v6582_v0  ;;  %v6594_v63 = vsub.f32 %v21416_v38, %v6593_v37  ;;  %v25562_v0 = vld [vmem:[#allocation23_spill] sm:$0xff] }
 0x9cb   : > { %v6601_v39 = vand.u32 4294901760, %v6600_v28  ;;  %v6611_v44 = vand.u32 4294901760, %v21432_v45  ;;  %v6465_v35 = vand.u32 4294901760, %v6421_v25  ;;  %v21443_v48 = vpack.c.bf16 %v6593_v37, %v6581_v12  ;;  %25560 = vst [vmem:[#allocation126_spill] sm:$0xff] %v21446_v2  ;;  %v25563_v12 = vld [vmem:[#allocation114_spill] sm:$0xff] }
 0x9cc   : > { %v6605_v56 = vand.u32 4294901760, %v21438_v49  ;;  %v6463_v57 = vand.u32 4294901760, %v6422_v59  ;;  %v6343_v8 = vpop.f32.mrb[46].mxu1  ;;  %v6595_v19 = vand.u32 4294901760, %v6594_v63 }
 0x9cd   : > { %25559 = vst [vmem:[#allocation157_spill] sm:$0xff] %v21443_v48  ;;  %v6612_v32 = vsub.f32 %v21432_v45, %v6611_v44  ;;  %v21449_v6 = vpack.c.bf16 %v6465_v35, %v6461_v43  ;;  %v21451_v3 = vsub.f32 %v6421_v25, %v6465_v35  ;;  %v6423_v28 = vmul.f32 %v25562_v0, %v6343_v8  ;;  %v6345_v23 = vpop.f32.mrb[47].mxu1  ;;  %v25566_v43 = vld [vmem:[#allocation119_spill] sm:$0xff] }
 0x9ce   : > { %v21454_v29 = vsub.f32 %v6422_v59, %v6463_v57  ;;  %v6424_v37 = vmul.f32 %v25563_v12, %v6345_v23  ;;  %v21457_v40 = vpack.c.bf16 %v6463_v57, %v6459_v52  ;;  %v21459_v18 = vpack.c.bf16 %v6595_v19, %v6583_v60  ;;  %v25565_v57 = vld [vmem:[#allocation27_spill] sm:$0xff] }
 0x9cf   : > { %25561 = vst [vmem:[#allocation134_spill] sm:$0xff] %v21449_v6  ;;  %v6613_v63 = vand.u32 4294901760, %v6612_v32  ;;  %v6623_v21 = vand.u32 4294901760, %v21451_v3  ;;  %v6469_v51 = vand.u32 4294901760, %v6423_v28  ;;  %v21466_v59 = vpack.c.bf16 %v6601_v39, %v6589_v53 }
 0x9d0   : > { %25564 = vst [vmem:[#allocation137_spill] sm:$0xff] %v21457_v40  ;;  %v6617_v25 = vand.u32 4294901760, %v21454_v29  ;;  %v6467_v35 = vand.u32 4294901760, %v6424_v37  ;;  %v6350_v8 = vpop.f32.mrb[48].mxu1  ;;  %15812 = vmatprep.subr.bf16.mxu0 %v21457_v40  ;;  %v6606_v52 = vsub.f32 %v21438_v49, %v6605_v56 }
 0x9d1   : > { %v6624_v19 = vsub.f32 %v21451_v3, %v6623_v21  ;;  %v21470_v60 = vsub.f32 %v6423_v28, %v6469_v51  ;;  %v6425_v32 = vmul.f32 %v25565_v57, %v6350_v8  ;;  %v6352_v0 = vpop.f32.mrb[49].mxu1  ;;  %15814 = vmatpush1.bf16.xpose.msra.mxu0 %v21449_v6  ;;  %v21484_v9 = vpack.c.bf16 %v6623_v21, %v6611_v44  ;;  %v25575_v21 = vld [vmem:[#allocation127_spill] sm:$0xff] }
 0x9d2   : > { %v21476_v12 = vsub.f32 %v6424_v37, %v6467_v35  ;;  %v6426_v27 = vmul.f32 %v25566_v43, %v6352_v0  ;;  %v6607_v39 = vand.u32 4294901760, %v6606_v52  ;;  %v6618_v53 = vsub.f32 %v21454_v29, %v6617_v25  ;;  %v25570_v52 = vld [vmem:[#allocation29_spill] sm:$0xff] }
 0x9d3   : > { %v6625_v11 = vand.u32 4294901760, %v6624_v19  ;;  %v6635_v54 = vand.u32 4294901760, %v21470_v60  ;;  %v6473_v28 = vand.u32 4294901760, %v6425_v32  ;;  %v21481_v46 = vpack.c.bf16 %v6617_v25, %v6605_v56  ;;  %25568 = vst [vmem:[#allocation156_spill] sm:$0xff] %v21484_v9  ;;  %v25571_v56 = vld [vmem:[#allocation123_spill] sm:$0xff] }
 0x9d4   : > { %v6629_v8 = vand.u32 4294901760, %v21476_v12  ;;  %v6471_v57 = vand.u32 4294901760, %v6426_v27  ;;  %v6357_v50 = vpop.f32.mrb[50].mxu1  ;;  %v6619_v30 = vand.u32 4294901760, %v6618_v53 }
 0x9d5   : > { %25567 = vst [vmem:[#allocation141_spill] sm:$0xff] %v21481_v46  ;;  %v6636_v37 = vsub.f32 %v21470_v60, %v6635_v54  ;;  %v21487_v23 = vpack.c.bf16 %v6473_v28, %v6469_v51  ;;  %v21489_v43 = vsub.f32 %v6425_v32, %v6473_v28  ;;  %v6427_v19 = vmul.f32 %v25570_v52, %v6357_v50  ;;  %v6359_v0 = vpop.f32.mrb[51].mxu1 }
 0x9d6   : > { %v21492_v47 = vsub.f32 %v6426_v27, %v6471_v57  ;;  %v6428_v25 = vmul.f32 %v25571_v56, %v6359_v0  ;;  %v21495_v14 = vpack.c.bf16 %v6471_v57, %v6467_v35  ;;  %v21497_v4 = vpack.c.bf16 %v6619_v30, %v6607_v39  ;;  %v25574_v57 = vld [vmem:[#allocation31_spill] sm:$0xff] }
 0x9d7   : > { %25569 = vst [vmem:[#allocation162_spill] sm:$0xff] %v21487_v23  ;;  %v6637_v53 = vand.u32 4294901760, %v6636_v37  ;;  %v6647_v44 = vand.u32 4294901760, %v21489_v43  ;;  %v6477_v51 = vand.u32 4294901760, %v6427_v19  ;;  %v21504_v27 = vpack.c.bf16 %v6625_v11, %v6613_v63 }
 0x9d8   : > { %25572 = vst [vmem:[#allocation165_spill] sm:$0xff] %v21495_v14  ;;  %v6641_v32 = vand.u32 4294901760, %v21492_v47  ;;  %v6475_v28 = vand.u32 4294901760, %v6428_v25  ;;  %v6364_v50 = vpop.f32.mrb[52].mxu1  ;;  %15816 = vmatprep.subr.bf16.mxu0 %v21495_v14  ;;  %v6630_v35 = vsub.f32 %v21476_v12, %v6629_v8 }
 0x9d9   : > { %v6648_v30 = vsub.f32 %v21489_v43, %v6647_v44  ;;  %v21508_v39 = vsub.f32 %v6427_v19, %v6477_v51  ;;  %v6429_v37 = vmul.f32 %v25574_v57, %v6364_v50  ;;  %v6366_v52 = vpop.f32.mrb[53].mxu1  ;;  %15818 = vmatpush1.bf16.xpose.msra.mxu0 %v21487_v23  ;;  %v21522_v48 = vpack.c.bf16 %v6647_v44, %v6635_v54  ;;  %v25585_v44 = vld [vmem:[#allocation135_spill] sm:$0xff] }
 0x9da   : > { %v21514_v56 = vsub.f32 %v6428_v25, %v6475_v28  ;;  %v6430_v7 = vmul.f32 %v25575_v21, %v6366_v52  ;;  %v6631_v11 = vand.u32 4294901760, %v6630_v35  ;;  %v6642_v63 = vsub.f32 %v21492_v47, %v6641_v32  ;;  %v25579_v35 = vld [vmem:[#allocation35_spill] sm:$0xff] }
 0x9db   : > { %25573 = vst [vmem:[#allocation38_spill] sm:$0xff] %v21508_v39  ;;  %v6649_v13 = vand.u32 4294901760, %v6648_v30  ;;  %v6659_v15 = vand.u32 4294901760, %v21508_v39  ;;  %v6481_v19 = vand.u32 4294901760, %v6429_v37  ;;  %v21519_v9 = vpack.c.bf16 %v6641_v32, %v6629_v8  ;;  %25577 = vst [vmem:[#allocation87_spill] sm:$0xff] %v21522_v48  ;;  %v25580_v8 = vld [vmem:[#allocation131_spill] sm:$0xff] }
 0x9dc   : > { %v6653_v50 = vand.u32 4294901760, %v21514_v56  ;;  %v6479_v57 = vand.u32 4294901760, %v6430_v7  ;;  %v6371_v46 = vpop.f32.mrb[54].mxu1  ;;  %v6643_v2 = vand.u32 4294901760, %v6642_v63 }
 0x9dd   : > { %25576 = vst [vmem:[#allocation85_spill] sm:$0xff] %v21519_v9  ;;  %v6660_v25 = vsub.f32 %v21508_v39, %v6659_v15  ;;  %v21525_v0 = vpack.c.bf16 %v6481_v19, %v6477_v51  ;;  %v21527_v21 = vsub.f32 %v6429_v37, %v6481_v19  ;;  %v6431_v30 = vmul.f32 %v25579_v35, %v6371_v46  ;;  %v6373_v52 = vpop.f32.mrb[55].mxu1 }
 0x9de   : > { %v21530_v58 = vsub.f32 %v6430_v7, %v6479_v57  ;;  %v6432_v32 = vmul.f32 %v25580_v8, %v6373_v52  ;;  %v21533_v9 = vpack.c.bf16 %v6479_v57, %v6475_v28  ;;  %v21535_v55 = vpack.c.bf16 %v6643_v2, %v6631_v11  ;;  %v25583_v57 = vld [vmem:[#allocation37_spill] sm:$0xff] }
 0x9df   : > { %25578 = vst [vmem:[#allocation91_spill] sm:$0xff] %v21525_v0  ;;  %v6661_v63 = vand.u32 4294901760, %v6660_v25  ;;  %v6671_v54 = vand.u32 4294901760, %v21527_v21  ;;  %v6485_v51 = vand.u32 4294901760, %v6431_v30  ;;  %v21542_v7 = vpack.c.bf16 %v6649_v13, %v6637_v53 }
 0x9e0   : > { %25581 = vst [vmem:[#allocation93_spill] sm:$0xff] %v21533_v9  ;;  %v6665_v37 = vand.u32 4294901760, %v21530_v58  ;;  %v6483_v19 = vand.u32 4294901760, %v6432_v32  ;;  %v6378_v46 = vpop.f32.mrb[56].mxu1  ;;  %15820 = vmatprep.subr.bf16.mxu0 %v21533_v9  ;;  %v6654_v28 = vsub.f32 %v21514_v56, %v6653_v50 }
 0x9e1   : > { %v6672_v2 = vsub.f32 %v21527_v21, %v6671_v54  ;;  %v21546_v11 = vsub.f32 %v6431_v30, %v6485_v51  ;;  %v6433_v25 = vmul.f32 %v25583_v57, %v6378_v46  ;;  %v6380_v35 = vpop.f32.mrb[57].mxu1  ;;  %15822 = vmatpush1.bf16.xpose.msra.mxu0 %v21525_v0  ;;  %v21560_v40 = vpack.c.bf16 %v6671_v54, %v6659_v15  ;;  %v25597_v54 = vld [vmem:[#allocation144_spill] sm:$0xff] }
 0x9e2   : > { %v21552_v8 = vsub.f32 %v6432_v32, %v6483_v19  ;;  %v6434_v48 = vmul.f32 %v25585_v44, %v6380_v35  ;;  %v6655_v13 = vand.u32 4294901760, %v6654_v28  ;;  %v6666_v53 = vsub.f32 %v21530_v58, %v6665_v37  ;;  %v25590_v28 = vld [vmem:[#allocation40_spill] sm:$0xff] }
 0x9e3   : > { %25582 = vst [vmem:[#allocation95_spill] sm:$0xff] %v21546_v11  ;;  %v6673_v9 = vand.u32 4294901760, %v6672_v2  ;;  %v6683_v23 = vand.u32 4294901760, %v21546_v11  ;;  %v6489_v30 = vand.u32 4294901760, %v6433_v25  ;;  %v21557_v14 = vpack.c.bf16 %v6665_v37, %v6653_v50  ;;  %25587 = vst [vmem:[#allocation100_spill] sm:$0xff] %v21560_v40  ;;  %v25592_v50 = vld [vmem:[#allocation139_spill] sm:$0xff] }
 0x9e4   : > { %25584 = vst [vmem:[#allocation96_spill] sm:$0xff] %v21552_v8  ;;  %v6677_v46 = vand.u32 4294901760, %v21552_v8  ;;  %v6487_v57 = vand.u32 4294901760, %v6434_v48  ;;  %v6385_v0 = vpop.f32.mrb[58].mxu1  ;;  %v6667_v6 = vand.u32 4294901760, %v6666_v53 }
 0x9e5   : > { %25586 = vst [vmem:[#allocation98_spill] sm:$0xff] %v21557_v14  ;;  %v6684_v32 = vsub.f32 %v21546_v11, %v6683_v23  ;;  %v21563_v52 = vpack.c.bf16 %v6489_v30, %v6485_v51  ;;  %v21565_v44 = vsub.f32 %v6433_v25, %v6489_v30  ;;  %v6435_v2 = vmul.f32 %v25590_v28, %v6385_v0  ;;  %v6387_v35 = vpop.f32.mrb[59].mxu1 }
 0x9e6   : > { %v21568_v62 = vsub.f32 %v6434_v48, %v6487_v57  ;;  %v6436_v37 = vmul.f32 %v25592_v50, %v6387_v35  ;;  %v21571_v14 = vpack.c.bf16 %v6487_v57, %v6483_v19  ;;  %v21573_v20 = vpack.c.bf16 %v6667_v6, %v6655_v13  ;;  %v25595_v57 = vld [vmem:[#allocation143_spill] sm:$0xff] }
 0x9e7   : > { %25588 = vst [vmem:[#allocation104_spill] sm:$0xff] %v21563_v52  ;;  %25589 = vst [vmem:[#allocation106_spill] sm:$0xff] %v21565_v44  ;;  %v6685_v53 = vand.u32 4294901760, %v6684_v32  ;;  %v6695_v15 = vand.u32 4294901760, %v21565_v44  ;;  %v6493_v51 = vand.u32 4294901760, %v6435_v2  ;;  %v21580_v48 = vpack.c.bf16 %v6673_v9, %v6661_v63 }
 0x9e8   : > { %25591 = vst [vmem:[#allocation17_spill] sm:$0xff] %v21568_v62  ;;  %25593 = vst [vmem:[#allocation111_spill] sm:$0xff] %v21571_v14  ;;  %v6689_v25 = vand.u32 4294901760, %v21568_v62  ;;  %v6491_v30 = vand.u32 4294901760, %v6436_v37  ;;  %v6392_v0 = vpop.f32.mrb[60].mxu1  ;;  %15824 = vmatprep.subr.bf16.mxu0 %v21571_v14  ;;  %v6678_v19 = vsub.f32 %v21552_v8, %v6677_v46 }
 0x9e9   : > { %v6696_v6 = vsub.f32 %v21565_v44, %v6695_v15  ;;  %v21584_v13 = vsub.f32 %v6435_v2, %v6493_v51  ;;  %v6437_v32 = vmul.f32 %v25595_v57, %v6392_v0  ;;  %v6394_v28 = vpop.f32.mrb[61].mxu1  ;;  %15826 = vmatpush1.bf16.xpose.msra.mxu0 %v21563_v52  ;;  %v21598_v44 = vpack.c.bf16 %v6695_v15, %v6683_v23  ;;  %v25607_v15 = vld [vmem:[#allocation155_spill] sm:$0xff] }
 0x9ea   : > { %v21590_v50 = vsub.f32 %v6436_v37, %v6491_v30  ;;  %v6438_v40 = vmul.f32 %v25597_v54, %v6394_v28  ;;  %v6679_v9 = vand.u32 4294901760, %v6678_v19  ;;  %v6690_v63 = vsub.f32 %v21568_v62, %v6689_v25  ;;  %v25602_v19 = vld [vmem:[#allocation149_spill] sm:$0xff] }
 0x9eb   : > { %25594 = vst [vmem:[#allocation23_spill] sm:$0xff] %v21584_v13  ;;  %v6697_v14 = vand.u32 4294901760, %v6696_v6  ;;  %v6707_v10 = vand.u32 4294901760, %v21584_v13  ;;  %v6497_v2 = vand.u32 4294901760, %v6437_v32  ;;  %v21595_v24 = vpack.c.bf16 %v6689_v25, %v6677_v46  ;;  %25599 = vst [vmem:[#allocation119_spill] sm:$0xff] %v21598_v44  ;;  %v25604_v46 = vld [vmem:[#allocation151_spill] sm:$0xff] }
 0x9ec   : > { %25596 = vst [vmem:[#allocation114_spill] sm:$0xff] %v21590_v50  ;;  %v6701_v0 = vand.u32 4294901760, %v21590_v50  ;;  %v6495_v57 = vand.u32 4294901760, %v6438_v40  ;;  %v6399_v52 = vpop.f32.mrb[62].mxu1  ;;  %v6691_v11 = vand.u32 4294901760, %v6690_v63 }
 0x9ed   : > { %25598 = vst [vmem:[#allocation27_spill] sm:$0xff] %v21595_v24  ;;  %v6708_v37 = vsub.f32 %v21584_v13, %v6707_v10  ;;  %v21601_v35 = vpack.c.bf16 %v6497_v2, %v6493_v51  ;;  %v21603_v54 = vsub.f32 %v6437_v32, %v6497_v2  ;;  %v6439_v6 = vmul.f32 %v25602_v19, %v6399_v52  ;;  %v6401_v28 = vpop.f32.mrb[63].mxu1 }
 0x9ee   : > { %v21606_v8 = vsub.f32 %v6438_v40, %v6495_v57  ;;  %v6440_v25 = vmul.f32 %v25604_v46, %v6401_v28  ;;  %v21609_v24 = vpack.c.bf16 %v6495_v57, %v6491_v30  ;;  %v21611_v62 = vpack.c.bf16 %v6691_v11, %v6679_v9  ;;  %v25606_v9 = vld [vmem:[#allocation154_spill] sm:$0xff] }
 0x9ef   : > { %25600 = vst [vmem:[#allocation29_spill] sm:$0xff] %v21601_v35  ;;  %25601 = vst [vmem:[#allocation123_spill] sm:$0xff] %v21603_v54  ;;  %v6709_v63 = vand.u32 4294901760, %v6708_v37  ;;  %v6719_v23 = vand.u32 4294901760, %v21603_v54  ;;  %v6501_v51 = vand.u32 4294901760, %v6439_v6  ;;  %v15857_v40 = vpack.c.bf16 %v6697_v14, %v6685_v53 }
 0x9f0   : > { %25603 = vst [vmem:[#allocation31_spill] sm:$0xff] %v21606_v8  ;;  %25605 = vst [vmem:[#allocation127_spill] sm:$0xff] %v21609_v24  ;;  %v6713_v32 = vand.u32 4294901760, %v21606_v8  ;;  %v6499_v2 = vand.u32 4294901760, %v6440_v25  ;;  %v6406_v52 = vpop.f32.mrb[64].mxu1  ;;  %15828 = vmatprep.subr.bf16.mxu0 %v21609_v24  ;;  %v6702_v19 = vsub.f32 %v21590_v50, %v6701_v0 }
 0x9f1   : > { %v6720_v30 = vsub.f32 %v21603_v54, %v6719_v23  ;;  %v21620_v11 = vsub.f32 %v6439_v6, %v6501_v51  ;;  %v6441_v57 = vmul.f32 %v25606_v9, %v6406_v52  ;;  %v6408_v37 = vpop.f32.mrb[65].mxu1  ;;  %15830 = vmatpush1.bf16.xpose.msra.mxu0 %v21601_v35  ;;  %v21634_v39 = vpack.c.bf16 %v6719_v23, %v6707_v10 }
 0x9f2   : > { %v21626_v46 = vsub.f32 %v6440_v25, %v6499_v2  ;;  %v6442_v44 = vmul.f32 %v25607_v15, %v6408_v37  ;;  %v6703_v24 = vand.u32 4294901760, %v6702_v19  ;;  %v6714_v14 = vsub.f32 %v21606_v8, %v6713_v32 }
 0x9f3   : > { %v6721_v53 = vand.u32 4294901760, %v6720_v30  ;;  %v6731_v13 = vand.u32 4294901760, %v21620_v11  ;;  %v6505_v6 = vand.u32 4294901760, %v6441_v57  ;;  %v21631_v54 = vpack.c.bf16 %v6713_v32, %v6701_v0 }
 0x9f4   : > { %v6725_v52 = vand.u32 4294901760, %v21626_v46  ;;  %v6503_v9 = vand.u32 4294901760, %v6442_v44  ;;  %v6715_v35 = vand.u32 4294901760, %v6714_v14  ;;  %v25608_v14 = vand.u32 4294901760, %v21373_v5 }
 0x9f5   : > { %v21636_v28 = vpack.c.bf16 %v6505_v6, %v6501_v51  ;;  %v6742_v25 = vsub.f32 %v6441_v57, %v6505_v6  ;;  %v15861_v50 = vpack.c.bf16 %v6721_v53, %v6709_v63  ;;  %v6732_v30 = vsub.f32 %v21620_v11, %v6731_v13 }
 0x9f6   : > { %v6736_v15 = vsub.f32 %v6442_v44, %v6503_v9  ;;  %v21638_v19 = vpack.c.bf16 %v6503_v9, %v6499_v2  ;;  %v15859_v37 = vpack.c.bf16 %v6715_v35, %v6703_v24  ;;  %v6548_v10 = vsub.f32 %v21373_v5, %v25608_v14 }
 0x9f7   : > { %v6743_v8 = vand.u32 4294901760, %v6742_v25  ;;  %v15897_v0 = vpack.c.bf16 %v6742_v25, %v21620_v11  ;;  %v6726_v23 = vsub.f32 %v21626_v46, %v6725_v52  ;;  %v6733_v2 = vand.u32 4294901760, %v6732_v30  ;;  %v25649_v30 = vld [vmem:[#allocation125_spill] sm:$0xff] }
 0x9f8   : > { %v6737_v32 = vand.u32 4294901760, %v6736_v15  ;;  %15832 = vmatprep.subr.bf16.mxu0 %v21638_v19  ;;  %v15895_v63 = vpack.c.bf16 %v6736_v15, %v21626_v46  ;;  %v6549_v57 = vand.u32 4294901760, %v6548_v10  ;;  %v25643_v46 = vld [vmem:[#allocation111_spill] sm:$0xff]  ;;  %v25652_v10 = vld [vmem:[#allocation141_spill] sm:$0xff] }
 0x9f9   : > { %v6744_v44 = vsub.f32 %v6742_v25, %v6743_v8  ;;  %15834 = vmatpush1.bf16.xpose.msra.mxu0 %v21636_v28  ;;  %v21649_v24 = vpack.c.bf16 %v6743_v8, %v6731_v13  ;;  %v6727_v53 = vand.u32 4294901760, %v6726_v23  ;;  %v25638_v8 = vld [vmem:[#allocation134_spill] sm:$0xff]  ;;  %v25646_v25 = vld [vmem:[#allocation29_spill] sm:$0xff]  ;;  %v25653_v23 = vld [vmem:[#allocation156_spill] sm:$0xff] }
 0x9fa   : > { %15836 = vmatprep.subr.bf16.mxu0 %v21421_v61  ;;  %v6738_v35 = vsub.f32 %v6736_v15, %v6737_v32  ;;  %v21652_v51 = vpack.c.bf16 %v6737_v32, %v6725_v52  ;;  %v25623_v61 = vld [vmem:[#allocation106_spill] sm:$0xff]  ;;  %v25645_v52 = vld [vmem:[#allocation127_spill] sm:$0xff]  ;;  %v25647_v15 = vld [vmem:[#allocation129_spill] sm:$0xff] }
 0x9fb   : > { %v6745_v11 = vand.u32 4294901760, %v6744_v44  ;;  %v25640_v13 = vld [vmem:[#allocation162_spill] sm:$0xff]  ;;  %v25655_v44 = vld [vmem:[#allocation87_spill] sm:$0xff] }
 0x9fc   : > { %v6739_v6 = vand.u32 4294901760, %v6738_v35  ;;  %v25651_v32 = vld [vmem:[#allocation126_spill] sm:$0xff] }
 0x9fd   : > { %v15865_v9 = vpack.c.bf16 %v6745_v11, %v6733_v2  ;;  %v25656_v35 = vld [vmem:[#allocation98_spill] sm:$0xff]  ;;  %v25658_v2 = vld [vmem:[#allocation27_spill] sm:$0xff] }
 0x9fe   : > { %v15863_v14 = vpack.c.bf16 %v6739_v6, %v6727_v53  ;;  %v25659_v11 = vld [vmem:[#allocation119_spill] sm:$0xff] }
 0x9ff   : > { %v7306_v53 = vld [vmem:[#allocation2 + $0x18] sm:$0xff] }
 0xa00   : > { %6550 = vmatmul.mubr.f32.vlgmr.msra.gmra.mrb[194].mxu0 %v6549_v57 }
 0xa01   : > { %15838 = vmatpush1.bf16.xpose.msra.mxu0 %v21428_v26  ;;  %6780 = vmatprep.mubr.f32.mxu0 %v21351_v33  ;;  %v25624_v26 = vld [vmem:[#allocation95_spill] sm:$0xff] }
 0xa02   : > { %15840 = vmatprep.subr.bf16.mxu0 %v21459_v18  ;;  %v25610_v18 = vpack.c.bf16 %v21377_v22, %v21364_v34  ;;  %v25615_v34 = vpack.c.bf16 %v21492_v47, %v21476_v12  ;;  %v25617_v22 = vpack.c.bf16 %v21530_v58, %v21514_v56  ;;  %v25625_v47 = vpack.c.bf16 %v25623_v61, %v25624_v26  ;;  %v25632_v12 = vld [vmem:[#allocation116_spill] sm:$0xff]  ;;  %v25635_v56 = vld [vmem:[#allocation146_spill] sm:$0xff] }
 0xa09   : > { %15842 = vmatpush1.bf16.xpose.msra.mxu0 %v21466_v59  ;;  %v25629_v59 = vld [vmem:[#allocation123_spill] sm:$0xff] }
 0xa0a   : > { %15844 = vmatprep.subr.bf16.mxu0 %v21497_v4  ;;  %v25609_v4 = vpack.c.bf16 %v21381_v17, %v21367_v36  ;;  %v25613_v36 = vpack.c.bf16 %v21454_v29, %v21438_v49  ;;  %v25614_v17 = vpack.c.bf16 %v21451_v3, %v21432_v45  ;;  %v25626_v45 = vld [vmem:[#allocation31_spill] sm:$0xff]  ;;  %v25627_v49 = vld [vmem:[#allocation114_spill] sm:$0xff] }
 0xa0b   : > { %v25628_v3 = vpack.c.bf16 %v25626_v45, %v25627_v49 }
 0xa11   : > { %15846 = vmatpush1.bf16.xpose.msra.mxu0 %v21504_v27  ;;  %v25634_v27 = vand.u32 4294901760, %v21354_v1 }
 0xa12   : > { %15848 = vmatprep.subr.bf16.mxu0 %v21535_v55  ;;  %v25611_v55 = vpack.c.bf16 %v21416_v38, %v21402_v31  ;;  %v25616_v31 = vpack.c.bf16 %v21489_v43, %v21470_v60  ;;  %v25621_v38 = vld [vmem:[#allocation96_spill] sm:$0xff]  ;;  %v25630_v60 = vld [vmem:[#allocation23_spill] sm:$0xff]  ;;  %v25633_v43 = vld [vmem:[#allocation113_spill] sm:$0xff] }
 0xa13   : > { %v25631_v58 = vpack.c.bf16 %v25629_v59, %v25630_v60 }
 0xa19   : > { %15850 = vmatpush1.bf16.xpose.msra.mxu0 %v21542_v7  ;;  %v25637_v7 = vld [vmem:[#allocation137_spill] sm:$0xff] }
 0xa1a   : > { %15852 = vmatprep.subr.bf16.mxu0 %v21573_v20 }
 0xa21   : > { %15854 = vmatpush1.bf16.xpose.msra.mxu0 %v21580_v48  ;;  %v25639_v48 = vld [vmem:[#allocation165_spill] sm:$0xff] }
 0xa22   : > { %15856 = vmatprep.subr.bf16.mxu0 %v21611_v62  ;;  %v25612_v62 = vpack.c.bf16 %v21413_v41, %v21396_v42  ;;  %v25618_v42 = vld [vmem:[#allocation38_spill] sm:$0xff]  ;;  %v25620_v41 = vld [vmem:[#allocation17_spill] sm:$0xff] }
 0xa23   : > { %v25619_v29 = vpack.c.bf16 %v21527_v21, %v25618_v42  ;;  %v25622_v20 = vpack.c.bf16 %v25620_v41, %v25621_v38  ;;  %v25636_v21 = vld [vmem:[#allocation138_spill] sm:$0xff] }
 0xa29   : > { %15858 = vmatpush1.bf16.xpose.msra.mxu0 %v15857_v40  ;;  %v25642_v40 = vld [vmem:[#allocation91_spill] sm:$0xff] }
 0xa2a   : > { %15860 = vmatprep.subr.bf16.mxu0 %v15859_v37  ;;  %v25648_v37 = vand.u32 4294901760, %v21373_v5 }
 0xa31   : > { %15862 = vmatpush1.bf16.xpose.msra.mxu0 %v15861_v50  ;;  %v25641_v50 = vld [vmem:[#allocation93_spill] sm:$0xff] }
 0xa32   : > { %15864 = vmatprep.subr.bf16.mxu0 %v15863_v14  ;;  %v7305_v14 = vld [vmem:[#allocation2 + $0x10] sm:$0xff] }
 0xa39   : > { %15866 = vmatpush1.bf16.xpose.msra.mxu0 %v15865_v9  ;;  %v21763_v9 = vand.u32 4294901760, %v7306_v53 }
 0xa3a   : > { %15868 = vmatprep.subr.bf16.mxu0 %v25609_v4 }
 0xa40   : > { %6782 = vmatmul.mubr.f32.vlgmr.msra.gmra.mrb[194].mxu0 %v21362_v16 }
 0xa41   : > { %15870 = vmatpush1.bf16.xpose.msra.mxu0 %v25610_v18  ;;  %6917 = vmatprep.mubr.f32.mxu0 %v21354_v1  ;;  %v25644_v1 = vld [vmem:[#allocation104_spill] sm:$0xff] }
 0xa42   : > { %15872 = vmatprep.subr.bf16.mxu0 %v25611_v55  ;;  %v21771_v55 = vsub.f32 %v7306_v53, %v21763_v9 }
 0xa49   : > { %15874 = vmatpush1.bf16.xpose.msra.mxu0 %v25612_v62 }
 0xa4a   : > { %15876 = vmatprep.subr.bf16.mxu0 %v25613_v36  ;;  %v21773_v36 = vand.u32 4294901760, %v7305_v14 }
 0xa51   : > { %15878 = vmatpush1.bf16.xpose.msra.mxu0 %v25614_v17 }
 0xa52   : > { %15880 = vmatprep.subr.bf16.mxu0 %v25615_v34  ;;  %v21778_v34 = vsub.f32 %v7305_v14, %v21773_v36 }
 0xa54   : > { %v7640_v41 = vand.u32 4294901760, %v21778_v34 }
 0xa56   : > { %v7641_v45 = vsub.f32 %v21778_v34, %v7640_v41 }
 0xa59   : > { %15882 = vmatpush1.bf16.xpose.msra.mxu0 %v25616_v31 }
 0xa5a   : > { %15884 = vmatprep.subr.bf16.mxu0 %v25617_v22 }
 0xa61   : > { %15886 = vmatpush1.bf16.xpose.msra.mxu0 %v25619_v29 }
 0xa62   : > { %15888 = vmatprep.subr.bf16.mxu0 %v25622_v20 }
 0xa69   : > { %15890 = vmatpush1.bf16.xpose.msra.mxu0 %v25625_v47 }
 0xa6a   : > { %15892 = vmatprep.subr.bf16.mxu0 %v25628_v3 }
 0xa71   : > { %15894 = vmatpush1.bf16.xpose.msra.mxu0 %v25631_v58 }
 0xa72   : > { %15896 = vmatprep.subr.bf16.mxu0 %v15895_v63  ;;  %v25654_v63 = vld [vmem:[#allocation85_spill] sm:$0xff] }
 0xa79   : > { %15898 = vmatpush1.bf16.xpose.msra.mxu0 %v15897_v0  ;;  %v25650_v0 = vld [vmem:[#allocation157_spill] sm:$0xff] }
 0xa7a   : > { %15900 = vmatprep.subr.bf16.mxu0 %v25632_v12 }
 0xa80   : > { %6920 = vmatmul.mubr.f32.vlgmr.msra.gmra.mrb[194].mxu0 %v21373_v5  ;;  %v25657_v5 = vld [vmem:[#allocation100_spill] sm:$0xff] }
 0xa81   : > { %15902 = vmatpush1.bf16.xpose.msra.mxu0 %v25633_v43  ;;  %7024 = vmatprep.mubr.f32.mxu0 %v25634_v27 }
 0xa82   : > { %15904 = vmatprep.subr.bf16.mxu0 %v25635_v56 }
 0xa89   : > { %15906 = vmatpush1.bf16.xpose.msra.mxu0 %v25636_v21 }
 0xa8a   : > { %15908 = vmatprep.subr.bf16.mxu0 %v25637_v7 }
 0xa91   : > { %15910 = vmatpush1.bf16.xpose.msra.mxu0 %v25638_v8 }
 0xa92   : > { %15912 = vmatprep.subr.bf16.mxu0 %v25639_v48 }
 0xa99   : > { %15914 = vmatpush1.bf16.xpose.msra.mxu0 %v25640_v13 }
 0xa9a   : > { %15916 = vmatprep.subr.bf16.mxu0 %v25641_v50 }
 0xaa1   : > { %15918 = vmatpush1.bf16.xpose.msra.mxu0 %v25642_v40 }
 0xaa2   : > { %15920 = vmatprep.subr.bf16.mxu0 %v25643_v46 }
 0xaa9   : > { %15922 = vmatpush1.bf16.xpose.msra.mxu0 %v25644_v1 }
 0xaaa   : > { %15924 = vmatprep.subr.bf16.mxu0 %v25645_v52 }
 0xab1   : > { %15926 = vmatpush1.bf16.xpose.msra.mxu0 %v25646_v25 }
 0xab2   : > { %15928 = vmatprep.subr.bf16.mxu0 %v21638_v19 }
 0xab9   : > { %15930 = vmatpush1.bf16.xpose.msra.mxu0 %v21636_v28 }
 0xaba   : > { %15932 = vmatprep.subr.bf16.mxu0 %v25647_v15 }
 0xac0   : > { %7028 = vmatmul.mubr.f32.vlgmr.msra.gmra.mrb[194].mxu0 %v25648_v37 }
 0xac1   : > { %15934 = vmatpush1.bf16.xpose.msra.mxu0 %v25649_v30  ;;  %7194 = vmatprep.mubr.f32.mxu0 %v21351_v33 }
 0xac2   : > { %15936 = vmatprep.subr.bf16.mxu0 %v25650_v0 }
 0xac9   : > { %15938 = vmatpush1.bf16.xpose.msra.mxu0 %v25651_v32 }
 0xaca   : > { %15940 = vmatprep.subr.bf16.mxu0 %v25652_v10 }
 0xad1   : > { %15942 = vmatpush1.bf16.xpose.msra.mxu0 %v25653_v23 }
 0xad2   : > { %15944 = vmatprep.subr.bf16.mxu0 %v25654_v63 }
 0xad9   : > { %15946 = vmatpush1.bf16.xpose.msra.mxu0 %v25655_v44 }
 0xada   : > { %15948 = vmatprep.subr.bf16.mxu0 %v25656_v35 }
 0xae1   : > { %15950 = vmatpush1.bf16.xpose.msra.mxu0 %v25657_v5 }
 0xae2   : > { %15952 = vmatprep.subr.bf16.mxu0 %v25658_v2 }
 0xae9   : > { %15954 = vmatpush1.bf16.xpose.msra.mxu0 %v25659_v11 }
 0xaea   : > { %15956 = vmatprep.subr.bf16.mxu0 %v21631_v54  ;;  %v7325_v54 = vpop.trf.xlu1 }
 0xaeb   : > { %v7342_v6 = vsel %vm1533_vm4, %v7325_v54, 0 }
 0xaec   : > { %v21767_v4 = vand.u32 4294901760, %v7342_v6 }
 0xaee   : > { %v21781_v31 = vsub.f32 %v7342_v6, %v21767_v4 }
 0xaf0   : > { %v7458_v38 = vand.u32 4294901760, %v21781_v31 }
 0xaf1   : > { %15958 = vmatpush1.bf16.xpose.msra.mxu0 %v21634_v39  ;;  %v7326_v39 = vpop.trf.xlu1 }
 0xaf2   : > { %15960 = vmatprep.subr.bf16.mxu0 %v21652_v51  ;;  %v7345_v18 = vsel %vm1533_vm4, %v7326_v39, 0  ;;  %v7459_v49 = vsub.f32 %v21781_v31, %v7458_v38 }
 0xaf3   : > { %v21775_v17 = vand.u32 4294901760, %v7345_v18 }
 0xaf5   : > { %v21787_v29 = vsub.f32 %v7345_v18, %v21775_v17 }
 0xaf7   : > { %v7469_v47 = vand.u32 4294901760, %v21787_v29 }
 0xaf9   : > { %15962 = vmatpush1.bf16.xpose.msra.mxu0 %v21649_v24  ;;  %v7327_v24 = vpop.trf.xlu1  ;;  %v7470_v27 = vsub.f32 %v21787_v29, %v7469_v47 }
 0xafa   : > { %15964 = vmatprep.subr.bf16.mxu0 %v25632_v12  ;;  %v7348_v22 = vsel %vm1533_vm4, %v7327_v24, 0  ;;  %v25660_v12 = vmov 0.0  }
 0xafb   : > { %v21791_v20 = vand.u32 4294901760, %v7348_v22 }
 0xafd   : > { %v7328_v51 = vpop.trf.xlu1  ;;  %v21808_v3 = vsub.f32 %v7348_v22, %v21791_v20 }
 0xafe   : > { %v7351_v61 = vsel %vm1533_vm4, %v7328_v51, 0 }
 0xb00   : > { %7196 = vmatmul.mubr.f32.vlgmr.msra.gmra.mrb[194].mxu0 %v21362_v16 }
 0xb01   : > { %15966 = vmatpush1.bf16.xpose.msra.mxu0 %v25633_v43  ;;  %7298 = vmatprep.mubr.f32.mxu0 %v21351_v33  ;;  %v7329_v33 = vpop.trf.xlu1 }
 0xb02   : > { %15968 = vmatprep.subr.bf16.mxu0 %v25635_v56  ;;  %v7354_v58 = vsel %vm1533_vm4, %v7329_v33, 0  ;;  %v7642_v56 = vand.u32 4294901760, %v7641_v45 }
 0xb05   : > { %v7330_v57 = vpop.trf.xlu1 }
 0xb09   : > { %15970 = vmatpush1.bf16.xpose.msra.mxu0 %v25636_v21  ;;  %v7331_v62 = vpop.trf.xlu1  ;;  %v7460_v21 = vand.u32 4294901760, %v7459_v49 }
 0xb0a   : > { %15972 = vmatprep.subr.bf16.mxu0 %v25637_v7  ;;  %v7480_v7 = vand.u32 4294901760, %v21808_v3 }
 0xb0d   : > { %v7332_v42 = vpop.trf.xlu1 }
 0xb0e   : > { %v7363_v10 = vsel %vm1533_vm4, %v7332_v42, 0 }
 0xb0f   : > { %v21852_v35 = vand.u32 4294901760, %v7363_v10 }
 0xb11   : > { %15974 = vmatpush1.bf16.xpose.msra.mxu0 %v25638_v8  ;;  %v7333_v60 = vpop.trf.xlu1  ;;  %v21821_v8 = vand.u32 4294901760, %v7354_v58  ;;  %v21863_v24 = vsub.f32 %v7363_v10, %v21852_v35 }
 0xb12   : > { %15976 = vmatprep.subr.bf16.mxu0 %v25639_v48  ;;  %v7366_v2 = vsel %vm1533_vm4, %v7333_v60, 0 }
 0xb13   : > { %v21860_v39 = vand.u32 4294901760, %v7366_v2  ;;  %v7535_v14 = vand.u32 4294901760, %v21863_v24 }
 0xb15   : > { %v7334_v48 = vpop.trf.xlu1  ;;  %v21871_v53 = vsub.f32 %v7366_v2, %v21860_v39 }
 0xb19   : > { %15978 = vmatpush1.bf16.xpose.msra.mxu0 %v25640_v13  ;;  %v7335_v32 = vpop.trf.xlu1 }
 0xb1a   : > { %15980 = vmatprep.subr.bf16.mxu0 %v25641_v50  ;;  %v7471_v50 = vand.u32 4294901760, %v7470_v27  ;;  %v7372_v42 = vsel %vm1533_vm4, %v7335_v32, 0 }
 0xb1b   : > { %v21885_v49 = vand.u32 4294901760, %v7372_v42 }
 0xb1d   : > { %v7336_v11 = vpop.trf.xlu1 }
 0xb1e   : > { %v7375_v60 = vsel %vm1533_vm4, %v7336_v11, 0 }
 0xb1f   : > { %v21892_v27 = vand.u32 4294901760, %v7375_v60 }
 0xb21   : > { %15982 = vmatpush1.bf16.xpose.msra.mxu0 %v25642_v40  ;;  %v21827_v40 = vsub.f32 %v7354_v58, %v21821_v8  ;;  %v7337_v22 = vpop.trf.xlu1 }
 0xb22   : > { %15984 = vmatprep.subr.bf16.mxu0 %v25643_v46 }
 0xb23   : > { %v7502_v37 = vand.u32 4294901760, %v21827_v40 }
 0xb25   : > { %v7503_v5 = vsub.f32 %v21827_v40, %v7502_v37  ;;  %v7338_v58 = vpop.trf.xlu1 }
 0xb27   : > { %v7504_v51 = vand.u32 4294901760, %v7503_v5 }
 0xb29   : > { %15986 = vmatpush1.bf16.xpose.msra.mxu0 %v25644_v1  ;;  %v7481_v1 = vsub.f32 %v21808_v3, %v7480_v7  ;;  %v7339_v10 = vpop.trf.xlu1 }
 0xb2a   : > { %15988 = vmatprep.subr.bf16.mxu0 %v25645_v52  ;;  %v7360_v52 = vsel %vm1533_vm4, %v7331_v62, 0 }
 0xb2b   : > { %v7482_v0 = vand.u32 4294901760, %v7481_v1  ;;  %v21904_v1 = vsub.f32 %v7375_v60, %v21892_v27 }
 0xb2d   : > { %v7579_v5 = vand.u32 4294901760, %v21904_v1 }
 0xb31   : > { %15990 = vmatpush1.bf16.xpose.msra.mxu0 %v25646_v25  ;;  %v21837_v25 = vand.u32 4294901760, %v7360_v52 }
 0xb32   : > { %15992 = vmatprep.subr.bf16.mxu0 %v21638_v19  ;;  %v7634_v19 = vand.u32 4294901760, %v21771_v55 }
 0xb33   : > { %v21849_v23 = vsub.f32 %v7360_v52, %v21837_v25 }
 0xb34   : > { %v7635_v26 = vsub.f32 %v21771_v55, %v7634_v19 }
 0xb35   : > { %v7524_v54 = vand.u32 4294901760, %v21849_v23 }
 0xb36   : > { %v7636_v59 = vand.u32 4294901760, %v7635_v26 }
 0xb37   : > { %v7525_v6 = vsub.f32 %v21849_v23, %v7524_v54 }
 0xb39   : > { %15994 = vmatpush1.bf16.xpose.msra.mxu0 %v21636_v28  ;;  %v21799_v28 = vand.u32 4294901760, %v7351_v61  ;;  %v7526_v26 = vand.u32 4294901760, %v7525_v6  ;;  %v7340_v6 = vpop.trf.xlu1 }
 0xb3a   : > { %7390 = vmatprep.subr.mxu0 %v21763_v9  ;;  %v7387_v60 = vsel %vm1533_vm4, %v7340_v6, 0 }
 0xb3b   : > { %v21815_v43 = vsub.f32 %v7351_v61, %v21799_v28  ;;  %v7546_v61 = vand.u32 4294901760, %v21871_v53 }
 0xb3d   : > { %v7491_v13 = vand.u32 4294901760, %v21815_v43 }
 0xb3f   : > { %v7492_v15 = vsub.f32 %v21815_v43, %v7491_v13 }
 0xb40   : > { %7300 = vmatmul.mubr.f32.vlgmr.msra.gmra.mrb[194].mxu0 %v21362_v16  ;;  %v7357_v16 = vsel %vm1533_vm4, %v7330_v57, 0  ;;  %v7369_v57 = vsel %vm1533_vm4, %v7334_v48, 0  ;;  %v7547_v48 = vsub.f32 %v21871_v53, %v7546_v61 }
 0xb41   : > { %7392 = vmatpush1.msra.mxu0 %v21773_v36  ;;  %7455 = vmatprep.mubr.f32.mxu0 %v25660_v12  ;;  %v21829_v46 = vand.u32 4294901760, %v7357_v16  ;;  %v7493_v63 = vand.u32 4294901760, %v7492_v15  ;;  %v21877_v62 = vand.u32 4294901760, %v7369_v57 }
 0xb42   : > { %7637 = vmatprep.subr.mxu0 %v7636_v59  ;;  %v7536_v59 = vsub.f32 %v21863_v24, %v7535_v14  ;;  %v7548_v15 = vand.u32 4294901760, %v7547_v48 }
 0xb43   : > { %v21844_v30 = vsub.f32 %v7357_v16, %v21829_v46  ;;  %v21883_v45 = vsub.f32 %v7369_v57, %v21877_v62  ;;  %v7384_v57 = vsel %vm1533_vm4, %v7339_v10, 0 }
 0xb44   : > { %7461 = vmatmul.mubr.f32.vlgmr.msra.gmra.mrb[196].mxu0 %v7460_v21  ;;  %v21896_v21 = vsub.f32 %v7372_v42, %v21885_v49  ;;  %v7537_v16 = vand.u32 4294901760, %v7536_v59  ;;  %v21932_v59 = vand.u32 4294901760, %v7384_v57 }
 0xb45   : > { %7466 = vmatprep.mubr.f32.mxu0 %v25660_v12  ;;  %7643 = vmatpush1.msra.mxu0 %v7642_v56  ;;  %v7513_v44 = vand.u32 4294901760, %v21844_v30  ;;  %v7557_v56 = vand.u32 4294901760, %v21883_v45 }
 0xb46   : > { %7821 = vmatprep.subr.mxu0 %v21771_v55  ;;  %v7568_v52 = vand.u32 4294901760, %v21896_v21  ;;  %v21938_v48 = vsub.f32 %v7384_v57, %v21932_v59 }
 0xb47   : > { %v7514_v33 = vsub.f32 %v21844_v30, %v7513_v44  ;;  %v7558_v32 = vsub.f32 %v21883_v45, %v7557_v56 }
 0xb48   : > { %7472 = vmatmul.mubr.f32.gmra.mrb[198].mxu0 %v7471_v50  ;;  %v7378_v50 = vsel %vm1533_vm4, %v7337_v22, 0 }
 0xb49   : > { %7477 = vmatprep.mubr.f32.mxu0 %v25660_v12  ;;  %v7515_v18 = vand.u32 4294901760, %v7514_v33  ;;  %v7559_v11 = vand.u32 4294901760, %v7558_v32  ;;  %v7569_v33 = vsub.f32 %v21896_v21, %v7568_v52  ;;  %v7612_v32 = vand.u32 4294901760, %v21938_v48 }
 0xb4b   : > { %v7613_v6 = vsub.f32 %v21938_v48, %v7612_v32 }
 0xb4c   : > { %7483 = vmatmul.mubr.f32.gmra.mrb[200].mxu0 %v7482_v0  ;;  %v21907_v0 = vand.u32 4294901760, %v7378_v50 }
 0xb4d   : > { %7488 = vmatprep.mubr.f32.mxu0 %v25660_v12 }
 0xb4e   : > { %v21916_v2 = vsub.f32 %v7378_v50, %v21907_v0  ;;  %v21940_v50 = vand.u32 4294901760, %v7387_v60 }
 0xb50   : > { %7494 = vmatmul.mubr.f32.gmra.mrb[202].mxu0 %v7493_v63  ;;  %v7381_v63 = vsel %vm1533_vm4, %v7338_v58, 0  ;;  %v7590_v22 = vand.u32 4294901760, %v21916_v2  ;;  %v21948_v10 = vsub.f32 %v7387_v60, %v21940_v50 }
 0xb51   : > { %7499 = vmatprep.mubr.f32.mxu0 %v25660_v12 }
 0xb54   : > { %7505 = vmatmul.mubr.f32.gmra.mrb[204].mxu0 %v7504_v51  ;;  %v21918_v51 = vand.u32 4294901760, %v7381_v63 }
 0xb55   : > { %7510 = vmatprep.mubr.f32.mxu0 %v25660_v12 }
 0xb56   : > { %v21930_v42 = vsub.f32 %v7381_v63, %v21918_v51 }
 0xb58   : > { %7516 = vmatmul.mubr.f32.gmra.mrb[206].mxu0 %v7515_v18  ;;  %v7580_v18 = vsub.f32 %v21904_v1, %v7579_v5 }
 0xb59   : > { %7521 = vmatprep.mubr.f32.mxu0 %v25660_v12 }
 0xb5a   : > { %v7581_v58 = vand.u32 4294901760, %v7580_v18  ;;  %v7614_v18 = vand.u32 4294901760, %v7613_v6 }
 0xb5c   : > { %7527 = vmatmul.mubr.f32.gmra.mrb[208].mxu0 %v7526_v26  ;;  %v7570_v26 = vand.u32 4294901760, %v7569_v33  ;;  %v7623_v33 = vand.u32 4294901760, %v21948_v10 }
 0xb5d   : > { %7532 = vmatprep.mubr.f32.mxu0 %v25660_v12 }
 0xb60   : > { %7538 = vmatmul.mubr.f32.gmra.mrb[210].mxu0 %v7537_v16  ;;  %v7601_v16 = vand.u32 4294901760, %v21930_v42 }
 0xb61   : > { %7543 = vmatprep.mubr.f32.mxu0 %v25660_v12 }
 0xb64   : > { %7549 = vmatmul.mubr.f32.gmra.mrb[212].mxu0 %v7548_v15  ;;  %v7591_v15 = vsub.f32 %v21916_v2, %v7590_v22 }
 0xb65   : > { %7554 = vmatprep.mubr.f32.mxu0 %v25660_v12 }
 0xb66   : > { %v7592_v63 = vand.u32 4294901760, %v7591_v15 }
 0xb68   : > { %7560 = vmatmul.mubr.f32.gmra.mrb[214].mxu0 %v7559_v11  ;;  %v7602_v11 = vsub.f32 %v21930_v42, %v7601_v16 }
 0xb69   : > { %7565 = vmatprep.mubr.f32.mxu0 %v25660_v12 }
 0xb6a   : > { %v7603_v57 = vand.u32 4294901760, %v7602_v11 }
 0xb6c   : > { %7571 = vmatmul.mubr.f32.gmra.mrb[216].mxu0 %v7570_v26  ;;  %v7624_v26 = vsub.f32 %v21948_v10, %v7623_v33 }
 0xb6d   : > { %7576 = vmatprep.mubr.f32.mxu0 %v25660_v12 }
 0xb6e   : > { %v7625_v60 = vand.u32 4294901760, %v7624_v26 }
 0xb70   : > { %7582 = vmatmul.mubr.f32.gmra.mrb[218].mxu0 %v7581_v58 }
 0xb71   : > { %7587 = vmatprep.mubr.f32.mxu0 %v25660_v12 }
 0xb74   : > { %7593 = vmatmul.mubr.f32.gmra.mrb[220].mxu0 %v7592_v63 }
 0xb75   : > { %7598 = vmatprep.mubr.f32.mxu0 %v25660_v12 }
 0xb78   : > { %7604 = vmatmul.mubr.f32.gmra.mrb[222].mxu0 %v7603_v57 }
 0xb79   : > { %7609 = vmatprep.mubr.f32.mxu0 %v25660_v12 }
 0xb7c   : > { %7615 = vmatmul.mubr.f32.gmra.mrb[224].mxu0 %v7614_v18 }
 0xb7d   : > { %7620 = vmatprep.mubr.f32.mxu0 %v25660_v12 }
 0xb80   : > { %7626 = vmatmul.mubr.f32.gmra.mrb[226].mxu0 %v7625_v60 }
 0xb81   : > { %7706 = vmatprep.mubr.f32.mxu0 %v25660_v12 }
 0xb84   : > { %7708 = vmatmul.mubr.f32.vlgmr.msra.gmra.mrb[196].mxu0 %v21767_v4 }
 0xb85   : > { %7713 = vmatprep.mubr.f32.mxu0 %v25660_v12  ;;  %7824 = vmatpush1.msra.mxu0 %v21778_v34 }
 0xb86   : > { %8017 = vmatprep.subr.mxu0 %v21763_v9 }
 0xb88   : > { %7715 = vmatmul.mubr.f32.gmra.mrb[198].mxu0 %v21775_v17 }
 0xb89   : > { %7720 = vmatprep.mubr.f32.mxu0 %v25660_v12 }
 0xb8c   : > { %7722 = vmatmul.mubr.f32.gmra.mrb[200].mxu0 %v21791_v20 }
 0xb8d   : > { %7727 = vmatprep.mubr.f32.mxu0 %v25660_v12 }
 0xb90   : > { %7729 = vmatmul.mubr.f32.gmra.mrb[202].mxu0 %v21799_v28 }
 0xb91   : > { %7734 = vmatprep.mubr.f32.mxu0 %v25660_v12 }
 0xb94   : > { %7736 = vmatmul.mubr.f32.gmra.mrb[204].mxu0 %v21821_v8 }
 0xb95   : > { %7741 = vmatprep.mubr.f32.mxu0 %v25660_v12 }
 0xb98   : > { %7743 = vmatmul.mubr.f32.gmra.mrb[206].mxu0 %v21829_v46 }
 0xb99   : > { %7748 = vmatprep.mubr.f32.mxu0 %v25660_v12 }
 0xb9c   : > { %7750 = vmatmul.mubr.f32.gmra.mrb[208].mxu0 %v21837_v25 }
 0xb9d   : > { %7755 = vmatprep.mubr.f32.mxu0 %v25660_v12 }
 0xba0   : > { %7757 = vmatmul.mubr.f32.gmra.mrb[210].mxu0 %v21852_v35 }
 0xba1   : > { %7762 = vmatprep.mubr.f32.mxu0 %v25660_v12 }
 0xba4   : > { %7764 = vmatmul.mubr.f32.gmra.mrb[212].mxu0 %v21860_v39 }
 0xba5   : > { %7769 = vmatprep.mubr.f32.mxu0 %v25660_v12 }
 0xba8   : > { %7771 = vmatmul.mubr.f32.gmra.mrb[214].mxu0 %v21877_v62 }
 0xba9   : > { %7776 = vmatprep.mubr.f32.mxu0 %v25660_v12 }
 0xbac   : > { %7778 = vmatmul.mubr.f32.gmra.mrb[216].mxu0 %v21885_v49 }
 0xbad   : > { %7783 = vmatprep.mubr.f32.mxu0 %v25660_v12 }
 0xbb0   : > { %7785 = vmatmul.mubr.f32.gmra.mrb[218].mxu0 %v21892_v27 }
 0xbb1   : > { %7790 = vmatprep.mubr.f32.mxu0 %v25660_v12 }
 0xbb4   : > { %7792 = vmatmul.mubr.f32.gmra.mrb[220].mxu0 %v21907_v0 }
 0xbb5   : > { %7797 = vmatprep.mubr.f32.mxu0 %v25660_v12 }
 0xbb8   : > { %7799 = vmatmul.mubr.f32.gmra.mrb[222].mxu0 %v21918_v51 }
 0xbb9   : > { %7804 = vmatprep.mubr.f32.mxu0 %v25660_v12 }
 0xbbc   : > { %7806 = vmatmul.mubr.f32.gmra.mrb[224].mxu0 %v21932_v59 }
 0xbbd   : > { %7811 = vmatprep.mubr.f32.mxu0 %v25660_v12 }
 0xbc0   : > { %7813 = vmatmul.mubr.f32.gmra.mrb[226].mxu0 %v21940_v50 }
 0xbc1   : > { %7887 = vmatprep.mubr.f32.mxu0 %v25660_v12 }
 0xbc4   : > { %7890 = vmatmul.mubr.f32.vlgmr.msra.gmra.mrb[196].mxu0 %v21781_v31  ;;  %v25664_v31 = vld [vmem:[#allocation34_spill] sm:$0xff] }
 0xbc5   : > { %7895 = vmatprep.mubr.f32.mxu0 %v25660_v12  ;;  %8019 = vmatpush1.msra.mxu0 %v21773_v36 }
 0xbc6   : > { %8230 = vmatprep.subr.mxu0 %v7634_v19  ;;  %v25665_v19 = vld [vmem:[#allocation128_spill] sm:$0xff] }
 0xbc8   : > { %7898 = vmatmul.mubr.f32.gmra.mrb[198].mxu0 %v21787_v29  ;;  %v25666_v29 = vld [vmem:[#allocation36_spill] sm:$0xff] }
 0xbc9   : > { %7903 = vmatprep.mubr.f32.mxu0 %v25660_v12 }
 0xbcc   : > { %7906 = vmatmul.mubr.f32.gmra.mrb[200].mxu0 %v21808_v3  ;;  %v25674_v3 = vld [vmem:[#allocation150_spill] sm:$0xff] }
 0xbcd   : > { %7911 = vmatprep.mubr.f32.mxu0 %v25660_v12 }
 0xbd0   : > { %7914 = vmatmul.mubr.f32.gmra.mrb[202].mxu0 %v21815_v43  ;;  %v25675_v43 = vld [vmem:[#allocation148_spill] sm:$0xff] }
 0xbd1   : > { %7919 = vmatprep.mubr.f32.mxu0 %v25660_v12 }
 0xbd4   : > { %7922 = vmatmul.mubr.f32.gmra.mrb[204].mxu0 %v21827_v40 }
 0xbd5   : > { %7927 = vmatprep.mubr.f32.mxu0 %v25660_v12 }
 0xbd8   : > { %7930 = vmatmul.mubr.f32.gmra.mrb[206].mxu0 %v21844_v30 }
 0xbd9   : > { %7935 = vmatprep.mubr.f32.mxu0 %v25660_v12 }
 0xbdc   : > { %7938 = vmatmul.mubr.f32.gmra.mrb[208].mxu0 %v21849_v23 }
 0xbdd   : > { %7943 = vmatprep.mubr.f32.mxu0 %v25660_v12 }
 0xbe0   : > { %7946 = vmatmul.mubr.f32.gmra.mrb[210].mxu0 %v21863_v24 }
 0xbe1   : > { %7951 = vmatprep.mubr.f32.mxu0 %v25660_v12 }
 0xbe4   : > { %7954 = vmatmul.mubr.f32.gmra.mrb[212].mxu0 %v21871_v53 }
 0xbe5   : > { %7959 = vmatprep.mubr.f32.mxu0 %v25660_v12 }
 0xbe8   : > { %7962 = vmatmul.mubr.f32.gmra.mrb[214].mxu0 %v21883_v45 }
 0xbe9   : > { %7967 = vmatprep.mubr.f32.mxu0 %v25660_v12 }
 0xbec   : > { %7970 = vmatmul.mubr.f32.gmra.mrb[216].mxu0 %v21896_v21 }
 0xbed   : > { %7975 = vmatprep.mubr.f32.mxu0 %v25660_v12 }
 0xbf0   : > { %7978 = vmatmul.mubr.f32.gmra.mrb[218].mxu0 %v21904_v1 }
 0xbf1   : > { %7983 = vmatprep.mubr.f32.mxu0 %v25660_v12 }
 0xbf4   : > { %7986 = vmatmul.mubr.f32.gmra.mrb[220].mxu0 %v21916_v2 }
 0xbf5   : > { %7991 = vmatprep.mubr.f32.mxu0 %v25660_v12 }
 0xbf8   : > { %7994 = vmatmul.mubr.f32.gmra.mrb[222].mxu0 %v21930_v42 }
 0xbf9   : > { %7999 = vmatprep.mubr.f32.mxu0 %v25660_v12 }
 0xbfc   : > { %8002 = vmatmul.mubr.f32.gmra.mrb[224].mxu0 %v21938_v48 }
 0xbfd   : > { %8007 = vmatprep.mubr.f32.mxu0 %v25660_v12 }
 0xc00   : > { %8010 = vmatmul.mubr.f32.gmra.mrb[226].mxu0 %v21948_v10 }
 0xc01   : > { %8082 = vmatprep.mubr.f32.mxu0 %v25660_v12 }
 0xc04   : > { %8086 = vmatmul.mubr.f32.vlgmr.msra.gmra.mrb[196].mxu0 %v7458_v38  ;;  %v25670_v38 = vld [vmem:[#allocation5_spill] sm:$0xff] }
 0xc05   : > { %8091 = vmatprep.mubr.f32.mxu0 %v25660_v12  ;;  %8234 = vmatpush1.msra.mxu0 %v7640_v41  ;;  %v25669_v41 = vld [vmem:[#allocation136_spill] sm:$0xff] }
 0xc06   : > { %8411 = vmatprep.subr.mxu0 %v21763_v9  ;;  %v25662_v9 = vld [vmem:[#allocation33_spill] sm:$0xff] }
 0xc08   : > { %8095 = vmatmul.mubr.f32.gmra.mrb[198].mxu0 %v7469_v47  ;;  %v25672_v47 = vld [vmem:[#allocation145_spill] sm:$0xff] }
 0xc09   : > { %8100 = vmatprep.mubr.f32.mxu0 %v25660_v12 }
 0xc0c   : > { %8104 = vmatmul.mubr.f32.gmra.mrb[200].mxu0 %v7480_v7  ;;  %v25676_v7 = vld [vmem:[#allocation66_spill] sm:$0xff] }
 0xc0d   : > { %8109 = vmatprep.mubr.f32.mxu0 %v25660_v12 }
 0xc10   : > { %8113 = vmatmul.mubr.f32.gmra.mrb[202].mxu0 %v7491_v13  ;;  %v25678_v13 = vld [vmem:[#allocation70_spill] sm:$0xff] }
 0xc11   : > { %8118 = vmatprep.mubr.f32.mxu0 %v25660_v12 }
 0xc13   : > { %v22048_v55 = vpop.f32.mrb[194].mxu0 }
 0xc14   : > { %25661 = vst [vmem:[#allocation35_spill] sm:$0xff] %v22048_v55  ;;  %v7303_v34 = vpop.f32.mrb[195].mxu0  ;;  %8122 = vmatmul.mubr.f32.gmra.mrb[204].mxu0 %v7502_v37 }
 0xc15   : > { %8127 = vmatprep.mubr.f32.mxu0 %v25660_v12 }
 0xc18   : > { %8131 = vmatmul.mubr.f32.gmra.mrb[206].mxu0 %v7513_v44 }
 0xc19   : > { %8136 = vmatprep.mubr.f32.mxu0 %v25660_v12 }
 0xc1c   : > { %8140 = vmatmul.mubr.f32.gmra.mrb[208].mxu0 %v7524_v54 }
 0xc1d   : > { %8145 = vmatprep.mubr.f32.mxu0 %v25660_v12 }
 0xc20   : > { %8149 = vmatmul.mubr.f32.gmra.mrb[210].mxu0 %v7535_v14 }
 0xc21   : > { %8154 = vmatprep.mubr.f32.mxu0 %v25660_v12 }
 0xc24   : > { %8158 = vmatmul.mubr.f32.gmra.mrb[212].mxu0 %v7546_v61 }
 0xc25   : > { %8163 = vmatprep.mubr.f32.mxu0 %v25660_v12 }
 0xc28   : > { %8167 = vmatmul.mubr.f32.gmra.mrb[214].mxu0 %v7557_v56 }
 0xc29   : > { %8172 = vmatprep.mubr.f32.mxu0 %v25660_v12 }
 0xc2c   : > { %8176 = vmatmul.mubr.f32.gmra.mrb[216].mxu0 %v7568_v52 }
 0xc2d   : > { %8181 = vmatprep.mubr.f32.mxu0 %v25660_v12 }
 0xc30   : > { %8185 = vmatmul.mubr.f32.gmra.mrb[218].mxu0 %v7579_v5 }
 0xc31   : > { %8190 = vmatprep.mubr.f32.mxu0 %v25660_v12 }
 0xc34   : > { %8194 = vmatmul.mubr.f32.gmra.mrb[220].mxu0 %v7590_v22 }
 0xc35   : > { %8199 = vmatprep.mubr.f32.mxu0 %v25660_v12 }
 0xc38   : > { %8203 = vmatmul.mubr.f32.gmra.mrb[222].mxu0 %v7601_v16 }
 0xc39   : > { %8208 = vmatprep.mubr.f32.mxu0 %v25660_v12 }
 0xc3c   : > { %8212 = vmatmul.mubr.f32.gmra.mrb[224].mxu0 %v7612_v32 }
 0xc3d   : > { %8217 = vmatprep.mubr.f32.mxu0 %v25660_v12 }
 0xc40   : > { %8221 = vmatmul.mubr.f32.gmra.mrb[226].mxu0 %v7623_v33 }
 0xc41   : > { %8297 = vmatprep.mubr.f32.mxu0 %v25660_v12 }
 0xc44   : > { %8299 = vmatmul.mubr.f32.vlgmr.msra.gmra.mrb[196].mxu0 %v21767_v4 }
 0xc45   : > { %8304 = vmatprep.mubr.f32.mxu0 %v25660_v12  ;;  %8413 = vmatpush1.msra.mxu0 %v21773_v36  ;;  %v25663_v36 = vld [vmem:[#allocation124_spill] sm:$0xff] }
 0xc46   : > { %16188 = vmatprep.subr.bf16.mxu0 %v25662_v9 }
 0xc48   : > { %8306 = vmatmul.mubr.f32.gmra.mrb[198].mxu0 %v21775_v17 }
 0xc49   : > { %8311 = vmatprep.mubr.f32.mxu0 %v25660_v12 }
 0xc4c   : > { %8313 = vmatmul.mubr.f32.gmra.mrb[200].mxu0 %v21791_v20 }
 0xc4d   : > { %8318 = vmatprep.mubr.f32.mxu0 %v25660_v12 }
 0xc50   : > { %8320 = vmatmul.mubr.f32.gmra.mrb[202].mxu0 %v21799_v28 }
 0xc51   : > { %8325 = vmatprep.mubr.f32.mxu0 %v25660_v12 }
 0xc54   : > { %8327 = vmatmul.mubr.f32.gmra.mrb[204].mxu0 %v21821_v8 }
 0xc55   : > { %8332 = vmatprep.mubr.f32.mxu0 %v25660_v12 }
 0xc58   : > { %8334 = vmatmul.mubr.f32.gmra.mrb[206].mxu0 %v21829_v46 }
 0xc59   : > { %8339 = vmatprep.mubr.f32.mxu0 %v25660_v12 }
 0xc5c   : > { %8341 = vmatmul.mubr.f32.gmra.mrb[208].mxu0 %v21837_v25 }
 0xc5d   : > { %8346 = vmatprep.mubr.f32.mxu0 %v25660_v12 }
 0xc60   : > { %8348 = vmatmul.mubr.f32.gmra.mrb[210].mxu0 %v21852_v35 }
 0xc61   : > { %8353 = vmatprep.mubr.f32.mxu0 %v25660_v12 }
 0xc64   : > { %8355 = vmatmul.mubr.f32.gmra.mrb[212].mxu0 %v21860_v39 }
 0xc65   : > { %8360 = vmatprep.mubr.f32.mxu0 %v25660_v12 }
 0xc68   : > { %8362 = vmatmul.mubr.f32.gmra.mrb[214].mxu0 %v21877_v62 }
 0xc69   : > { %8367 = vmatprep.mubr.f32.mxu0 %v25660_v12 }
 0xc6c   : > { %8369 = vmatmul.mubr.f32.gmra.mrb[216].mxu0 %v21885_v49 }
 0xc6d   : > { %8374 = vmatprep.mubr.f32.mxu0 %v25660_v12 }
 0xc70   : > { %8376 = vmatmul.mubr.f32.gmra.mrb[218].mxu0 %v21892_v27 }
 0xc71   : > { %8381 = vmatprep.mubr.f32.mxu0 %v25660_v12 }
 0xc74   : > { %8383 = vmatmul.mubr.f32.gmra.mrb[220].mxu0 %v21907_v0 }
 0xc75   : > { %8388 = vmatprep.mubr.f32.mxu0 %v25660_v12 }
 0xc78   : > { %8390 = vmatmul.mubr.f32.gmra.mrb[222].mxu0 %v21918_v51 }
 0xc79   : > { %8395 = vmatprep.mubr.f32.mxu0 %v25660_v12 }
 0xc7c   : > { %8397 = vmatmul.mubr.f32.gmra.mrb[224].mxu0 %v21932_v59 }
 0xc7d   : > { %8402 = vmatprep.mubr.f32.mxu0 %v25660_v12 }
 0xc80   : > { %8404 = vmatmul.mubr.f32.gmra.mrb[226].mxu0 %v21940_v50 }
 0xc81   : > { %8476 = vmatprep.mubr.f32.mxu0 %v25660_v12 }
 0xc84   : > { %8478 = vmatmul.mubr.f32.vlgmr.msra.gmra.mrb[196].mxu0 %v21767_v4  ;;  %v25667_v4 = vld [vmem:[#allocation132_spill] sm:$0xff] }
 0xc85   : > { %8483 = vmatprep.mubr.f32.mxu0 %v25660_v12  ;;  %16190 = vmatpush3.bf16.xpose.msra.mxu0 %v25663_v36 }
 0xc86   : > { %16192 = vmatprep.subr.bf16.mxu0 %v25664_v31 }
 0xc88   : > { %8485 = vmatmul.mubr.f32.gmra.mrb[198].mxu0 %v21775_v17  ;;  %v25668_v17 = vld [vmem:[#allocation39_spill] sm:$0xff] }
 0xc89   : > { %8490 = vmatprep.mubr.f32.mxu0 %v25660_v12 }
 0xc8c   : > { %8492 = vmatmul.mubr.f32.gmra.mrb[200].mxu0 %v21791_v20  ;;  %v25671_v20 = vld [vmem:[#allocation140_spill] sm:$0xff] }
 0xc8d   : > { %8497 = vmatprep.mubr.f32.mxu0 %v25660_v12  ;;  %16194 = vmatpush3.bf16.xpose.msra.mxu0 %v25665_v19  ;;  %v25728_v19 = vld [vmem:[#allocation109_spill] sm:$0xff] }
 0xc8e   : > { %16196 = vmatprep.subr.bf16.mxu0 %v25666_v29 }
 0xc90   : > { %8499 = vmatmul.mubr.f32.gmra.mrb[202].mxu0 %v21799_v28  ;;  %v25673_v28 = vld [vmem:[#allocation4_spill] sm:$0xff] }
 0xc91   : > { %8504 = vmatprep.mubr.f32.mxu0 %v25660_v12 }
 0xc94   : > { %8506 = vmatmul.mubr.f32.gmra.mrb[204].mxu0 %v21821_v8  ;;  %v25677_v8 = vld [vmem:[#allocation69_spill] sm:$0xff] }
 0xc95   : > { %8511 = vmatprep.mubr.f32.mxu0 %v25660_v12  ;;  %16198 = vmatpush3.bf16.xpose.msra.mxu0 %v25667_v4 }
 0xc96   : > { %16200 = vmatprep.subr.bf16.mxu0 %v25668_v17 }
 0xc98   : > { %8513 = vmatmul.mubr.f32.gmra.mrb[206].mxu0 %v21829_v46 }
 0xc99   : > { %8518 = vmatprep.mubr.f32.mxu0 %v25660_v12 }
 0xc9c   : > { %8520 = vmatmul.mubr.f32.gmra.mrb[208].mxu0 %v21837_v25 }
 0xc9d   : > { %8525 = vmatprep.mubr.f32.mxu0 %v25660_v12  ;;  %16202 = vmatpush3.bf16.xpose.msra.mxu0 %v25669_v41 }
 0xc9e   : > { %16204 = vmatprep.subr.bf16.mxu0 %v25670_v38 }
 0xca0   : > { %8527 = vmatmul.mubr.f32.gmra.mrb[210].mxu0 %v21852_v35 }
 0xca1   : > { %8532 = vmatprep.mubr.f32.mxu0 %v25660_v12 }
 0xca4   : > { %8534 = vmatmul.mubr.f32.gmra.mrb[212].mxu0 %v21860_v39 }
 0xca5   : > { %8539 = vmatprep.mubr.f32.mxu0 %v25660_v12  ;;  %16206 = vmatpush3.bf16.xpose.msra.mxu0 %v25671_v20 }
 0xca6   : > { %16208 = vmatprep.subr.bf16.mxu0 %v25672_v47 }
 0xca8   : > { %8541 = vmatmul.mubr.f32.gmra.mrb[214].mxu0 %v21877_v62 }
 0xca9   : > { %8546 = vmatprep.mubr.f32.mxu0 %v25660_v12 }
 0xcac   : > { %8548 = vmatmul.mubr.f32.gmra.mrb[216].mxu0 %v21885_v49 }
 0xcad   : > { %8553 = vmatprep.mubr.f32.mxu0 %v25660_v12  ;;  %16210 = vmatpush3.bf16.xpose.msra.mxu0 %v25673_v28 }
 0xcae   : > { %16212 = vmatprep.subr.bf16.mxu0 %v25674_v3 }
 0xcb0   : > { %8555 = vmatmul.mubr.f32.gmra.mrb[218].mxu0 %v21892_v27 }
 0xcb1   : > { %8560 = vmatprep.mubr.f32.mxu0 %v25660_v12 }
 0xcb4   : > { %8562 = vmatmul.mubr.f32.gmra.mrb[220].mxu0 %v21907_v0 }
 0xcb5   : > { %8567 = vmatprep.mubr.f32.mxu0 %v25660_v12  ;;  %16214 = vmatpush3.bf16.xpose.msra.mxu0 %v25675_v43 }
 0xcb6   : > { %16216 = vmatprep.subr.bf16.mxu0 %v25676_v7 }
 0xcb8   : > { %8569 = vmatmul.mubr.f32.gmra.mrb[222].mxu0 %v21918_v51 }
 0xcb9   : > { %8574 = vmatprep.mubr.f32.mxu0 %v25660_v12 }
 0xcbc   : > { %8576 = vmatmul.mubr.f32.gmra.mrb[224].mxu0 %v21932_v59 }
 0xcbd   : > { %8581 = vmatprep.mubr.f32.mxu0 %v25660_v12  ;;  %16218 = vmatpush3.bf16.xpose.msra.mxu0 %v25677_v8  ;;  %v25691_v8 = vld [vmem:[#allocation86_spill] sm:$0xff] }
 0xcbe   : > { %16220 = vmatprep.subr.bf16.mxu0 %v25678_v13 }
 0xcc0   : > { %8583 = vmatmul.mubr.f32.gmra.mrb[226].mxu0 %v21940_v50 }
 0xd57   : > { %v22167_v40 = vpop.f32.mrb[196].mxu0 }
 0xd58   : > { %v22169_v46 = vpop.f32.mrb[197].mxu0 }
 0xd59   : > { %v8589_v25 = vmax.f32 %v22167_v40, %v22169_v46 }
 0xd5b   : > { %8590 = vmax.xlane.f32.xlu1 %v8589_v25  ;;  %v22173_v37 = vpop.f32.mrb[198].mxu0 }
 0xd5c   : > { %v22175_v30 = vpop.f32.mrb[199].mxu0 }
 0xd5d   : > { %v8592_v23 = vmax.f32 %v22173_v37, %v22175_v30 }
 0xd5f   : > { %8593 = vmax.xlane.f32.xlu0 %v8592_v23  ;;  %v22179_v44 = vpop.f32.mrb[200].mxu0 }
 0xd60   : > { %v22181_v35 = vpop.f32.mrb[201].mxu0 }
 0xd61   : > { %v8595_v54 = vmax.f32 %v22179_v44, %v22181_v35 }
 0xd63   : > { %8596 = vmax.xlane.f32.xlu0 %v8595_v54  ;;  %v22185_v39 = vpop.f32.mrb[202].mxu0  ;;  %v13016_v54 = vld [vmem:[%s24094_s4] sm:$0xf] }
 0xd64   : > { %v22187_v24 = vpop.f32.mrb[203].mxu0 }
 0xd65   : > { %v8598_v53 = vmax.f32 %v22185_v39, %v22187_v24 }
 0xd67   : > { %8599 = vmax.xlane.f32.xlu0 %v8598_v53  ;;  %v22191_v14 = vpop.f32.mrb[204].mxu0 }
 0xd68   : > { %v22193_v62 = vpop.f32.mrb[205].mxu0 }
 0xd69   : > { %v8601_v61 = vmax.f32 %v22191_v14, %v22193_v62 }
 0xd6b   : > { %8602 = vmax.xlane.f32.xlu0 %v8601_v61  ;;  %v22197_v45 = vpop.f32.mrb[206].mxu0 }
 0xd6c   : > { %v22199_v49 = vpop.f32.mrb[207].mxu0 }
 0xd6d   : > { %v8604_v27 = vmax.f32 %v22197_v45, %v22199_v49 }
 0xd6f   : > { %8605 = vmax.xlane.f32.xlu0 %v8604_v27  ;;  %v22203_v56 = vpop.f32.mrb[208].mxu0 }
 0xd70   : > { %v22205_v21 = vpop.f32.mrb[209].mxu0 }
 0xd71   : > { %v8607_v1 = vmax.f32 %v22203_v56, %v22205_v21 }
 0xd73   : > { %8608 = vmax.xlane.f32.xlu0 %v8607_v1  ;;  %v22209_v52 = vpop.f32.mrb[210].mxu0 }
 0xd74   : > { %v22211_v0 = vpop.f32.mrb[211].mxu0 }
 0xd75   : > { %v8610_v5 = vmax.f32 %v22209_v52, %v22211_v0 }
 0xd77   : > { %8611 = vmax.xlane.f32.xlu0 %v8610_v5  ;;  %v22215_v2 = vpop.f32.mrb[212].mxu0 }
 0xd78   : > { %v22217_v51 = vpop.f32.mrb[213].mxu0 }
 0xd79   : > { %v8613_v22 = vmax.f32 %v22215_v2, %v22217_v51 }
 0xd7b   : > { %8614 = vmax.xlane.f32.xlu0 %v8613_v22  ;;  %v22221_v42 = vpop.f32.mrb[214].mxu0 }
 0xd7c   : > { %v22223_v59 = vpop.f32.mrb[215].mxu0 }
 0xd7d   : > { %v8616_v58 = vmax.f32 %v22221_v42, %v22223_v59 }
 0xd7f   : > { %8617 = vmax.xlane.f32.xlu0 %v8616_v58  ;;  %v22227_v16 = vpop.f32.mrb[216].mxu0 }
 0xd80   : > { %v22229_v48 = vpop.f32.mrb[217].mxu0 }
 0xd81   : > { %v8619_v50 = vmax.f32 %v22227_v16, %v22229_v48 }
 0xd83   : > { %8620 = vmax.xlane.f32.xlu0 %v8619_v50  ;;  %v22233_v15 = vpop.f32.mrb[218].mxu0 }
 0xd84   : > { %v22235_v32 = vpop.f32.mrb[219].mxu0 }
 0xd85   : > { %v8622_v10 = vmax.f32 %v22233_v15, %v22235_v32 }
 0xd87   : > { %8623 = vmax.xlane.f32.xlu0 %v8622_v10  ;;  %v22239_v63 = vpop.f32.mrb[220].mxu0 }
 0xd88   : > { %v22241_v11 = vpop.f32.mrb[221].mxu0 }
 0xd89   : > { %v8625_v33 = vmax.f32 %v22239_v63, %v22241_v11 }
 0xd8b   : > { %8626 = vmax.xlane.f32.xlu0 %v8625_v33  ;;  %v22245_v57 = vpop.f32.mrb[222].mxu0 }
 0xd8c   : > { %v22247_v6 = vpop.f32.mrb[223].mxu0 }
 0xd8d   : > { %v8628_v18 = vmax.f32 %v22245_v57, %v22247_v6 }
 0xd8f   : > { %8629 = vmax.xlane.f32.xlu0 %v8628_v18  ;;  %v22251_v26 = vpop.f32.mrb[224].mxu0 }
 0xd90   : > { %v22253_v60 = vpop.f32.mrb[225].mxu0 }
 0xd91   : > { %v8631_v34 = vmax.f32 %v22251_v26, %v22253_v60 }
 0xd93   : > { %8632 = vmax.xlane.f32.xlu0 %v8631_v34  ;;  %v22257_v13 = vpop.f32.mrb[226].mxu0 }
 0xd94   : > { %v22259_v25 = vpop.f32.mrb[227].mxu0 }
 0xd95   : > { %v8634_v23 = vmax.f32 %v22257_v13, %v22259_v25 }
 0xd97   : > { %8635 = vmax.xlane.f32.xlu0 %v8634_v23 }
 0xdad   : > { %13019 = vperm.xlu0 %17358, %v13016_v54  }
 0xde8   : > { %v8591_v53 = vpop.xlane.xlu1 %8590 }
 0xde9   : > { %v8637_v61 = vsub.f32 %v22167_v40, %v8591_v53  ;;  %v8638_v27 = vsub.f32 %v22169_v46, %v8591_v53 }
 0xdeb   : > { %v8669_v1 = vmul.f32 1.442695, %v8637_v61  ;;  %v8671_v5 = vmul.f32 1.442695, %v8638_v27 }
 0xdec   : > { %v8594_v22 = vpop.xlane.xlu0 %8593 }
 0xded   : > { %17456 = vpow2.f32 %v8669_v1  ;;  %v8639_v58 = vsub.f32 %v22173_v37, %v8594_v22  ;;  %v8640_v50 = vsub.f32 %v22175_v30, %v8594_v22 }
 0xdee   : > { %17458 = vpow2.f32 %v8671_v5 }
 0xdef   : > { %v8673_v10 = vmul.f32 1.442695, %v8639_v58  ;;  %v8675_v33 = vmul.f32 1.442695, %v8640_v50 }
 0xdf0   : > { %v8597_v18 = vpop.xlane.xlu0 %8596 }
 0xdf1   : > { %17460 = vpow2.f32 %v8673_v10  ;;  %v8641_v34 = vsub.f32 %v22179_v44, %v8597_v18  ;;  %v8642_v23 = vsub.f32 %v22181_v35, %v8597_v18 }
 0xdf2   : > { %17462 = vpow2.f32 %v8675_v33 }
 0xdf3   : > { %v8677_v40 = vmul.f32 1.442695, %v8641_v34  ;;  %v8679_v46 = vmul.f32 1.442695, %v8642_v23 }
 0xdf4   : > { %v8600_v54 = vpop.xlane.xlu0 %8599 }
 0xdf5   : > { %17464 = vpow2.f32 %v8677_v40  ;;  %v8643_v53 = vsub.f32 %v22185_v39, %v8600_v54  ;;  %v8644_v37 = vsub.f32 %v22187_v24, %v8600_v54 }
 0xdf6   : > { %17466 = vpow2.f32 %v8679_v46 }
 0xdf7   : > { %v22274_v30 = vpop.eup %17456  ;;  %v8681_v61 = vmul.f32 1.442695, %v8643_v53  ;;  %v8683_v27 = vmul.f32 1.442695, %v8644_v37 }
 0xdf8   : > { %25679 = vst [vmem:[#allocation131_spill] sm:$0xff] %v22274_v30  ;;  %v22276_v1 = vpop.eup %17458  ;;  %v8603_v5 = vpop.xlane.xlu0 %8602  ;;  %v22279_v44 = vand.u32 4294901760, %v22274_v30 }
 0xdf9   : > { %25680 = vst [vmem:[#allocation37_spill] sm:$0xff] %v22276_v1  ;;  %17468 = vpow2.f32 %v8681_v61  ;;  %v8645_v35 = vsub.f32 %v22191_v14, %v8603_v5  ;;  %v8646_v22 = vsub.f32 %v22193_v62, %v8603_v5  ;;  %v22284_v39 = vand.u32 4294901760, %v22276_v1 }
 0xdfa   : > { %17470 = vpow2.f32 %v8683_v27  ;;  %v22288_v24 = vsub.f32 %v22274_v30, %v22279_v44 }
 0xdfb   : > { %v22290_v58 = vpop.eup %17460  ;;  %v8685_v50 = vmul.f32 1.442695, %v8645_v35  ;;  %v8687_v10 = vmul.f32 1.442695, %v8646_v22  ;;  %v22294_v33 = vsub.f32 %v22276_v1, %v22284_v39 }
 0xdfc   : > { %25681 = vst [vmem:[#allocation135_spill] sm:$0xff] %v22290_v58  ;;  %v22296_v18 = vpop.eup %17462  ;;  %v8606_v14 = vpop.xlane.xlu0 %8605  ;;  %v24673_v62 = vand.u32 4294901760, %v22288_v24  ;;  %v22300_v34 = vand.u32 4294901760, %v22290_v58 }
 0xdfd   : > { %25682 = vst [vmem:[#allocation40_spill] sm:$0xff] %v22296_v18  ;;  %17472 = vpow2.f32 %v8685_v50  ;;  %v8647_v23 = vsub.f32 %v22197_v45, %v8606_v14  ;;  %v8648_v40 = vsub.f32 %v22199_v49, %v8606_v14  ;;  %v24674_v46 = vand.u32 4294901760, %v22294_v33 }
 0xdfe   : > { %17474 = vpow2.f32 %v8687_v10  ;;  %v8838_v54 = vsub.f32 %v22288_v24, %v24673_v62  ;;  %v22309_v53 = vand.u32 4294901760, %v22296_v18  ;;  %v22313_v37 = vsub.f32 %v22290_v58, %v22300_v34 }
 0xdff   : > { %v22315_v61 = vpop.eup %17464  ;;  %v8689_v27 = vmul.f32 1.442695, %v8647_v23  ;;  %v8691_v45 = vmul.f32 1.442695, %v8648_v40  ;;  %v8832_v49 = vsub.f32 %v22294_v33, %v24674_v46 }
 0xe00   : > { %25683 = vst [vmem:[#allocation139_spill] sm:$0xff] %v22315_v61  ;;  %v22320_v5 = vpop.eup %17466  ;;  %v8609_v35 = vpop.xlane.xlu0 %8608  ;;  %v8839_v22 = vand.u32 4294901760, %v8838_v54  ;;  %v22324_v50 = vsub.f32 %v22296_v18, %v22309_v53  ;;  %v24679_v10 = vand.u32 4294901760, %v22313_v37  ;;  %v22328_v14 = vand.u32 4294901760, %v22315_v61 }
 0xe01   : > { %25684 = vst [vmem:[#allocation143_spill] sm:$0xff] %v22320_v5  ;;  %17476 = vpow2.f32 %v8689_v27  ;;  %v8649_v23 = vsub.f32 %v22203_v56, %v8609_v35  ;;  %v8650_v40 = vsub.f32 %v22205_v21, %v8609_v35  ;;  %v8833_v62 = vand.u32 4294901760, %v8832_v49 }
 0xe02   : > { %17478 = vpow2.f32 %v8691_v45  ;;  %v24681_v46 = vand.u32 4294901760, %v22324_v50  ;;  %v8853_v54 = vsub.f32 %v22313_v37, %v24679_v10  ;;  %v22337_v55 = vand.u32 4294901760, %v22320_v5  ;;  %v25687_v10 = vld [vmem:[#allocation81_spill] sm:$0xff] }
 0xe03   : > { %v22339_v12 = vpop.eup %17468  ;;  %v8693_v18 = vmul.f32 1.442695, %v8649_v23  ;;  %v8695_v58 = vmul.f32 1.442695, %v8650_v40  ;;  %8834 = vmatprep.mubr.f32.mxu1 %v8833_v62  ;;  %v22343_v56 = vsub.f32 %v22315_v61, %v22328_v14 }
 0xe04   : > { %25685 = vst [vmem:[#allocation144_spill] sm:$0xff] %v22339_v12  ;;  %v22345_v21 = vpop.eup %17470  ;;  %8840 = vmatmul.mubr.f32.vlgmr.msra.gmra.mrb[66].mxu1 %v8839_v22  ;;  %v8612_v27 = vpop.xlane.xlu0 %8611  ;;  %v8847_v45 = vsub.f32 %v22324_v50, %v24681_v46  ;;  %v8854_v49 = vand.u32 4294901760, %v8853_v54  ;;  %v22352_v35 = vsub.f32 %v22320_v5, %v22337_v55  ;;  %v22355_v23 = vand.u32 4294901760, %v22339_v12  ;;  %v25688_v5 = vld [vmem:[#allocation84_spill] sm:$0xff] }
 0xe05   : > { %25686 = vst [vmem:[#allocation149_spill] sm:$0xff] %v22345_v21  ;;  %17480 = vpow2.f32 %v8693_v18  ;;  %v8651_v62 = vsub.f32 %v22209_v52, %v8612_v27  ;;  %v8652_v40 = vsub.f32 %v22211_v0, %v8612_v27  ;;  %16030 = vmatpush3.bf16.msra.mxu1 %v25687_v10  ;;  %v24685_v22 = vand.u32 4294901760, %v22343_v56 }
 0xe06   : > { %17482 = vpow2.f32 %v8695_v58  ;;  %v8848_v61 = vand.u32 4294901760, %v8847_v45  ;;  %v24687_v54 = vand.u32 4294901760, %v22352_v35  ;;  %v22363_v46 = vand.u32 4294901760, %v22345_v21  ;;  %16032 = vmatprep.subr.bf16.mxu1 %v25688_v5 }
 0xe07   : > { %v22366_v1 = vpop.eup %17472  ;;  %v8697_v18 = vmul.f32 1.442695, %v8651_v62  ;;  %v8699_v30 = vmul.f32 1.442695, %v8652_v40  ;;  %v8868_v52 = vsub.f32 %v22343_v56, %v24685_v22  ;;  %v22373_v0 = vsub.f32 %v22339_v12, %v22355_v23 }
 0xe08   : > { %25689 = vst [vmem:[#allocation151_spill] sm:$0xff] %v22366_v1  ;;  %v22375_v58 = vpop.eup %17474  ;;  %8849 = vmatprep.mubr.f32.mxu1 %v8848_v61  ;;  %v8615_v10 = vpop.xlane.xlu0 %8614  ;;  %v8862_v5 = vsub.f32 %v22352_v35, %v24687_v54  ;;  %v22382_v27 = vsub.f32 %v22345_v21, %v22363_v46  ;;  %v22385_v45 = vand.u32 4294901760, %v22366_v1 }
 0xe09   : > { %25690 = vst [vmem:[#allocation154_spill] sm:$0xff] %v22375_v58  ;;  %17484 = vpow2.f32 %v8697_v18  ;;  %8855 = vmatmul.mubr.f32.gmra.mrb[68].mxu1 %v8854_v49  ;;  %v8653_v62 = vsub.f32 %v22215_v2, %v8615_v10  ;;  %v8654_v40 = vsub.f32 %v22217_v51, %v8615_v10  ;;  %v8869_v22 = vand.u32 4294901760, %v8868_v52  ;;  %v25693_v51 = vld [vmem:[#allocation45_spill] sm:$0xff] }
 0xe0a   : > { %17486 = vpow2.f32 %v8699_v30  ;;  %v8863_v61 = vand.u32 4294901760, %v8862_v5  ;;  %v24689_v12 = vand.u32 4294901760, %v22382_v27  ;;  %v24691_v54 = vand.u32 4294901760, %v22373_v0  ;;  %16034 = vmatpush3.bf16.msra.mxu1 %v25691_v8 }
 0xe0b   : > { %v22392_v21 = vpop.eup %17476  ;;  %v8701_v7 = vmul.f32 1.442695, %v8653_v62  ;;  %v8703_v43 = vmul.f32 1.442695, %v8654_v40  ;;  %v22395_v18 = vand.u32 4294901760, %v22375_v58  ;;  %v22399_v2 = vsub.f32 %v22366_v1, %v22385_v45  ;;  %16036 = vmatprep.subr.bf16.mxu1 %v25693_v51  ;;  %v25695_v1 = vld [vmem:[#allocation48_spill] sm:$0xff] }
 0xe0c   : > { %25692 = vst [vmem:[#allocation155_spill] sm:$0xff] %v22392_v21  ;;  %v22402_v30 = vpop.eup %17478  ;;  %8864 = vmatprep.mubr.f32.mxu1 %v8863_v61  ;;  %v8618_v49 = vpop.xlane.xlu0 %8617  ;;  %v8877_v8 = vsub.f32 %v22382_v27, %v24689_v12  ;;  %v8883_v52 = vsub.f32 %v22373_v0, %v24691_v54  ;;  %v22411_v10 = vand.u32 4294901760, %v22392_v21 }
 0xe0d   : > { %25694 = vst [vmem:[#allocation38_spill] sm:$0xff] %v22402_v30  ;;  %17488 = vpow2.f32 %v8701_v7  ;;  %8870 = vmatmul.mubr.f32.gmra.mrb[70].mxu1 %v8869_v22  ;;  %v8655_v5 = vsub.f32 %v22221_v42, %v8618_v49  ;;  %v8656_v62 = vsub.f32 %v22223_v59, %v8618_v49  ;;  %v22417_v40 = vsub.f32 %v22375_v58, %v22395_v18  ;;  %v25697_v59 = vld [vmem:[#allocation51_spill] sm:$0xff]  ;;  %v25700_v58 = vld [vmem:[#allocation54_spill] sm:$0xff] }
 0xe0e   : > { %17490 = vpow2.f32 %v8703_v43  ;;  %v8878_v61 = vand.u32 4294901760, %v8877_v8  ;;  %v8884_v51 = vand.u32 4294901760, %v8883_v52  ;;  %v24692_v12 = vand.u32 4294901760, %v22399_v2  ;;  %16038 = vmatpush3.bf16.msra.mxu1 %v25695_v1 }
 0xe0f   : > { %v22421_v54 = vpop.eup %17480  ;;  %v8705_v3 = vmul.f32 1.442695, %v8655_v5  ;;  %v8707_v7 = vmul.f32 1.442695, %v8656_v62  ;;  %v24695_v22 = vand.u32 4294901760, %v22417_v40  ;;  %v22425_v42 = vand.u32 4294901760, %v22402_v30  ;;  %16040 = vmatprep.subr.bf16.mxu1 %v25697_v59 }
 0xe10   : > { %25696 = vst [vmem:[#allocation17_spill] sm:$0xff] %v22421_v54  ;;  %v22428_v49 = vpop.eup %17482  ;;  %8879 = vmatprep.mubr.f32.mxu1 %v8878_v61  ;;  %v8621_v43 = vpop.xlane.xlu0 %8620  ;;  %v8898_v8 = vsub.f32 %v22399_v2, %v24692_v12  ;;  %v22435_v1 = vsub.f32 %v22392_v21, %v22411_v10  ;;  %v22438_v52 = vand.u32 4294901760, %v22421_v54 }
 0xe11   : > { %25698 = vst [vmem:[#allocation96_spill] sm:$0xff] %v22428_v49  ;;  %17492 = vpow2.f32 %v8705_v3  ;;  %8885 = vmatmul.mubr.f32.gmra.mrb[72].mxu1 %v8884_v51  ;;  %v8657_v5 = vsub.f32 %v22227_v16, %v8621_v43  ;;  %v8658_v62 = vsub.f32 %v22229_v48, %v8621_v43  ;;  %v8892_v61 = vsub.f32 %v22417_v40, %v24695_v22  ;;  %v25702_v43 = vld [vmem:[#allocation59_spill] sm:$0xff] }
 0xe12   : > { %25699 = vst [vmem:[#allocation106_spill] sm:$0xff] %v22438_v52  ;;  %17494 = vpow2.f32 %v8707_v7  ;;  %v8899_v59 = vand.u32 4294901760, %v8898_v8  ;;  %v22447_v12 = vsub.f32 %v22402_v30, %v22425_v42  ;;  %v24697_v21 = vand.u32 4294901760, %v22435_v1  ;;  %16042 = vmatpush3.bf16.msra.mxu1 %v25700_v58 }
 0xe13   : > { %v22451_v3 = vpop.eup %17484  ;;  %v8709_v51 = vmul.f32 1.442695, %v8657_v5  ;;  %v8711_v16 = vmul.f32 1.442695, %v8658_v62  ;;  %v8893_v28 = vand.u32 4294901760, %v8892_v61  ;;  %v22454_v48 = vand.u32 4294901760, %v22428_v49  ;;  %16044 = vmatprep.subr.bf16.mxu1 %v25702_v43 }
 0xe14   : > { %25701 = vst [vmem:[#allocation95_spill] sm:$0xff] %v22451_v3  ;;  %v22457_v7 = vpop.eup %17486  ;;  %v8624_v8 = vpop.xlane.xlu0 %8623  ;;  %v24700_v22 = vand.u32 4294901760, %v22447_v12  ;;  %v8913_v30 = vsub.f32 %v22435_v1, %v24697_v21  ;;  %v22465_v58 = vsub.f32 %v22421_v54, %v22438_v52  ;;  %v22468_v5 = vand.u32 4294901760, %v22451_v3 }
 0xe15   : > { %25703 = vst [vmem:[#allocation31_spill] sm:$0xff] %v22457_v7  ;;  %17496 = vpow2.f32 %v8709_v51  ;;  %8894 = vmatprep.mubr.f32.mxu1 %v8893_v28  ;;  %v8659_v62 = vsub.f32 %v22233_v15, %v8624_v8  ;;  %v8660_v61 = vsub.f32 %v22235_v32, %v8624_v8  ;;  %v22474_v43 = vsub.f32 %v22428_v49, %v22454_v48  ;;  %v25707_v8 = vld [vmem:[#allocation62_spill] sm:$0xff] }
 0xe16   : > { %25704 = vst [vmem:[#allocation114_spill] sm:$0xff] %v22468_v5  ;;  %17498 = vpow2.f32 %v8711_v16  ;;  %8900 = vmatmul.mubr.f32.gmra.mrb[74].mxu1 %v8899_v59  ;;  %v8907_v21 = vsub.f32 %v22447_v12, %v24700_v22  ;;  %v8914_v54 = vand.u32 4294901760, %v8913_v30  ;;  %v24701_v47 = vand.u32 4294901760, %v22465_v58 }
 0xe17   : > { %v22480_v20 = vpop.eup %17488  ;;  %v8713_v28 = vmul.f32 1.442695, %v8659_v62  ;;  %v8715_v51 = vmul.f32 1.442695, %v8660_v61  ;;  %v22484_v32 = vand.u32 4294901760, %v22457_v7  ;;  %16046 = vmatpush3.bf16.msra.mxu1 %v25707_v8  ;;  %v22494_v22 = vsub.f32 %v22451_v3, %v22468_v5  ;;  %v25710_v61 = vld [vmem:[#allocation63_spill] sm:$0xff] }
 0xe18   : > { %25705 = vst [vmem:[#allocation123_spill] sm:$0xff] %v22480_v20  ;;  %v22487_v16 = vpop.eup %17490  ;;  %v8908_v59 = vand.u32 4294901760, %v8907_v21  ;;  %v8627_v49 = vpop.xlane.xlu0 %8626  ;;  %v8928_v30 = vsub.f32 %v22465_v58, %v24701_v47  ;;  %v22497_v62 = vand.u32 4294901760, %v22480_v20  ;;  %16048 = vmatprep.subr.bf16.mxu1 %v25710_v61  ;;  %v25711_v21 = vand.u32 4294901760, %v22474_v43 }
 0xe19   : > { %25706 = vst [vmem:[#allocation23_spill] sm:$0xff] %v22484_v32  ;;  %25708 = vst [vmem:[#allocation116_spill] sm:$0xff] %v22487_v16  ;;  %17500 = vpow2.f32 %v8713_v28  ;;  %v8661_v8 = vsub.f32 %v22239_v63, %v8627_v49  ;;  %v8662_v15 = vsub.f32 %v22241_v11, %v8627_v49  ;;  %v22507_v3 = vsub.f32 %v22457_v7, %v22484_v32 }
 0xe1a   : > { %25709 = vst [vmem:[#allocation113_spill] sm:$0xff] %v22497_v62  ;;  %v8922_v38 = vsub.f32 %v22474_v43, %v25711_v21  ;;  %17502 = vpow2.f32 %v8715_v51  ;;  %8909 = vmatprep.mubr.f32.mxu1 %v8908_v59  ;;  %v8929_v47 = vand.u32 4294901760, %v8928_v30  ;;  %v24703_v41 = vand.u32 4294901760, %v22494_v22 }
 0xe1b   : > { %v22510_v17 = vpop.eup %17492  ;;  %8915 = vmatmul.mubr.f32.gmra.mrb[76].mxu1 %v8914_v54  ;;  %v8717_v28 = vmul.f32 1.442695, %v8661_v8  ;;  %v8719_v63 = vmul.f32 1.442695, %v8662_v15  ;;  %v22513_v11 = vand.u32 4294901760, %v22487_v16  ;;  %v22523_v21 = vsub.f32 %v22480_v20, %v22497_v62 }
 0xe1c   : > { %25712 = vst [vmem:[#allocation146_spill] sm:$0xff] %v22510_v17  ;;  %v8923_v61 = vand.u32 4294901760, %v8922_v38  ;;  %v22515_v49 = vpop.eup %17494  ;;  %v8630_v51 = vpop.xlane.xlu0 %8629  ;;  %v8943_v30 = vsub.f32 %v22494_v22, %v24703_v41  ;;  %v22526_v54 = vand.u32 4294901760, %v22510_v17  ;;  %v25717_v38 = vld [vmem:[#allocation64_spill] sm:$0xff]  ;;  %v25720_v20 = vand.u32 4294901760, %v22507_v3 }
 0xe1d   : > { %25713 = vst [vmem:[#allocation138_spill] sm:$0xff] %v22513_v11  ;;  %25714 = vst [vmem:[#allocation137_spill] sm:$0xff] %v22515_v49  ;;  %16050 = vmatpush3.bf16.msra.mxu1 %v25717_v38  ;;  %17504 = vpow2.f32 %v8717_v28  ;;  %v8663_v15 = vsub.f32 %v22245_v57, %v8630_v51  ;;  %v8664_v8 = vsub.f32 %v22247_v6, %v8630_v51  ;;  %v25719_v41 = vld [vmem:[#allocation88_spill] sm:$0xff]  ;;  %v24707_v38 = vand.u32 4294901760, %v22523_v21 }
 0xe1e   : > { %25715 = vst [vmem:[#allocation134_spill] sm:$0xff] %v22523_v21  ;;  %25716 = vst [vmem:[#allocation165_spill] sm:$0xff] %v22526_v54  ;;  %8924 = vmatprep.mubr.f32.mxu1 %v8923_v61  ;;  %v22533_v59 = vsub.f32 %v22487_v16, %v22513_v11  ;;  %16052 = vmatprep.subr.bf16.mxu1 %v25719_v41  ;;  %17506 = vpow2.f32 %v8719_v63  ;;  %v8937_v7 = vsub.f32 %v22507_v3, %v25720_v20 }
 0xe1f   : > { %v8944_v4 = vand.u32 4294901760, %v8943_v30  ;;  %v22540_v28 = vpop.eup %17496  ;;  %8930 = vmatmul.mubr.f32.gmra.mrb[78].mxu1 %v8929_v47  ;;  %v8721_v57 = vmul.f32 1.442695, %v8663_v15  ;;  %v8723_v61 = vmul.f32 1.442695, %v8664_v8  ;;  %v22544_v51 = vand.u32 4294901760, %v22515_v49 }
 0xe20   : > { %25718 = vst [vmem:[#allocation162_spill] sm:$0xff] %v22533_v59  ;;  %25721 = vst [vmem:[#allocation93_spill] sm:$0xff] %v22540_v28  ;;  %v22546_v16 = vpop.eup %17498  ;;  %v8938_v41 = vand.u32 4294901760, %v8937_v7  ;;  %v8633_v63 = vpop.xlane.xlu0 %8632  ;;  %v8958_v20 = vsub.f32 %v22523_v21, %v24707_v38  ;;  %v22553_v30 = vsub.f32 %v22510_v17, %v22526_v54  ;;  %v22556_v47 = vand.u32 4294901760, %v22540_v28  ;;  %v25726_v15 = vld [vmem:[#allocation90_spill] sm:$0xff] }
 0xe21   : > { %25722 = vst [vmem:[#allocation91_spill] sm:$0xff] %v22544_v51  ;;  %25723 = vst [vmem:[#allocation111_spill] sm:$0xff] %v22546_v16  ;;  %16054 = vmatpush3.bf16.msra.mxu1 %v25726_v15  ;;  %17508 = vpow2.f32 %v8721_v57  ;;  %v8665_v8 = vsub.f32 %v22251_v26, %v8633_v63  ;;  %v8666_v6 = vsub.f32 %v22253_v60, %v8633_v63  ;;  %v25727_v7 = vand.u32 4294901760, %v22533_v59 }
 0xe22   : > { %25724 = vst [vmem:[#allocation104_spill] sm:$0xff] %v22553_v30  ;;  %25725 = vst [vmem:[#allocation127_spill] sm:$0xff] %v22556_v47  ;;  %16056 = vmatprep.subr.bf16.mxu1 %v25728_v19  ;;  %17510 = vpow2.f32 %v8723_v61  ;;  %8939 = vmatprep.mubr.f32.mxu1 %v8938_v41  ;;  %v8959_v38 = vand.u32 4294901760, %v8958_v20  ;;  %v22567_v17 = vsub.f32 %v22515_v49, %v22544_v51  ;;  %v24709_v15 = vand.u32 4294901760, %v22553_v30 }
 0xe23   : > { %v8952_v29 = vsub.f32 %v22533_v59, %v25727_v7  ;;  %v22570_v57 = vpop.eup %17500  ;;  %8945 = vmatmul.mubr.f32.gmra.mrb[80].mxu1 %v8944_v4  ;;  %v8725_v26 = vmul.f32 1.442695, %v8665_v8  ;;  %v8727_v60 = vmul.f32 1.442695, %v8666_v6  ;;  %v22573_v31 = vand.u32 4294901760, %v22546_v16 }
 0xe24   : > { %25729 = vst [vmem:[#allocation29_spill] sm:$0xff] %v22567_v17  ;;  %25730 = vst [vmem:[#allocation129_spill] sm:$0xff] %v22570_v57  ;;  %v22575_v7 = vpop.eup %17502  ;;  %v8636_v19 = vpop.xlane.xlu0 %8635  ;;  %v8973_v41 = vsub.f32 %v22553_v30, %v24709_v15  ;;  %v22583_v20 = vsub.f32 %v22540_v28, %v22556_v47  ;;  %v22586_v4 = vand.u32 4294901760, %v22570_v57  ;;  %v25737_v15 = vld [vmem:[#allocation65_spill] sm:$0xff]  ;;  %v25738_v28 = vand.u32 4294901760, %v22567_v17 }
 0xe25   : > { %v8953_v63 = vand.u32 4294901760, %v8952_v29  ;;  %25731 = vst [vmem:[#allocation125_spill] sm:$0xff] %v22573_v31  ;;  %25732 = vst [vmem:[#allocation157_spill] sm:$0xff] %v22575_v7  ;;  %v25735_v29 = vld [vmem:[#allocation117_spill] sm:$0xff]  ;;  %17512 = vpow2.f32 %v8725_v26  ;;  %v8667_v6 = vsub.f32 %v22257_v13, %v8636_v19  ;;  %v8668_v8 = vsub.f32 %v22259_v25, %v8636_v19 }
 0xe26   : > { %25733 = vst [vmem:[#allocation126_spill] sm:$0xff] %v22583_v20  ;;  %25734 = vst [vmem:[#allocation141_spill] sm:$0xff] %v22586_v4  ;;  %16058 = vmatpush3.bf16.msra.mxu1 %v25735_v29  ;;  %v22593_v61 = vsub.f32 %v22546_v16, %v22573_v31  ;;  %17514 = vpow2.f32 %v8727_v60  ;;  %v8967_v49 = vsub.f32 %v22567_v17, %v25738_v28  ;;  %v8974_v36 = vand.u32 4294901760, %v8973_v41 }
 0xe27   : > { %8954 = vmatprep.mubr.f32.mxu1 %v8953_v63  ;;  %16060 = vmatprep.subr.bf16.mxu1 %v25737_v15  ;;  %v24713_v29 = vand.u32 4294901760, %v22583_v20  ;;  %v22600_v26 = vpop.eup %17504  ;;  %v8729_v13 = vmul.f32 1.442695, %v8667_v6  ;;  %v8731_v63 = vmul.f32 1.442695, %v8668_v8  ;;  %v22604_v19 = vand.u32 4294901760, %v22575_v7 }
 0xe28   : > { %25736 = vst [vmem:[#allocation156_spill] sm:$0xff] %v22593_v61  ;;  %25739 = vst [vmem:[#allocation85_spill] sm:$0xff] %v22600_v26  ;;  %8960 = vmatmul.mubr.f32.gmra.mrb[82].mxu1 %v8959_v38  ;;  %v24715_v25 = vand.u32 4294901760, %v22593_v61  ;;  %v22606_v16 = vpop.eup %17506  ;;  %v8968_v15 = vand.u32 4294901760, %v8967_v49  ;;  %v22613_v60 = vsub.f32 %v22570_v57, %v22586_v4  ;;  %v22616_v38 = vand.u32 4294901760, %v22600_v26 }
 0xe29   : > { %25740 = vst [vmem:[#allocation87_spill] sm:$0xff] %v22604_v19  ;;  %25741 = vst [vmem:[#allocation98_spill] sm:$0xff] %v22606_v16  ;;  %v8988_v28 = vsub.f32 %v22583_v20, %v24713_v29  ;;  %17516 = vpow2.f32 %v8729_v13  ;;  %v22623_v6 = vsub.f32 %v22575_v7, %v22604_v19  ;;  %v22626_v49 = vand.u32 4294901760, %v22606_v16 }
 0xe2a   : > { %25742 = vst [vmem:[#allocation100_spill] sm:$0xff] %v22613_v60  ;;  %25743 = vst [vmem:[#allocation27_spill] sm:$0xff] %v22616_v38  ;;  %v8982_v41 = vsub.f32 %v22593_v61, %v24715_v25  ;;  %17518 = vpow2.f32 %v8731_v63  ;;  %8969 = vmatprep.mubr.f32.mxu1 %v8968_v15  ;;  %v24723_v8 = vand.u32 4294901760, %v22613_v60  ;;  %v22631_v29 = vsub.f32 %v22600_v26, %v22616_v38 }
 0xe2b   : > { %25744 = vst [vmem:[#allocation119_spill] sm:$0xff] %v22623_v6  ;;  %25745 = vst [vmem:[#allocation70_spill] sm:$0xff] %v22626_v49  ;;  %v22633_v13 = vpop.eup %17508  ;;  %v8989_v25 = vand.u32 4294901760, %v8988_v28  ;;  %v24724_v9 = vand.u32 4294901760, %v22623_v6  ;;  %v22638_v7 = vsub.f32 %v22606_v16, %v22626_v49 }
 0xe2c   : > { %25746 = vst [vmem:[#allocation81_spill] sm:$0xff] %v22631_v29  ;;  %25747 = vst [vmem:[#allocation84_spill] sm:$0xff] %v22633_v13  ;;  %8975 = vmatmul.mubr.f32.gmra.mrb[84].mxu1 %v8974_v36  ;;  %v8983_v57 = vand.u32 4294901760, %v8982_v41  ;;  %v22640_v20 = vpop.eup %17510  ;;  %v9003_v63 = vsub.f32 %v22613_v60, %v24723_v8  ;;  %v22647_v26 = vand.u32 4294901760, %v22633_v13 }
 0xe2d   : > { %25748 = vst [vmem:[#allocation86_spill] sm:$0xff] %v22638_v7  ;;  %25749 = vst [vmem:[#allocation45_spill] sm:$0xff] %v22640_v20  ;;  %v8997_v36 = vsub.f32 %v22623_v6, %v24724_v9  ;;  %v24732_v28 = vand.u32 4294901760, %v22638_v7  ;;  %v22654_v41 = vand.u32 4294901760, %v22640_v20  ;;  %v25754_v9 = vand.u32 4294901760, %v22631_v29 }
 0xe2e   : > { %25750 = vst [vmem:[#allocation48_spill] sm:$0xff] %v22647_v26  ;;  %8984 = vmatprep.mubr.f32.mxu1 %v8983_v57  ;;  %v9004_v16 = vand.u32 4294901760, %v9003_v63  ;;  %v22658_v61 = vsub.f32 %v22633_v13, %v22647_v26 }
 0xe2f   : > { %25751 = vst [vmem:[#allocation51_spill] sm:$0xff] %v22654_v41  ;;  %v22660_v8 = vpop.eup %17512  ;;  %v8998_v15 = vand.u32 4294901760, %v8997_v36  ;;  %v9012_v57 = vsub.f32 %v22638_v7, %v24732_v28  ;;  %v9018_v60 = vsub.f32 %v22631_v29, %v25754_v9  ;;  %v22670_v6 = vsub.f32 %v22640_v20, %v22654_v41 }
 0xe30   : > { %25752 = vst [vmem:[#allocation54_spill] sm:$0xff] %v22658_v61  ;;  %25753 = vst [vmem:[#allocation59_spill] sm:$0xff] %v22660_v8  ;;  %8990 = vmatmul.mubr.f32.gmra.mrb[86].mxu1 %v8989_v25  ;;  %v22672_v63 = vpop.eup %17514  ;;  %v22676_v30 = vand.u32 4294901760, %v22660_v8 }
 0xe31   : > { %25755 = vst [vmem:[#allocation62_spill] sm:$0xff] %v22670_v6  ;;  %25756 = vst [vmem:[#allocation63_spill] sm:$0xff] %v22672_v63  ;;  %8999 = vmatprep.mubr.f32.mxu1 %v8998_v15  ;;  %v9013_v25 = vand.u32 4294901760, %v9012_v57  ;;  %v24743_v36 = vand.u32 4294901760, %v22670_v6  ;;  %v22680_v28 = vand.u32 4294901760, %v22672_v63  ;;  %v9019_v29 = vand.u32 4294901760, %v9018_v60 }
 0xe32   : > { %25757 = vst [vmem:[#allocation64_spill] sm:$0xff] %v22676_v30  ;;  %v22684_v9 = vsub.f32 %v22660_v8, %v22676_v30  ;;  %v25760_v15 = vand.u32 4294901760, %v22658_v61 }
 0xe33   : > { %25758 = vst [vmem:[#allocation88_spill] sm:$0xff] %v22680_v28  ;;  %v22686_v20 = vpop.eup %17516  ;;  %v9027_v13 = vsub.f32 %v22670_v6, %v24743_v36  ;;  %v22696_v7 = vsub.f32 %v22672_v63, %v22680_v28 }
 0xe34   : > { %25759 = vst [vmem:[#allocation90_spill] sm:$0xff] %v22686_v20  ;;  %9005 = vmatmul.mubr.f32.gmra.mrb[88].mxu1 %v9004_v16  ;;  %v9033_v57 = vsub.f32 %v22658_v61, %v25760_v15  ;;  %v22698_v17 = vpop.eup %17518  ;;  %v24752_v8 = vand.u32 4294901760, %v22684_v9  ;;  %v22702_v16 = vand.u32 4294901760, %v22686_v20 }
 0xe35   : > { %25761 = vst [vmem:[#allocation109_spill] sm:$0xff] %v22698_v17  ;;  %9014 = vmatprep.mubr.f32.mxu1 %v9013_v25  ;;  %v9028_v60 = vand.u32 4294901760, %v9027_v13  ;;  %v24753_v21 = vand.u32 4294901760, %v22696_v7  ;;  %v22706_v36 = vand.u32 4294901760, %v22698_v17 }
 0xe36   : > { %25762 = vst [vmem:[#allocation117_spill] sm:$0xff] %v22702_v16  ;;  %v22710_v15 = vsub.f32 %v22686_v20, %v22702_v16  ;;  %v9034_v63 = vand.u32 4294901760, %v9033_v57  ;;  %v9048_v61 = vsub.f32 %v22684_v9, %v24752_v8 }
 0xe37   : > { %25763 = vst [vmem:[#allocation65_spill] sm:$0xff] %v22706_v36  ;;  %v9042_v25 = vsub.f32 %v22696_v7, %v24753_v21  ;;  %v22720_v13 = vsub.f32 %v22698_v17, %v22706_v36 }
 0xe38   : > { %9020 = vmatmul.mubr.f32.gmra.mrb[90].mxu1 %v9019_v29  ;;  %v24755_v6 = vand.u32 4294901760, %v22710_v15  ;;  %v9049_v29 = vand.u32 4294901760, %v9048_v61  ;;  %v25764_v61 = vld [vmem:[#allocation68_spill] sm:$0xff] }
 0xe39   : > { %9029 = vmatprep.mubr.f32.mxu1 %v9028_v60  ;;  %v9043_v59 = vand.u32 4294901760, %v9042_v25  ;;  %v24756_v20 = vand.u32 4294901760, %v22720_v13  ;;  %v25767_v60 = vld [vmem:[#allocation75_spill] sm:$0xff] }
 0xe3a   : > { %v9063_v8 = vsub.f32 %v22710_v15, %v24755_v6  ;;  %v25771_v25 = vld [vmem:[#allocation79_spill] sm:$0xff]  ;;  %v25789_v6 = vld [vmem:[#allocation16_spill] sm:$0xff] }
 0xe3b   : > { %v9057_v57 = vsub.f32 %v22720_v13, %v24756_v20  ;;  %v25790_v20 = vld [vmem:[#allocation18_spill] sm:$0xff] }
 0xe3c   : > { %9035 = vmatmul.mubr.f32.gmra.mrb[92].mxu1 %v9034_v63  ;;  %v9064_v17 = vand.u32 4294901760, %v9063_v8  ;;  %v25765_v63 = vld [vmem:[#allocation71_spill] sm:$0xff]  ;;  %v25770_v8 = vld [vmem:[#allocation78_spill] sm:$0xff] }
 0xe3d   : > { %9044 = vmatprep.mubr.f32.mxu1 %v9043_v59  ;;  %v9058_v21 = vand.u32 4294901760, %v9057_v57  ;;  %v25766_v59 = vld [vmem:[#allocation74_spill] sm:$0xff] }
 0xe3e   : > { %v25773_v57 = vld [vmem:[#allocation82_spill] sm:$0xff] }
 0xe40   : > { %9050 = vmatmul.mubr.f32.gmra.mrb[94].mxu1 %v9049_v29  ;;  %v25772_v29 = vld [vmem:[#allocation80_spill] sm:$0xff] }
 0xe41   : > { %9059 = vmatprep.mubr.f32.mxu1 %v9058_v21  ;;  %v25769_v21 = vld [vmem:[#allocation77_spill] sm:$0xff] }
 0xe44   : > { %9065 = vmatmul.mubr.f32.gmra.mrb[96].mxu1 %v9064_v17  ;;  %v25768_v17 = vld [vmem:[#allocation76_spill] sm:$0xff] }
 0xe45   : > { %9295 = vmatprep.mubr.f32.mxu1 %v22284_v39 }
 0xe48   : > { %9297 = vmatmul.mubr.f32.vlgmr.msra.gmra.mrb[98].mxu1 %v22279_v44 }
 0xe49   : > { %9302 = vmatprep.mubr.f32.mxu1 %v22309_v53  ;;  %16062 = vmatpush3.bf16.msra.mxu1 %v25764_v61  ;;  %v25774_v61 = vld [vmem:[#allocation83_spill] sm:$0xff] }
 0xe4a   : > { %16064 = vmatprep.subr.bf16.mxu1 %v25765_v63  ;;  %v25775_v63 = vld [vmem:[#allocation158_spill] sm:$0xff] }
 0xe4c   : > { %9304 = vmatmul.mubr.f32.gmra.mrb[100].mxu1 %v22300_v34 }
 0xe4d   : > { %9309 = vmatprep.mubr.f32.mxu1 %v22337_v55  ;;  %16066 = vmatpush3.bf16.msra.mxu1 %v25766_v59  ;;  %v25776_v59 = vld [vmem:[#allocation159_spill] sm:$0xff] }
 0xe4e   : > { %16068 = vmatprep.subr.bf16.mxu1 %v25767_v60  ;;  %v25777_v60 = vld [vmem:[#allocation160_spill] sm:$0xff] }
 0xe50   : > { %9311 = vmatmul.mubr.f32.gmra.mrb[102].mxu1 %v22328_v14 }
 0xe51   : > { %9316 = vmatprep.mubr.f32.mxu1 %v22363_v46  ;;  %16070 = vmatpush3.bf16.msra.mxu1 %v25768_v17  ;;  %v25778_v17 = vld [vmem:[#allocation161_spill] sm:$0xff] }
 0xe52   : > { %16072 = vmatprep.subr.bf16.mxu1 %v25769_v21  ;;  %v25779_v21 = vld [vmem:[#allocation6_spill] sm:$0xff] }
 0xe54   : > { %9318 = vmatmul.mubr.f32.gmra.mrb[104].mxu1 %v22355_v23 }
 0xe55   : > { %9323 = vmatprep.mubr.f32.mxu1 %v22395_v18  ;;  %16074 = vmatpush3.bf16.msra.mxu1 %v25770_v8  ;;  %v25780_v8 = vld [vmem:[#allocation7_spill] sm:$0xff] }
 0xe56   : > { %16076 = vmatprep.subr.bf16.mxu1 %v25771_v25  ;;  %v25781_v25 = vld [vmem:[#allocation8_spill] sm:$0xff] }
 0xe58   : > { %9325 = vmatmul.mubr.f32.gmra.mrb[106].mxu1 %v22385_v45 }
 0xe59   : > { %9330 = vmatprep.mubr.f32.mxu1 %v22425_v42  ;;  %16078 = vmatpush3.bf16.msra.mxu1 %v25772_v29  ;;  %v25782_v29 = vld [vmem:[#allocation9_spill] sm:$0xff] }
 0xe5a   : > { %16080 = vmatprep.subr.bf16.mxu1 %v25773_v57  ;;  %v25783_v57 = vld [vmem:[#allocation10_spill] sm:$0xff] }
 0xe5c   : > { %9332 = vmatmul.mubr.f32.gmra.mrb[108].mxu1 %v22411_v10 }
 0xe5d   : > { %9337 = vmatprep.mubr.f32.mxu1 %v22454_v48  ;;  %16082 = vmatpush3.bf16.msra.mxu1 %v25774_v61  ;;  %v25784_v61 = vld [vmem:[#allocation11_spill] sm:$0xff] }
 0xe5e   : > { %16084 = vmatprep.subr.bf16.mxu1 %v25775_v63  ;;  %v25785_v63 = vld [vmem:[#allocation12_spill] sm:$0xff] }
 0xe60   : > { %9339 = vmatmul.mubr.f32.gmra.mrb[110].mxu1 %v22438_v52  ;;  %v25813_v52 = vand.u32 4294901760, %v22313_v37 }
 0xe61   : > { %9344 = vmatprep.mubr.f32.mxu1 %v22484_v32  ;;  %16086 = vmatpush3.bf16.msra.mxu1 %v25776_v59  ;;  %v25786_v59 = vld [vmem:[#allocation13_spill] sm:$0xff] }
 0xe62   : > { %16088 = vmatprep.subr.bf16.mxu1 %v25777_v60  ;;  %v25787_v60 = vld [vmem:[#allocation14_spill] sm:$0xff]  ;;  %v25812_v32 = vld [vmem:[#allocation97_spill] sm:$0xff] }
 0xe64   : > { %9346 = vmatmul.mubr.f32.gmra.mrb[112].mxu1 %v22468_v5  ;;  %v25809_v5 = vand.u32 4294901760, %v22288_v24 }
 0xe65   : > { %9351 = vmatprep.mubr.f32.mxu1 %v22513_v11  ;;  %16090 = vmatpush3.bf16.msra.mxu1 %v25778_v17  ;;  %v25788_v17 = vld [vmem:[#allocation15_spill] sm:$0xff]  ;;  %v25808_v11 = vand.u32 4294901760, %v22294_v33 }
 0xe66   : > { %16092 = vmatprep.subr.bf16.mxu1 %v25779_v21 }
 0xe68   : > { %9353 = vmatmul.mubr.f32.gmra.mrb[114].mxu1 %v22497_v62  ;;  %v25805_v62 = vld [vmem:[#allocation81_spill] sm:$0xff] }
 0xe69   : > { %9358 = vmatprep.mubr.f32.mxu1 %v22544_v51  ;;  %v25804_v51 = vld [vmem:[#allocation86_spill] sm:$0xff] }
 0xe6c   : > { %9360 = vmatmul.mubr.f32.gmra.mrb[116].mxu1 %v22526_v54  ;;  %v25803_v54 = vld [vmem:[#allocation100_spill] sm:$0xff] }
 0xe6d   : > { %9365 = vmatprep.mubr.f32.mxu1 %v22573_v31  ;;  %v25802_v31 = vld [vmem:[#allocation119_spill] sm:$0xff] }
 0xe70   : > { %9367 = vmatmul.mubr.f32.gmra.mrb[118].mxu1 %v22556_v47  ;;  %v25801_v47 = vld [vmem:[#allocation126_spill] sm:$0xff] }
 0xe71   : > { %9372 = vmatprep.mubr.f32.mxu1 %v22604_v19  ;;  %v25800_v19 = vld [vmem:[#allocation156_spill] sm:$0xff] }
 0xe74   : > { %9374 = vmatmul.mubr.f32.gmra.mrb[120].mxu1 %v22586_v4  ;;  %v25799_v4 = vld [vmem:[#allocation104_spill] sm:$0xff] }
 0xe75   : > { %9379 = vmatprep.mubr.f32.mxu1 %v22626_v49  ;;  %v25798_v49 = vld [vmem:[#allocation29_spill] sm:$0xff] }
 0xe78   : > { %9381 = vmatmul.mubr.f32.gmra.mrb[122].mxu1 %v22616_v38  ;;  %v25797_v38 = vld [vmem:[#allocation134_spill] sm:$0xff] }
 0xe79   : > { %9386 = vmatprep.mubr.f32.mxu1 %v22654_v41  ;;  %v25796_v41 = vld [vmem:[#allocation92_spill] sm:$0xff] }
 0xe7c   : > { %9388 = vmatmul.mubr.f32.gmra.mrb[124].mxu1 %v22647_v26  ;;  %v25795_v26 = vld [vmem:[#allocation26_spill] sm:$0xff] }
 0xe7d   : > { %9393 = vmatprep.mubr.f32.mxu1 %v22680_v28  ;;  %v25794_v28 = vld [vmem:[#allocation162_spill] sm:$0xff] }
 0xe80   : > { %9395 = vmatmul.mubr.f32.gmra.mrb[126].mxu1 %v22676_v30  ;;  %v25793_v30 = vld [vmem:[#allocation24_spill] sm:$0xff] }
 0xe81   : > { %9400 = vmatprep.mubr.f32.mxu1 %v22706_v36  ;;  %v25792_v36 = vld [vmem:[#allocation22_spill] sm:$0xff] }
 0xe84   : > { %9402 = vmatmul.mubr.f32.gmra.mrb[128].mxu1 %v22702_v16  ;;  %v25791_v16 = vld [vmem:[#allocation20_spill] sm:$0xff] }
 0xe85   : > { %9537 = vmatprep.mubr.f32.mxu1 %v22294_v33  ;;  %v25816_v33 = vld [vmem:[#allocation101_spill] sm:$0xff] }
 0xe88   : > { %9540 = vmatmul.mubr.f32.vlgmr.msra.gmra.mrb[130].mxu1 %v22288_v24  ;;  %v25817_v24 = vand.u32 4294901760, %v22343_v56 }
 0xe89   : > { %9546 = vmatprep.mubr.f32.mxu1 %v22324_v50  ;;  %16094 = vmatpush3.bf16.msra.mxu1 %v25780_v8 }
 0xe8a   : > { %16096 = vmatprep.subr.bf16.mxu1 %v25781_v25 }
 0xe8c   : > { %9549 = vmatmul.mubr.f32.gmra.mrb[132].mxu1 %v22313_v37  ;;  %v25821_v37 = vand.u32 4294901760, %v22373_v0 }
 0xe8d   : > { %9555 = vmatprep.mubr.f32.mxu1 %v22352_v35  ;;  %16098 = vmatpush3.bf16.msra.mxu1 %v25782_v29 }
 0xe8e   : > { %16100 = vmatprep.subr.bf16.mxu1 %v25783_v57 }
 0xe90   : > { %9558 = vmatmul.mubr.f32.gmra.mrb[134].mxu1 %v22343_v56  ;;  %v25825_v56 = vand.u32 4294901760, %v22399_v2 }
 0xe91   : > { %9564 = vmatprep.mubr.f32.mxu1 %v22382_v27  ;;  %16102 = vmatpush3.bf16.msra.mxu1 %v25784_v61 }
 0xe92   : > { %16104 = vmatprep.subr.bf16.mxu1 %v25785_v63 }
 0xe94   : > { %9567 = vmatmul.mubr.f32.gmra.mrb[136].mxu1 %v22373_v0  ;;  %v25828_v0 = vld [vmem:[#allocation25_spill] sm:$0xff] }
 0xe95   : > { %9573 = vmatprep.mubr.f32.mxu1 %v22417_v40  ;;  %16106 = vmatpush3.bf16.msra.mxu1 %v25786_v59 }
 0xe96   : > { %16108 = vmatprep.subr.bf16.mxu1 %v25787_v60 }
 0xe98   : > { %9576 = vmatmul.mubr.f32.gmra.mrb[138].mxu1 %v22399_v2  ;;  %v25831_v2 = vld [vmem:[#allocation115_spill] sm:$0xff] }
 0xe99   : > { %9582 = vmatprep.mubr.f32.mxu1 %v22447_v12  ;;  %16110 = vmatpush3.bf16.msra.mxu1 %v25788_v17 }
 0xe9a   : > { %16112 = vmatprep.subr.bf16.mxu1 %v25789_v6 }
 0xe9c   : > { %9585 = vmatmul.mubr.f32.gmra.mrb[140].mxu1 %v22435_v1 }
 0xe9d   : > { %9591 = vmatprep.mubr.f32.mxu1 %v22474_v43  ;;  %16114 = vmatpush3.bf16.msra.mxu1 %v25790_v20  ;;  %v25815_v20 = vld [vmem:[#allocation94_spill] sm:$0xff] }
 0xe9e   : > { %16116 = vmatprep.subr.bf16.mxu1 %v25791_v16  ;;  %v25814_v16 = vand.u32 4294901760, %v22352_v35  ;;  %v25822_v35 = vand.u32 4294901760, %v22417_v40  ;;  %v25829_v40 = vand.u32 4294901760, %v22435_v1  ;;  %v25835_v1 = vld [vmem:[#allocation120_spill] sm:$0xff] }
 0xea0   : > { %9594 = vmatmul.mubr.f32.gmra.mrb[142].mxu1 %v22465_v58 }
 0xea1   : > { %9600 = vmatprep.mubr.f32.mxu1 %v22507_v3  ;;  %16118 = vmatpush3.bf16.msra.mxu1 %v25792_v36  ;;  %v25811_v36 = vld [vmem:[#allocation89_spill] sm:$0xff] }
 0xea2   : > { %16120 = vmatprep.subr.bf16.mxu1 %v25793_v30  ;;  %v25810_v30 = vand.u32 4294901760, %v22324_v50  ;;  %v25818_v50 = vand.u32 4294901760, %v22382_v27  ;;  %v25826_v27 = vand.u32 4294901760, %v22447_v12 }
 0xea4   : > { %9603 = vmatmul.mubr.f32.gmra.mrb[144].mxu1 %v22494_v22 }
 0xea5   : > { %9609 = vmatprep.mubr.f32.mxu1 %v25794_v28  ;;  %16122 = vmatpush3.bf16.msra.mxu1 %v25795_v26  ;;  %v25806_v26 = vld [vmem:[#allocation62_spill] sm:$0xff] }
 0xea6   : > { %16124 = vmatprep.subr.bf16.mxu1 %v25796_v41  ;;  %v25807_v41 = vld [vmem:[#allocation54_spill] sm:$0xff] }
 0xea8   : > { %9612 = vmatmul.mubr.f32.gmra.mrb[146].mxu1 %v25797_v38 }
 0xea9   : > { %9618 = vmatprep.mubr.f32.mxu1 %v25798_v49 }
 0xeac   : > { %9621 = vmatmul.mubr.f32.gmra.mrb[148].mxu1 %v25799_v4 }
 0xead   : > { %9627 = vmatprep.mubr.f32.mxu1 %v25800_v19 }
 0xeb0   : > { %9630 = vmatmul.mubr.f32.gmra.mrb[150].mxu1 %v25801_v47 }
 0xeb1   : > { %9636 = vmatprep.mubr.f32.mxu1 %v25802_v31 }
 0xeb4   : > { %9639 = vmatmul.mubr.f32.gmra.mrb[152].mxu1 %v25803_v54 }
 0xeb5   : > { %9645 = vmatprep.mubr.f32.mxu1 %v25804_v51 }
 0xeb8   : > { %9648 = vmatmul.mubr.f32.gmra.mrb[154].mxu1 %v25805_v62 }
 0xeb9   : > { %9654 = vmatprep.mubr.f32.mxu1 %v25806_v26 }
 0xebc   : > { %9657 = vmatmul.mubr.f32.gmra.mrb[156].mxu1 %v25807_v41 }
 0xebd   : > { %9663 = vmatprep.mubr.f32.mxu1 %v22696_v7 }
 0xec0   : > { %9666 = vmatmul.mubr.f32.gmra.mrb[158].mxu1 %v22684_v9 }
 0xec1   : > { %9672 = vmatprep.mubr.f32.mxu1 %v22720_v13 }
 0xec4   : > { %9675 = vmatmul.mubr.f32.gmra.mrb[160].mxu1 %v22710_v15 }
 0xec5   : > { %9779 = vmatprep.mubr.f32.mxu1 %v25808_v11  ;;  %v25820_v11 = vld [vmem:[#allocation107_spill] sm:$0xff] }
 0xec8   : > { %9783 = vmatmul.mubr.f32.vlgmr.msra.gmra.mrb[162].mxu1 %v25809_v5  ;;  %v25819_v5 = vld [vmem:[#allocation99_spill] sm:$0xff] }
 0xec9   : > { %9790 = vmatprep.mubr.f32.mxu1 %v25810_v30  ;;  %16126 = vmatpush3.bf16.msra.mxu1 %v25811_v36  ;;  %v25827_v36 = vld [vmem:[#allocation110_spill] sm:$0xff] }
 0xeca   : > { %16128 = vmatprep.subr.bf16.mxu1 %v25812_v32  ;;  %v25824_v32 = vld [vmem:[#allocation21_spill] sm:$0xff] }
 0xecc   : > { %9794 = vmatmul.mubr.f32.gmra.mrb[164].mxu1 %v25813_v52  ;;  %v25823_v52 = vld [vmem:[#allocation105_spill] sm:$0xff] }
 0xecd   : > { %9801 = vmatprep.mubr.f32.mxu1 %v25814_v16  ;;  %16130 = vmatpush3.bf16.msra.mxu1 %v25815_v20 }
 0xece   : > { %16132 = vmatprep.subr.bf16.mxu1 %v25816_v33  ;;  %v25830_v33 = vand.u32 4294901760, %v22474_v43  ;;  %v25836_v43 = vld [vmem:[#allocation30_spill] sm:$0xff] }
 0xed0   : > { %9805 = vmatmul.mubr.f32.gmra.mrb[166].mxu1 %v25817_v24 }
 0xed1   : > { %9812 = vmatprep.mubr.f32.mxu1 %v25818_v50  ;;  %16134 = vmatpush3.bf16.msra.mxu1 %v25819_v5  ;;  %v25832_v5 = vld [vmem:[#allocation28_spill] sm:$0xff] }
 0xed2   : > { %16136 = vmatprep.subr.bf16.mxu1 %v25820_v11  ;;  %v25833_v11 = vand.u32 4294901760, %v22465_v58  ;;  %v25839_v58 = vld [vmem:[#allocation32_spill] sm:$0xff] }
 0xed4   : > { %9816 = vmatmul.mubr.f32.gmra.mrb[168].mxu1 %v25821_v37  ;;  %v25834_v37 = vand.u32 4294901760, %v22507_v3 }
 0xed5   : > { %9823 = vmatprep.mubr.f32.mxu1 %v25822_v35  ;;  %16138 = vmatpush3.bf16.msra.mxu1 %v25823_v52 }
 0xed6   : > { %16140 = vmatprep.subr.bf16.mxu1 %v25824_v32 }
 0xed7   : > { %v14497_v30 = vpop.f32.mrb[66].mxu1 }
 0xed8   : > { %9827 = vmatmul.mubr.f32.gmra.mrb[170].mxu1 %v25825_v56  ;;  %v14498_v20 = vpop.f32.mrb[67].mxu1  ;;  %v25837_v56 = vand.u32 4294901760, %v22494_v22 }
 0xed9   : > { %9834 = vmatprep.mubr.f32.mxu1 %v25826_v27  ;;  %16142 = vmatpush3.bf16.msra.mxu1 %v25827_v36  ;;  %v22857_v16 = vadd.f32 %v14498_v20, %v14497_v30  ;;  %v25838_v30 = vand.u32 4294901760, %v25794_v28  ;;  %v25840_v36 = vand.u32 4294901760, %v25797_v38  ;;  %v25842_v28 = vand.u32 4294901760, %v25799_v4 }
 0xeda   : > { %16144 = vmatprep.subr.bf16.mxu1 %v25828_v0  ;;  %v25841_v0 = vand.u32 4294901760, %v25798_v49  ;;  %v25845_v49 = vand.u32 4294901760, %v25802_v31  ;;  %v25849_v31 = vand.u32 4294901760, %v25806_v26  ;;  %v25853_v26 = vand.u32 4294901760, %v22720_v13 }
 0xedc   : > { %9838 = vmatmul.mubr.f32.gmra.mrb[172].mxu1 %v25829_v40  ;;  %v14500_v24 = vpop.f32.mrb[68].mxu1 }
 0xedd   : > { %9845 = vmatprep.mubr.f32.mxu1 %v25830_v33  ;;  %16146 = vmatpush3.bf16.msra.mxu1 %v25831_v2  ;;  %v14501_v50 = vpop.f32.mrb[69].mxu1 }
 0xede   : > { %16148 = vmatprep.subr.bf16.mxu1 %v25832_v5  ;;  %v22866_v12 = vadd.f32 %v14501_v50, %v14500_v24  ;;  %v25843_v24 = vand.u32 4294901760, %v25800_v19  ;;  %v25844_v50 = vand.u32 4294901760, %v25801_v47  ;;  %v25847_v19 = vand.u32 4294901760, %v25804_v51 }
 0xedf   : > { %v25848_v47 = vand.u32 4294901760, %v25805_v62  ;;  %v25851_v51 = vand.u32 4294901760, %v22696_v7  ;;  %v25852_v62 = vand.u32 4294901760, %v22684_v9 }
 0xee0   : > { %9849 = vmatmul.mubr.f32.gmra.mrb[174].mxu1 %v25833_v11  ;;  %v14503_v35 = vpop.f32.mrb[70].mxu1 }
 0xee1   : > { %9856 = vmatprep.mubr.f32.mxu1 %v25834_v37  ;;  %16150 = vmatpush3.bf16.msra.mxu1 %v25835_v1  ;;  %v14504_v52 = vpop.f32.mrb[71].mxu1  ;;  %v25846_v37 = vand.u32 4294901760, %v25803_v54  ;;  %v25850_v54 = vand.u32 4294901760, %v25807_v41  ;;  %v25854_v41 = vand.u32 4294901760, %v22710_v15 }
 0xee2   : > { %16152 = vmatprep.subr.bf16.mxu1 %v25836_v43  ;;  %v22874_v32 = vadd.f32 %v14504_v52, %v14503_v35 }
 0xee4   : > { %9860 = vmatmul.mubr.f32.gmra.mrb[176].mxu1 %v25837_v56  ;;  %v14506_v27 = vpop.f32.mrb[72].mxu1 }
 0xee5   : > { %9867 = vmatprep.mubr.f32.mxu1 %v25838_v30  ;;  %16154 = vmatpush3.bf16.msra.mxu1 %v25839_v58  ;;  %v14507_v20 = vpop.f32.mrb[73].mxu1 }
 0xee6   : > { %16156 = vmatprep.subr.bf16.mxu1 %v25779_v21  ;;  %v22882_v3 = vadd.f32 %v14507_v20, %v14506_v27 }
 0xee8   : > { %9871 = vmatmul.mubr.f32.gmra.mrb[178].mxu1 %v25840_v36 }
 0xee9   : > { %9878 = vmatprep.mubr.f32.mxu1 %v25841_v0  ;;  %v14509_v40 = vpop.f32.mrb[74].mxu1 }
 0xeea   : > { %v14510_v22 = vpop.f32.mrb[75].mxu1 }
 0xeeb   : > { %v22888_v33 = vadd.f32 %v14510_v22, %v14509_v40 }
 0xeec   : > { %9882 = vmatmul.mubr.f32.gmra.mrb[180].mxu1 %v25842_v28 }
 0xeed   : > { %9889 = vmatprep.mubr.f32.mxu1 %v25843_v24 }
 0xeee   : > { %v14512_v2 = vpop.f32.mrb[76].mxu1 }
 0xeef   : > { %v14513_v21 = vpop.f32.mrb[77].mxu1 }
 0xef0   : > { %9893 = vmatmul.mubr.f32.gmra.mrb[182].mxu1 %v25844_v50  ;;  %v22896_v38 = vadd.f32 %v14513_v21, %v14512_v2 }
 0xef1   : > { %9900 = vmatprep.mubr.f32.mxu1 %v25845_v49 }
 0xef2   : > { %v14515_v5 = vpop.f32.mrb[78].mxu1 }
 0xef3   : > { %v14516_v11 = vpop.f32.mrb[79].mxu1 }
 0xef4   : > { %9904 = vmatmul.mubr.f32.gmra.mrb[184].mxu1 %v25846_v37  ;;  %v22902_v4 = vadd.f32 %v14516_v11, %v14515_v5 }
 0xef5   : > { %9911 = vmatprep.mubr.f32.mxu1 %v25847_v19 }
 0xef6   : > { %v14518_v35 = vpop.f32.mrb[80].mxu1 }
 0xef7   : > { %v14519_v1 = vpop.f32.mrb[81].mxu1 }
 0xef8   : > { %9915 = vmatmul.mubr.f32.gmra.mrb[186].mxu1 %v25848_v47  ;;  %v22908_v52 = vadd.f32 %v14519_v1, %v14518_v35  ;;  %v25857_v35 = vld [vmem:[#allocation106_spill] sm:$0xff]  ;;  %v25860_v47 = vld [vmem:[#allocation24_spill] sm:$0xff] }
 0xef9   : > { %9922 = vmatprep.mubr.f32.mxu1 %v25849_v31  ;;  %v25859_v1 = vld [vmem:[#allocation22_spill] sm:$0xff] }
 0xefb   : > { %v14521_v43 = vpop.f32.mrb[82].mxu1 }
 0xefc   : > { %v14522_v56 = vpop.f32.mrb[83].mxu1  ;;  %9926 = vmatmul.mubr.f32.gmra.mrb[188].mxu1 %v25850_v54  ;;  %v25861_v54 = vld [vmem:[#allocation114_spill] sm:$0xff] }
 0xefd   : > { %v22914_v30 = vadd.f32 %v14522_v56, %v14521_v43  ;;  %9933 = vmatprep.mubr.f32.mxu1 %v25851_v51  ;;  %v25862_v51 = vld [vmem:[#allocation138_spill] sm:$0xff] }
 0xeff   : > { %v14524_v27 = vpop.f32.mrb[84].mxu1 }
 0xf00   : > { %v14525_v58 = vpop.f32.mrb[85].mxu1  ;;  %9937 = vmatmul.mubr.f32.gmra.mrb[190].mxu1 %v25852_v62 }
 0xf01   : > { %v22920_v20 = vadd.f32 %v14525_v58, %v14524_v27  ;;  %9944 = vmatprep.mubr.f32.mxu1 %v25853_v26  ;;  %v25863_v27 = vld [vmem:[#allocation26_spill] sm:$0xff] }
 0xf03   : > { %v14527_v36 = vpop.f32.mrb[86].mxu1 }
 0xf04   : > { %v14528_v0 = vpop.f32.mrb[87].mxu1  ;;  %9948 = vmatmul.mubr.f32.gmra.mrb[192].mxu1 %v25854_v41  ;;  %v25865_v41 = vld [vmem:[#allocation91_spill] sm:$0xff] }
 0xf05   : > { %v22926_v40 = vadd.f32 %v14528_v0, %v14527_v36  ;;  %10114 = vmatprep.mubr.f32.mxu1 %v22284_v39  ;;  %v25864_v36 = vld [vmem:[#allocation113_spill] sm:$0xff] }
 0xf07   : > { %v14530_v7 = vpop.f32.mrb[88].mxu1 }
 0xf08   : > { %v14531_v22 = vpop.f32.mrb[89].mxu1  ;;  %10116 = vmatmul.mubr.f32.vlgmr.msra.gmra.mrb[194].mxu1 %v22279_v44 }
 0xf09   : > { %v22930_v9 = vadd.f32 %v14531_v22, %v14530_v7  ;;  %10121 = vmatprep.mubr.f32.mxu1 %v22309_v53  ;;  %16158 = vmatpush3.bf16.msra.mxu1 %v25780_v8 }
 0xf0a   : > { %16160 = vmatprep.subr.bf16.mxu1 %v25781_v25 }
 0xf0b   : > { %v14533_v13 = vpop.f32.mrb[90].mxu1 }
 0xf0c   : > { %v14534_v28 = vpop.f32.mrb[91].mxu1  ;;  %10123 = vmatmul.mubr.f32.gmra.mrb[196].mxu1 %v22300_v34 }
 0xf0d   : > { %v22936_v15 = vadd.f32 %v14534_v28, %v14533_v13  ;;  %10128 = vmatprep.mubr.f32.mxu1 %v22337_v55  ;;  %16162 = vmatpush3.bf16.msra.mxu1 %v25782_v29  ;;  %v25866_v13 = vld [vmem:[#allocation165_spill] sm:$0xff] }
 0xf0e   : > { %16164 = vmatprep.subr.bf16.mxu1 %v25783_v57 }
 0xf0f   : > { %v14536_v24 = vpop.f32.mrb[92].mxu1 }
 0xf10   : > { %v14537_v2 = vpop.f32.mrb[93].mxu1  ;;  %10130 = vmatmul.mubr.f32.gmra.mrb[198].mxu1 %v22328_v14 }
 0xf11   : > { %v22942_v21 = vadd.f32 %v14537_v2, %v14536_v24  ;;  %10135 = vmatprep.mubr.f32.mxu1 %v22363_v46  ;;  %16166 = vmatpush3.bf16.msra.mxu1 %v25784_v61  ;;  %v25867_v24 = vld [vmem:[#allocation125_spill] sm:$0xff] }
 0xf12   : > { %16168 = vmatprep.subr.bf16.mxu1 %v25785_v63 }
 0xf13   : > { %v14539_v8 = vpop.f32.mrb[94].mxu1 }
 0xf14   : > { %v14540_v25 = vpop.f32.mrb[95].mxu1  ;;  %10137 = vmatmul.mubr.f32.gmra.mrb[200].mxu1 %v22355_v23 }
 0xf15   : > { %v22948_v50 = vadd.f32 %v14540_v25, %v14539_v8  ;;  %10142 = vmatprep.mubr.f32.mxu1 %v22395_v18  ;;  %16170 = vmatpush3.bf16.msra.mxu1 %v25786_v59  ;;  %v25855_v59 = vld [vmem:[#allocation18_spill] sm:$0xff]  ;;  %v25868_v25 = vld [vmem:[#allocation127_spill] sm:$0xff] }
 0xf16   : > { %16172 = vmatprep.subr.bf16.mxu1 %v25787_v60  ;;  %v25856_v60 = vld [vmem:[#allocation20_spill] sm:$0xff] }
 0xf17   : > { %v14542_v29 = vpop.f32.mrb[96].mxu1 }
 0xf18   : > { %v14543_v57 = vpop.f32.mrb[97].mxu1  ;;  %10144 = vmatmul.mubr.f32.gmra.mrb[202].mxu1 %v22385_v45 }
 0xf19   : > { %v22954_v49 = vadd.f32 %v14543_v57, %v14542_v29  ;;  %10149 = vmatprep.mubr.f32.mxu1 %v22425_v42  ;;  %16174 = vmatpush3.bf16.msra.mxu1 %v25788_v17  ;;  %v25869_v57 = vld [vmem:[#allocation87_spill] sm:$0xff] }
 0xf1a   : > { %16176 = vmatprep.subr.bf16.mxu1 %v25789_v6  ;;  %v25858_v6 = vld [vmem:[#allocation23_spill] sm:$0xff] }
 0xf1b   : > { %v14577_v61 = vpop.f32.mrb[98].mxu1 }
 0xf1c   : > { %v14578_v63 = vpop.f32.mrb[99].mxu1  ;;  %10151 = vmatmul.mubr.f32.gmra.mrb[204].mxu1 %v22411_v10 }
 0xf1d   : > { %v14579_v5 = vadd.f32 %v14578_v63, %v14577_v61  ;;  %10156 = vmatprep.mubr.f32.mxu1 %v22454_v48  ;;  %16178 = vmatpush3.bf16.msra.mxu1 %v25855_v59 }
 0xf1e   : > { %16180 = vmatprep.subr.bf16.mxu1 %v25856_v60  ;;  %v25871_v60 = vld [vmem:[#allocation70_spill] sm:$0xff] }
 0xf1f   : > { %v22964_v11 = vadd.f32 %v14579_v5, %v22857_v16  ;;  %v14580_v37 = vpop.f32.mrb[100].mxu1  ;;  %v25870_v5 = vld [vmem:[#allocation141_spill] sm:$0xff] }
 0xf20   : > { %v14581_v19 = vpop.f32.mrb[101].mxu1  ;;  %10158 = vmatmul.mubr.f32.gmra.mrb[206].mxu1 %v25857_v35 }
 0xf21   : > { %v14582_v17 = vadd.f32 %v14581_v19, %v14580_v37  ;;  %10163 = vmatprep.mubr.f32.mxu1 %v25858_v6  ;;  %16182 = vmatpush3.bf16.msra.mxu1 %v25859_v1 }
 0xf22   : > { %16184 = vmatprep.subr.bf16.mxu1 %v25860_v47  ;;  %v25873_v47 = vld [vmem:[#allocation51_spill] sm:$0xff] }
 0xf23   : > { %v22971_v31 = vadd.f32 %v14582_v17, %v22866_v12  ;;  %v14583_v43 = vpop.f32.mrb[102].mxu1  ;;  %v25872_v17 = vld [vmem:[#allocation27_spill] sm:$0xff] }
 0xf24   : > { %v14584_v56 = vpop.f32.mrb[103].mxu1  ;;  %10165 = vmatmul.mubr.f32.gmra.mrb[208].mxu1 %v25861_v54 }
 0xf25   : > { %v14585_v16 = vadd.f32 %v14584_v56, %v14583_v43  ;;  %10170 = vmatprep.mubr.f32.mxu1 %v25862_v51  ;;  %16186 = vmatpush3.bf16.msra.mxu1 %v25863_v27 }
 0xf27   : > { %v22977_v58 = vadd.f32 %v14585_v16, %v22874_v32  ;;  %v14586_v62 = vpop.f32.mrb[104].mxu1  ;;  %v25874_v16 = vld [vmem:[#allocation48_spill] sm:$0xff] }
 0xf28   : > { %v14587_v26 = vpop.f32.mrb[105].mxu1  ;;  %10172 = vmatmul.mubr.f32.gmra.mrb[210].mxu1 %v25864_v36 }
 0xf29   : > { %v14588_v0 = vadd.f32 %v14587_v26, %v14586_v62  ;;  %10177 = vmatprep.mubr.f32.mxu1 %v25865_v41  ;;  %v25875_v62 = vld [vmem:[#allocation88_spill] sm:$0xff] }
 0xf2b   : > { %v22982_v12 = vadd.f32 %v14588_v0, %v22882_v3  ;;  %v14589_v7 = vpop.f32.mrb[106].mxu1 }
 0xf2c   : > { %v14590_v22 = vpop.f32.mrb[107].mxu1  ;;  %10179 = vmatmul.mubr.f32.gmra.mrb[212].mxu1 %v25866_v13 }
 0xf2d   : > { %v14591_v28 = vadd.f32 %v14590_v22, %v14589_v7  ;;  %10184 = vmatprep.mubr.f32.mxu1 %v25867_v24  ;;  %v25876_v7 = vld [vmem:[#allocation64_spill] sm:$0xff] }
 0xf2f   : > { %v22987_v32 = vadd.f32 %v14591_v28, %v22888_v33  ;;  %v14592_v2 = vpop.f32.mrb[108].mxu1  ;;  %v25877_v28 = vld [vmem:[#allocation65_spill] sm:$0xff] }
 0xf30   : > { %v14593_v8 = vpop.f32.mrb[109].mxu1  ;;  %10186 = vmatmul.mubr.f32.gmra.mrb[214].mxu1 %v25868_v25 }
 0xf31   : > { %v14594_v29 = vadd.f32 %v14593_v8, %v14592_v2  ;;  %10191 = vmatprep.mubr.f32.mxu1 %v25869_v57 }
 0xf33   : > { %v22992_v3 = vadd.f32 %v14594_v29, %v22896_v38  ;;  %v14595_v61 = vpop.f32.mrb[110].mxu1  ;;  %v25878_v29 = vld [vmem:[#allocation117_spill] sm:$0xff] }
 0xf34   : > { %v14596_v63 = vpop.f32.mrb[111].mxu1  ;;  %10193 = vmatmul.mubr.f32.gmra.mrb[216].mxu1 %v25870_v5 }
 0xf35   : > { %v14597_v59 = vadd.f32 %v14596_v63, %v14595_v61  ;;  %10198 = vmatprep.mubr.f32.mxu1 %v25871_v60 }
 0xf37   : > { %v22997_v33 = vadd.f32 %v14597_v59, %v22902_v4  ;;  %v14598_v37 = vpop.f32.mrb[112].mxu1 }
 0xf38   : > { %v14599_v19 = vpop.f32.mrb[113].mxu1  ;;  %10200 = vmatmul.mubr.f32.gmra.mrb[218].mxu1 %v25872_v17 }
 0xf39   : > { %v14600_v1 = vadd.f32 %v14599_v19, %v14598_v37  ;;  %10205 = vmatprep.mubr.f32.mxu1 %v25873_v47 }
 0xf3b   : > { %v23002_v38 = vadd.f32 %v14600_v1, %v22908_v52  ;;  %v14601_v43 = vpop.f32.mrb[114].mxu1 }
 0xf3c   : > { %v14602_v56 = vpop.f32.mrb[115].mxu1  ;;  %10207 = vmatmul.mubr.f32.gmra.mrb[220].mxu1 %v25874_v16 }
 0xf3d   : > { %v14603_v27 = vadd.f32 %v14602_v56, %v14601_v43  ;;  %10212 = vmatprep.mubr.f32.mxu1 %v25875_v62 }
 0xf3f   : > { %v23007_v4 = vadd.f32 %v14603_v27, %v22914_v30  ;;  %v14604_v26 = vpop.f32.mrb[116].mxu1 }
 0xf40   : > { %v14605_v0 = vpop.f32.mrb[117].mxu1  ;;  %10214 = vmatmul.mubr.f32.gmra.mrb[222].mxu1 %v25876_v7 }
 0xf41   : > { %v14606_v22 = vadd.f32 %v14605_v0, %v14604_v26  ;;  %10219 = vmatprep.mubr.f32.mxu1 %v25877_v28 }
 0xf43   : > { %v23012_v52 = vadd.f32 %v14606_v22, %v22920_v20  ;;  %v14607_v2 = vpop.f32.mrb[118].mxu1 }
 0xf44   : > { %v14608_v8 = vpop.f32.mrb[119].mxu1  ;;  %10221 = vmatmul.mubr.f32.gmra.mrb[224].mxu1 %v25878_v29 }
 0xf45   : > { %v14609_v61 = vadd.f32 %v14608_v8, %v14607_v2  ;;  %10323 = vmatprep.mubr.f32.mxu1 %v22284_v39 }
 0xf47   : > { %v23017_v30 = vadd.f32 %v14609_v61, %v22926_v40  ;;  %v14610_v63 = vpop.f32.mrb[120].mxu1 }
 0xf48   : > { %v14611_v59 = vpop.f32.mrb[121].mxu1  ;;  %10325 = vmatmul.mubr.f32.vlgmr.msra.gmra.mrb[226].mxu1 %v22279_v44 }
 0xf49   : > { %v14612_v37 = vadd.f32 %v14611_v59, %v14610_v63  ;;  %10330 = vmatprep.mubr.f32.mxu1 %v22309_v53 }
 0xf4b   : > { %v23022_v20 = vadd.f32 %v14612_v37, %v22930_v9  ;;  %v14613_v19 = vpop.f32.mrb[122].mxu1 }
 0xf4c   : > { %v14614_v1 = vpop.f32.mrb[123].mxu1  ;;  %10332 = vmatmul.mubr.f32.gmra.mrb[228].mxu1 %v22300_v34 }
 0xf4d   : > { %v14615_v43 = vadd.f32 %v14614_v1, %v14613_v19  ;;  %10337 = vmatprep.mubr.f32.mxu1 %v22337_v55 }
 0xf4f   : > { %v23027_v39 = vadd.f32 %v14615_v43, %v22936_v15  ;;  %v14616_v40 = vpop.f32.mrb[124].mxu1 }
 0xf50   : > { %v14617_v56 = vpop.f32.mrb[125].mxu1  ;;  %10339 = vmatmul.mubr.f32.gmra.mrb[230].mxu1 %v22328_v14 }
 0xf51   : > { %v14618_v44 = vadd.f32 %v14617_v56, %v14616_v40  ;;  %10344 = vmatprep.mubr.f32.mxu1 %v22363_v46 }
 0xf53   : > { %v23032_v53 = vadd.f32 %v14618_v44, %v22942_v21  ;;  %v14619_v9 = vpop.f32.mrb[126].mxu1 }
 0xf54   : > { %v14620_v27 = vpop.f32.mrb[127].mxu1  ;;  %10346 = vmatmul.mubr.f32.gmra.mrb[232].mxu1 %v22355_v23 }
 0xf55   : > { %v14621_v34 = vadd.f32 %v14620_v27, %v14619_v9  ;;  %10351 = vmatprep.mubr.f32.mxu1 %v22395_v18 }
 0xf57   : > { %v23037_v55 = vadd.f32 %v14621_v34, %v22948_v50  ;;  %v14622_v15 = vpop.f32.mrb[128].mxu1 }
 0xf58   : > { %v14623_v26 = vpop.f32.mrb[129].mxu1  ;;  %10353 = vmatmul.mubr.f32.gmra.mrb[234].mxu1 %v22385_v45 }
 0xf59   : > { %v14624_v14 = vadd.f32 %v14623_v26, %v14622_v15  ;;  %10358 = vmatprep.mubr.f32.mxu1 %v22425_v42 }
 0xf5b   : > { %v23042_v46 = vadd.f32 %v14624_v14, %v22954_v49  ;;  %v14657_v21 = vpop.f32.mrb[130].mxu1 }
 0xf5c   : > { %v14658_v0 = vpop.f32.mrb[131].mxu1  ;;  %10360 = vmatmul.mubr.f32.gmra.mrb[236].mxu1 %v22411_v10 }
 0xf5d   : > { %v14659_v23 = vadd.f32 %v14658_v0, %v14657_v21  ;;  %10365 = vmatprep.mubr.f32.mxu1 %v22454_v48 }
 0xf5f   : > { %v23047_v18 = vadd.f32 %v14659_v23, %v22964_v11  ;;  %v14660_v50 = vpop.f32.mrb[132].mxu1 }
 0xf60   : > { %v14661_v22 = vpop.f32.mrb[133].mxu1  ;;  %10367 = vmatmul.mubr.f32.gmra.mrb[238].mxu1 %v25857_v35 }
 0xf61   : > { %v14662_v45 = vadd.f32 %v14661_v22, %v14660_v50  ;;  %10372 = vmatprep.mubr.f32.mxu1 %v25858_v6 }
 0xf63   : > { %v23052_v42 = vadd.f32 %v14662_v45, %v22971_v31  ;;  %v14663_v49 = vpop.f32.mrb[134].mxu1 }
 0xf64   : > { %v14664_v2 = vpop.f32.mrb[135].mxu1  ;;  %10374 = vmatmul.mubr.f32.gmra.mrb[240].mxu1 %v25861_v54 }
 0xf65   : > { %v14665_v10 = vadd.f32 %v14664_v2, %v14663_v49  ;;  %10379 = vmatprep.mubr.f32.mxu1 %v25862_v51 }
 0xf67   : > { %v23057_v48 = vadd.f32 %v14665_v10, %v22977_v58  ;;  %v14666_v11 = vpop.f32.mrb[136].mxu1 }
 0xf68   : > { %v14667_v8 = vpop.f32.mrb[137].mxu1  ;;  %10381 = vmatmul.mubr.f32.gmra.mrb[242].mxu1 %v25864_v36 }
 0xf69   : > { %v14668_v35 = vadd.f32 %v14667_v8, %v14666_v11  ;;  %10386 = vmatprep.mubr.f32.mxu1 %v25865_v41 }
 0xf6b   : > { %v23062_v6 = vadd.f32 %v14668_v35, %v22982_v12  ;;  %v14669_v31 = vpop.f32.mrb[138].mxu1 }
 0xf6c   : > { %v14670_v61 = vpop.f32.mrb[139].mxu1  ;;  %10388 = vmatmul.mubr.f32.gmra.mrb[244].mxu1 %v25866_v13 }
 0xf6d   : > { %v14671_v54 = vadd.f32 %v14670_v61, %v14669_v31  ;;  %10393 = vmatprep.mubr.f32.mxu1 %v25867_v24 }
 0xf6f   : > { %v23067_v51 = vadd.f32 %v14671_v54, %v22987_v32  ;;  %v14672_v58 = vpop.f32.mrb[140].mxu1 }
 0xf70   : > { %v14673_v63 = vpop.f32.mrb[141].mxu1  ;;  %10395 = vmatmul.mubr.f32.gmra.mrb[246].mxu1 %v25868_v25 }
 0xf71   : > { %v14674_v36 = vadd.f32 %v14673_v63, %v14672_v58  ;;  %10400 = vmatprep.mubr.f32.mxu1 %v25869_v57 }
 0xf73   : > { %v23072_v41 = vadd.f32 %v14674_v36, %v22992_v3  ;;  %v14675_v12 = vpop.f32.mrb[142].mxu1 }
 0xf74   : > { %v14676_v59 = vpop.f32.mrb[143].mxu1  ;;  %10402 = vmatmul.mubr.f32.gmra.mrb[248].mxu1 %v25870_v5 }
 0xf75   : > { %v14677_v13 = vadd.f32 %v14676_v59, %v14675_v12  ;;  %10407 = vmatprep.mubr.f32.mxu1 %v25871_v60 }
 0xf77   : > { %v23077_v24 = vadd.f32 %v14677_v13, %v22997_v33  ;;  %v14678_v32 = vpop.f32.mrb[144].mxu1 }
 0xf78   : > { %v14679_v37 = vpop.f32.mrb[145].mxu1  ;;  %10409 = vmatmul.mubr.f32.gmra.mrb[250].mxu1 %v25872_v17 }
 0xf79   : > { %v14680_v25 = vadd.f32 %v14679_v37, %v14678_v32  ;;  %10414 = vmatprep.mubr.f32.mxu1 %v25873_v47 }
 0xf7b   : > { %v23082_v57 = vadd.f32 %v14680_v25, %v23002_v38  ;;  %v14681_v3 = vpop.f32.mrb[146].mxu1 }
 0xf7c   : > { %v14682_v19 = vpop.f32.mrb[147].mxu1  ;;  %10416 = vmatmul.mubr.f32.gmra.mrb[252].mxu1 %v25874_v16 }
 0xf7d   : > { %v14683_v5 = vadd.f32 %v14682_v19, %v14681_v3  ;;  %10421 = vmatprep.mubr.f32.mxu1 %v25875_v62 }
 0xf7f   : > { %v23087_v60 = vadd.f32 %v14683_v5, %v23007_v4  ;;  %v14684_v33 = vpop.f32.mrb[148].mxu1 }
 0xf80   : > { %v14685_v1 = vpop.f32.mrb[149].mxu1  ;;  %10423 = vmatmul.mubr.f32.gmra.mrb[254].mxu1 %v25876_v7 }
 0xf81   : > { %v14686_v17 = vadd.f32 %v14685_v1, %v14684_v33  ;;  %10428 = vmatprep.mubr.f32.mxu1 %v25877_v28 }
 0xf83   : > { %v23092_v47 = vadd.f32 %v14686_v17, %v23012_v52  ;;  %v14687_v38 = vpop.f32.mrb[150].mxu1 }
 0xf84   : > { %v14688_v43 = vpop.f32.mrb[151].mxu1  ;;  %10430 = vmatmul.mubr.f32.gmra.mrb[0].mxu1 %v25878_v29 }
 0xf85   : > { %v14689_v16 = vadd.f32 %v14688_v43, %v14687_v38 }
 0xf87   : > { %v23096_v62 = vadd.f32 %v14689_v16, %v23017_v30  ;;  %v14690_v4 = vpop.f32.mrb[152].mxu1 }
 0xf88   : > { %v14691_v40 = vpop.f32.mrb[153].mxu1 }
 0xf89   : > { %v14692_v56 = vadd.f32 %v14691_v40, %v14690_v4 }
 0xf8b   : > { %v23099_v44 = vadd.f32 %v14692_v56, %v23022_v20  ;;  %v14693_v7 = vpop.f32.mrb[154].mxu1 }
 0xf8c   : > { %v14694_v9 = vpop.f32.mrb[155].mxu1 }
 0xf8d   : > { %v14695_v28 = vadd.f32 %v14694_v9, %v14693_v7 }
 0xf8f   : > { %v23102_v52 = vadd.f32 %v14695_v28, %v23027_v39  ;;  %v14696_v27 = vpop.f32.mrb[156].mxu1 }
 0xf90   : > { %v14697_v34 = vpop.f32.mrb[157].mxu1 }
 0xf91   : > { %v14698_v15 = vadd.f32 %v14697_v34, %v14696_v27 }
 0xf93   : > { %v23105_v29 = vadd.f32 %v14698_v15, %v23032_v53  ;;  %v14699_v30 = vpop.f32.mrb[158].mxu1 }
 0xf94   : > { %v14700_v26 = vpop.f32.mrb[159].mxu1 }
 0xf95   : > { %v14701_v14 = vadd.f32 %v14700_v26, %v14699_v30 }
 0xf97   : > { %v23108_v21 = vadd.f32 %v14701_v14, %v23037_v55  ;;  %v14702_v20 = vpop.f32.mrb[160].mxu1 }
 0xf98   : > { %v14703_v0 = vpop.f32.mrb[161].mxu1 }
 0xf99   : > { %v14704_v23 = vadd.f32 %v14703_v0, %v14702_v20 }
 0xf9b   : > { %v23111_v50 = vadd.f32 %v14704_v23, %v23042_v46  ;;  %v14737_v39 = vpop.f32.mrb[162].mxu1 }
 0xf9c   : > { %v14738_v22 = vpop.f32.mrb[163].mxu1 }
 0xf9d   : > { %v14739_v45 = vadd.f32 %v14738_v22, %v14737_v39 }
 0xf9f   : > { %v23114_v49 = vadd.f32 %v14739_v45, %v23047_v18  ;;  %v14740_v53 = vpop.f32.mrb[164].mxu1 }
 0xfa0   : > { %v14741_v2 = vpop.f32.mrb[165].mxu1 }
 0xfa1   : > { %v14742_v10 = vadd.f32 %v14741_v2, %v14740_v53 }
 0xfa3   : > { %v23117_v11 = vadd.f32 %v14742_v10, %v23052_v42  ;;  %v14743_v55 = vpop.f32.mrb[166].mxu1 }
 0xfa4   : > { %v14744_v8 = vpop.f32.mrb[167].mxu1 }
 0xfa5   : > { %v14745_v35 = vadd.f32 %v14744_v8, %v14743_v55 }
 0xfa7   : > { %v23120_v31 = vadd.f32 %v14745_v35, %v23057_v48  ;;  %v14746_v46 = vpop.f32.mrb[168].mxu1 }
 0xfa8   : > { %v14747_v61 = vpop.f32.mrb[169].mxu1 }
 0xfa9   : > { %v14748_v54 = vadd.f32 %v14747_v61, %v14746_v46 }
 0xfab   : > { %v23123_v58 = vadd.f32 %v14748_v54, %v23062_v6  ;;  %v14749_v18 = vpop.f32.mrb[170].mxu1 }
 0xfac   : > { %v14750_v63 = vpop.f32.mrb[171].mxu1 }
 0xfad   : > { %v14751_v36 = vadd.f32 %v14750_v63, %v14749_v18 }
 0xfaf   : > { %v23126_v12 = vadd.f32 %v14751_v36, %v23067_v51  ;;  %v14752_v42 = vpop.f32.mrb[172].mxu1 }
 0xfb0   : > { %v14753_v59 = vpop.f32.mrb[173].mxu1 }
 0xfb1   : > { %v14754_v13 = vadd.f32 %v14753_v59, %v14752_v42 }
 0xfb3   : > { %v23129_v32 = vadd.f32 %v14754_v13, %v23072_v41  ;;  %v14755_v48 = vpop.f32.mrb[174].mxu1 }
 0xfb4   : > { %v14756_v37 = vpop.f32.mrb[175].mxu1 }
 0xfb5   : > { %v14757_v25 = vadd.f32 %v14756_v37, %v14755_v48 }
 0xfb7   : > { %v23132_v3 = vadd.f32 %v14757_v25, %v23077_v24  ;;  %v14758_v6 = vpop.f32.mrb[176].mxu1 }
 0xfb8   : > { %v14759_v19 = vpop.f32.mrb[177].mxu1 }
 0xfb9   : > { %v14760_v5 = vadd.f32 %v14759_v19, %v14758_v6 }
 0xfbb   : > { %v23135_v33 = vadd.f32 %v14760_v5, %v23082_v57  ;;  %v14761_v51 = vpop.f32.mrb[178].mxu1 }
 0xfbc   : > { %v14762_v1 = vpop.f32.mrb[179].mxu1 }
 0xfbd   : > { %v14763_v17 = vadd.f32 %v14762_v1, %v14761_v51 }
 0xfbf   : > { %v23138_v38 = vadd.f32 %v14763_v17, %v23087_v60  ;;  %v14764_v41 = vpop.f32.mrb[180].mxu1 }
 0xfc0   : > { %v14765_v43 = vpop.f32.mrb[181].mxu1 }
 0xfc1   : > { %v14766_v16 = vadd.f32 %v14765_v43, %v14764_v41 }
 0xfc3   : > { %v23141_v4 = vadd.f32 %v14766_v16, %v23092_v47  ;;  %v14767_v24 = vpop.f32.mrb[182].mxu1 }
 0xfc4   : > { %v14768_v40 = vpop.f32.mrb[183].mxu1 }
 0xfc5   : > { %v14769_v56 = vadd.f32 %v14768_v40, %v14767_v24 }
 0xfc7   : > { %v23144_v7 = vadd.f32 %v14769_v56, %v23096_v62  ;;  %v14770_v57 = vpop.f32.mrb[184].mxu1 }
 0xfc8   : > { %v14771_v9 = vpop.f32.mrb[185].mxu1 }
 0xfc9   : > { %v14772_v28 = vadd.f32 %v14771_v9, %v14770_v57 }
 0xfcb   : > { %v23147_v27 = vadd.f32 %v14772_v28, %v23099_v44  ;;  %v14773_v60 = vpop.f32.mrb[186].mxu1 }
 0xfcc   : > { %v14774_v34 = vpop.f32.mrb[187].mxu1 }
 0xfcd   : > { %v14775_v15 = vadd.f32 %v14774_v34, %v14773_v60 }
 0xfcf   : > { %v23150_v30 = vadd.f32 %v14775_v15, %v23102_v52  ;;  %v14776_v47 = vpop.f32.mrb[188].mxu1 }
 0xfd0   : > { %v14777_v26 = vpop.f32.mrb[189].mxu1 }
 0xfd1   : > { %v14778_v14 = vadd.f32 %v14777_v26, %v14776_v47 }
 0xfd3   : > { %v23153_v20 = vadd.f32 %v14778_v14, %v23105_v29  ;;  %v14779_v62 = vpop.f32.mrb[190].mxu1 }
 0xfd4   : > { %v14780_v0 = vpop.f32.mrb[191].mxu1 }
 0xfd5   : > { %v14781_v23 = vadd.f32 %v14780_v0, %v14779_v62 }
 0xfd7   : > { %v23156_v39 = vadd.f32 %v14781_v23, %v23108_v21  ;;  %v14782_v44 = vpop.f32.mrb[192].mxu1 }
 0xfd8   : > { %v14783_v22 = vpop.f32.mrb[193].mxu1 }
 0xfd9   : > { %v14784_v45 = vadd.f32 %v14783_v22, %v14782_v44 }
 0xfdb   : > { %v23159_v53 = vadd.f32 %v14784_v45, %v23111_v50  ;;  %v14817_v52 = vpop.f32.mrb[194].mxu1 }
 0xfdc   : > { %v14818_v2 = vpop.f32.mrb[195].mxu1 }
 0xfdd   : > { %v14819_v10 = vadd.f32 %v14818_v2, %v14817_v52 }
 0xfdf   : > { %v23162_v55 = vadd.f32 %v14819_v10, %v23114_v49  ;;  %v14820_v29 = vpop.f32.mrb[196].mxu1 }
 0xfe0   : > { %v14821_v8 = vpop.f32.mrb[197].mxu1 }
 0xfe1   : > { %v14822_v35 = vadd.f32 %v14821_v8, %v14820_v29 }
 0xfe3   : > { %v23165_v46 = vadd.f32 %v14822_v35, %v23117_v11  ;;  %v14823_v21 = vpop.f32.mrb[198].mxu1 }
 0xfe4   : > { %v14824_v61 = vpop.f32.mrb[199].mxu1 }
 0xfe5   : > { %v14825_v54 = vadd.f32 %v14824_v61, %v14823_v21 }
 0xfe7   : > { %v23168_v18 = vadd.f32 %v14825_v54, %v23120_v31  ;;  %v14826_v50 = vpop.f32.mrb[200].mxu1 }
 0xfe8   : > { %v14827_v63 = vpop.f32.mrb[201].mxu1 }
 0xfe9   : > { %v14828_v36 = vadd.f32 %v14827_v63, %v14826_v50 }
 0xfeb   : > { %v23171_v42 = vadd.f32 %v14828_v36, %v23123_v58  ;;  %v14829_v49 = vpop.f32.mrb[202].mxu1 }
 0xfec   : > { %v14830_v59 = vpop.f32.mrb[203].mxu1 }
 0xfed   : > { %v14831_v13 = vadd.f32 %v14830_v59, %v14829_v49 }
 0xfef   : > { %v23174_v48 = vadd.f32 %v14831_v13, %v23126_v12  ;;  %v14832_v11 = vpop.f32.mrb[204].mxu1 }
 0xff0   : > { %v14833_v37 = vpop.f32.mrb[205].mxu1 }
 0xff1   : > { %v14834_v25 = vadd.f32 %v14833_v37, %v14832_v11 }
 0xff3   : > { %v23177_v6 = vadd.f32 %v14834_v25, %v23129_v32  ;;  %v14835_v31 = vpop.f32.mrb[206].mxu1 }
 0xff4   : > { %v14836_v19 = vpop.f32.mrb[207].mxu1 }
 0xff5   : > { %v14837_v5 = vadd.f32 %v14836_v19, %v14835_v31 }
 0xff7   : > { %v23180_v51 = vadd.f32 %v14837_v5, %v23132_v3  ;;  %v14838_v58 = vpop.f32.mrb[208].mxu1 }
 0xff8   : > { %v14839_v1 = vpop.f32.mrb[209].mxu1 }
 0xff9   : > { %v14840_v17 = vadd.f32 %v14839_v1, %v14838_v58 }
 0xffb   : > { %v23183_v41 = vadd.f32 %v14840_v17, %v23135_v33  ;;  %v14841_v12 = vpop.f32.mrb[210].mxu1 }
 0xffc   : > { %v14842_v43 = vpop.f32.mrb[211].mxu1 }
 0xffd   : > { %v14843_v16 = vadd.f32 %v14842_v43, %v14841_v12 }
 0xfff   : > { %v23186_v24 = vadd.f32 %v14843_v16, %v23138_v38  ;;  %v14844_v32 = vpop.f32.mrb[212].mxu1 }
0x1000   : > { %v14845_v40 = vpop.f32.mrb[213].mxu1 }
0x1001   : > { %v14846_v56 = vadd.f32 %v14845_v40, %v14844_v32 }
0x1003   : > { %v23189_v57 = vadd.f32 %v14846_v56, %v23141_v4  ;;  %v14847_v3 = vpop.f32.mrb[214].mxu1 }
0x1004   : > { %v14848_v9 = vpop.f32.mrb[215].mxu1 }
0x1005   : > { %v14849_v28 = vadd.f32 %v14848_v9, %v14847_v3 }
0x1007   : > { %v23192_v60 = vadd.f32 %v14849_v28, %v23144_v7  ;;  %v14850_v33 = vpop.f32.mrb[216].mxu1 }
0x1008   : > { %v14851_v34 = vpop.f32.mrb[217].mxu1 }
0x1009   : > { %v14852_v15 = vadd.f32 %v14851_v34, %v14850_v33 }
0x100b   : > { %v23195_v47 = vadd.f32 %v14852_v15, %v23147_v27  ;;  %v14853_v38 = vpop.f32.mrb[218].mxu1 }
0x100c   : > { %v14854_v26 = vpop.f32.mrb[219].mxu1 }
0x100d   : > { %v14855_v14 = vadd.f32 %v14854_v26, %v14853_v38 }
0x100f   : > { %v23198_v62 = vadd.f32 %v14855_v14, %v23150_v30  ;;  %v14856_v4 = vpop.f32.mrb[220].mxu1 }
0x1010   : > { %v14857_v0 = vpop.f32.mrb[221].mxu1 }
0x1011   : > { %v14858_v23 = vadd.f32 %v14857_v0, %v14856_v4 }
0x1013   : > { %v23201_v44 = vadd.f32 %v14858_v23, %v23153_v20  ;;  %v14859_v7 = vpop.f32.mrb[222].mxu1 }
0x1014   : > { %v14860_v22 = vpop.f32.mrb[223].mxu1 }
0x1015   : > { %v14861_v45 = vadd.f32 %v14860_v22, %v14859_v7 }
0x1017   : > { %v23204_v52 = vadd.f32 %v14861_v45, %v23156_v39  ;;  %v14862_v27 = vpop.f32.mrb[224].mxu1 }
0x1018   : > { %v14863_v2 = vpop.f32.mrb[225].mxu1 }
0x1019   : > { %v14864_v10 = vadd.f32 %v14863_v2, %v14862_v27 }
0x101b   : > { %v23207_v29 = vadd.f32 %v14864_v10, %v23159_v53  ;;  %v14897_v30 = vpop.f32.mrb[226].mxu1 }
0x101c   : > { %v14898_v8 = vpop.f32.mrb[227].mxu1 }
0x101d   : > { %v14899_v35 = vadd.f32 %v14898_v8, %v14897_v30 }
0x101f   : > { %v10327_v21 = vadd.f32 %v14899_v35, %v23162_v55  ;;  %v14900_v61 = vpop.f32.mrb[228].mxu1 }
0x1020   : > { %v14901_v20 = vpop.f32.mrb[229].mxu1 }
0x1021   : > { %v10435_v54 = vmax.f32 %v10327_v21, 1e-30  ;;  %v14902_v50 = vadd.f32 %v14901_v20, %v14900_v61  ;;  %v25879_v61 = vld [vmem:[#allocation47_spill] sm:$0xff] }
0x1023   : > { %17520 = vrcp.f32 %v10435_v54  ;;  %v10334_v63 = vadd.f32 %v14902_v50, %v23165_v46  ;;  %v14903_v39 = vpop.f32.mrb[230].mxu1 }
0x1024   : > { %v14904_v36 = vpop.f32.mrb[231].mxu1 }
0x1025   : > { %v10436_v49 = vmax.f32 %v10334_v63, 1e-30  ;;  %v14905_v59 = vadd.f32 %v14904_v36, %v14903_v39  ;;  %v25880_v39 = vld [vmem:[#allocation49_spill] sm:$0xff] }
0x1027   : > { %17522 = vrcp.f32 %v10436_v49  ;;  %v10341_v53 = vadd.f32 %v14905_v59, %v23168_v18  ;;  %v14906_v13 = vpop.f32.mrb[232].mxu1 }
0x1028   : > { %v14907_v11 = vpop.f32.mrb[233].mxu1 }
0x1029   : > { %v10437_v37 = vmax.f32 %v10341_v53, 1e-30  ;;  %v14908_v25 = vadd.f32 %v14907_v11, %v14906_v13 }
0x102b   : > { %17524 = vrcp.f32 %v10437_v37  ;;  %v10348_v55 = vadd.f32 %v14908_v25, %v23171_v42  ;;  %v14909_v31 = vpop.f32.mrb[234].mxu1 }
0x102c   : > { %v14910_v19 = vpop.f32.mrb[235].mxu1 }
0x102d   : > { %v17521_v5 = vpop.eup %17520  ;;  %v10438_v58 = vmax.f32 %v10348_v55, 1e-30  ;;  %v14911_v1 = vadd.f32 %v14910_v19, %v14909_v31 }
0x102e   : > { %v10484_v46 = vsel %vm4676_vm5, %v17521_v5, 0 }
0x102f   : > { %17526 = vrcp.f32 %v10438_v58  ;;  %v10355_v17 = vadd.f32 %v14911_v1, %v23174_v48  ;;  %v14912_v12 = vpop.f32.mrb[236].mxu1  ;;  %v23215_v43 = vand.u32 4294901760, %v10484_v46 }
0x1030   : > { %v14913_v18 = vpop.f32.mrb[237].mxu1 }
0x1031   : > { %v17523_v16 = vpop.eup %17522  ;;  %v10439_v32 = vmax.f32 %v10355_v17, 1e-30  ;;  %v14914_v40 = vadd.f32 %v14913_v18, %v14912_v12  ;;  %v23218_v56 = vsub.f32 %v10484_v46, %v23215_v43 }
0x1032   : > { %v10487_v42 = vsel %vm4676_vm5, %v17523_v16, 0 }
0x1033   : > { %17528 = vrcp.f32 %v10439_v32  ;;  %v10362_v3 = vadd.f32 %v14914_v40, %v23177_v6  ;;  %v14915_v9 = vpop.f32.mrb[238].mxu1  ;;  %v23223_v28 = vand.u32 4294901760, %v23218_v56  ;;  %v23225_v48 = vand.u32 4294901760, %v10487_v42  ;;  %v25881_v40 = vld [vmem:[#allocation50_spill] sm:$0xff] }
0x1034   : > { %v14916_v33 = vpop.f32.mrb[239].mxu1 }
0x1035   : > { %v17525_v34 = vpop.eup %17524  ;;  %v10440_v15 = vmax.f32 %v10362_v3, 1e-30  ;;  %v14917_v38 = vadd.f32 %v14916_v33, %v14915_v9  ;;  %v10631_v26 = vsub.f32 %v23218_v56, %v23223_v28  ;;  %v23230_v14 = vsub.f32 %v10487_v42, %v23225_v48 }
0x1036   : > { %v10490_v4 = vsel %vm4676_vm5, %v17525_v34, 0 }
0x1037   : > { %17530 = vrcp.f32 %v10440_v15  ;;  %v10369_v6 = vadd.f32 %v14917_v38, %v23180_v51  ;;  %v14918_v0 = vpop.f32.mrb[240].mxu1  ;;  %v10632_v23 = vand.u32 4294901760, %v10631_v26  ;;  %v23235_v7 = vand.u32 4294901760, %v23230_v14  ;;  %v25882_v38 = vld [vmem:[#allocation58_spill] sm:$0xff] }
0x1038   : > { %v14919_v22 = vpop.f32.mrb[241].mxu1  ;;  %v23237_v45 = vand.u32 4294901760, %v10490_v4 }
0x1039   : > { %v17527_v27 = vpop.eup %17526  ;;  %v10441_v2 = vmax.f32 %v10369_v6, 1e-30  ;;  %v14920_v10 = vadd.f32 %v14919_v22, %v14918_v0  ;;  %14977 = vmatprep.mubr.f32.mxu0 %v10632_v23  ;;  %v10642_v30 = vsub.f32 %v23230_v14, %v23235_v7 }
0x103a   : > { %14978 = vmatmul.mubr.f32.vlgmr.msra.gmra.mrb[228].mxu0 %v10632_v23  ;;  %v23242_v8 = vsub.f32 %v10490_v4, %v23237_v45  ;;  %v10493_v51 = vsel %vm4676_vm5, %v17527_v27, 0 }
0x103b   : > { %17532 = vrcp.f32 %v10441_v2  ;;  %v10376_v35 = vadd.f32 %v14920_v10, %v23183_v41  ;;  %v14921_v21 = vpop.f32.mrb[242].mxu1  ;;  %16222 = vmatpush3.bf16.xpose.msra.mxu0 %v25879_v61  ;;  %v10643_v20 = vand.u32 4294901760, %v10642_v30  ;;  %v23247_v54 = vand.u32 4294901760, %v10493_v51 }
0x103c   : > { %v14922_v50 = vpop.f32.mrb[243].mxu1  ;;  %v23250_v63 = vand.u32 4294901760, %v23242_v8  ;;  %16224 = vmatprep.subr.bf16.mxu0 %v25880_v39  ;;  %v25883_v39 = vld [vmem:[#allocation60_spill] sm:$0xff] }
0x103d   : > { %v17529_v36 = vpop.eup %17528  ;;  %v10442_v49 = vmax.f32 %v10376_v35, 1e-30  ;;  %v14923_v59 = vadd.f32 %v14922_v50, %v14921_v21  ;;  %14979 = vmatprep.mubr.f32.mxu0 %v10643_v20  ;;  %v23254_v53 = vsub.f32 %v10493_v51, %v23247_v54 }
0x103e   : > { %14980 = vmatmul.mubr.f32.gmra.mrb[230].mxu0 %v10643_v20  ;;  %v10653_v41 = vsub.f32 %v23242_v8, %v23250_v63  ;;  %v10496_v13 = vsel %vm4676_vm5, %v17529_v36, 0 }
0x103f   : > { %17534 = vrcp.f32 %v10442_v49  ;;  %v10383_v11 = vadd.f32 %v14923_v59, %v23186_v24  ;;  %v14924_v37 = vpop.f32.mrb[244].mxu1  ;;  %v23261_v25 = vand.u32 4294901760, %v23254_v53  ;;  %v23263_v55 = vand.u32 4294901760, %v10496_v13 }
0x1040   : > { %v14925_v31 = vpop.f32.mrb[245].mxu1  ;;  %v10654_v19 = vand.u32 4294901760, %v10653_v41 }
0x1041   : > { %v17531_v5 = vpop.eup %17530  ;;  %v10443_v58 = vmax.f32 %v10383_v11, 1e-30  ;;  %v14926_v1 = vadd.f32 %v14925_v31, %v14924_v37  ;;  %v10664_v46 = vsub.f32 %v23254_v53, %v23261_v25  ;;  %v23268_v17 = vsub.f32 %v10496_v13, %v23263_v55  ;;  %v25884_v37 = vld [vmem:[#allocation108_spill] sm:$0xff] }
0x1042   : > { %14981 = vmatprep.mubr.f32.mxu0 %v10654_v19  ;;  %v10499_v24 = vsel %vm4676_vm5, %v17531_v5, 0 }
0x1043   : > { %17536 = vrcp.f32 %v10443_v58  ;;  %v10390_v12 = vadd.f32 %v14926_v1, %v23189_v57  ;;  %14982 = vmatmul.mubr.f32.gmra.mrb[232].mxu0 %v10654_v19  ;;  %v14927_v18 = vpop.f32.mrb[246].mxu1  ;;  %v10665_v16 = vand.u32 4294901760, %v10664_v46  ;;  %v23273_v32 = vand.u32 4294901760, %v23268_v17 }
0x1044   : > { %16226 = vmatpush3.bf16.xpose.msra.mxu0 %v25881_v40  ;;  %v14928_v42 = vpop.f32.mrb[247].mxu1  ;;  %v23276_v3 = vand.u32 4294901760, %v10499_v24 }
0x1045   : > { %v17533_v9 = vpop.eup %17532  ;;  %v10444_v33 = vmax.f32 %v10390_v12, 1e-30  ;;  %v14929_v34 = vadd.f32 %v14928_v42, %v14927_v18  ;;  %14983 = vmatprep.mubr.f32.mxu0 %v10665_v16  ;;  %v10675_v15 = vsub.f32 %v23268_v17, %v23273_v32  ;;  %16228 = vmatprep.subr.bf16.mxu0 %v25882_v38  ;;  %v25885_v38 = vld [vmem:[#allocation118_spill] sm:$0xff] }
0x1046   : > { %v23282_v57 = vsub.f32 %v10499_v24, %v23276_v3  ;;  %v10502_v26 = vsel %vm4676_vm5, %v17533_v9, 0 }
0x1047   : > { %17538 = vrcp.f32 %v10444_v33  ;;  %v10397_v4 = vadd.f32 %v14929_v34, %v23192_v60  ;;  %14984 = vmatmul.mubr.f32.gmra.mrb[234].mxu0 %v10665_v16  ;;  %v14930_v6 = vpop.f32.mrb[248].mxu1  ;;  %v10676_v0 = vand.u32 4294901760, %v10675_v15  ;;  %v23286_v23 = vand.u32 4294901760, %v10502_v26 }
0x1048   : > { %v14931_v22 = vpop.f32.mrb[249].mxu1  ;;  %v23289_v27 = vand.u32 4294901760, %v23282_v57 }
0x1049   : > { %v17535_v2 = vpop.eup %17534  ;;  %v10445_v10 = vmax.f32 %v10397_v4, 1e-30  ;;  %v14932_v30 = vadd.f32 %v14931_v22, %v14930_v6  ;;  %14985 = vmatprep.mubr.f32.mxu0 %v10676_v0  ;;  %v23292_v51 = vsub.f32 %v10502_v26, %v23286_v23 }
0x104a   : > { %v10686_v35 = vsub.f32 %v23282_v57, %v23289_v27  ;;  %v10505_v60 = vsel %vm4676_vm5, %v17535_v2, 0  ;;  %v25886_v2 = vld [vmem:[#allocation122_spill] sm:$0xff] }
0x104b   : > { %17540 = vrcp.f32 %v10445_v10  ;;  %v10404_v21 = vadd.f32 %v14932_v30, %v23195_v47  ;;  %14986 = vmatmul.mubr.f32.gmra.mrb[236].mxu0 %v10676_v0  ;;  %v14933_v61 = vpop.f32.mrb[250].mxu1  ;;  %v23299_v20 = vand.u32 4294901760, %v23292_v51  ;;  %v23301_v50 = vand.u32 4294901760, %v10505_v60 }
0x104c   : > { %16230 = vmatpush3.bf16.xpose.msra.mxu0 %v25883_v39  ;;  %v14934_v36 = vpop.f32.mrb[251].mxu1  ;;  %v10687_v49 = vand.u32 4294901760, %v10686_v35 }
0x104d   : > { %v17537_v59 = vpop.eup %17536  ;;  %v10446_v41 = vmax.f32 %v10404_v21, 1e-30  ;;  %v14935_v13 = vadd.f32 %v14934_v36, %v14933_v61  ;;  %v10697_v11 = vsub.f32 %v23292_v51, %v23299_v20  ;;  %16232 = vmatprep.subr.bf16.mxu0 %v25884_v37  ;;  %v23308_v47 = vsub.f32 %v10505_v60, %v23301_v50 }
0x104e   : > { %14987 = vmatprep.mubr.f32.mxu0 %v10687_v49  ;;  %v10508_v31 = vsel %vm4676_vm5, %v17537_v59, 0 }
0x104f   : > { %17542 = vrcp.f32 %v10446_v41  ;;  %v10411_v19 = vadd.f32 %v14935_v13, %v23198_v62  ;;  %14988 = vmatmul.mubr.f32.gmra.mrb[238].mxu0 %v10687_v49  ;;  %v14936_v5 = vpop.f32.mrb[252].mxu1  ;;  %v10698_v58 = vand.u32 4294901760, %v10697_v11  ;;  %v23313_v1 = vand.u32 4294901760, %v23308_v47 }
0x1050   : > { %v14937_v46 = vpop.f32.mrb[253].mxu1  ;;  %v23315_v24 = vand.u32 4294901760, %v10508_v31 }
0x1051   : > { %v17539_v12 = vpop.eup %17538  ;;  %v10447_v18 = vmax.f32 %v10411_v19, 1e-30  ;;  %v14938_v16 = vadd.f32 %v14937_v46, %v14936_v5  ;;  %14989 = vmatprep.mubr.f32.mxu0 %v10698_v58  ;;  %v10708_v40 = vsub.f32 %v23308_v47, %v23313_v1  ;;  %v25887_v5 = vld [vmem:[#allocation130_spill] sm:$0xff] }
0x1052   : > { %v23320_v42 = vsub.f32 %v10508_v31, %v23315_v24  ;;  %v10511_v62 = vsel %vm4676_vm5, %v17539_v12, 0 }
0x1053   : > { %17544 = vrcp.f32 %v10447_v18  ;;  %v10418_v9 = vadd.f32 %v14938_v16, %v23201_v44  ;;  %14990 = vmatmul.mubr.f32.gmra.mrb[240].mxu0 %v10698_v58  ;;  %v14939_v33 = vpop.f32.mrb[254].mxu1  ;;  %v10709_v34 = vand.u32 4294901760, %v10708_v40  ;;  %v23324_v15 = vand.u32 4294901760, %v10511_v62  ;;  %v25888_v16 = vld [vmem:[#allocation133_spill] sm:$0xff] }
0x1054   : > { %16234 = vmatpush3.bf16.xpose.msra.mxu0 %v25885_v38  ;;  %v14940_v26 = vpop.f32.mrb[255].mxu1  ;;  %v23328_v4 = vand.u32 4294901760, %v23320_v42 }
0x1055   : > { %v17541_v6 = vpop.eup %17540  ;;  %v10448_v0 = vmax.f32 %v10418_v9, 1e-30  ;;  %v14941_v22 = vadd.f32 %v14940_v26, %v14939_v33  ;;  %14991 = vmatprep.mubr.f32.mxu0 %v10709_v34  ;;  %16236 = vmatprep.subr.bf16.mxu0 %v25886_v2  ;;  %v23332_v10 = vsub.f32 %v10511_v62, %v23324_v15  ;;  %v25889_v2 = vld [vmem:[#allocation147_spill] sm:$0xff] }
0x1056   : > { %v10719_v44 = vsub.f32 %v23320_v42, %v23328_v4  ;;  %v10514_v30 = vsel %vm4676_vm5, %v17541_v6, 0 }
0x1057   : > { %17546 = vrcp.f32 %v10448_v0  ;;  %v10425_v35 = vadd.f32 %v14941_v22, %v23204_v52  ;;  %14992 = vmatmul.mubr.f32.gmra.mrb[242].mxu0 %v10709_v34  ;;  %v14942_v60 = vpop.f32.mrb[0].mxu1  ;;  %v23339_v21 = vand.u32 4294901760, %v23332_v10  ;;  %v23341_v61 = vand.u32 4294901760, %v10514_v30 }
0x1058   : > { %v14943_v39 = vpop.f32.mrb[1].mxu1  ;;  %v10720_v36 = vand.u32 4294901760, %v10719_v44 }
0x1059   : > { %v17543_v49 = vpop.eup %17542  ;;  %v10449_v59 = vmax.f32 %v10425_v35, 1e-30  ;;  %v14944_v41 = vadd.f32 %v14943_v39, %v14942_v60  ;;  %v10730_v13 = vsub.f32 %v23332_v10, %v23339_v21  ;;  %v23346_v11 = vsub.f32 %v10514_v30, %v23341_v61  ;;  %v25890_v60 = vld [vmem:[#allocation152_spill] sm:$0xff] }
0x105a   : > { %14993 = vmatprep.mubr.f32.mxu0 %v10720_v36  ;;  %v10517_v52 = vsel %vm4676_vm5, %v17543_v49, 0 }
0x105b   : > { %17548 = vrcp.f32 %v10449_v59  ;;  %v10432_v37 = vadd.f32 %v14944_v41, %v23207_v29  ;;  %14994 = vmatmul.mubr.f32.gmra.mrb[244].mxu0 %v10720_v36  ;;  %v10731_v31 = vand.u32 4294901760, %v10730_v13  ;;  %v23351_v19 = vand.u32 4294901760, %v23346_v11 }
0x105c   : > { %16238 = vmatpush3.bf16.xpose.msra.mxu0 %v25887_v5  ;;  %v23354_v58 = vand.u32 4294901760, %v10517_v52 }
0x105d   : > { %v17545_v46 = vpop.eup %17544  ;;  %v10450_v12 = vmax.f32 %v10432_v37, 1e-30  ;;  %14995 = vmatprep.mubr.f32.mxu0 %v10731_v31  ;;  %v10741_v18 = vsub.f32 %v23346_v11, %v23351_v19  ;;  %16240 = vmatprep.subr.bf16.mxu0 %v25888_v16 }
0x105e   : > { %v23360_v40 = vsub.f32 %v10517_v52, %v23354_v58  ;;  %v10520_v29 = vsel %vm4676_vm5, %v17545_v46, 0 }
0x105f   : > { %17550 = vrcp.f32 %v10450_v12  ;;  %14996 = vmatmul.mubr.f32.gmra.mrb[246].mxu0 %v10731_v31  ;;  %v10742_v62 = vand.u32 4294901760, %v10741_v18  ;;  %v23363_v9 = vand.u32 4294901760, %v10520_v29  ;;  %v25891_v18 = vld [vmem:[#allocation163_spill] sm:$0xff] }
0x1060   : > { %v23366_v33 = vand.u32 4294901760, %v23360_v40 }
0x1061   : > { %v17547_v34 = vpop.eup %17546  ;;  %14997 = vmatprep.mubr.f32.mxu0 %v10742_v62  ;;  %v23369_v38 = vsub.f32 %v10520_v29, %v23363_v9  ;;  %v25892_v29 = vld [vmem:[#allocation164_spill] sm:$0xff] }
0x1062   : > { %v10752_v26 = vsub.f32 %v23360_v40, %v23366_v33  ;;  %v10523_v6 = vsel %vm4676_vm5, %v17547_v34, 0 }
0x1063   : > { %14998 = vmatmul.mubr.f32.gmra.mrb[248].mxu0 %v10742_v62  ;;  %v23375_v0 = vand.u32 4294901760, %v23369_v38  ;;  %v23377_v22 = vand.u32 4294901760, %v10523_v6 }
0x1064   : > { %16242 = vmatpush3.bf16.xpose.msra.mxu0 %v25889_v2  ;;  %v10753_v44 = vand.u32 4294901760, %v10752_v26 }
0x1065   : > { %v17549_v30 = vpop.eup %17548  ;;  %v10763_v35 = vsub.f32 %v23369_v38, %v23375_v0  ;;  %16244 = vmatprep.subr.bf16.mxu0 %v25890_v60  ;;  %v23384_v39 = vsub.f32 %v10523_v6, %v23377_v22  ;;  %v25896_v60 = vld [vmem:[#allocation72_spill] sm:$0xff] }
0x1066   : > { %14999 = vmatprep.mubr.f32.mxu0 %v10753_v44  ;;  %v10526_v36 = vsel %vm4676_vm5, %v17549_v30, 0  ;;  %v25894_v30 = vld [vmem:[#allocation67_spill] sm:$0xff] }
0x1067   : > { %15000 = vmatmul.mubr.f32.gmra.mrb[250].mxu0 %v10753_v44  ;;  %v10764_v49 = vand.u32 4294901760, %v10763_v35  ;;  %v23388_v59 = vand.u32 4294901760, %v23384_v39  ;;  %v23390_v41 = vand.u32 4294901760, %v10526_v36  ;;  %v25893_v44 = vld [vmem:[#allocation166_spill] sm:$0xff]  ;;  %v25895_v35 = vld [vmem:[#allocation167_spill] sm:$0xff] }
0x1069   : > { %v17551_v13 = vpop.eup %17550  ;;  %15001 = vmatprep.mubr.f32.mxu0 %v10764_v49  ;;  %v10774_v52 = vsub.f32 %v23384_v39, %v23388_v59  ;;  %v23395_v37 = vsub.f32 %v10526_v36, %v23390_v41  ;;  %v25897_v36 = vld [vmem:[#allocation73_spill] sm:$0xff] }
0x106a   : > { %v10529_v31 = vsel %vm4676_vm5, %v17551_v13, 0  ;;  %v25899_v13 = vld [vmem:[#allocation42_spill] sm:$0xff] }
0x106b   : > { %15002 = vmatmul.mubr.f32.gmra.mrb[252].mxu0 %v10764_v49  ;;  %v10775_v5 = vand.u32 4294901760, %v10774_v52  ;;  %v23399_v46 = vand.u32 4294901760, %v23395_v37  ;;  %v23401_v12 = vand.u32 4294901760, %v10529_v31  ;;  %v25898_v49 = vld [vmem:[#allocation41_spill] sm:$0xff]  ;;  %v25900_v52 = vld [vmem:[#allocation168_spill] sm:$0xff] }
0x106c   : > { %16246 = vmatpush3.bf16.xpose.msra.mxu0 %v25891_v18  ;;  %v25903_v18 = vld [vmem:[#allocation171_spill] sm:$0xff] }
0x106d   : > { %15003 = vmatprep.mubr.f32.mxu0 %v10775_v5  ;;  %v10785_v16 = vsub.f32 %v23395_v37, %v23399_v46  ;;  %16248 = vmatprep.subr.bf16.mxu0 %v25892_v29  ;;  %v23408_v62 = vsub.f32 %v10529_v31, %v23401_v12  ;;  %v25901_v31 = vld [vmem:[#allocation169_spill] sm:$0xff] }
0x106e   : > { %v25905_v29 = vld [vmem:[#allocation173_spill] sm:$0xff] }
0x106f   : > { %15004 = vmatmul.mubr.f32.gmra.mrb[254].mxu0 %v10775_v5  ;;  %v10786_v34 = vand.u32 4294901760, %v10785_v16  ;;  %v23411_v26 = vand.u32 4294901760, %v23408_v62  ;;  %v25902_v5 = vld [vmem:[#allocation170_spill] sm:$0xff]  ;;  %v25904_v16 = vld [vmem:[#allocation172_spill] sm:$0xff] }
0x1071   : > { %15005 = vmatprep.mubr.f32.mxu0 %v10786_v34  ;;  %v10796_v6 = vsub.f32 %v23408_v62, %v23411_v26 }
0x1073   : > { %15006 = vmatmul.mubr.f32.gmra.mrb[0].mxu0 %v10786_v34  ;;  %v10797_v2 = vand.u32 4294901760, %v10796_v6  ;;  %v25906_v34 = vld [vmem:[#allocation174_spill] sm:$0xff]  ;;  %v25907_v6 = vld [vmem:[#allocation175_spill] sm:$0xff] }
0x1074   : > { %16250 = vmatpush3.bf16.xpose.msra.mxu0 %v25893_v44  ;;  %v25909_v44 = vld [vmem:[#allocation177_spill] sm:$0xff] }
0x1075   : > { %15007 = vmatprep.mubr.f32.mxu0 %v10797_v2  ;;  %16252 = vmatprep.subr.bf16.mxu0 %v25894_v30  ;;  %v25910_v30 = vld [vmem:[#allocation33_spill] sm:$0xff] }
0x1077   : > { %15008 = vmatmul.mubr.f32.gmra.mrb[2].mxu0 %v10797_v2  ;;  %v25908_v2 = vld [vmem:[#allocation176_spill] sm:$0xff] }
0x1078   : > { %15041 = vmatprep.mubr.f32.mxu0 %v23215_v43 }
0x107b   : > { %15042 = vmatmul.mubr.f32.vlgmr.msra.gmra.mrb[228].mxu0 %v23215_v43 }
0x107c   : > { %15043 = vmatprep.mubr.f32.mxu0 %v23225_v48  ;;  %16254 = vmatpush3.bf16.xpose.msra.mxu0 %v25895_v35  ;;  %v25911_v35 = vld [vmem:[#allocation124_spill] sm:$0xff] }
0x107d   : > { %16256 = vmatprep.subr.bf16.mxu0 %v25896_v60  ;;  %v25912_v60 = vld [vmem:[#allocation34_spill] sm:$0xff] }
0x107f   : > { %15044 = vmatmul.mubr.f32.gmra.mrb[230].mxu0 %v23225_v48 }
0x1080   : > { %15045 = vmatprep.mubr.f32.mxu0 %v23237_v45 }
0x1083   : > { %15046 = vmatmul.mubr.f32.gmra.mrb[232].mxu0 %v23237_v45 }
0x1084   : > { %15047 = vmatprep.mubr.f32.mxu0 %v23247_v54  ;;  %16258 = vmatpush3.bf16.xpose.msra.mxu0 %v25897_v36  ;;  %v25913_v36 = vld [vmem:[#allocation128_spill] sm:$0xff] }
0x1085   : > { %16260 = vmatprep.subr.bf16.mxu0 %v25898_v49  ;;  %v25914_v49 = vld [vmem:[#allocation36_spill] sm:$0xff] }
0x1087   : > { %15048 = vmatmul.mubr.f32.gmra.mrb[234].mxu0 %v23247_v54 }
0x1088   : > { %15049 = vmatprep.mubr.f32.mxu0 %v23263_v55 }
0x108b   : > { %15050 = vmatmul.mubr.f32.gmra.mrb[236].mxu0 %v23263_v55 }
0x108c   : > { %15051 = vmatprep.mubr.f32.mxu0 %v23276_v3  ;;  %16262 = vmatpush3.bf16.xpose.msra.mxu0 %v25899_v13 }
0x108d   : > { %16264 = vmatprep.subr.bf16.mxu0 %v25900_v52  ;;  %v25945_v52 = vld [vmem:[#allocation40_spill] sm:$0xff] }
0x108f   : > { %15052 = vmatmul.mubr.f32.gmra.mrb[238].mxu0 %v23276_v3 }
0x1090   : > { %15053 = vmatprep.mubr.f32.mxu0 %v23286_v23 }
0x1093   : > { %15054 = vmatmul.mubr.f32.gmra.mrb[240].mxu0 %v23286_v23 }
0x1094   : > { %15055 = vmatprep.mubr.f32.mxu0 %v23301_v50  ;;  %16266 = vmatpush3.bf16.xpose.msra.mxu0 %v25901_v31 }
0x1095   : > { %16268 = vmatprep.subr.bf16.mxu0 %v25902_v5 }
0x1097   : > { %15056 = vmatmul.mubr.f32.gmra.mrb[242].mxu0 %v23301_v50 }
0x1098   : > { %15057 = vmatprep.mubr.f32.mxu0 %v23315_v24 }
0x109b   : > { %15058 = vmatmul.mubr.f32.gmra.mrb[244].mxu0 %v23315_v24 }
0x109c   : > { %15059 = vmatprep.mubr.f32.mxu0 %v23324_v15  ;;  %16270 = vmatpush3.bf16.xpose.msra.mxu0 %v25903_v18 }
0x109d   : > { %16272 = vmatprep.subr.bf16.mxu0 %v25904_v16 }
0x109f   : > { %15060 = vmatmul.mubr.f32.gmra.mrb[246].mxu0 %v23324_v15 }
0x10a0   : > { %15061 = vmatprep.mubr.f32.mxu0 %v23341_v61 }
0x10a3   : > { %15062 = vmatmul.mubr.f32.gmra.mrb[248].mxu0 %v23341_v61 }
0x10a4   : > { %15063 = vmatprep.mubr.f32.mxu0 %v23354_v58  ;;  %16274 = vmatpush3.bf16.xpose.msra.mxu0 %v25905_v29 }
0x10a5   : > { %16276 = vmatprep.subr.bf16.mxu0 %v25906_v34 }
0x10a7   : > { %15064 = vmatmul.mubr.f32.gmra.mrb[250].mxu0 %v23354_v58 }
0x10a8   : > { %15065 = vmatprep.mubr.f32.mxu0 %v23363_v9 }
0x10ab   : > { %15066 = vmatmul.mubr.f32.gmra.mrb[252].mxu0 %v23363_v9 }
0x10ac   : > { %15067 = vmatprep.mubr.f32.mxu0 %v23377_v22  ;;  %16278 = vmatpush3.bf16.xpose.msra.mxu0 %v25907_v6 }
0x10ad   : > { %16280 = vmatprep.subr.bf16.mxu0 %v25908_v2 }
0x10af   : > { %15068 = vmatmul.mubr.f32.gmra.mrb[254].mxu0 %v23377_v22 }
0x10b0   : > { %15069 = vmatprep.mubr.f32.mxu0 %v23390_v41 }
0x10b3   : > { %15070 = vmatmul.mubr.f32.gmra.mrb[0].mxu0 %v23390_v41 }
0x10b4   : > { %15071 = vmatprep.mubr.f32.mxu0 %v23401_v12  ;;  %16282 = vmatpush3.bf16.xpose.msra.mxu0 %v25909_v44 }
0x10b5   : > { %16284 = vmatprep.subr.bf16.mxu0 %v25910_v30 }
0x10b7   : > { %15072 = vmatmul.mubr.f32.gmra.mrb[2].mxu0 %v23401_v12 }
0x10b8   : > { %15105 = vmatprep.mubr.f32.mxu0 %v23218_v56 }
0x10bb   : > { %15106 = vmatmul.mubr.f32.vlgmr.msra.gmra.mrb[228].mxu0 %v23218_v56  ;;  %v25915_v56 = vld [vmem:[#allocation132_spill] sm:$0xff] }
0x10bc   : > { %15107 = vmatprep.mubr.f32.mxu0 %v23230_v14  ;;  %16286 = vmatpush3.bf16.xpose.msra.mxu0 %v25911_v35 }
0x10bd   : > { %16288 = vmatprep.subr.bf16.mxu0 %v25912_v60 }
0x10bf   : > { %15108 = vmatmul.mubr.f32.gmra.mrb[230].mxu0 %v23230_v14  ;;  %v25916_v14 = vld [vmem:[#allocation39_spill] sm:$0xff] }
0x10c0   : > { %15109 = vmatprep.mubr.f32.mxu0 %v23242_v8 }
0x10c3   : > { %15110 = vmatmul.mubr.f32.gmra.mrb[232].mxu0 %v23242_v8  ;;  %v25917_v8 = vld [vmem:[#allocation136_spill] sm:$0xff] }
0x10c4   : > { %15111 = vmatprep.mubr.f32.mxu0 %v23254_v53  ;;  %16290 = vmatpush3.bf16.xpose.msra.mxu0 %v25913_v36 }
0x10c5   : > { %16292 = vmatprep.subr.bf16.mxu0 %v25914_v49 }
0x10c7   : > { %15112 = vmatmul.mubr.f32.gmra.mrb[234].mxu0 %v23254_v53  ;;  %v25918_v53 = vld [vmem:[#allocation5_spill] sm:$0xff] }
0x10c8   : > { %15113 = vmatprep.mubr.f32.mxu0 %v23268_v17 }
0x10cb   : > { %15114 = vmatmul.mubr.f32.gmra.mrb[236].mxu0 %v23268_v17  ;;  %v25919_v17 = vld [vmem:[#allocation140_spill] sm:$0xff] }
0x10cc   : > { %15115 = vmatprep.mubr.f32.mxu0 %v23282_v57  ;;  %16294 = vmatpush3.bf16.xpose.msra.mxu0 %v25915_v56 }
0x10cd   : > { %16296 = vmatprep.subr.bf16.mxu0 %v25916_v14 }
0x10cf   : > { %15116 = vmatmul.mubr.f32.gmra.mrb[238].mxu0 %v23282_v57  ;;  %v25920_v57 = vld [vmem:[#allocation145_spill] sm:$0xff] }
0x10d0   : > { %15117 = vmatprep.mubr.f32.mxu0 %v23292_v51 }
0x10d3   : > { %15118 = vmatmul.mubr.f32.gmra.mrb[240].mxu0 %v23292_v51  ;;  %v25921_v51 = vld [vmem:[#allocation4_spill] sm:$0xff] }
0x10d4   : > { %15119 = vmatprep.mubr.f32.mxu0 %v23308_v47  ;;  %16298 = vmatpush3.bf16.xpose.msra.mxu0 %v25917_v8 }
0x10d5   : > { %16300 = vmatprep.subr.bf16.mxu0 %v25918_v53 }
0x10d7   : > { %15120 = vmatmul.mubr.f32.gmra.mrb[242].mxu0 %v23308_v47  ;;  %v25922_v47 = vld [vmem:[#allocation150_spill] sm:$0xff] }
0x10d8   : > { %15121 = vmatprep.mubr.f32.mxu0 %v23320_v42 }
0x10db   : > { %15122 = vmatmul.mubr.f32.gmra.mrb[244].mxu0 %v23320_v42  ;;  %v25923_v42 = vld [vmem:[#allocation148_spill] sm:$0xff] }
0x10dc   : > { %15123 = vmatprep.mubr.f32.mxu0 %v23332_v10  ;;  %16302 = vmatpush3.bf16.xpose.msra.mxu0 %v25919_v17 }
0x10dd   : > { %16304 = vmatprep.subr.bf16.mxu0 %v25920_v57 }
0x10df   : > { %15124 = vmatmul.mubr.f32.gmra.mrb[246].mxu0 %v23332_v10  ;;  %v25924_v10 = vld [vmem:[#allocation66_spill] sm:$0xff] }
0x10e0   : > { %15125 = vmatprep.mubr.f32.mxu0 %v23346_v11 }
0x10e3   : > { %15126 = vmatmul.mubr.f32.gmra.mrb[248].mxu0 %v23346_v11  ;;  %v25925_v11 = vld [vmem:[#allocation69_spill] sm:$0xff] }
0x10e4   : > { %15127 = vmatprep.mubr.f32.mxu0 %v23360_v40  ;;  %16306 = vmatpush3.bf16.xpose.msra.mxu0 %v25921_v51 }
0x10e5   : > { %16308 = vmatprep.subr.bf16.mxu0 %v25922_v47 }
0x10e7   : > { %15128 = vmatmul.mubr.f32.gmra.mrb[250].mxu0 %v23360_v40  ;;  %v25926_v40 = vld [vmem:[#allocation43_spill] sm:$0xff] }
0x10e8   : > { %15129 = vmatprep.mubr.f32.mxu0 %v23369_v38 }
0x10eb   : > { %15130 = vmatmul.mubr.f32.gmra.mrb[252].mxu0 %v23369_v38  ;;  %v25927_v38 = vld [vmem:[#allocation46_spill] sm:$0xff] }
0x10ec   : > { %15131 = vmatprep.mubr.f32.mxu0 %v23384_v39  ;;  %16310 = vmatpush3.bf16.xpose.msra.mxu0 %v25923_v42 }
0x10ed   : > { %16312 = vmatprep.subr.bf16.mxu0 %v25924_v10 }
0x10ef   : > { %15132 = vmatmul.mubr.f32.gmra.mrb[254].mxu0 %v23384_v39  ;;  %v25928_v39 = vld [vmem:[#allocation53_spill] sm:$0xff] }
0x10f0   : > { %15133 = vmatprep.mubr.f32.mxu0 %v23395_v37 }
0x10f3   : > { %15134 = vmatmul.mubr.f32.gmra.mrb[0].mxu0 %v23395_v37  ;;  %v25929_v37 = vld [vmem:[#allocation56_spill] sm:$0xff] }
0x10f4   : > { %15135 = vmatprep.mubr.f32.mxu0 %v23408_v62  ;;  %16314 = vmatpush3.bf16.xpose.msra.mxu0 %v25925_v11 }
0x10f5   : > { %16316 = vmatprep.subr.bf16.mxu0 %v25926_v40 }
0x10f7   : > { %15136 = vmatmul.mubr.f32.gmra.mrb[2].mxu0 %v23408_v62  ;;  %v25930_v62 = vld [vmem:[#allocation61_spill] sm:$0xff] }
0x10f8   : > { %15169 = vmatprep.mubr.f32.mxu0 %v23223_v28 }
0x10fb   : > { %15170 = vmatmul.mubr.f32.vlgmr.msra.gmra.mrb[228].mxu0 %v23223_v28  ;;  %v25931_v28 = vld [vmem:[#allocation102_spill] sm:$0xff] }
0x10fc   : > { %15171 = vmatprep.mubr.f32.mxu0 %v23235_v7  ;;  %16318 = vmatpush3.bf16.xpose.msra.mxu0 %v25927_v38 }
0x10fd   : > { %16320 = vmatprep.subr.bf16.mxu0 %v25928_v39 }
0x10ff   : > { %15172 = vmatmul.mubr.f32.gmra.mrb[230].mxu0 %v23235_v7  ;;  %v25932_v7 = vld [vmem:[#allocation112_spill] sm:$0xff] }
0x1100   : > { %15173 = vmatprep.mubr.f32.mxu0 %v23250_v63 }
0x1103   : > { %15174 = vmatmul.mubr.f32.gmra.mrb[232].mxu0 %v23250_v63  ;;  %v25933_v63 = vld [vmem:[#allocation121_spill] sm:$0xff] }
0x1104   : > { %15175 = vmatprep.mubr.f32.mxu0 %v23261_v25  ;;  %16322 = vmatpush3.bf16.xpose.msra.mxu0 %v25929_v37  ;;  %v25950_v37 = vld [vmem:[#allocation144_spill] sm:$0xff] }
0x1105   : > { %16324 = vmatprep.subr.bf16.mxu0 %v25930_v62 }
0x1107   : > { %15176 = vmatmul.mubr.f32.gmra.mrb[234].mxu0 %v23261_v25  ;;  %v25934_v25 = vld [vmem:[#allocation142_spill] sm:$0xff] }
0x1108   : > { %15177 = vmatprep.mubr.f32.mxu0 %v23273_v32 }
0x110b   : > { %15178 = vmatmul.mubr.f32.gmra.mrb[236].mxu0 %v23273_v32  ;;  %v25935_v32 = vld [vmem:[#allocation153_spill] sm:$0xff] }
0x110c   : > { %15179 = vmatprep.mubr.f32.mxu0 %v23289_v27  ;;  %16326 = vmatpush3.bf16.xpose.msra.mxu0 %v25931_v28 }
0x110d   : > { %16328 = vmatprep.subr.bf16.mxu0 %v25932_v7 }
0x110f   : > { %15180 = vmatmul.mubr.f32.gmra.mrb[238].mxu0 %v23289_v27  ;;  %v25936_v27 = vld [vmem:[#allocation44_spill] sm:$0xff] }
0x1110   : > { %15181 = vmatprep.mubr.f32.mxu0 %v23299_v20 }
0x1113   : > { %15182 = vmatmul.mubr.f32.gmra.mrb[240].mxu0 %v23299_v20  ;;  %v25937_v20 = vld [vmem:[#allocation52_spill] sm:$0xff] }
0x1114   : > { %15183 = vmatprep.mubr.f32.mxu0 %v23313_v1  ;;  %16330 = vmatpush3.bf16.xpose.msra.mxu0 %v25933_v63 }
0x1115   : > { %16332 = vmatprep.subr.bf16.mxu0 %v25934_v25  ;;  %v25952_v25 = vld [vmem:[#allocation149_spill] sm:$0xff] }
0x1117   : > { %15184 = vmatmul.mubr.f32.gmra.mrb[242].mxu0 %v23313_v1  ;;  %v25938_v1 = vld [vmem:[#allocation55_spill] sm:$0xff] }
0x1118   : > { %15185 = vmatprep.mubr.f32.mxu0 %v23328_v4 }
0x111b   : > { %15186 = vmatmul.mubr.f32.gmra.mrb[244].mxu0 %v23328_v4  ;;  %v25939_v4 = vld [vmem:[#allocation57_spill] sm:$0xff] }
0x111c   : > { %15187 = vmatprep.mubr.f32.mxu0 %v23339_v21  ;;  %16334 = vmatpush3.bf16.xpose.msra.mxu0 %v25935_v32 }
0x111d   : > { %16336 = vmatprep.subr.bf16.mxu0 %v25936_v27 }
0x111f   : > { %15188 = vmatmul.mubr.f32.gmra.mrb[246].mxu0 %v23339_v21  ;;  %v25940_v21 = vld [vmem:[#allocation103_spill] sm:$0xff] }
0x1120   : > { %15189 = vmatprep.mubr.f32.mxu0 %v23351_v19 }
0x1123   : > { %15190 = vmatmul.mubr.f32.gmra.mrb[248].mxu0 %v23351_v19  ;;  %v25941_v19 = vld [vmem:[#allocation19_spill] sm:$0xff] }
0x1124   : > { %15191 = vmatprep.mubr.f32.mxu0 %v23366_v33  ;;  %16338 = vmatpush3.bf16.xpose.msra.mxu0 %v25937_v20 }
0x1125   : > { %16340 = vmatprep.subr.bf16.mxu0 %v25938_v1 }
0x1127   : > { %15192 = vmatmul.mubr.f32.gmra.mrb[250].mxu0 %v23366_v33 }
0x1128   : > { %15193 = vmatprep.mubr.f32.mxu0 %v23375_v0 }
0x112b   : > { %15194 = vmatmul.mubr.f32.gmra.mrb[252].mxu0 %v23375_v0 }
0x112c   : > { %15195 = vmatprep.mubr.f32.mxu0 %v23388_v59  ;;  %16342 = vmatpush3.bf16.xpose.msra.mxu0 %v25939_v4 }
0x112d   : > { %16344 = vmatprep.subr.bf16.mxu0 %v25940_v21 }
0x112f   : > { %15196 = vmatmul.mubr.f32.gmra.mrb[254].mxu0 %v23388_v59 }
0x1130   : > { %15197 = vmatprep.mubr.f32.mxu0 %v23399_v46 }
0x1133   : > { %15198 = vmatmul.mubr.f32.gmra.mrb[0].mxu0 %v23399_v46  ;;  %v25944_v46 = vld [vmem:[#allocation135_spill] sm:$0xff] }
0x1134   : > { %15199 = vmatprep.mubr.f32.mxu0 %v23411_v26  ;;  %16346 = vmatpush3.bf16.xpose.msra.mxu0 %v25941_v19 }
0x1135   : > { %16348 = vmatprep.subr.bf16.mxu0 %v25910_v30  ;;  %v25947_v30 = vld [vmem:[#allocation139_spill] sm:$0xff] }
0x1137   : > { %15200 = vmatmul.mubr.f32.gmra.mrb[2].mxu0 %v23411_v26 }
0x1138   : > { %15233 = vmatprep.mubr.f32.mxu0 %v23215_v43 }
0x113b   : > { %15234 = vmatmul.mubr.f32.vlgmr.msra.gmra.mrb[228].mxu0 %v23215_v43 }
0x113c   : > { %15235 = vmatprep.mubr.f32.mxu0 %v23225_v48  ;;  %16350 = vmatpush3.bf16.xpose.msra.mxu0 %v25911_v35 }
0x113d   : > { %16352 = vmatprep.subr.bf16.mxu0 %v25912_v60 }
0x113f   : > { %15236 = vmatmul.mubr.f32.gmra.mrb[230].mxu0 %v23225_v48 }
0x1140   : > { %15237 = vmatprep.mubr.f32.mxu0 %v23237_v45 }
0x1143   : > { %15238 = vmatmul.mubr.f32.gmra.mrb[232].mxu0 %v23237_v45 }
0x1144   : > { %15239 = vmatprep.mubr.f32.mxu0 %v23247_v54  ;;  %16354 = vmatpush3.bf16.xpose.msra.mxu0 %v25913_v36 }
0x1145   : > { %16356 = vmatprep.subr.bf16.mxu0 %v25914_v49 }
0x1147   : > { %15240 = vmatmul.mubr.f32.gmra.mrb[234].mxu0 %v23247_v54 }
0x1148   : > { %15241 = vmatprep.mubr.f32.mxu0 %v23263_v55 }
0x114b   : > { %15242 = vmatmul.mubr.f32.gmra.mrb[236].mxu0 %v23263_v55 }
0x114c   : > { %15243 = vmatprep.mubr.f32.mxu0 %v23276_v3  ;;  %16358 = vmatpush3.bf16.xpose.msra.mxu0 %v25915_v56  ;;  %v25948_v56 = vld [vmem:[#allocation143_spill] sm:$0xff] }
0x114d   : > { %16360 = vmatprep.subr.bf16.mxu0 %v25916_v14 }
0x114f   : > { %15244 = vmatmul.mubr.f32.gmra.mrb[238].mxu0 %v23276_v3 }
0x1150   : > { %15245 = vmatprep.mubr.f32.mxu0 %v23286_v23 }
0x1153   : > { %15246 = vmatmul.mubr.f32.gmra.mrb[240].mxu0 %v23286_v23 }
0x1154   : > { %15247 = vmatprep.mubr.f32.mxu0 %v23301_v50  ;;  %16362 = vmatpush3.bf16.xpose.msra.mxu0 %v25917_v8 }
0x1155   : > { %16364 = vmatprep.subr.bf16.mxu0 %v25918_v53 }
0x1157   : > { %15248 = vmatmul.mubr.f32.gmra.mrb[242].mxu0 %v23301_v50 }
0x1158   : > { %15249 = vmatprep.mubr.f32.mxu0 %v23315_v24 }
0x115b   : > { %15250 = vmatmul.mubr.f32.gmra.mrb[244].mxu0 %v23315_v24 }
0x115c   : > { %15251 = vmatprep.mubr.f32.mxu0 %v23324_v15  ;;  %16366 = vmatpush3.bf16.xpose.msra.mxu0 %v25919_v17 }
0x115d   : > { %16368 = vmatprep.subr.bf16.mxu0 %v25920_v57 }
0x115f   : > { %15252 = vmatmul.mubr.f32.gmra.mrb[246].mxu0 %v23324_v15 }
0x1160   : > { %15253 = vmatprep.mubr.f32.mxu0 %v23341_v61 }
0x1163   : > { %15254 = vmatmul.mubr.f32.gmra.mrb[248].mxu0 %v23341_v61 }
0x1164   : > { %15255 = vmatprep.mubr.f32.mxu0 %v23354_v58  ;;  %16370 = vmatpush3.bf16.xpose.msra.mxu0 %v25921_v51 }
0x1165   : > { %16372 = vmatprep.subr.bf16.mxu0 %v25922_v47 }
0x1167   : > { %15256 = vmatmul.mubr.f32.gmra.mrb[250].mxu0 %v23354_v58 }
0x1168   : > { %15257 = vmatprep.mubr.f32.mxu0 %v23363_v9 }
0x116b   : > { %15258 = vmatmul.mubr.f32.gmra.mrb[252].mxu0 %v23363_v9 }
0x116c   : > { %15259 = vmatprep.mubr.f32.mxu0 %v23377_v22  ;;  %16374 = vmatpush3.bf16.xpose.msra.mxu0 %v25923_v42 }
0x116d   : > { %16376 = vmatprep.subr.bf16.mxu0 %v25924_v10 }
0x116f   : > { %15260 = vmatmul.mubr.f32.gmra.mrb[254].mxu0 %v23377_v22 }
0x1170   : > { %15261 = vmatprep.mubr.f32.mxu0 %v23390_v41 }
0x1173   : > { %15262 = vmatmul.mubr.f32.gmra.mrb[0].mxu0 %v23390_v41 }
0x1174   : > { %15263 = vmatprep.mubr.f32.mxu0 %v23401_v12  ;;  %16378 = vmatpush3.bf16.xpose.msra.mxu0 %v25925_v11 }
0x1177   : > { %15264 = vmatmul.mubr.f32.gmra.mrb[2].mxu0 %v23401_v12 }
0x1178   : > { %15297 = vmatprep.mubr.f32.mxu0 %v23215_v43 }
0x117b   : > { %15298 = vmatmul.mubr.f32.vlgmr.msra.gmra.mrb[228].mxu0 %v23215_v43  ;;  %v7308_v43 = vld [vmem:[#allocation3 + $0x18] sm:$0xff] }
0x117c   : > { %15299 = vmatprep.mubr.f32.mxu0 %v23225_v48 }
0x117f   : > { %15300 = vmatmul.mubr.f32.gmra.mrb[230].mxu0 %v23225_v48  ;;  %v23640_v48 = vand.u32 4294901760, %v7308_v43 }
0x1180   : > { %15301 = vmatprep.mubr.f32.mxu0 %v23237_v45 }
0x1183   : > { %15302 = vmatmul.mubr.f32.gmra.mrb[232].mxu0 %v23237_v45  ;;  %v23643_v45 = vsub.f32 %v7308_v43, %v23640_v48 }
0x1184   : > { %15303 = vmatprep.mubr.f32.mxu0 %v23247_v54 }
0x1187   : > { %15304 = vmatmul.mubr.f32.gmra.mrb[234].mxu0 %v23247_v54  ;;  %v24795_v54 = vand.u32 4294901760, %v23643_v45 }
0x1188   : > { %15305 = vmatprep.mubr.f32.mxu0 %v23263_v55 }
0x118b   : > { %15306 = vmatmul.mubr.f32.gmra.mrb[236].mxu0 %v23263_v55  ;;  %v12252_v55 = vsub.f32 %v23643_v45, %v24795_v54 }
0x118c   : > { %15307 = vmatprep.mubr.f32.mxu0 %v23276_v3 }
0x118f   : > { %15308 = vmatmul.mubr.f32.gmra.mrb[238].mxu0 %v23276_v3  ;;  %v12253_v3 = vand.u32 4294901760, %v12252_v55 }
0x1190   : > { %15309 = vmatprep.mubr.f32.mxu0 %v23286_v23 }
0x1191   : > { %12254 = vmatprep.mubr.f32.mxu1 %v12253_v3 }
0x1193   : > { %15310 = vmatmul.mubr.f32.gmra.mrb[240].mxu0 %v23286_v23 }
0x1194   : > { %15311 = vmatprep.mubr.f32.mxu0 %v23301_v50 }
0x1197   : > { %15312 = vmatmul.mubr.f32.gmra.mrb[242].mxu0 %v23301_v50  ;;  %v25942_v50 = vld [vmem:[#allocation131_spill] sm:$0xff] }
0x1198   : > { %15313 = vmatprep.mubr.f32.mxu0 %v23315_v24 }
0x119b   : > { %15314 = vmatmul.mubr.f32.gmra.mrb[244].mxu0 %v23315_v24 }
0x119c   : > { %15315 = vmatprep.mubr.f32.mxu0 %v23324_v15 }
0x119f   : > { %15316 = vmatmul.mubr.f32.gmra.mrb[246].mxu0 %v23324_v15 }
0x11a0   : > { %15317 = vmatprep.mubr.f32.mxu0 %v23341_v61 }
0x11a3   : > { %15318 = vmatmul.mubr.f32.gmra.mrb[248].mxu0 %v23341_v61  ;;  %v7307_v61 = vld [vmem:[#allocation3 + $0x10] sm:$0xff] }
0x11a4   : > { %15319 = vmatprep.mubr.f32.mxu0 %v23354_v58  ;;  %v23651_v59 = vand.u32 4294901760, %v7307_v61 }
0x11a6   : > { %v23662_v6 = vsub.f32 %v7307_v61, %v23651_v59 }
0x11a7   : > { %15320 = vmatmul.mubr.f32.gmra.mrb[250].mxu0 %v23354_v58  ;;  %v25943_v58 = vld [vmem:[#allocation37_spill] sm:$0xff] }
0x11a8   : > { %15321 = vmatprep.mubr.f32.mxu0 %v23363_v9 }
0x11ab   : > { %15322 = vmatmul.mubr.f32.gmra.mrb[252].mxu0 %v23363_v9 }
0x11ac   : > { %15323 = vmatprep.mubr.f32.mxu0 %v23377_v22 }
0x11af   : > { %15324 = vmatmul.mubr.f32.gmra.mrb[254].mxu0 %v23377_v22 }
0x11b0   : > { %15325 = vmatprep.mubr.f32.mxu0 %v23390_v41 }
0x11b3   : > { %15326 = vmatmul.mubr.f32.gmra.mrb[0].mxu0 %v23390_v41 }
0x11b4   : > { %15327 = vmatprep.mubr.f32.mxu0 %v23401_v12 }
0x11b7   : > { %15328 = vmatmul.mubr.f32.gmra.mrb[2].mxu0 %v23401_v12 }
0x124e   : > { %v12011_v23 = vpop.f32.mrb[228].mxu0 }
0x124f   : > { %v12121_v24 = vmul.f32 %v25942_v50, %v12011_v23  ;;  %v12013_v15 = vpop.f32.mrb[229].mxu0 }
0x1250   : > { %v12122_v9 = vmul.f32 %v25943_v58, %v12013_v15  ;;  %v25955_v58 = vld [vmem:[#allocation151_spill] sm:$0xff] }
0x1251   : > { %v12155_v33 = vand.u32 4294901760, %v12121_v24 }
0x1252   : > { %v12153_v0 = vand.u32 4294901760, %v12122_v9  ;;  %v12018_v22 = vpop.f32.mrb[230].mxu0 }
0x1253   : > { %v23653_v41 = vsub.f32 %v12121_v24, %v12155_v33  ;;  %v12123_v12 = vmul.f32 %v25944_v46, %v12018_v22  ;;  %v12020_v26 = vpop.f32.mrb[231].mxu0  ;;  %v25956_v22 = vld [vmem:[#allocation154_spill] sm:$0xff] }
0x1254   : > { %v23656_v13 = vsub.f32 %v12122_v9, %v12153_v0  ;;  %v12124_v31 = vmul.f32 %v25945_v52, %v12020_v26 }
0x1255   : > { %v12273_v5 = vand.u32 4294901760, %v23653_v41  ;;  %v12159_v18 = vand.u32 4294901760, %v12123_v12 }
0x1256   : > { %v12267_v16 = vand.u32 4294901760, %v23656_v13  ;;  %v12157_v29 = vand.u32 4294901760, %v12124_v31  ;;  %v12025_v34 = vpop.f32.mrb[232].mxu0 }
0x1257   : > { %v23664_v2 = vpack.c.bf16 %v12159_v18, %v12155_v33  ;;  %v23666_v44 = vsub.f32 %v12123_v12, %v12159_v18  ;;  %v12125_v35 = vmul.f32 %v25947_v30, %v12025_v34  ;;  %v12027_v60 = vpop.f32.mrb[233].mxu0  ;;  %v12274_v36 = vsub.f32 %v23653_v41, %v12273_v5 }
0x1258   : > { %v23670_v49 = vsub.f32 %v12124_v31, %v12157_v29  ;;  %v12126_v14 = vmul.f32 %v25948_v56, %v12027_v60  ;;  %v23673_v8 = vpack.c.bf16 %v12157_v29, %v12153_v0  ;;  %v12268_v51 = vsub.f32 %v23656_v13, %v12267_v16  ;;  %v25958_v56 = vld [vmem:[#allocation155_spill] sm:$0xff] }
0x1259   : > { %25946 = vst [vmem:[#allocation68_spill] sm:$0xff] %v23664_v2  ;;  %v12285_v53 = vand.u32 4294901760, %v23666_v44  ;;  %v12163_v57 = vand.u32 4294901760, %v12125_v35  ;;  %v12275_v1 = vand.u32 4294901760, %v12274_v36 }
0x125a   : > { %25949 = vst [vmem:[#allocation71_spill] sm:$0xff] %v23673_v8  ;;  %v12279_v47 = vand.u32 4294901760, %v23670_v49  ;;  %v12161_v42 = vand.u32 4294901760, %v12126_v14  ;;  %v12032_v10 = vpop.f32.mrb[234].mxu0  ;;  %16380 = vmatprep.subr.bf16.mxu1 %v23673_v8  ;;  %v12269_v19 = vand.u32 4294901760, %v12268_v51 }
0x125b   : > { %v12286_v38 = vsub.f32 %v23666_v44, %v12285_v53  ;;  %v23685_v39 = vsub.f32 %v12125_v35, %v12163_v57  ;;  %v12127_v62 = vmul.f32 %v25950_v37, %v12032_v10  ;;  %v12034_v28 = vpop.f32.mrb[235].mxu0  ;;  %16382 = vmatpush1.bf16.xpose.msra.mxu1 %v23664_v2  ;;  %v23689_v7 = vpack.c.bf16 %v12285_v53, %v12273_v5 }
0x125c   : > { %v23691_v63 = vsub.f32 %v12126_v14, %v12161_v42  ;;  %v12128_v32 = vmul.f32 %v25952_v25, %v12034_v28  ;;  %v12280_v27 = vsub.f32 %v23670_v49, %v12279_v47  ;;  %v23695_v20 = vpack.c.bf16 %v12279_v47, %v12267_v16  ;;  %v25959_v47 = vld [vmem:[#allocation38_spill] sm:$0xff] }
0x125d   : > { %25951 = vst [vmem:[#allocation74_spill] sm:$0xff] %v23689_v7  ;;  %v12297_v4 = vand.u32 4294901760, %v23685_v39  ;;  %v12167_v21 = vand.u32 4294901760, %v12127_v62  ;;  %v12287_v43 = vand.u32 4294901760, %v12286_v38 }
0x125e   : > { %25953 = vst [vmem:[#allocation75_spill] sm:$0xff] %v23695_v20  ;;  %v12291_v55 = vand.u32 4294901760, %v23691_v63  ;;  %v12165_v3 = vand.u32 4294901760, %v12128_v32  ;;  %v12039_v23 = vpop.f32.mrb[236].mxu0  ;;  %v12281_v50 = vand.u32 4294901760, %v12280_v27 }
0x125f   : > { %v12298_v24 = vsub.f32 %v23685_v39, %v12297_v4  ;;  %v23700_v15 = vpack.c.bf16 %v12167_v21, %v12163_v57  ;;  %v23702_v61 = vsub.f32 %v12127_v62, %v12167_v21  ;;  %v12129_v9 = vmul.f32 %v25955_v58, %v12039_v23  ;;  %v12041_v33 = vpop.f32.mrb[237].mxu0 }
0x1260   : > { %v23705_v0 = vsub.f32 %v12128_v32, %v12165_v3  ;;  %v12130_v46 = vmul.f32 %v25956_v22, %v12041_v33  ;;  %v23708_v12 = vpack.c.bf16 %v12165_v3, %v12161_v42  ;;  %v23710_v26 = vpack.c.bf16 %v12281_v50, %v12269_v19  ;;  %v25963_v50 = vld [vmem:[#allocation17_spill] sm:$0xff] }
0x1261   : > { %25954 = vst [vmem:[#allocation76_spill] sm:$0xff] %v23700_v15  ;;  %v12299_v52 = vand.u32 4294901760, %v12298_v24  ;;  %v12309_v31 = vand.u32 4294901760, %v23702_v61  ;;  %v12171_v18 = vand.u32 4294901760, %v12129_v9  ;;  %v23717_v30 = vpack.c.bf16 %v12287_v43, %v12275_v1 }
0x1262   : > { %25957 = vst [vmem:[#allocation77_spill] sm:$0xff] %v23708_v12  ;;  %v12303_v16 = vand.u32 4294901760, %v23705_v0  ;;  %v12169_v29 = vand.u32 4294901760, %v12130_v46  ;;  %v12046_v34 = vpop.f32.mrb[238].mxu0  ;;  %16384 = vmatprep.subr.bf16.mxu1 %v23708_v12  ;;  %v12292_v35 = vsub.f32 %v23691_v63, %v12291_v55 }
0x1263   : > { %v12310_v60 = vsub.f32 %v23702_v61, %v12309_v31  ;;  %v23721_v36 = vsub.f32 %v12129_v9, %v12171_v18  ;;  %v12131_v14 = vmul.f32 %v25958_v56, %v12046_v34  ;;  %v12048_v53 = vpop.f32.mrb[239].mxu0  ;;  %16386 = vmatpush1.bf16.xpose.msra.mxu1 %v23700_v15  ;;  %v23735_v19 = vpack.c.bf16 %v12309_v31, %v12297_v4 }
0x1264   : > { %v23727_v51 = vsub.f32 %v12130_v46, %v12169_v29  ;;  %v12132_v42 = vmul.f32 %v25959_v47, %v12048_v53  ;;  %v12293_v10 = vand.u32 4294901760, %v12292_v35  ;;  %v12304_v38 = vsub.f32 %v23705_v0, %v12303_v16  ;;  %v25966_v47 = vld [vmem:[#allocation95_spill] sm:$0xff] }
0x1265   : > { %v12311_v37 = vand.u32 4294901760, %v12310_v60  ;;  %v12321_v62 = vand.u32 4294901760, %v23721_v36  ;;  %v12175_v28 = vand.u32 4294901760, %v12131_v14  ;;  %v23732_v25 = vpack.c.bf16 %v12303_v16, %v12291_v55  ;;  %25961 = vst [vmem:[#allocation79_spill] sm:$0xff] %v23735_v19  ;;  %v25964_v55 = vld [vmem:[#allocation96_spill] sm:$0xff] }
0x1266   : > { %v12315_v32 = vand.u32 4294901760, %v23727_v51  ;;  %v12173_v27 = vand.u32 4294901760, %v12132_v42  ;;  %v12053_v1 = vpop.f32.mrb[240].mxu0  ;;  %v12305_v21 = vand.u32 4294901760, %v12304_v38 }
0x1267   : > { %25960 = vst [vmem:[#allocation78_spill] sm:$0xff] %v23732_v25  ;;  %v12322_v43 = vsub.f32 %v23721_v36, %v12321_v62  ;;  %v23738_v3 = vpack.c.bf16 %v12175_v28, %v12171_v18  ;;  %v23740_v23 = vsub.f32 %v12131_v14, %v12175_v28  ;;  %v12133_v24 = vmul.f32 %v25963_v50, %v12053_v1  ;;  %v12055_v58 = vpop.f32.mrb[241].mxu0 }
0x1268   : > { %v23743_v9 = vsub.f32 %v12132_v42, %v12173_v27  ;;  %v12134_v33 = vmul.f32 %v25964_v55, %v12055_v58  ;;  %v23746_v22 = vpack.c.bf16 %v12173_v27, %v12169_v29  ;;  %v23748_v46 = vpack.c.bf16 %v12305_v21, %v12293_v10  ;;  %v25967_v27 = vld [vmem:[#allocation31_spill] sm:$0xff] }
0x1269   : > { %25962 = vst [vmem:[#allocation80_spill] sm:$0xff] %v23738_v3  ;;  %v12323_v16 = vand.u32 4294901760, %v12322_v43  ;;  %v12333_v4 = vand.u32 4294901760, %v23740_v23  ;;  %v12179_v18 = vand.u32 4294901760, %v12133_v24  ;;  %v23755_v56 = vpack.c.bf16 %v12311_v37, %v12299_v52 }
0x126a   : > { %25965 = vst [vmem:[#allocation82_spill] sm:$0xff] %v23746_v22  ;;  %v12327_v34 = vand.u32 4294901760, %v23743_v9  ;;  %v12177_v35 = vand.u32 4294901760, %v12134_v33  ;;  %v12060_v60 = vpop.f32.mrb[242].mxu0  ;;  %16388 = vmatprep.subr.bf16.mxu1 %v23746_v22  ;;  %v12316_v29 = vsub.f32 %v23727_v51, %v12315_v32 }
0x126b   : > { %v12334_v14 = vsub.f32 %v23740_v23, %v12333_v4  ;;  %v23759_v53 = vsub.f32 %v12133_v24, %v12179_v18  ;;  %v12135_v42 = vmul.f32 %v25966_v47, %v12060_v60  ;;  %v12062_v10 = vpop.f32.mrb[243].mxu0  ;;  %16390 = vmatpush1.bf16.xpose.msra.mxu1 %v23738_v3  ;;  %v23773_v54 = vpack.c.bf16 %v12333_v4, %v12321_v62  ;;  %v25976_v4 = vld [vmem:[#allocation137_spill] sm:$0xff] }
0x126c   : > { %v23765_v28 = vsub.f32 %v12134_v33, %v12177_v35  ;;  %v12136_v1 = vmul.f32 %v25967_v27, %v12062_v10  ;;  %v12317_v52 = vand.u32 4294901760, %v12316_v29  ;;  %v12328_v37 = vsub.f32 %v23743_v9, %v12327_v34  ;;  %v25971_v10 = vld [vmem:[#allocation123_spill] sm:$0xff] }
0x126d   : > { %v12335_v21 = vand.u32 4294901760, %v12334_v14  ;;  %v12345_v43 = vand.u32 4294901760, %v23759_v53  ;;  %v12183_v50 = vand.u32 4294901760, %v12135_v42  ;;  %v23770_v24 = vpack.c.bf16 %v12327_v34, %v12315_v32  ;;  %25969 = vst [vmem:[#allocation158_spill] sm:$0xff] %v23773_v54  ;;  %v25972_v32 = vld [vmem:[#allocation116_spill] sm:$0xff] }
0x126e   : > { %v12339_v58 = vand.u32 4294901760, %v23765_v28  ;;  %v12181_v55 = vand.u32 4294901760, %v12136_v1  ;;  %v12067_v60 = vpop.f32.mrb[244].mxu0  ;;  %v12329_v47 = vand.u32 4294901760, %v12328_v37 }
0x126f   : > { %25968 = vst [vmem:[#allocation83_spill] sm:$0xff] %v23770_v24  ;;  %v12346_v33 = vsub.f32 %v23759_v53, %v12345_v43  ;;  %v23776_v31 = vpack.c.bf16 %v12183_v50, %v12179_v18  ;;  %v23778_v29 = vsub.f32 %v12135_v42, %v12183_v50  ;;  %v12137_v14 = vmul.f32 %v25971_v10, %v12067_v60  ;;  %v12069_v27 = vpop.f32.mrb[245].mxu0 }
0x1270   : > { %v23781_v38 = vsub.f32 %v12136_v1, %v12181_v55  ;;  %v12138_v34 = vmul.f32 %v25972_v32, %v12069_v27  ;;  %v23784_v5 = vpack.c.bf16 %v12181_v55, %v12177_v35  ;;  %v23786_v57 = vpack.c.bf16 %v12329_v47, %v12317_v52  ;;  %v25975_v47 = vld [vmem:[#allocation146_spill] sm:$0xff] }
0x1271   : > { %25970 = vst [vmem:[#allocation159_spill] sm:$0xff] %v23776_v31  ;;  %v12347_v37 = vand.u32 4294901760, %v12346_v33  ;;  %v12357_v62 = vand.u32 4294901760, %v23778_v29  ;;  %v12187_v18 = vand.u32 4294901760, %v12137_v14  ;;  %v23793_v1 = vpack.c.bf16 %v12335_v21, %v12323_v16 }
0x1272   : > { %25973 = vst [vmem:[#allocation160_spill] sm:$0xff] %v23784_v5  ;;  %v12351_v42 = vand.u32 4294901760, %v23781_v38  ;;  %v12185_v50 = vand.u32 4294901760, %v12138_v34  ;;  %v12074_v60 = vpop.f32.mrb[246].mxu0  ;;  %16392 = vmatprep.subr.bf16.mxu1 %v23784_v5  ;;  %v12340_v35 = vsub.f32 %v23765_v28, %v12339_v58 }
0x1273   : > { %v12358_v52 = vsub.f32 %v23778_v29, %v12357_v62  ;;  %v23797_v55 = vsub.f32 %v12137_v14, %v12187_v18  ;;  %v12139_v33 = vmul.f32 %v25975_v47, %v12074_v60  ;;  %v12076_v10 = vpop.f32.mrb[247].mxu0  ;;  %16394 = vmatpush1.bf16.xpose.msra.mxu1 %v23776_v31  ;;  %v23811_v25 = vpack.c.bf16 %v12357_v62, %v12345_v43  ;;  %v25986_v62 = vld [vmem:[#allocation157_spill] sm:$0xff] }
0x1274   : > { %v23803_v32 = vsub.f32 %v12138_v34, %v12185_v50  ;;  %v12140_v17 = vmul.f32 %v25976_v4, %v12076_v10  ;;  %v12341_v16 = vand.u32 4294901760, %v12340_v35  ;;  %v12352_v21 = vsub.f32 %v23781_v38, %v12351_v42  ;;  %v25980_v35 = vld [vmem:[#allocation93_spill] sm:$0xff] }
0x1275   : > { %25974 = vst [vmem:[#allocation161_spill] sm:$0xff] %v23797_v55  ;;  %v12359_v40 = vand.u32 4294901760, %v12358_v52  ;;  %v12369_v11 = vand.u32 4294901760, %v23797_v55  ;;  %v12191_v14 = vand.u32 4294901760, %v12139_v33  ;;  %v23808_v54 = vpack.c.bf16 %v12351_v42, %v12339_v58  ;;  %25978 = vst [vmem:[#allocation7_spill] sm:$0xff] %v23811_v25  ;;  %v25981_v58 = vld [vmem:[#allocation111_spill] sm:$0xff] }
0x1276   : > { %v12363_v60 = vand.u32 4294901760, %v23803_v32  ;;  %v12189_v47 = vand.u32 4294901760, %v12140_v17  ;;  %v12081_v24 = vpop.f32.mrb[248].mxu0  ;;  %v12353_v19 = vand.u32 4294901760, %v12352_v21 }
0x1277   : > { %25977 = vst [vmem:[#allocation6_spill] sm:$0xff] %v23808_v54  ;;  %v12370_v34 = vsub.f32 %v23797_v55, %v12369_v11  ;;  %v23814_v27 = vpack.c.bf16 %v12191_v14, %v12187_v18  ;;  %v23816_v4 = vsub.f32 %v12139_v33, %v12191_v14  ;;  %v12141_v52 = vmul.f32 %v25980_v35, %v12081_v24  ;;  %v12083_v10 = vpop.f32.mrb[249].mxu0 }
0x1278   : > { %v23819_v7 = vsub.f32 %v12140_v17, %v12189_v47  ;;  %v12142_v42 = vmul.f32 %v25981_v58, %v12083_v10  ;;  %v23822_v54 = vpack.c.bf16 %v12189_v47, %v12185_v50  ;;  %v23824_v20 = vpack.c.bf16 %v12353_v19, %v12341_v16  ;;  %v25984_v47 = vld [vmem:[#allocation129_spill] sm:$0xff] }
0x1279   : > { %25979 = vst [vmem:[#allocation8_spill] sm:$0xff] %v23814_v27  ;;  %v12371_v21 = vand.u32 4294901760, %v12370_v34  ;;  %v12381_v43 = vand.u32 4294901760, %v23816_v4  ;;  %v12195_v18 = vand.u32 4294901760, %v12141_v52  ;;  %v23831_v17 = vpack.c.bf16 %v12359_v40, %v12347_v37 }
0x127a   : > { %25982 = vst [vmem:[#allocation9_spill] sm:$0xff] %v23822_v54  ;;  %v12375_v33 = vand.u32 4294901760, %v23819_v7  ;;  %v12193_v14 = vand.u32 4294901760, %v12142_v42  ;;  %v12088_v24 = vpop.f32.mrb[250].mxu0  ;;  %16396 = vmatprep.subr.bf16.mxu1 %v23822_v54  ;;  %v12364_v50 = vsub.f32 %v23803_v32, %v12363_v60 }
0x127b   : > { %v12382_v19 = vsub.f32 %v23816_v4, %v12381_v43  ;;  %v23835_v16 = vsub.f32 %v12141_v52, %v12195_v18  ;;  %v12143_v34 = vmul.f32 %v25984_v47, %v12088_v24  ;;  %v12090_v35 = vpop.f32.mrb[251].mxu0  ;;  %16398 = vmatpush1.bf16.xpose.msra.mxu1 %v23814_v27  ;;  %v23849_v22 = vpack.c.bf16 %v12381_v43, %v12369_v11  ;;  %v25998_v43 = vld [vmem:[#allocation45_spill] sm:$0xff] }
0x127c   : > { %v23841_v58 = vsub.f32 %v12142_v42, %v12193_v14  ;;  %v12144_v25 = vmul.f32 %v25986_v62, %v12090_v35  ;;  %v12365_v40 = vand.u32 4294901760, %v12364_v50  ;;  %v12376_v37 = vsub.f32 %v23819_v7, %v12375_v33  ;;  %v25991_v50 = vld [vmem:[#allocation85_spill] sm:$0xff] }
0x127d   : > { %25983 = vst [vmem:[#allocation10_spill] sm:$0xff] %v23835_v16  ;;  %v12383_v54 = vand.u32 4294901760, %v12382_v19  ;;  %v12393_v31 = vand.u32 4294901760, %v23835_v16  ;;  %v12199_v52 = vand.u32 4294901760, %v12143_v34  ;;  %v23846_v5 = vpack.c.bf16 %v12375_v33, %v12363_v60  ;;  %25988 = vst [vmem:[#allocation13_spill] sm:$0xff] %v23849_v22  ;;  %v25993_v60 = vld [vmem:[#allocation98_spill] sm:$0xff] }
0x127e   : > { %25985 = vst [vmem:[#allocation11_spill] sm:$0xff] %v23841_v58  ;;  %v12387_v24 = vand.u32 4294901760, %v23841_v58  ;;  %v12197_v47 = vand.u32 4294901760, %v12144_v25  ;;  %v12095_v27 = vpop.f32.mrb[252].mxu0  ;;  %v12377_v3 = vand.u32 4294901760, %v12376_v37 }
0x127f   : > { %25987 = vst [vmem:[#allocation12_spill] sm:$0xff] %v23846_v5  ;;  %v12394_v42 = vsub.f32 %v23835_v16, %v12393_v31  ;;  %v23852_v10 = vpack.c.bf16 %v12199_v52, %v12195_v18  ;;  %v23854_v62 = vsub.f32 %v12143_v34, %v12199_v52  ;;  %v12145_v19 = vmul.f32 %v25991_v50, %v12095_v27  ;;  %v12097_v35 = vpop.f32.mrb[253].mxu0 }
0x1280   : > { %v23857_v15 = vsub.f32 %v12144_v25, %v12197_v47  ;;  %v12146_v33 = vmul.f32 %v25993_v60, %v12097_v35  ;;  %v23860_v5 = vpack.c.bf16 %v12197_v47, %v12193_v14  ;;  %v23862_v12 = vpack.c.bf16 %v12377_v3, %v12365_v40  ;;  %v25996_v47 = vld [vmem:[#allocation84_spill] sm:$0xff] }
0x1281   : > { %25989 = vst [vmem:[#allocation14_spill] sm:$0xff] %v23852_v10  ;;  %25990 = vst [vmem:[#allocation15_spill] sm:$0xff] %v23854_v62  ;;  %v12395_v37 = vand.u32 4294901760, %v12394_v42  ;;  %v12405_v11 = vand.u32 4294901760, %v23854_v62  ;;  %v12203_v18 = vand.u32 4294901760, %v12145_v19  ;;  %v23869_v25 = vpack.c.bf16 %v12383_v54, %v12371_v21 }
0x1282   : > { %25992 = vst [vmem:[#allocation16_spill] sm:$0xff] %v23857_v15  ;;  %25994 = vst [vmem:[#allocation162_spill] sm:$0xff] %v23860_v5  ;;  %v12399_v34 = vand.u32 4294901760, %v23857_v15  ;;  %v12201_v52 = vand.u32 4294901760, %v12146_v33  ;;  %v12102_v27 = vpop.f32.mrb[254].mxu0  ;;  %16400 = vmatprep.subr.bf16.mxu1 %v23860_v5  ;;  %v12388_v14 = vsub.f32 %v23841_v58, %v12387_v24 }
0x1283   : > { %v12406_v3 = vsub.f32 %v23854_v62, %v12405_v11  ;;  %v23873_v40 = vsub.f32 %v12145_v19, %v12203_v18  ;;  %v12147_v42 = vmul.f32 %v25996_v47, %v12102_v27  ;;  %v12104_v50 = vpop.f32.mrb[255].mxu0  ;;  %16402 = vmatpush1.bf16.xpose.msra.mxu1 %v23852_v10  ;;  %v23887_v62 = vpack.c.bf16 %v12405_v11, %v12393_v31  ;;  %v26008_v11 = vld [vmem:[#allocation109_spill] sm:$0xff] }
0x1284   : > { %v23879_v60 = vsub.f32 %v12146_v33, %v12201_v52  ;;  %v12148_v22 = vmul.f32 %v25998_v43, %v12104_v50  ;;  %v12389_v54 = vand.u32 4294901760, %v12388_v14  ;;  %v12400_v21 = vsub.f32 %v23857_v15, %v12399_v34  ;;  %v26003_v14 = vld [vmem:[#allocation59_spill] sm:$0xff] }
0x1285   : > { %25995 = vst [vmem:[#allocation92_spill] sm:$0xff] %v23873_v40  ;;  %v12407_v5 = vand.u32 4294901760, %v12406_v3  ;;  %v12417_v2 = vand.u32 4294901760, %v23873_v40  ;;  %v12207_v19 = vand.u32 4294901760, %v12147_v42  ;;  %v23884_v8 = vpack.c.bf16 %v12399_v34, %v12387_v24  ;;  %26000 = vst [vmem:[#allocation104_spill] sm:$0xff] %v23887_v62  ;;  %v26005_v24 = vld [vmem:[#allocation63_spill] sm:$0xff] }
0x1286   : > { %25997 = vst [vmem:[#allocation134_spill] sm:$0xff] %v23879_v60  ;;  %v12411_v27 = vand.u32 4294901760, %v23879_v60  ;;  %v12205_v47 = vand.u32 4294901760, %v12148_v22  ;;  %v12109_v10 = vpop.f32.mrb[0].mxu0  ;;  %v12401_v16 = vand.u32 4294901760, %v12400_v21 }
0x1287   : > { %25999 = vst [vmem:[#allocation29_spill] sm:$0xff] %v23884_v8  ;;  %v12418_v33 = vsub.f32 %v23873_v40, %v12417_v2  ;;  %v23890_v35 = vpack.c.bf16 %v12207_v19, %v12203_v18  ;;  %v23892_v43 = vsub.f32 %v12147_v42, %v12207_v19  ;;  %v12149_v3 = vmul.f32 %v26003_v14, %v12109_v10  ;;  %v12111_v50 = vpop.f32.mrb[1].mxu0 }
0x1288   : > { %v23895_v58 = vsub.f32 %v12148_v22, %v12205_v47  ;;  %v12150_v34 = vmul.f32 %v26005_v24, %v12111_v50  ;;  %v23898_v8 = vpack.c.bf16 %v12205_v47, %v12201_v52  ;;  %v23900_v15 = vpack.c.bf16 %v12401_v16, %v12389_v54  ;;  %v26007_v54 = vld [vmem:[#allocation90_spill] sm:$0xff] }
0x1289   : > { %26001 = vst [vmem:[#allocation156_spill] sm:$0xff] %v23890_v35  ;;  %26002 = vst [vmem:[#allocation126_spill] sm:$0xff] %v23892_v43  ;;  %v12419_v21 = vand.u32 4294901760, %v12418_v33  ;;  %v12429_v31 = vand.u32 4294901760, %v23892_v43  ;;  %v12211_v18 = vand.u32 4294901760, %v12149_v3  ;;  %v16433_v22 = vpack.c.bf16 %v12407_v5, %v12395_v37 }
0x128a   : > { %26004 = vst [vmem:[#allocation119_spill] sm:$0xff] %v23895_v58  ;;  %26006 = vst [vmem:[#allocation100_spill] sm:$0xff] %v23898_v8  ;;  %v12423_v42 = vand.u32 4294901760, %v23895_v58  ;;  %v12209_v19 = vand.u32 4294901760, %v12150_v34  ;;  %v12116_v10 = vpop.f32.mrb[2].mxu0  ;;  %16404 = vmatprep.subr.bf16.mxu1 %v23898_v8  ;;  %v12412_v14 = vsub.f32 %v23879_v60, %v12411_v27 }
0x128b   : > { %v12430_v52 = vsub.f32 %v23892_v43, %v12429_v31  ;;  %v23909_v16 = vsub.f32 %v12149_v3, %v12211_v18  ;;  %v12151_v47 = vmul.f32 %v26007_v54, %v12116_v10  ;;  %v12118_v33 = vpop.f32.mrb[3].mxu0  ;;  %16406 = vmatpush1.bf16.xpose.msra.mxu1 %v23890_v35  ;;  %v23923_v55 = vpack.c.bf16 %v12429_v31, %v12417_v2 }
0x128c   : > { %v23915_v24 = vsub.f32 %v12150_v34, %v12209_v19  ;;  %v12152_v62 = vmul.f32 %v26008_v11, %v12118_v33  ;;  %v12413_v8 = vand.u32 4294901760, %v12412_v14  ;;  %v12424_v5 = vsub.f32 %v23895_v58, %v12423_v42 }
0x128d   : > { %v12431_v37 = vand.u32 4294901760, %v12430_v52  ;;  %v12441_v40 = vand.u32 4294901760, %v23909_v16  ;;  %v12215_v3 = vand.u32 4294901760, %v12151_v47  ;;  %v23920_v43 = vpack.c.bf16 %v12423_v42, %v12411_v27 }
0x128e   : > { %v12435_v10 = vand.u32 4294901760, %v23915_v24  ;;  %v12213_v54 = vand.u32 4294901760, %v12152_v62  ;;  %v12425_v35 = vand.u32 4294901760, %v12424_v5  ;;  %v26009_v5 = vand.u32 4294901760, %v23662_v6 }
0x128f   : > { %v23925_v50 = vpack.c.bf16 %v12215_v3, %v12211_v18  ;;  %v12452_v34 = vsub.f32 %v12151_v47, %v12215_v3  ;;  %v16437_v60 = vpack.c.bf16 %v12431_v37, %v12419_v21  ;;  %v12442_v52 = vsub.f32 %v23909_v16, %v12441_v40 }
0x1290   : > { %v12446_v11 = vsub.f32 %v12152_v62, %v12213_v54  ;;  %v23927_v14 = vpack.c.bf16 %v12213_v54, %v12209_v19  ;;  %v16435_v33 = vpack.c.bf16 %v12425_v35, %v12413_v8  ;;  %v12258_v2 = vsub.f32 %v23662_v6, %v26009_v5 }
0x1291   : > { %v12453_v58 = vand.u32 4294901760, %v12452_v34  ;;  %v16473_v27 = vpack.c.bf16 %v12452_v34, %v23909_v16  ;;  %v12436_v31 = vsub.f32 %v23915_v24, %v12435_v10  ;;  %v12443_v19 = vand.u32 4294901760, %v12442_v52  ;;  %v26050_v52 = vld [vmem:[#allocation74_spill] sm:$0xff] }
0x1292   : > { %v12447_v42 = vand.u32 4294901760, %v12446_v11  ;;  %16408 = vmatprep.subr.bf16.mxu1 %v23927_v14  ;;  %v16471_v21 = vpack.c.bf16 %v12446_v11, %v23915_v24  ;;  %v12259_v47 = vand.u32 4294901760, %v12258_v2  ;;  %v26044_v24 = vld [vmem:[#allocation162_spill] sm:$0xff]  ;;  %v26053_v2 = vld [vmem:[#allocation83_spill] sm:$0xff] }
0x1293   : > { %v12454_v62 = vsub.f32 %v12452_v34, %v12453_v58  ;;  %16410 = vmatpush1.bf16.xpose.msra.mxu1 %v23925_v50  ;;  %v23938_v8 = vpack.c.bf16 %v12453_v58, %v12441_v40  ;;  %v12437_v37 = vand.u32 4294901760, %v12436_v31  ;;  %v26039_v58 = vld [vmem:[#allocation80_spill] sm:$0xff]  ;;  %v26041_v40 = vld [vmem:[#allocation159_spill] sm:$0xff]  ;;  %v26054_v31 = vld [vmem:[#allocation158_spill] sm:$0xff] }
0x1294   : > { %16412 = vmatprep.subr.bf16.mxu1 %v23710_v26  ;;  %v12448_v35 = vsub.f32 %v12446_v11, %v12447_v42  ;;  %v23941_v18 = vpack.c.bf16 %v12447_v42, %v12435_v10  ;;  %v26010_v26 = vpack.c.bf16 %v23670_v49, %v23656_v13  ;;  %v26014_v13 = vpack.c.bf16 %v23743_v9, %v23727_v51  ;;  %v26025_v51 = vld [vmem:[#allocation10_spill] sm:$0xff]  ;;  %v26027_v9 = vld [vmem:[#allocation119_spill] sm:$0xff]  ;;  %v26046_v10 = vld [vmem:[#allocation100_spill] sm:$0xff] }
0x1295   : > { %v12455_v16 = vand.u32 4294901760, %v12454_v62  ;;  %v26015_v49 = vpack.c.bf16 %v23740_v23, %v23721_v36  ;;  %v26047_v34 = vld [vmem:[#allocation156_spill] sm:$0xff]  ;;  %v26048_v11 = vld [vmem:[#allocation75_spill] sm:$0xff] }
0x1296   : > { %v12449_v3 = vand.u32 4294901760, %v12448_v35  ;;  %v26052_v42 = vld [vmem:[#allocation79_spill] sm:$0xff]  ;;  %v26057_v35 = vld [vmem:[#allocation12_spill] sm:$0xff] }
0x1297   : > { %v16441_v54 = vpack.c.bf16 %v12455_v16, %v12443_v19  ;;  %v26056_v62 = vld [vmem:[#allocation7_spill] sm:$0xff]  ;;  %v26059_v19 = vld [vmem:[#allocation29_spill] sm:$0xff]  ;;  %v26060_v16 = vld [vmem:[#allocation104_spill] sm:$0xff] }
0x1298   : > { %v16439_v5 = vpack.c.bf16 %v12449_v3, %v12437_v37  ;;  %v26062_v37 = vld [vmem:[#allocation35_spill] sm:$0xff] }
0x129a   : > { %12260 = vmatmul.mubr.f32.vlgmr.msra.gmra.mrb[2].mxu1 %v12259_v47 }
0x129b   : > { %16414 = vmatpush1.bf16.xpose.msra.mxu1 %v23717_v30  ;;  %12490 = vmatprep.mubr.f32.mxu1 %v23640_v48  ;;  %v26022_v30 = vld [vmem:[#allocation11_spill] sm:$0xff] }
0x129c   : > { %16416 = vmatprep.subr.bf16.mxu1 %v23748_v46  ;;  %v26028_v46 = vld [vmem:[#allocation134_spill] sm:$0xff] }
0x12a3   : > { %16418 = vmatpush1.bf16.xpose.msra.mxu1 %v23755_v56  ;;  %v26029_v56 = vpack.c.bf16 %v26027_v9, %v26028_v46 }
0x12a4   : > { %16420 = vmatprep.subr.bf16.mxu1 %v23786_v57  ;;  %v26024_v57 = vld [vmem:[#allocation15_spill] sm:$0xff] }
0x12a5   : > { %v26026_v23 = vpack.c.bf16 %v26024_v57, %v26025_v51  ;;  %v13020_v51 = vpop.permute.xlu0 %13019 }
0x12ab   : > { %16422 = vmatpush1.bf16.xpose.msra.mxu1 %v23793_v1  ;;  %v26035_v1 = vand.u32 4294901760, %v23643_v45 }
0x12ac   : > { %16424 = vmatprep.subr.bf16.mxu1 %v23824_v20  ;;  %v26011_v20 = vpack.c.bf16 %v23666_v44, %v23653_v41  ;;  %v26016_v41 = vpack.c.bf16 %v23781_v38, %v23765_v28  ;;  %v26017_v44 = vpack.c.bf16 %v23778_v29, %v23759_v53  ;;  %v26030_v53 = vld [vmem:[#allocation126_spill] sm:$0xff]  ;;  %v26031_v38 = vld [vmem:[#allocation92_spill] sm:$0xff]  ;;  %v26033_v28 = vld [vmem:[#allocation71_spill] sm:$0xff] }
0x12ad   : > { %v26034_v29 = vld [vmem:[#allocation68_spill] sm:$0xff] }
0x12b3   : > { %16426 = vmatpush1.bf16.xpose.msra.mxu1 %v23831_v17  ;;  %v26038_v17 = vld [vmem:[#allocation82_spill] sm:$0xff] }
0x12b4   : > { %16428 = vmatprep.subr.bf16.mxu1 %v23862_v12  ;;  %v26013_v12 = vpack.c.bf16 %v23702_v61, %v23685_v39  ;;  %v26018_v39 = vpack.c.bf16 %v23819_v7, %v23803_v32  ;;  %v26032_v7 = vpack.c.bf16 %v26030_v53, %v26031_v38  ;;  %v26036_v32 = vld [vmem:[#allocation77_spill] sm:$0xff] }
0x12bb   : > { %16430 = vmatpush1.bf16.xpose.msra.mxu1 %v23869_v25  ;;  %v26040_v25 = vld [vmem:[#allocation160_spill] sm:$0xff] }
0x12bc   : > { %16432 = vmatprep.subr.bf16.mxu1 %v23900_v15  ;;  %v26012_v15 = vpack.c.bf16 %v23705_v0, %v23691_v63  ;;  %v26019_v63 = vld [vmem:[#allocation161_spill] sm:$0xff]  ;;  %v26021_v0 = vld [vmem:[#allocation16_spill] sm:$0xff] }
0x12bd   : > { %v26020_v61 = vpack.c.bf16 %v23816_v4, %v26019_v63  ;;  %v26023_v36 = vpack.c.bf16 %v26021_v0, %v26022_v30  ;;  %v26037_v4 = vld [vmem:[#allocation76_spill] sm:$0xff] }
0x12c3   : > { %16434 = vmatpush1.bf16.xpose.msra.mxu1 %v16433_v22  ;;  %v26043_v22 = vld [vmem:[#allocation8_spill] sm:$0xff] }
0x12c4   : > { %16436 = vmatprep.subr.bf16.mxu1 %v16435_v33  ;;  %v26049_v33 = vand.u32 4294901760, %v23662_v6 }
0x12cb   : > { %16438 = vmatpush1.bf16.xpose.msra.mxu1 %v16437_v60  ;;  %v26042_v60 = vld [vmem:[#allocation9_spill] sm:$0xff] }
0x12cc   : > { %16440 = vmatprep.subr.bf16.mxu1 %v16439_v5 }
0x12d3   : > { %16442 = vmatpush1.bf16.xpose.msra.mxu1 %v16441_v54 }
0x12d4   : > { %16444 = vmatprep.subr.bf16.mxu1 %v26010_v26 }
0x12da   : > { %12492 = vmatmul.mubr.f32.vlgmr.msra.gmra.mrb[2].mxu1 %v23651_v59 }
0x12db   : > { %16446 = vmatpush1.bf16.xpose.msra.mxu1 %v26011_v20  ;;  %12627 = vmatprep.mubr.f32.mxu1 %v23643_v45  ;;  %v26045_v45 = vld [vmem:[#allocation14_spill] sm:$0xff] }
0x12dc   : > { %16448 = vmatprep.subr.bf16.mxu1 %v26012_v15 }
0x12e3   : > { %16450 = vmatpush1.bf16.xpose.msra.mxu1 %v26013_v12 }
0x12e4   : > { %16452 = vmatprep.subr.bf16.mxu1 %v26014_v13 }
0x12eb   : > { %16454 = vmatpush1.bf16.xpose.msra.mxu1 %v26015_v49 }
0x12ec   : > { %16456 = vmatprep.subr.bf16.mxu1 %v26016_v41 }
0x12f3   : > { %16458 = vmatpush1.bf16.xpose.msra.mxu1 %v26017_v44 }
0x12f4   : > { %16460 = vmatprep.subr.bf16.mxu1 %v26018_v39 }
0x12fb   : > { %16462 = vmatpush1.bf16.xpose.msra.mxu1 %v26020_v61 }
0x12fc   : > { %16464 = vmatprep.subr.bf16.mxu1 %v26023_v36 }
0x1303   : > { %16466 = vmatpush1.bf16.xpose.msra.mxu1 %v26026_v23 }
0x1304   : > { %16468 = vmatprep.subr.bf16.mxu1 %v26029_v56 }
0x130b   : > { %16470 = vmatpush1.bf16.xpose.msra.mxu1 %v26032_v7 }
0x130c   : > { %16472 = vmatprep.subr.bf16.mxu1 %v16471_v21  ;;  %v26055_v21 = vld [vmem:[#allocation6_spill] sm:$0xff] }
0x1313   : > { %16474 = vmatpush1.bf16.xpose.msra.mxu1 %v16473_v27  ;;  %v26051_v27 = vld [vmem:[#allocation78_spill] sm:$0xff] }
0x1314   : > { %16476 = vmatprep.subr.bf16.mxu1 %v26033_v28 }
0x131a   : > { %12630 = vmatmul.mubr.f32.vlgmr.msra.gmra.mrb[2].mxu1 %v23662_v6  ;;  %v26058_v6 = vld [vmem:[#allocation13_spill] sm:$0xff] }
0x131b   : > { %16478 = vmatpush1.bf16.xpose.msra.mxu1 %v26034_v29  ;;  %12734 = vmatprep.mubr.f32.mxu1 %v26035_v1 }
0x131c   : > { %16480 = vmatprep.subr.bf16.mxu1 %v26036_v32 }
0x1323   : > { %16482 = vmatpush1.bf16.xpose.msra.mxu1 %v26037_v4 }
0x1324   : > { %16484 = vmatprep.subr.bf16.mxu1 %v26038_v17 }
0x132b   : > { %16486 = vmatpush1.bf16.xpose.msra.mxu1 %v26039_v58 }
0x132c   : > { %16488 = vmatprep.subr.bf16.mxu1 %v26040_v25 }
0x1333   : > { %16490 = vmatpush1.bf16.xpose.msra.mxu1 %v26041_v40 }
0x1334   : > { %16492 = vmatprep.subr.bf16.mxu1 %v26042_v60 }
0x133b   : > { %16494 = vmatpush1.bf16.xpose.msra.mxu1 %v26043_v22 }
0x133c   : > { %16496 = vmatprep.subr.bf16.mxu1 %v26044_v24 }
0x1343   : > { %16498 = vmatpush1.bf16.xpose.msra.mxu1 %v26045_v45 }
0x1344   : > { %16500 = vmatprep.subr.bf16.mxu1 %v26046_v10 }
0x134b   : > { %16502 = vmatpush1.bf16.xpose.msra.mxu1 %v26047_v34 }
0x134c   : > { %16504 = vmatprep.subr.bf16.mxu1 %v23927_v14 }
0x1353   : > { %16506 = vmatpush1.bf16.xpose.msra.mxu1 %v23925_v50 }
0x1354   : > { %16508 = vmatprep.subr.bf16.mxu1 %v26048_v11 }
0x135a   : > { %12738 = vmatmul.mubr.f32.vlgmr.msra.gmra.mrb[2].mxu1 %v26049_v33 }
0x135b   : > { %16510 = vmatpush1.bf16.xpose.msra.mxu1 %v26050_v52  ;;  %12904 = vmatprep.mubr.f32.mxu1 %v23640_v48 }
0x135c   : > { %16512 = vmatprep.subr.bf16.mxu1 %v26051_v27 }
0x1363   : > { %16514 = vmatpush1.bf16.xpose.msra.mxu1 %v26052_v42 }
0x1364   : > { %16516 = vmatprep.subr.bf16.mxu1 %v26053_v2 }
0x136b   : > { %16518 = vmatpush1.bf16.xpose.msra.mxu1 %v26054_v31 }
0x136c   : > { %16520 = vmatprep.subr.bf16.mxu1 %v26055_v21 }
0x1373   : > { %16522 = vmatpush1.bf16.xpose.msra.mxu1 %v26056_v62 }
0x1374   : > { %16524 = vmatprep.subr.bf16.mxu1 %v26057_v35 }
0x137b   : > { %16526 = vmatpush1.bf16.xpose.msra.mxu1 %v26058_v6 }
0x137c   : > { %16528 = vmatprep.subr.bf16.mxu1 %v26059_v19 }
0x1383   : > { %16530 = vmatpush1.bf16.xpose.msra.mxu1 %v26060_v16 }
0x1384   : > { %16532 = vmatprep.subr.bf16.mxu1 %v23920_v43  ;;  %v13015_v43 = vld [vmem:[%s24093_s3] sm:$0xf] }
0x138b   : > { %16534 = vmatpush1.bf16.xpose.msra.mxu1 %v23923_v55  ;;  %v26061_v55 = vmov 0.0  }
0x138c   : > { %16536 = vmatprep.subr.bf16.mxu1 %v23941_v18 }
0x1393   : > { %16538 = vmatpush1.bf16.xpose.msra.mxu1 %v23938_v8  ;;  %v13023_v8 = vsel %vm4676_vm5, %v13015_v43, 0 }
0x1394   : > { %16540 = vmatprep.subr.bf16.mxu1 %v26033_v28  ;;  %v13092_v18 = vand.u32 4294901760, %v13023_v8 }
0x1396   : > { %v13093_v47 = vsub.f32 %v13023_v8, %v13092_v18 }
0x1398   : > { %v13094_v3 = vand.u32 4294901760, %v13093_v47 }
0x139a   : > { %12906 = vmatmul.mubr.f32.vlgmr.msra.gmra.mrb[2].mxu1 %v23651_v59  ;;  %v13095_v54 = vsub.f32 %v13093_v47, %v13094_v3 }
0x139b   : > { %16542 = vmatpush1.bf16.xpose.msra.mxu1 %v26034_v29  ;;  %13008 = vmatprep.mubr.f32.mxu1 %v23640_v48  ;;  %v17629_v48 = vmov 0.0|0.0  }
0x139c   : > { %16544 = vmatprep.subr.bf16.mxu1 %v26036_v32  ;;  %v13096_v13 = vand.u32 4294901760, %v13095_v54 }
0x13a3   : > { %16546 = vmatpush1.bf16.xpose.msra.mxu1 %v26037_v4 }
0x13a4   : > { %16548 = vmatprep.subr.bf16.mxu1 %v26038_v17 }
0x13ab   : > { %16550 = vmatpush1.bf16.xpose.msra.mxu1 %v26039_v58 }
0x13ac   : > { %16552 = vmatprep.subr.bf16.mxu1 %v26040_v25 }
0x13b3   : > { %16554 = vmatpush1.bf16.xpose.msra.mxu1 %v26041_v40 }
0x13b4   : > { %16556 = vmatprep.subr.bf16.mxu1 %v26042_v60  ;;  %v17584_v60 = vld [vmem:[%s17832_s29] sm:$0xf] }
0x13bb   : > { %16558 = vmatpush1.bf16.xpose.msra.mxu1 %v26043_v22 }
0x13bc   : > { %16560 = vmatprep.subr.bf16.mxu1 %v26044_v24 }
0x13c3   : > { %16562 = vmatpush1.bf16.xpose.msra.mxu1 %v26045_v45 }
0x13c4   : > { %16564 = vmatprep.subr.bf16.mxu1 %v26046_v10 }
0x13cb   : > { %16566 = vmatpush1.bf16.xpose.msra.mxu1 %v26047_v34 }
0x13cc   : > { %16568 = vmatprep.subr.bf16.mxu1 %v23927_v14  ;;  %v13026_v14 = vand.u32 4294901760, %v26062_v37 }
0x13d3   : > { %16570 = vmatpush1.bf16.xpose.msra.mxu1 %v23925_v50  ;;  %v13104_v50 = vsub.f32 %v26062_v37, %v13026_v14 }
0x13d4   : > { %16571 = vmatprep.subr.bf16.mxu1 %v17629_v48 }
0x13d5   : > { %v13105_v5 = vand.u32 4294901760, %v13104_v50 }
0x13d7   : > { %v13106_v49 = vsub.f32 %v13104_v50, %v13105_v5 }
0x13d9   : > { %v13107_v61 = vand.u32 4294901760, %v13106_v49 }
0x13da   : > { %13010 = vmatmul.mubr.f32.vlgmr.msra.gmra.mrb[2].mxu1 %v23651_v59 }
0x13db   : > { %15381 = vmatprep.mubr.msk.f32.mxu1 %vm17630_vm6, %v26061_v55 }
0x14ad   : > { %v13011_v59 = vpop.f32.mrb[2].mxu1 }
0x14ae   : > { %v13029_v26 = vand.u32 4294901760, %v13011_v59  ;;  %v13013_v20 = vpop.f32.mrb[3].mxu1 }
0x14b0   : > { %v16572_v15 = vpack.c.bf16 %v13029_v26, %v13026_v14  ;;  %v13111_v12 = vsub.f32 %v13011_v59, %v13029_v26 }
0x14b2   : > { %v13112_v41 = vand.u32 4294901760, %v13111_v12  ;;  %v16578_v44 = vpack.c.bf16 %v13111_v12, %v13104_v50  ;;  %16573 = vmatpush3.bf16.msra.mxu1 %v16572_v15 }
0x14b3   : > { %16574 = vmatprep.subr.bf16.mxu1 %v17629_v48 }
0x14b4   : > { %v13113_v39 = vsub.f32 %v13111_v12, %v13112_v41  ;;  %v16584_v63 = vpack.c.bf16 %v13112_v41, %v13105_v5 }
0x14b5   : > { %15382 = vmatmul.mubr.f32.vlgmr.msra.gmra.mrb[4].mxu1 %v13096_v13 }
0x14b6   : > { %v13114_v0 = vand.u32 4294901760, %v13113_v39  ;;  %15388 = vmatprep.mubr.msk.f32.mxu1 %vm17630_vm6, %v26061_v55 }
0x14b8   : > { %v16575_v30 = vpack.c.bf16 %v13114_v0, %v13107_v61 }
0x14ba   : > { %16576 = vmatpush3.bf16.msra.mxu1 %v16575_v30 }
0x14bb   : > { %16577 = vmatprep.subr.bf16.mxu1 %v17629_v48 }
0x14bd   : > { %15389 = vmatmul.mubr.f32.vlgmr.msra.gmra.mrb[6].mxu1 %v13092_v18 }
0x14be   : > { %16579 = vmatpush3.bf16.msra.mxu1 %v16578_v44  ;;  %15395 = vmatprep.mubr.msk.f32.mxu1 %vm17630_vm6, %v26061_v55 }
0x14bf   : > { %16580 = vmatprep.subr.bf16.mxu1 %v17629_v48 }
0x14c1   : > { %15396 = vmatmul.mubr.f32.vlgmr.msra.gmra.mrb[8].mxu1 %v13093_v47 }
0x14c2   : > { %16582 = vmatpush3.bf16.msra.mxu1 %v16572_v15  ;;  %15402 = vmatprep.mubr.msk.f32.mxu1 %vm17630_vm6, %v26061_v55 }
0x14c3   : > { %16583 = vmatprep.subr.bf16.mxu1 %v17629_v48 }
0x14c5   : > { %15403 = vmatmul.mubr.f32.vlgmr.msra.gmra.mrb[10].mxu1 %v13094_v3 }
0x14c6   : > { %16585 = vmatpush3.bf16.msra.mxu1 %v16584_v63  ;;  %15409 = vmatprep.mubr.msk.f32.mxu1 %vm17630_vm6, %v26061_v55 }
0x14c7   : > { %16586 = vmatprep.subr.bf16.mxu1 %v17629_v48 }
0x14c9   : > { %15410 = vmatmul.mubr.f32.vlgmr.msra.gmra.mrb[12].mxu1 %v13092_v18 }
0x14ca   : > { %16588 = vmatpush3.bf16.msra.mxu1 %v16572_v15  ;;  %15416 = vmatprep.mubr.msk.f32.mxu1 %vm17630_vm6, %v26061_v55 }
0x14cd   : > { %15417 = vmatmul.mubr.f32.vlgmr.msra.gmra.mrb[14].mxu1 %v13092_v18 }
0x1588   : > { %v13098_v36 = vpop.f32.mrb[4].mxu1 }
0x1589   : > { %v15383_v57 = vpop.f32.mrb[5].mxu1  ;;  %v13099_v23 = vadd.f32 %v13098_v36, %v13020_v51 }
0x1590   : > { %v13179_v9 = vpop.f32.mrb[6].mxu1 }
0x1591   : > { %v13180_v46 = vadd.f32 %v13179_v9, %v13099_v23  ;;  %v15390_v56 = vpop.f32.mrb[7].mxu1 }
0x1594   : > { %v13255_v53 = vpop.f32.mrb[8].mxu1 }
0x1595   : > { %v13256_v38 = vadd.f32 %v13255_v53, %v13180_v46  ;;  %v15397_v7 = vpop.f32.mrb[9].mxu1 }
0x1598   : > { %v13330_v28 = vpop.f32.mrb[10].mxu1 }
0x1599   : > { %v13331_v29 = vadd.f32 %v13330_v28, %v13256_v38  ;;  %v15404_v1 = vpop.f32.mrb[11].mxu1 }
0x159c   : > { %v13407_v32 = vpop.f32.mrb[12].mxu1 }
0x159d   : > { %v13408_v4 = vadd.f32 %v13407_v32, %v13331_v29  ;;  %v15411_v17 = vpop.f32.mrb[13].mxu1 }
0x15a0   : > { %v13480_v58 = vpop.f32.mrb[14].mxu1 }
0x15a1   : > { %v13481_v25 = vadd.f32 %v13480_v58, %v13408_v4  ;;  %v15418_v40 = vpop.f32.mrb[15].mxu1 }
0x15a3   : > { %v13484_v22 = vadd.f32 %v17584_v60, %v13481_v25 }
0x15a5   : > { %13485 = vst [vmem:[%s17708_s14] sm:$0xf] %v13484_v22 }
0x15a6 PF: > { %s16_s25 = sadd.s32 1, %s17623_s25   ;;  %s26063_s21 = smov %s17615_s23 }
0x15a7   : > { %p13_p8 = scmp.ge.s32.totalorder %s16_s25, 6   ;;  %s26064_s22 = smov %s17619_s24 }
0x15a8   : > { %s26065_s23 = smov %s26068_s26  ;;  %s26066_s24 = smov %s26072_s27 }
0x15a9   :  { %15 = sbr.rel (!%p13_p8) target bundleno = 3 (0x3), region = 79 }

</bundles_post_ra>
